<compile_context>
chip_gen: v6e
topology: v6e:2x2x1
jax: 0.10.0
libtpu: 0.0.40
codegen_flags: <defaults>
</compile_context>

<pallas_src>
import functools
import math

import jax
import jax.numpy as jnp
from jax import lax
from jax.experimental import pallas as pl
from jax.experimental.pallas import tpu as pltpu

NEG_INF = -1e9          # HF CLIP uses finfo.min; large-finite is numerically safe here.
LN_EPS = 1e-5


@functools.lru_cache(maxsize=None)
def _vmem_limit_bytes():
    """Generation-aware scoped-VMEM limit (v7x has 64 MiB/TC, v5e/v6e have 128 MiB)."""
    cap = 128 * 1024 * 1024
    try:
        cap = int(pltpu.get_tpu_info().vmem_capacity_bytes)
    except Exception:
        pass
    if cap <= 64 * 1024 * 1024:                      # v7x-class: leave DMA headroom
        return 40 * 1024 * 1024
    return min(int(cap * 0.75), 100 * 1024 * 1024)   # v5e / v6e


def _compiler_params(semantics):
    return pltpu.CompilerParams(dimension_semantics=semantics,
                                vmem_limit_bytes=_vmem_limit_bytes())


def _ln_f32(x, g, b, eps):
    mean = jnp.mean(x, axis=-1, keepdims=True)
    var = jnp.mean(jnp.square(x - mean), axis=-1, keepdims=True)
    return (x - mean) * lax.rsqrt(var + eps) * g + b


# --------------------- fused encoder megakernel (grid over layers) ---------------------

def _encoder_kernel(x_in_ref, bias_ref,
                    ln1_g_ref, ln1_b_ref, qkv_w_ref, qkv_b_ref,
                    out_w_ref, out_b_ref, ln2_g_ref, ln2_b_ref,
                    fc1_w_ref, fc1_b_ref, fc2_w_ref, fc2_b_ref,
                    fln_g_ref, fln_b_ref,
                    o_ref, x_scratch,
                    *, batch, seq, num_heads, head_dim, eps):
    layer = pl.program_id(0)
    H = num_heads * head_dim
    scale = 1.0 / math.sqrt(head_dim)

    # Residual stream lives in a persistent f32 VMEM scratch across the layer grid.
    @pl.when(layer == 0)
    def _():
        x_scratch[...] = x_in_ref[...].astype(jnp.float32)

    x = x_scratch[...]                                            # [M, H] f32

    # ---- LN1 -> fused QKV projection (single [H, 3H] MXU pass) ----
    xn = _ln_f32(x, ln1_g_ref[0], ln1_b_ref[0], eps)
    qkv = jnp.dot(xn.astype(qkv_w_ref.dtype), qkv_w_ref[0],
                  preferred_element_type=jnp.float32) + qkv_b_ref[0]      # [M, 3H]

    # ---- causal multi-head attention (bias precomputed & hoisted; indexed per batch) ----
    attn_rows = []
    for b in range(batch):                        # static, small
        r0, r1 = b * seq, (b + 1) * seq
        bias_b = bias_ref[b]                      # [S, S] f32 (causal + key padding)
        heads_out = []
        # TODO(synk): for head counts >> 12 switch to a bounded-unroll fori_loop /
        # head-batched dot_general to limit code size; static unroll is fine here.
        for h in range(num_heads):
            c0, c1 = h * head_dim, (h + 1) * head_dim
            q = qkv[r0:r1, c0:c1].astype(jnp.bfloat16)
            k = qkv[r0:r1, H + c0:H + c1].astype(jnp.bfloat16)
            v = qkv[r0:r1, 2 * H + c0:2 * H + c1].astype(jnp.bfloat16)
            # q @ k^T without explicit transpose: contract last axes on the MXU.
            s = lax.dot_general(q, k, (((1,), (1,)), ((), ())),
                                preferred_element_type=jnp.float32)
            s = s * scale + bias_b
            m = jnp.max(s, axis=-1, keepdims=True)
            p = jnp.exp(s - m)
            denom = jnp.sum(p, axis=-1, keepdims=True)
            p = p * pl.reciprocal(denom, approx=True)             # EUP, not VALU divide
            oh = jnp.dot(p.astype(jnp.bfloat16), v,
                         preferred_element_type=jnp.float32)
            heads_out.append(oh.astype(jnp.bfloat16))             # cast before concat
        attn_rows.append(jnp.concatenate(heads_out, axis=-1))     # [S, H] bf16
    attn = jnp.concatenate(attn_rows, axis=0)                     # [M, H] bf16

    # ---- out-proj + residual (residual folded into matmul epilogue) ----
    x = x + jnp.dot(attn, out_w_ref[0],
                    preferred_element_type=jnp.float32) + out_b_ref[0]

    # ---- LN2 -> fc1 -> quick_gelu -> fc2 + residual ([M, 4H] never leaves VMEM) ----
    xn2 = _ln_f32(x, ln2_g_ref[0], ln2_b_ref[0], eps)
    hdn = jnp.dot(xn2.astype(fc1_w_ref.dtype), fc1_w_ref[0],
                  preferred_element_type=jnp.float32) + fc1_b_ref[0]
    hdn = hdn * jax.nn.sigmoid(1.702 * hdn)                       # CLIP quick_gelu (EUP)
    x = x + jnp.dot(hdn.astype(fc2_w_ref.dtype), fc2_w_ref[0],
                    preferred_element_type=jnp.float32) + fc2_b_ref[0]

    x_scratch[...] = x

    # ---- final LayerNorm fused into the last layer's epilogue ----
    @pl.when(layer == pl.num_programs(0) - 1)
    def _():
        xf = _ln_f32(x, fln_g_ref[...], fln_b_ref[...], eps)
        o_ref[...] = xf.astype(o_ref.dtype)


def clip_encoder(x, bias, lp, fln_g, fln_b, *, batch, seq, num_heads, eps=LN_EPS):
    """x: [M, H] bf16 (M = batch*seq), bias: [batch, seq, seq] f32. Returns LN'd hidden [M, H] bf16."""
    M, H = x.shape
    L = lp["qkv_w"].shape[0]
    threeH = lp["qkv_w"].shape[2]
    I = lp["fc1_w"].shape[2]

    def const2(shape):
        return pl.BlockSpec(shape, lambda l: (0, 0))

    def const3(shape):
        return pl.BlockSpec(shape, lambda l: (0, 0, 0))

    def per_layer(shape):
        return pl.BlockSpec((1,) + shape, lambda l: (l, 0, 0))

    return pl.pallas_call(
        functools.partial(_encoder_kernel, batch=batch, seq=seq,
                          num_heads=num_heads, head_dim=H // num_heads, eps=eps),
        out_shape=jax.ShapeDtypeStruct((M, H), jnp.bfloat16),
        grid=(L,),
        in_specs=[
            const2((M, H)),                 # x_in (read once at layer 0)
            const3((batch, seq, seq)),      # hoisted causal + padding bias
            per_layer((1, H)),              # ln1_g
            per_layer((1, H)),              # ln1_b
            per_layer((H, threeH)),         # qkv_w   (streamed per layer)
            per_layer((1, threeH)),         # qkv_b
            per_layer((H, H)),              # out_w
            per_layer((1, H)),              # out_b
            per_layer((1, H)),              # ln2_g
            per_layer((1, H)),              # ln2_b
            per_layer((H, I)),              # fc1_w
            per_layer((1, I)),              # fc1_b
            per_layer((I, H)),              # fc2_w
            per_layer((1, H)),              # fc2_b
            const2((1, H)),                 # final LN gamma
            const2((1, H)),                 # final LN beta
        ],
        out_specs=pl.BlockSpec((M, H), lambda l: (0, 0)),
        scratch_shapes=[pltpu.VMEM((M, H), jnp.float32)],
        compiler_params=_compiler_params(("arbitrary",)),
    )(x, bias, lp["ln1_g"], lp["ln1_b"], lp["qkv_w"], lp["qkv_b"],
      lp["out_w"], lp["out_b"], lp["ln2_g"], lp["ln2_b"],
      lp["fc1_w"], lp["fc1_b"], lp["fc2_w"], lp["fc2_b"], fln_g, fln_b)


# ----------------------------- llama projection kernel ------------------------------

def _proj_kernel(x_ref, w_ref, b_ref, o_ref):
    y = jnp.dot(x_ref[...], w_ref[...], preferred_element_type=jnp.float32)
    o_ref[...] = (y + b_ref[...]).astype(o_ref.dtype)


def linear_proj(x, w, b, out_dtype=jnp.float32):
    """y = x @ W + b with an N-tiled (column-streamed) grid."""
    M, H = x.shape
    N = w.shape[1]
    tm = 128 if M % 128 == 0 else M
    if N % 128 == 0 and N > 512:
        tn = 512 if N % 512 == 0 else (256 if N % 256 == 0 else 128)
    else:
        tn = N
    return pl.pallas_call(
        _proj_kernel,
        out_shape=jax.ShapeDtypeStruct((M, N), out_dtype),
        grid=(M // tm, N // tn),
        in_specs=[
            pl.BlockSpec((tm, H), lambda i, j: (i, 0)),
            pl.BlockSpec((H, tn), lambda i, j: (0, j)),   # column-block weight stream
            pl.BlockSpec((1, tn), lambda i, j: (0, j)),
        ],
        out_specs=pl.BlockSpec((tm, tn), lambda i, j: (i, j)),
        compiler_params=_compiler_params(("parallel", "parallel")),
    )(x, w, b)


# ------------------------------ model (glue) --------------------------------

def custom_text_encoder_forward(params, input_ids, attention_mask, *, num_heads):
    B, S = input_ids.shape
    H = params["token_embedding"].shape[1]
    S_pad = ((S + 127) // 128) * 128                # lane-aligned sequence length

    # embeddings (gather stays in plain JAX — no clean Pallas equivalent needed here)
    tok = params["token_embedding"][input_ids]                  # [B, S, H] bf16
    pos = params["position_embedding"][:S]                      # [S, H]   bf16
    x = (tok + pos[None, :, :]).astype(jnp.bfloat16)
    if S_pad != S:
        x = jnp.pad(x, ((0, 0), (0, S_pad - S), (0, 0)))        # padded rows masked below
    x = x.reshape(B * S_pad, H)

    # Hoisted additive bias: causal + key padding, built ONCE as [B, S_pad, S_pad] f32.
    if attention_mask is None:
        key_mask = jnp.ones((B, S), jnp.float32)
    else:
        key_mask = attention_mask.astype(jnp.float32)
    key_mask = jnp.pad(key_mask, ((0, 0), (0, S_pad - S)))      # padded keys masked
    idx = jnp.arange(S_pad)
    causal = jnp.where(idx[:, None] >= idx[None, :], 0.0, NEG_INF).astype(jnp.float32)
    bias = causal[None, :, :] + (1.0 - key_mask)[:, None, :] * NEG_INF

    hidden = clip_encoder(x, bias, params["layers"],
                          params["final_ln_g"], params["final_ln_b"],
                          batch=B, seq=S_pad, num_heads=num_heads)          # [M, H] bf16

    out = linear_proj(hidden, params["proj_w"], params["proj_b"])           # [M, P] f32
    P = params["proj_w"].shape[1]
    return out.reshape(B, S_pad, P)[:, :S, :]


# ------------------------------ param init ----------------------------------

def init_params(key, *, vocab_size, max_pos, hidden, num_heads, num_layers,
                intermediate, llama_dim):
    wdtype = jnp.bfloat16   # matmul operands in bf16 (f32 accumulation inside kernels)
    H, I, L = hidden, intermediate, num_layers

    def dense(k, fan_in, fan_out):
        kw, kb = jax.random.split(k)
        w = (jax.random.normal(kw, (fan_in, fan_out), jnp.float32) * 0.02).astype(wdtype)
        b = jax.random.normal(kb, (fan_out,), jnp.float32) * 0.02
        return w, b

    keys = jax.random.split(key, 3 + num_layers)
    params = {
        "token_embedding": (jax.random.normal(keys[0], (vocab_size, H), jnp.float32)
                            * 0.02).astype(wdtype),
        "position_embedding": (jax.random.normal(keys[1], (max_pos, H), jnp.float32)
                               * 0.02).astype(wdtype),
        "final_ln_g": jnp.ones((1, H), jnp.float32),
        "final_ln_b": jnp.zeros((1, H), jnp.float32),
    }
    pw, pb = dense(keys[2], H, llama_dim)
    params["proj_w"] = pw
    params["proj_b"] = pb.reshape(1, llama_dim)

    qkv_w, qkv_b, out_w, out_b = [], [], [], []
    fc1_w, fc1_b, fc2_w, fc2_b = [], [], [], []
    for i in range(num_layers):
        ks = jax.random.split(keys[3 + i], 6)
        qw, qb = dense(ks[0], H, H)
        kw_, kb_ = dense(ks[1], H, H)
        vw, vb = dense(ks[2], H, H)
        ow, ob = dense(ks[3], H, H)
        f1w, f1b = dense(ks[4], H, I)
        f2w, f2b = dense(ks[5], I, H)
        qkv_w.append(jnp.concatenate([qw, kw_, vw], axis=1))                 # [H, 3H]
        qkv_b.append(jnp.concatenate([qb, kb_, vb], axis=0).reshape(1, 3 * H))
        out_w.append(ow)
        out_b.append(ob.reshape(1, H))
        fc1_w.append(f1w)
        fc1_b.append(f1b.reshape(1, I))
        fc2_w.append(f2w)
        fc2_b.append(f2b.reshape(1, H))

    ones = jnp.ones((L, 1, H), jnp.float32)
    zeros = jnp.zeros((L, 1, H), jnp.float32)
    params["layers"] = {
        "ln1_g": ones, "ln1_b": zeros, "ln2_g": ones, "ln2_b": zeros,
        "qkv_w": jnp.stack(qkv_w), "qkv_b": jnp.stack(qkv_b),
        "out_w": jnp.stack(out_w), "out_b": jnp.stack(out_b),
        "fc1_w": jnp.stack(fc1_w), "fc1_b": jnp.stack(fc1_b),
        "fc2_w": jnp.stack(fc2_w), "fc2_b": jnp.stack(fc2_b),
    }
    return params


# --------------------------------- main --------------------------------------

if __name__ == "__main__":
    # Small synthetic CLIP-text-like config (head_dim=64 like CLIP).
    B, S = 2, 8
    VOCAB, MAX_POS = 100, 16
    HIDDEN, NUM_HEADS, NUM_LAYERS = 128, 2, 2
    INTERMEDIATE = 4 * HIDDEN
    LLAMA_DIM = 256

    key = jax.random.PRNGKey(0)
    k_param, k_ids = jax.random.split(key)
    params = init_params(k_param, vocab_size=VOCAB, max_pos=MAX_POS, hidden=HIDDEN,
                         num_heads=NUM_HEADS, num_layers=NUM_LAYERS,
                         intermediate=INTERMEDIATE, llama_dim=LLAMA_DIM)

    input_ids = jax.random.randint(k_ids, (B, S), 0, VOCAB, dtype=jnp.int32)
    attention_mask = jnp.array(
        [[1, 1, 1, 1, 1, 1, 1, 1],
         [1, 1, 1, 1, 1, 1, 0, 0]], dtype=jnp.int32)

    fwd = jax.jit(functools.partial(custom_text_encoder_forward, num_heads=NUM_HEADS))
    out = fwd(params, input_ids, attention_mask)
    out = jax.block_until_ready(out)

    assert out.shape == (B, S, LLAMA_DIM), out.shape
    assert bool(jnp.all(jnp.isfinite(out)))
    print("KERNEL_OK")
</pallas_src>

<mosaic_0001>
module attributes {stable_mosaic.version = 11 : i64} {
  func.func @_proj_kernel(%arg0: i32, %arg1: i32, %arg2: memref<128x128xbf16, #tpu.memory_space<vmem>>, %arg3: memref<128x256xbf16, #tpu.memory_space<vmem>>, %arg4: memref<1x256xf32, #tpu.memory_space<vmem>>, %arg5: memref<128x256xf32, #tpu.memory_space<vmem>>) attributes {dimension_semantics = [#tpu.dimension_semantics<parallel>, #tpu.dimension_semantics<parallel>], iteration_bounds = array<i64: 2, 1>, scalar_prefetch = 0 : i64, scratch_operands = 0 : i64, tpu.core_type = #tpu.core_type<tc>, window_params = [{transform_indices = @transform_0, window_bounds = array<i64: 128, 128>}, {transform_indices = @transform_1, window_bounds = array<i64: 128, 256>}, {transform_indices = @transform_2, window_bounds = array<i64: 1, 256>}, {transform_indices = @transform_3, window_bounds = array<i64: 128, 256>}]} {
    %c0 = arith.constant 0 : index
    %c0_0 = arith.constant 0 : index
    %0 = vector.load %arg2[%c0, %c0_0] : memref<128x128xbf16, #tpu.memory_space<vmem>>, vector<128x128xbf16>
    %c0_1 = arith.constant 0 : index
    %c0_2 = arith.constant 0 : index
    %1 = vector.load %arg3[%c0_1, %c0_2] : memref<128x256xbf16, #tpu.memory_space<vmem>>, vector<128x256xbf16>
    %cst = arith.constant dense<0.000000e+00> : vector<128x256xf32>
    %2 = tpu.matmul %0, %1, %cst {dimension_numbers = #tpu.dot_dimension_numbers<[1], [0], [0], [1], [0, 0, 1, 1], [], []>} : vector<128x128xbf16>, vector<128x256xbf16>, vector<128x256xf32> -> vector<128x256xf32>
    %c0_3 = arith.constant 0 : index
    %c0_4 = arith.constant 0 : index
    %3 = vector.load %arg4[%c0_3, %c0_4] : memref<1x256xf32, #tpu.memory_space<vmem>>, vector<1x256xf32>
    %4 = vector.broadcast %3 : vector<1x256xf32> to vector<128x256xf32>
    %5 = arith.addf %2, %4 : vector<128x256xf32>
    %c0_5 = arith.constant 0 : index
    %c0_6 = arith.constant 0 : index
    %6 = vector.load %arg5[%c0_5, %c0_6] : memref<128x256xf32, #tpu.memory_space<vmem>>, vector<128x256xf32>
    tpu.vector_store %arg5[%c0_5, %c0_6], %5 {strides = array<i32>} : memref<128x256xf32, #tpu.memory_space<vmem>>, vector<128x256xf32>,
    return
  }
  func.func @transform_0(%arg0: i32, %arg1: i32) -> (i32, i32) {
    %c0_i32 = arith.constant 0 : i32
    %c0_i32_0 = arith.constant 0 : i32
    return %arg0, %c0_i32 : i32, i32
  }
  func.func @transform_1(%arg0: i32, %arg1: i32) -> (i32, i32) {
    %c0_i32 = arith.constant 0 : i32
    %c0_i32_0 = arith.constant 0 : i32
    return %c0_i32, %arg1 : i32, i32
  }
  func.func @transform_2(%arg0: i32, %arg1: i32) -> (i32, i32) {
    %c0_i32 = arith.constant 0 : i32
    %c0_i32_0 = arith.constant 0 : i32
    return %c0_i32, %arg1 : i32, i32
  }
  func.func @transform_3(%arg0: i32, %arg1: i32) -> (i32, i32) {
    %c0_i32 = arith.constant 0 : i32
    return %arg0, %arg1 : i32, i32
  }
}

module attributes {stable_mosaic.version = 11 : i64} {
  func.func @_encoder_kernel(%arg0: i32, %arg1: memref<256x128xbf16, #tpu.memory_space<vmem>>, %arg2: memref<2x128x128xf32, #tpu.memory_space<vmem>>, %arg3: memref<1x1x128xf32, #tpu.memory_space<vmem>>, %arg4: memref<1x1x128xf32, #tpu.memory_space<vmem>>, %arg5: memref<1x128x384xbf16, #tpu.memory_space<vmem>>, %arg6: memref<1x1x384xf32, #tpu.memory_space<vmem>>, %arg7: memref<1x128x128xbf16, #tpu.memory_space<vmem>>, %arg8: memref<1x1x128xf32, #tpu.memory_space<vmem>>, %arg9: memref<1x1x128xf32, #tpu.memory_space<vmem>>, %arg10: memref<1x1x128xf32, #tpu.memory_space<vmem>>, %arg11: memref<1x128x512xbf16, #tpu.memory_space<vmem>>, %arg12: memref<1x1x512xf32, #tpu.memory_space<vmem>>, %arg13: memref<1x512x128xbf16, #tpu.memory_space<vmem>>, %arg14: memref<1x1x128xf32, #tpu.memory_space<vmem>>, %arg15: memref<1x128xf32, #tpu.memory_space<vmem>>, %arg16: memref<1x128xf32, #tpu.memory_space<vmem>>, %arg17: memref<256x128xbf16, #tpu.memory_space<vmem>>, %arg18: memref<256x128xf32, #tpu.memory_space<vmem>>) attributes {dimension_semantics = [#tpu.dimension_semantics<arbitrary>], iteration_bounds = array<i64: 2>, scalar_prefetch = 0 : i64, scratch_operands = 1 : i64, tpu.core_type = #tpu.core_type<tc>, window_params = [{pipeline_mode = #tpu.pipeline_mode<synchronous>, transform_indices = @transform_0, window_bounds = array<i64: 256, 128>}, {pipeline_mode = #tpu.pipeline_mode<synchronous>, transform_indices = @transform_1, window_bounds = array<i64: 2, 128, 128>}, {transform_indices = @transform_2, window_bounds = array<i64: 1, 1, 128>}, {transform_indices = @transform_3, window_bounds = array<i64: 1, 1, 128>}, {transform_indices = @transform_4, window_bounds = array<i64: 1, 128, 384>}, {transform_indices = @transform_5, window_bounds = array<i64: 1, 1, 384>}, {transform_indices = @transform_6, window_bounds = array<i64: 1, 128, 128>}, {transform_indices = @transform_7, window_bounds = array<i64: 1, 1, 128>}, {transform_indices = @transform_8, window_bounds = array<i64: 1, 1, 128>}, {transform_indices = @transform_9, window_bounds = array<i64: 1, 1, 128>}, {transform_indices = @transform_10, window_bounds = array<i64: 1, 128, 512>}, {transform_indices = @transform_11, window_bounds = array<i64: 1, 1, 512>}, {transform_indices = @transform_12, window_bounds = array<i64: 1, 512, 128>}, {transform_indices = @transform_13, window_bounds = array<i64: 1, 1, 128>}, {pipeline_mode = #tpu.pipeline_mode<synchronous>, transform_indices = @transform_14, window_bounds = array<i64: 1, 128>}, {pipeline_mode = #tpu.pipeline_mode<synchronous>, transform_indices = @transform_15, window_bounds = array<i64: 1, 128>}, {pipeline_mode = #tpu.pipeline_mode<synchronous>, transform_indices = @transform_16, window_bounds = array<i64: 256, 128>}]} {
    %c0_i32 = arith.constant 0 : i32
    %0 = arith.cmpi eq, %arg0, %c0_i32 : i32
    %1 = arith.extui %0 : i1 to i32
    %c0_i32_0 = arith.constant 0 : i32
    %2 = arith.cmpi ne, %1, %c0_i32_0 : i32
    scf.if %2 {
      %c0_81 = arith.constant 0 : index
      %c0_82 = arith.constant 0 : index
      %200 = vector.load %arg1[%c0_81, %c0_82] : memref<256x128xbf16, #tpu.memory_space<vmem>>, vector<256x128xbf16>
      %201 = arith.extf %200 : vector<256x128xbf16> to vector<256x128xf32>
      %c0_83 = arith.constant 0 : index
      %c0_84 = arith.constant 0 : index
      %202 = vector.load %arg18[%c0_83, %c0_84] : memref<256x128xf32, #tpu.memory_space<vmem>>, vector<256x128xf32>
      tpu.vector_store %arg18[%c0_83, %c0_84], %201 {strides = array<i32>} : memref<256x128xf32, #tpu.memory_space<vmem>>, vector<256x128xf32>,
    } else {
    }
    %c0 = arith.constant 0 : index
    %c0_1 = arith.constant 0 : index
    %3 = vector.load %arg18[%c0, %c0_1] : memref<256x128xf32, #tpu.memory_space<vmem>>, vector<256x128xf32>
    %c0_2 = arith.constant 0 : index
    %c0_3 = arith.constant 0 : index
    %c0_4 = arith.constant 0 : index
    %4 = vector.load %arg3[%c0_2, %c0_3, %c0_4] : memref<1x1x128xf32, #tpu.memory_space<vmem>>, vector<1x1x128xf32>
    %5 = vector.shape_cast %4 : vector<1x1x128xf32> to vector<1x128xf32>
    %c0_5 = arith.constant 0 : index
    %c0_6 = arith.constant 0 : index
    %c0_7 = arith.constant 0 : index
    %6 = vector.load %arg4[%c0_5, %c0_6, %c0_7] : memref<1x1x128xf32, #tpu.memory_space<vmem>>, vector<1x1x128xf32>
    %7 = vector.shape_cast %6 : vector<1x1x128xf32> to vector<1x128xf32>
    %cst = arith.constant dense<0.000000e+00> : vector<256xf32>
    %8 = vector.multi_reduction <add>, %3, %cst [1] : vector<256x128xf32> to vector<256xf32>
    %9 = vector.shape_cast %8 : vector<256xf32> to vector<256x1xf32>
    %cst_8 = arith.constant 1.280000e+02 : f32
    %10 = vector.broadcast %cst_8 : f32 to vector<256x1xf32>
    %11 = arith.divf %9, %10 : vector<256x1xf32>
    %12 = vector.broadcast %11 : vector<256x1xf32> to vector<256x128xf32>
    %13 = arith.subf %3, %12 : vector<256x128xf32>
    %14 = arith.mulf %13, %13 : vector<256x128xf32>
    %cst_9 = arith.constant dense<0.000000e+00> : vector<256xf32>
    %15 = vector.multi_reduction <add>, %14, %cst_9 [1] : vector<256x128xf32> to vector<256xf32>
    %16 = vector.shape_cast %15 : vector<256xf32> to vector<256x1xf32>
    %cst_10 = arith.constant 1.280000e+02 : f32
    %17 = vector.broadcast %cst_10 : f32 to vector<256x1xf32>
    %18 = arith.divf %16, %17 : vector<256x1xf32>
    %19 = vector.broadcast %11 : vector<256x1xf32> to vector<256x128xf32>
    %20 = arith.subf %3, %19 : vector<256x128xf32>
    %cst_11 = arith.constant 9.99999974E-6 : f32
    %21 = vector.broadcast %cst_11 : f32 to vector<256x1xf32>
    %22 = arith.addf %18, %21 : vector<256x1xf32>
    %23 = math.rsqrt %22 : vector<256x1xf32>
    %24 = vector.broadcast %23 : vector<256x1xf32> to vector<256x128xf32>
    %25 = arith.mulf %20, %24 : vector<256x128xf32>
    %26 = vector.broadcast %5 : vector<1x128xf32> to vector<256x128xf32>
    %27 = arith.mulf %25, %26 : vector<256x128xf32>
    %28 = vector.broadcast %7 : vector<1x128xf32> to vector<256x128xf32>
    %29 = arith.addf %27, %28 : vector<256x128xf32>
    %30 = arith.truncf %29 : vector<256x128xf32> to vector<256x128xbf16>
    %c0_12 = arith.constant 0 : index
    %c0_13 = arith.constant 0 : index
    %c0_14 = arith.constant 0 : index
    %31 = vector.load %arg5[%c0_12, %c0_13, %c0_14] : memref<1x128x384xbf16, #tpu.memory_space<vmem>>, vector<1x128x384xbf16>
    %32 = vector.shape_cast %31 : vector<1x128x384xbf16> to vector<128x384xbf16>
    %cst_15 = arith.constant dense<0.000000e+00> : vector<256x384xf32>
    %33 = tpu.matmul %30, %32, %cst_15 {dimension_numbers = #tpu.dot_dimension_numbers<[1], [0], [0], [1], [0, 0, 1, 1], [], []>} : vector<256x128xbf16>, vector<128x384xbf16>, vector<256x384xf32> -> vector<256x384xf32>
    %c0_16 = arith.constant 0 : index
    %c0_17 = arith.constant 0 : index
    %c0_18 = arith.constant 0 : index
    %34 = vector.load %arg6[%c0_16, %c0_17, %c0_18] : memref<1x1x384xf32, #tpu.memory_space<vmem>>, vector<1x1x384xf32>
    %35 = vector.shape_cast %34 : vector<1x1x384xf32> to vector<1x384xf32>
    %36 = vector.broadcast %35 : vector<1x384xf32> to vector<256x384xf32>
    %37 = arith.addf %33, %36 : vector<256x384xf32>
    %c0_19 = arith.constant 0 : index
    %c0_20 = arith.constant 0 : index
    %c0_21 = arith.constant 0 : index
    %38 = vector.load %arg2[%c0_19, %c0_20, %c0_21] : memref<2x128x128xf32, #tpu.memory_space<vmem>>, vector<1x128x128xf32>
    %39 = vector.shape_cast %38 : vector<1x128x128xf32> to vector<128x128xf32>
    %40 = vector.extract_strided_slice %37 {offsets = [0, 0], sizes = [128, 64], strides = [1, 1]} : vector<256x384xf32> to vector<128x64xf32>
    %41 = arith.truncf %40 : vector<128x64xf32> to vector<128x64xbf16>
    %42 = vector.extract_strided_slice %37 {offsets = [0, 128], sizes = [128, 64], strides = [1, 1]} : vector<256x384xf32> to vector<128x64xf32>
    %43 = arith.truncf %42 : vector<128x64xf32> to vector<128x64xbf16>
    %44 = vector.extract_strided_slice %37 {offsets = [0, 256], sizes = [128, 64], strides = [1, 1]} : vector<256x384xf32> to vector<128x64xf32>
    %45 = arith.truncf %44 : vector<128x64xf32> to vector<128x64xbf16>
    %cst_22 = arith.constant dense<0.000000e+00> : vector<128x128xf32>
    %46 = tpu.matmul %41, %43, %cst_22 {dimension_numbers = #tpu.dot_dimension_numbers<[1], [1], [0], [0], [0, 0, 1, 0], [], []>} : vector<128x64xbf16>, vector<128x64xbf16>, vector<128x128xf32> -> vector<128x128xf32>
    %cst_23 = arith.constant 1.250000e-01 : f32
    %47 = vector.broadcast %cst_23 : f32 to vector<128x128xf32>
    %48 = arith.mulf %46, %47 : vector<128x128xf32>
    %49 = arith.addf %48, %39 : vector<128x128xf32>
    %cst_24 = arith.constant dense<0xFF800000> : vector<128xf32>
    %50 = vector.multi_reduction <maximumf>, %49, %cst_24 [1] : vector<128x128xf32> to vector<128xf32>
    %51 = vector.shape_cast %50 : vector<128xf32> to vector<128x1xf32>
    %52 = vector.broadcast %51 : vector<128x1xf32> to vector<128x128xf32>
    %53 = arith.subf %49, %52 : vector<128x128xf32>
    %54 = math.exp %53 : vector<128x128xf32>
    %cst_25 = arith.constant dense<0.000000e+00> : vector<128xf32>
    %55 = vector.multi_reduction <add>, %54, %cst_25 [1] : vector<128x128xf32> to vector<128xf32>
    %56 = vector.shape_cast %55 : vector<128xf32> to vector<128x1xf32>
    %57 = tpu.reciprocal %56 {approx = true} : vector<128x1xf32> -> vector<128x1xf32>
    %58 = vector.broadcast %57 : vector<128x1xf32> to vector<128x128xf32>
    %59 = arith.mulf %54, %58 : vector<128x128xf32>
    %60 = arith.truncf %59 : vector<128x128xf32> to vector<128x128xbf16>
    %cst_26 = arith.constant dense<0.000000e+00> : vector<128x64xf32>
    %61 = tpu.matmul %60, %45, %cst_26 {dimension_numbers = #tpu.dot_dimension_numbers<[1], [0], [0], [1], [0, 0, 1, 1], [], []>} : vector<128x128xbf16>, vector<128x64xbf16>, vector<128x64xf32> -> vector<128x64xf32>
    %62 = arith.truncf %61 : vector<128x64xf32> to vector<128x64xbf16>
    %63 = vector.extract_strided_slice %37 {offsets = [0, 64], sizes = [128, 64], strides = [1, 1]} : vector<256x384xf32> to vector<128x64xf32>
    %64 = arith.truncf %63 : vector<128x64xf32> to vector<128x64xbf16>
    %65 = vector.extract_strided_slice %37 {offsets = [0, 192], sizes = [128, 64], strides = [1, 1]} : vector<256x384xf32> to vector<128x64xf32>
    %66 = arith.truncf %65 : vector<128x64xf32> to vector<128x64xbf16>
    %67 = vector.extract_strided_slice %37 {offsets = [0, 320], sizes = [128, 64], strides = [1, 1]} : vector<256x384xf32> to vector<128x64xf32>
    %68 = arith.truncf %67 : vector<128x64xf32> to vector<128x64xbf16>
    %cst_27 = arith.constant dense<0.000000e+00> : vector<128x128xf32>
    %69 = tpu.matmul %64, %66, %cst_27 {dimension_numbers = #tpu.dot_dimension_numbers<[1], [1], [0], [0], [0, 0, 1, 0], [], []>} : vector<128x64xbf16>, vector<128x64xbf16>, vector<128x128xf32> -> vector<128x128xf32>
    %cst_28 = arith.constant 1.250000e-01 : f32
    %70 = vector.broadcast %cst_28 : f32 to vector<128x128xf32>
    %71 = arith.mulf %69, %70 : vector<128x128xf32>
    %72 = arith.addf %71, %39 : vector<128x128xf32>
    %cst_29 = arith.constant dense<0xFF800000> : vector<128xf32>
    %73 = vector.multi_reduction <maximumf>, %72, %cst_29 [1] : vector<128x128xf32> to vector<128xf32>
    %74 = vector.shape_cast %73 : vector<128xf32> to vector<128x1xf32>
    %75 = vector.broadcast %74 : vector<128x1xf32> to vector<128x128xf32>
    %76 = arith.subf %72, %75 : vector<128x128xf32>
    %77 = math.exp %76 : vector<128x128xf32>
    %cst_30 = arith.constant dense<0.000000e+00> : vector<128xf32>
    %78 = vector.multi_reduction <add>, %77, %cst_30 [1] : vector<128x128xf32> to vector<128xf32>
    %79 = vector.shape_cast %78 : vector<128xf32> to vector<128x1xf32>
    %80 = tpu.reciprocal %79 {approx = true} : vector<128x1xf32> -> vector<128x1xf32>
    %81 = vector.broadcast %80 : vector<128x1xf32> to vector<128x128xf32>
    %82 = arith.mulf %77, %81 : vector<128x128xf32>
    %83 = arith.truncf %82 : vector<128x128xf32> to vector<128x128xbf16>
    %cst_31 = arith.constant dense<0.000000e+00> : vector<128x64xf32>
    %84 = tpu.matmul %83, %68, %cst_31 {dimension_numbers = #tpu.dot_dimension_numbers<[1], [0], [0], [1], [0, 0, 1, 1], [], []>} : vector<128x128xbf16>, vector<128x64xbf16>, vector<128x64xf32> -> vector<128x64xf32>
    %85 = arith.truncf %84 : vector<128x64xf32> to vector<128x64xbf16>
    %86 = tpu.concatenate %62, %85 in 1 : vector<128x64xbf16>, vector<128x64xbf16> -> vector<128x128xbf16>
    %c1 = arith.constant 1 : index
    %c0_32 = arith.constant 0 : index
    %c0_33 = arith.constant 0 : index
    %87 = vector.load %arg2[%c1, %c0_32, %c0_33] : memref<2x128x128xf32, #tpu.memory_space<vmem>>, vector<1x128x128xf32>
    %88 = vector.shape_cast %87 : vector<1x128x128xf32> to vector<128x128xf32>
    %89 = vector.extract_strided_slice %37 {offsets = [128, 0], sizes = [128, 64], strides = [1, 1]} : vector<256x384xf32> to vector<128x64xf32>
    %90 = arith.truncf %89 : vector<128x64xf32> to vector<128x64xbf16>
    %91 = vector.extract_strided_slice %37 {offsets = [128, 128], sizes = [128, 64], strides = [1, 1]} : vector<256x384xf32> to vector<128x64xf32>
    %92 = arith.truncf %91 : vector<128x64xf32> to vector<128x64xbf16>
    %93 = vector.extract_strided_slice %37 {offsets = [128, 256], sizes = [128, 64], strides = [1, 1]} : vector<256x384xf32> to vector<128x64xf32>
    %94 = arith.truncf %93 : vector<128x64xf32> to vector<128x64xbf16>
    %cst_34 = arith.constant dense<0.000000e+00> : vector<128x128xf32>
    %95 = tpu.matmul %90, %92, %cst_34 {dimension_numbers = #tpu.dot_dimension_numbers<[1], [1], [0], [0], [0, 0, 1, 0], [], []>} : vector<128x64xbf16>, vector<128x64xbf16>, vector<128x128xf32> -> vector<128x128xf32>
    %cst_35 = arith.constant 1.250000e-01 : f32
    %96 = vector.broadcast %cst_35 : f32 to vector<128x128xf32>
    %97 = arith.mulf %95, %96 : vector<128x128xf32>
    %98 = arith.addf %97, %88 : vector<128x128xf32>
    %cst_36 = arith.constant dense<0xFF800000> : vector<128xf32>
    %99 = vector.multi_reduction <maximumf>, %98, %cst_36 [1] : vector<128x128xf32> to vector<128xf32>
    %100 = vector.shape_cast %99 : vector<128xf32> to vector<128x1xf32>
    %101 = vector.broadcast %100 : vector<128x1xf32> to vector<128x128xf32>
    %102 = arith.subf %98, %101 : vector<128x128xf32>
    %103 = math.exp %102 : vector<128x128xf32>
    %cst_37 = arith.constant dense<0.000000e+00> : vector<128xf32>
    %104 = vector.multi_reduction <add>, %103, %cst_37 [1] : vector<128x128xf32> to vector<128xf32>
    %105 = vector.shape_cast %104 : vector<128xf32> to vector<128x1xf32>
    %106 = tpu.reciprocal %105 {approx = true} : vector<128x1xf32> -> vector<128x1xf32>
    %107 = vector.broadcast %106 : vector<128x1xf32> to vector<128x128xf32>
    %108 = arith.mulf %103, %107 : vector<128x128xf32>
    %109 = arith.truncf %108 : vector<128x128xf32> to vector<128x128xbf16>
    %cst_38 = arith.constant dense<0.000000e+00> : vector<128x64xf32>
    %110 = tpu.matmul %109, %94, %cst_38 {dimension_numbers = #tpu.dot_dimension_numbers<[1], [0], [0], [1], [0, 0, 1, 1], [], []>} : vector<128x128xbf16>, vector<128x64xbf16>, vector<128x64xf32> -> vector<128x64xf32>
    %111 = arith.truncf %110 : vector<128x64xf32> to vector<128x64xbf16>
    %112 = vector.extract_strided_slice %37 {offsets = [128, 64], sizes = [128, 64], strides = [1, 1]} : vector<256x384xf32> to vector<128x64xf32>
    %113 = arith.truncf %112 : vector<128x64xf32> to vector<128x64xbf16>
    %114 = vector.extract_strided_slice %37 {offsets = [128, 192], sizes = [128, 64], strides = [1, 1]} : vector<256x384xf32> to vector<128x64xf32>
    %115 = arith.truncf %114 : vector<128x64xf32> to vector<128x64xbf16>
    %116 = vector.extract_strided_slice %37 {offsets = [128, 320], sizes = [128, 64], strides = [1, 1]} : vector<256x384xf32> to vector<128x64xf32>
    %117 = arith.truncf %116 : vector<128x64xf32> to vector<128x64xbf16>
    %cst_39 = arith.constant dense<0.000000e+00> : vector<128x128xf32>
    %118 = tpu.matmul %113, %115, %cst_39 {dimension_numbers = #tpu.dot_dimension_numbers<[1], [1], [0], [0], [0, 0, 1, 0], [], []>} : vector<128x64xbf16>, vector<128x64xbf16>, vector<128x128xf32> -> vector<128x128xf32>
    %cst_40 = arith.constant 1.250000e-01 : f32
    %119 = vector.broadcast %cst_40 : f32 to vector<128x128xf32>
    %120 = arith.mulf %118, %119 : vector<128x128xf32>
    %121 = arith.addf %120, %88 : vector<128x128xf32>
    %cst_41 = arith.constant dense<0xFF800000> : vector<128xf32>
    %122 = vector.multi_reduction <maximumf>, %121, %cst_41 [1] : vector<128x128xf32> to vector<128xf32>
    %123 = vector.shape_cast %122 : vector<128xf32> to vector<128x1xf32>
    %124 = vector.broadcast %123 : vector<128x1xf32> to vector<128x128xf32>
    %125 = arith.subf %121, %124 : vector<128x128xf32>
    %126 = math.exp %125 : vector<128x128xf32>
    %cst_42 = arith.constant dense<0.000000e+00> : vector<128xf32>
    %127 = vector.multi_reduction <add>, %126, %cst_42 [1] : vector<128x128xf32> to vector<128xf32>
    %128 = vector.shape_cast %127 : vector<128xf32> to vector<128x1xf32>
    %129 = tpu.reciprocal %128 {approx = true} : vector<128x1xf32> -> vector<128x1xf32>
    %130 = vector.broadcast %129 : vector<128x1xf32> to vector<128x128xf32>
    %131 = arith.mulf %126, %130 : vector<128x128xf32>
    %132 = arith.truncf %131 : vector<128x128xf32> to vector<128x128xbf16>
    %cst_43 = arith.constant dense<0.000000e+00> : vector<128x64xf32>
    %133 = tpu.matmul %132, %117, %cst_43 {dimension_numbers = #tpu.dot_dimension_numbers<[1], [0], [0], [1], [0, 0, 1, 1], [], []>} : vector<128x128xbf16>, vector<128x64xbf16>, vector<128x64xf32> -> vector<128x64xf32>
    %134 = arith.truncf %133 : vector<128x64xf32> to vector<128x64xbf16>
    %135 = tpu.concatenate %111, %134 in 1 : vector<128x64xbf16>, vector<128x64xbf16> -> vector<128x128xbf16>
    %136 = tpu.concatenate %86, %135 in 0 : vector<128x128xbf16>, vector<128x128xbf16> -> vector<256x128xbf16>
    %c0_44 = arith.constant 0 : index
    %c0_45 = arith.constant 0 : index
    %c0_46 = arith.constant 0 : index
    %137 = vector.load %arg7[%c0_44, %c0_45, %c0_46] : memref<1x128x128xbf16, #tpu.memory_space<vmem>>, vector<1x128x128xbf16>
    %138 = vector.shape_cast %137 : vector<1x128x128xbf16> to vector<128x128xbf16>
    %cst_47 = arith.constant dense<0.000000e+00> : vector<256x128xf32>
    %139 = tpu.matmul %136, %138, %cst_47 {dimension_numbers = #tpu.dot_dimension_numbers<[1], [0], [0], [1], [0, 0, 1, 1], [], []>} : vector<256x128xbf16>, vector<128x128xbf16>, vector<256x128xf32> -> vector<256x128xf32>
    %140 = arith.addf %3, %139 : vector<256x128xf32>
    %c0_48 = arith.constant 0 : index
    %c0_49 = arith.constant 0 : index
    %c0_50 = arith.constant 0 : index
    %141 = vector.load %arg8[%c0_48, %c0_49, %c0_50] : memref<1x1x128xf32, #tpu.memory_space<vmem>>, vector<1x1x128xf32>
    %142 = vector.shape_cast %141 : vector<1x1x128xf32> to vector<1x128xf32>
    %143 = vector.broadcast %142 : vector<1x128xf32> to vector<256x128xf32>
    %144 = arith.addf %140, %143 : vector<256x128xf32>
    %c0_51 = arith.constant 0 : index
    %c0_52 = arith.constant 0 : index
    %c0_53 = arith.constant 0 : index
    %145 = vector.load %arg9[%c0_51, %c0_52, %c0_53] : memref<1x1x128xf32, #tpu.memory_space<vmem>>, vector<1x1x128xf32>
    %146 = vector.shape_cast %145 : vector<1x1x128xf32> to vector<1x128xf32>
    %c0_54 = arith.constant 0 : index
    %c0_55 = arith.constant 0 : index
    %c0_56 = arith.constant 0 : index
    %147 = vector.load %arg10[%c0_54, %c0_55, %c0_56] : memref<1x1x128xf32, #tpu.memory_space<vmem>>, vector<1x1x128xf32>
    %148 = vector.shape_cast %147 : vector<1x1x128xf32> to vector<1x128xf32>
    %cst_57 = arith.constant dense<0.000000e+00> : vector<256xf32>
    %149 = vector.multi_reduction <add>, %144, %cst_57 [1] : vector<256x128xf32> to vector<256xf32>
    %150 = vector.shape_cast %149 : vector<256xf32> to vector<256x1xf32>
    %cst_58 = arith.constant 1.280000e+02 : f32
    %151 = vector.broadcast %cst_58 : f32 to vector<256x1xf32>
    %152 = arith.divf %150, %151 : vector<256x1xf32>
    %153 = vector.broadcast %152 : vector<256x1xf32> to vector<256x128xf32>
    %154 = arith.subf %144, %153 : vector<256x128xf32>
    %155 = arith.mulf %154, %154 : vector<256x128xf32>
    %cst_59 = arith.constant dense<0.000000e+00> : vector<256xf32>
    %156 = vector.multi_reduction <add>, %155, %cst_59 [1] : vector<256x128xf32> to vector<256xf32>
    %157 = vector.shape_cast %156 : vector<256xf32> to vector<256x1xf32>
    %cst_60 = arith.constant 1.280000e+02 : f32
    %158 = vector.broadcast %cst_60 : f32 to vector<256x1xf32>
    %159 = arith.divf %157, %158 : vector<256x1xf32>
    %160 = vector.broadcast %152 : vector<256x1xf32> to vector<256x128xf32>
    %161 = arith.subf %144, %160 : vector<256x128xf32>
    %cst_61 = arith.constant 9.99999974E-6 : f32
    %162 = vector.broadcast %cst_61 : f32 to vector<256x1xf32>
    %163 = arith.addf %159, %162 : vector<256x1xf32>
    %164 = math.rsqrt %163 : vector<256x1xf32>
    %165 = vector.broadcast %164 : vector<256x1xf32> to vector<256x128xf32>
    %166 = arith.mulf %161, %165 : vector<256x128xf32>
    %167 = vector.broadcast %146 : vector<1x128xf32> to vector<256x128xf32>
    %168 = arith.mulf %166, %167 : vector<256x128xf32>
    %169 = vector.broadcast %148 : vector<1x128xf32> to vector<256x128xf32>
    %170 = arith.addf %168, %169 : vector<256x128xf32>
    %171 = arith.truncf %170 : vector<256x128xf32> to vector<256x128xbf16>
    %c0_62 = arith.constant 0 : index
    %c0_63 = arith.constant 0 : index
    %c0_64 = arith.constant 0 : index
    %172 = vector.load %arg11[%c0_62, %c0_63, %c0_64] : memref<1x128x512xbf16, #tpu.memory_space<vmem>>, vector<1x128x512xbf16>
    %173 = vector.shape_cast %172 : vector<1x128x512xbf16> to vector<128x512xbf16>
    %cst_65 = arith.constant dense<0.000000e+00> : vector<256x512xf32>
    %174 = tpu.matmul %171, %173, %cst_65 {dimension_numbers = #tpu.dot_dimension_numbers<[1], [0], [0], [1], [0, 0, 1, 1], [], []>} : vector<256x128xbf16>, vector<128x512xbf16>, vector<256x512xf32> -> vector<256x512xf32>
    %c0_66 = arith.constant 0 : index
    %c0_67 = arith.constant 0 : index
    %c0_68 = arith.constant 0 : index
    %175 = vector.load %arg12[%c0_66, %c0_67, %c0_68] : memref<1x1x512xf32, #tpu.memory_space<vmem>>, vector<1x1x512xf32>
    %176 = vector.shape_cast %175 : vector<1x1x512xf32> to vector<1x512xf32>
    %177 = vector.broadcast %176 : vector<1x512xf32> to vector<256x512xf32>
    %178 = arith.addf %174, %177 : vector<256x512xf32>
    %cst_69 = arith.constant 1.702000e+00 : f32
    %179 = vector.broadcast %cst_69 : f32 to vector<256x512xf32>
    %180 = arith.mulf %179, %178 : vector<256x512xf32>
    %181 = arith.negf %180 : vector<256x512xf32>
    %182 = math.exp %181 : vector<256x512xf32>
    %cst_70 = arith.constant 1.000000e+00 : f32
    %183 = vector.broadcast %cst_70 : f32 to vector<256x512xf32>
    %184 = arith.addf %183, %182 : vector<256x512xf32>
    %185 = arith.divf %183, %184 : vector<256x512xf32>
    %186 = arith.mulf %178, %185 : vector<256x512xf32>
    %187 = arith.truncf %186 : vector<256x512xf32> to vector<256x512xbf16>
    %c0_71 = arith.constant 0 : index
    %c0_72 = arith.constant 0 : index
    %c0_73 = arith.constant 0 : index
    %188 = vector.load %arg13[%c0_71, %c0_72, %c0_73] : memref<1x512x128xbf16, #tpu.memory_space<vmem>>, vector<1x512x128xbf16>
    %189 = vector.shape_cast %188 : vector<1x512x128xbf16> to vector<512x128xbf16>
    %cst_74 = arith.constant dense<0.000000e+00> : vector<256x128xf32>
    %190 = tpu.matmul %187, %189, %cst_74 {dimension_numbers = #tpu.dot_dimension_numbers<[1], [0], [0], [1], [0, 0, 1, 1], [], []>} : vector<256x512xbf16>, vector<512x128xbf16>, vector<256x128xf32> -> vector<256x128xf32>
    %191 = arith.addf %144, %190 : vector<256x128xf32>
    %c0_75 = arith.constant 0 : index
    %c0_76 = arith.constant 0 : index
    %c0_77 = arith.constant 0 : index
    %192 = vector.load %arg14[%c0_75, %c0_76, %c0_77] : memref<1x1x128xf32, #tpu.memory_space<vmem>>, vector<1x1x128xf32>
    %193 = vector.shape_cast %192 : vector<1x1x128xf32> to vector<1x128xf32>
    %194 = vector.broadcast %193 : vector<1x128xf32> to vector<256x128xf32>
    %195 = arith.addf %191, %194 : vector<256x128xf32>
    %c0_78 = arith.constant 0 : index
    %c0_79 = arith.constant 0 : index
    %196 = vector.load %arg18[%c0_78, %c0_79] : memref<256x128xf32, #tpu.memory_space<vmem>>, vector<256x128xf32>
    tpu.vector_store %arg18[%c0_78, %c0_79], %195 {strides = array<i32>} : memref<256x128xf32, #tpu.memory_space<vmem>>, vector<256x128xf32>,
    %c1_i32 = arith.constant 1 : i32
    %197 = arith.cmpi eq, %arg0, %c1_i32 : i32
    %198 = arith.extui %197 : i1 to i32
    %c0_i32_80 = arith.constant 0 : i32
    %199 = arith.cmpi ne, %198, %c0_i32_80 : i32
    scf.if %199 {
      %c0_81 = arith.constant 0 : index
      %c0_82 = arith.constant 0 : index
      %200 = vector.load %arg15[%c0_81, %c0_82] : memref<1x128xf32, #tpu.memory_space<vmem>>, vector<1x128xf32>
      %c0_83 = arith.constant 0 : index
      %c0_84 = arith.constant 0 : index
      %201 = vector.load %arg16[%c0_83, %c0_84] : memref<1x128xf32, #tpu.memory_space<vmem>>, vector<1x128xf32>
      %cst_85 = arith.constant dense<0.000000e+00> : vector<256xf32>
      %202 = vector.multi_reduction <add>, %195, %cst_85 [1] : vector<256x128xf32> to vector<256xf32>
      %203 = vector.shape_cast %202 : vector<256xf32> to vector<256x1xf32>
      %cst_86 = arith.constant 1.280000e+02 : f32
      %204 = vector.broadcast %cst_86 : f32 to vector<256x1xf32>
      %205 = arith.divf %203, %204 : vector<256x1xf32>
      %206 = vector.broadcast %205 : vector<256x1xf32> to vector<256x128xf32>
      %207 = arith.subf %195, %206 : vector<256x128xf32>
      %208 = arith.mulf %207, %207 : vector<256x128xf32>
      %cst_87 = arith.constant dense<0.000000e+00> : vector<256xf32>
      %209 = vector.multi_reduction <add>, %208, %cst_87 [1] : vector<256x128xf32> to vector<256xf32>
      %210 = vector.shape_cast %209 : vector<256xf32> to vector<256x1xf32>
      %cst_88 = arith.constant 1.280000e+02 : f32
      %211 = vector.broadcast %cst_88 : f32 to vector<256x1xf32>
      %212 = arith.divf %210, %211 : vector<256x1xf32>
      %213 = vector.broadcast %205 : vector<256x1xf32> to vector<256x128xf32>
      %214 = arith.subf %195, %213 : vector<256x128xf32>
      %cst_89 = arith.constant 9.99999974E-6 : f32
      %215 = vector.broadcast %cst_89 : f32 to vector<256x1xf32>
      %216 = arith.addf %212, %215 : vector<256x1xf32>
      %217 = math.rsqrt %216 : vector<256x1xf32>
      %218 = vector.broadcast %217 : vector<256x1xf32> to vector<256x128xf32>
      %219 = arith.mulf %214, %218 : vector<256x128xf32>
      %220 = vector.broadcast %200 : vector<1x128xf32> to vector<256x128xf32>
      %221 = arith.mulf %219, %220 : vector<256x128xf32>
      %222 = vector.broadcast %201 : vector<1x128xf32> to vector<256x128xf32>
      %223 = arith.addf %221, %222 : vector<256x128xf32>
      %224 = arith.truncf %223 : vector<256x128xf32> to vector<256x128xbf16>
      %c0_90 = arith.constant 0 : index
      %c0_91 = arith.constant 0 : index
      %225 = vector.load %arg17[%c0_90, %c0_91] : memref<256x128xbf16, #tpu.memory_space<vmem>>, vector<256x128xbf16>
      tpu.vector_store %arg17[%c0_90, %c0_91], %224 {strides = array<i32>} : memref<256x128xbf16, #tpu.memory_space<vmem>>, vector<256x128xbf16>,
    } else {
    }
    return
  }
  func.func @transform_0(%arg0: i32) -> (i32, i32) {
    %c0_i32 = arith.constant 0 : i32
    %c0_i32_0 = arith.constant 0 : i32
    %c0_i32_1 = arith.constant 0 : i32
    return %c0_i32, %c0_i32_0 : i32, i32
  }
  func.func @transform_1(%arg0: i32) -> (i32, i32, i32) {
    %c0_i32 = arith.constant 0 : i32
    %c0_i32_0 = arith.constant 0 : i32
    %c0_i32_1 = arith.constant 0 : i32
    %c0_i32_2 = arith.constant 0 : i32
    return %c0_i32, %c0_i32_0, %c0_i32_1 : i32, i32, i32
  }
  func.func @transform_2(%arg0: i32) -> (i32, i32, i32) {
    %c0_i32 = arith.constant 0 : i32
    %c0_i32_0 = arith.constant 0 : i32
    %c0_i32_1 = arith.constant 0 : i32
    return %arg0, %c0_i32, %c0_i32_0 : i32, i32, i32
  }
  func.func @transform_3(%arg0: i32) -> (i32, i32, i32) {
    %c0_i32 = arith.constant 0 : i32
    %c0_i32_0 = arith.constant 0 : i32
    %c0_i32_1 = arith.constant 0 : i32
    return %arg0, %c0_i32, %c0_i32_0 : i32, i32, i32
  }
  func.func @transform_4(%arg0: i32) -> (i32, i32, i32) {
    %c0_i32 = arith.constant 0 : i32
    %c0_i32_0 = arith.constant 0 : i32
    %c0_i32_1 = arith.constant 0 : i32
    return %arg0, %c0_i32, %c0_i32_0 : i32, i32, i32
  }
  func.func @transform_5(%arg0: i32) -> (i32, i32, i32) {
    %c0_i32 = arith.constant 0 : i32
    %c0_i32_0 = arith.constant 0 : i32
    %c0_i32_1 = arith.constant 0 : i32
    return %arg0, %c0_i32, %c0_i32_0 : i32, i32, i32
  }
  func.func @transform_6(%arg0: i32) -> (i32, i32, i32) {
    %c0_i32 = arith.constant 0 : i32
    %c0_i32_0 = arith.constant 0 : i32
    %c0_i32_1 = arith.constant 0 : i32
    return %arg0, %c0_i32, %c0_i32_0 : i32, i32, i32
  }
  func.func @transform_7(%arg0: i32) -> (i32, i32, i32) {
    %c0_i32 = arith.constant 0 : i32
    %c0_i32_0 = arith.constant 0 : i32
    %c0_i32_1 = arith.constant 0 : i32
    return %arg0, %c0_i32, %c0_i32_0 : i32, i32, i32
  }
  func.func @transform_8(%arg0: i32) -> (i32, i32, i32) {
    %c0_i32 = arith.constant 0 : i32
    %c0_i32_0 = arith.constant 0 : i32
    %c0_i32_1 = arith.constant 0 : i32
    return %arg0, %c0_i32, %c0_i32_0 : i32, i32, i32
  }
  func.func @transform_9(%arg0: i32) -> (i32, i32, i32) {
    %c0_i32 = arith.constant 0 : i32
    %c0_i32_0 = arith.constant 0 : i32
    %c0_i32_1 = arith.constant 0 : i32
    return %arg0, %c0_i32, %c0_i32_0 : i32, i32, i32
  }
  func.func @transform_10(%arg0: i32) -> (i32, i32, i32) {
    %c0_i32 = arith.constant 0 : i32
    %c0_i32_0 = arith.constant 0 : i32
    %c0_i32_1 = arith.constant 0 : i32
    return %arg0, %c0_i32, %c0_i32_0 : i32, i32, i32
  }
  func.func @transform_11(%arg0: i32) -> (i32, i32, i32) {
    %c0_i32 = arith.constant 0 : i32
    %c0_i32_0 = arith.constant 0 : i32
    %c0_i32_1 = arith.constant 0 : i32
    return %arg0, %c0_i32, %c0_i32_0 : i32, i32, i32
  }
  func.func @transform_12(%arg0: i32) -> (i32, i32, i32) {
    %c0_i32 = arith.constant 0 : i32
    %c0_i32_0 = arith.constant 0 : i32
    %c0_i32_1 = arith.constant 0 : i32
    return %arg0, %c0_i32, %c0_i32_0 : i32, i32, i32
  }
  func.func @transform_13(%arg0: i32) -> (i32, i32, i32) {
    %c0_i32 = arith.constant 0 : i32
    %c0_i32_0 = arith.constant 0 : i32
    %c0_i32_1 = arith.constant 0 : i32
    return %arg0, %c0_i32, %c0_i32_0 : i32, i32, i32
  }
  func.func @transform_14(%arg0: i32) -> (i32, i32) {
    %c0_i32 = arith.constant 0 : i32
    %c0_i32_0 = arith.constant 0 : i32
    %c0_i32_1 = arith.constant 0 : i32
    return %c0_i32, %c0_i32_0 : i32, i32
  }
  func.func @transform_15(%arg0: i32) -> (i32, i32) {
    %c0_i32 = arith.constant 0 : i32
    %c0_i32_0 = arith.constant 0 : i32
    %c0_i32_1 = arith.constant 0 : i32
    return %c0_i32, %c0_i32_0 : i32, i32
  }
  func.func @transform_16(%arg0: i32) -> (i32, i32) {
    %c0_i32 = arith.constant 0 : i32
    %c0_i32_0 = arith.constant 0 : i32
    %c0_i32_1 = arith.constant 0 : i32
    return %c0_i32, %c0_i32_0 : i32, i32
  }
}

</mosaic_0001>

<bundles_post_ra>
// kernel: custom_text_encoder_forward.3
= control target key start
LH: loop header
LB: loop body
LE: loop exit
PB: predicated region body
PF: predicated region fallthrough
CT: control target
= control target key end

     0   :  { %s826_s12 = smov 0   ;;  %s828_s13 = smov 0   ;;  %s1002_s0 = inlined_call_operand.vmem [shape: bf16[256,128], index: 0, kind: input, shape index: {}]   ;;  %s1003_s1 = inlined_call_operand.vmem [shape: bf16[128,256], index: 1, kind: input, shape index: {}]   ;;  %s1004_s2 = inlined_call_operand.vmem [shape: f32[1,256], index: 2, kind: input, shape index: {}]   ;;  %s1005_s3 = inlined_call_operand.vmem [shape: f32[256,256], index: 3, kind: output, shape index: {}]  }
   0x1   :  { %s830_s14 = smov 0  }
   0x2 LB: > { %s25_s15 = sadd.s32 1, %s799_s13  ;;  %p675_p0 = scmp.ge.s32.totalorder %s803_s14, 1  ;;  %s803_s14 = sphi %s830_s14, %s13_s14   ;;  %s799_s13 = sphi %s828_s13, %s1007_s13   ;;  %s795_s12 = sphi %s826_s12, %s1006_s12  }
   0x3   : > { %p27_p1 = scmp.ge.s32.totalorder %s25_s15, 2  ;;  %p173_p2 = scmp.lt.s32.totalorder %s803_s14, 3 }
   0x5   : > { %s1009_s15 = smov (%p27_p1, %s25_s15), 0  ;;  %p174_p3 = pnand %p675_p0, %p173_p2 }
   0x6   : > { %s676_s18 = sshll.u32 (!%p174_p3), %s795_s12, 4 }
   0x7   : > { %177 = sbr.rel (%p174_p3) target bundleno = 272 (0x110), region = 32  ;;  %p212_p4 = scmp.lt.s32.totalorder (!%p174_p3), %s676_s18, 31 }
   0xc   : > { %v749_v0 = vld [vmem:[%s1003_s1 + $0x74] ss:$8 sps:$4 sm:$0xff]   ;;  %v751_v1 = vld [vmem:[%s1003_s1 + $0x70] ss:$8 sps:$4 sm:$0xff]   ;;  %v805_v2 = vmov 0   ;;  %s1011_s18 = smov (!%p212_p4, %s676_s18), 31  ;;  %v275_v25 = vlaneseq }
   0xd   : > { %445 = vmatprep.mubr.bf16.mxu0 %v805_v2  ;;  %485 = vmatprep.mubr.bf16.mxu1 %v805_v2  ;;  %v752_v3 = vld [vmem:[%s1003_s1 + $0x64] ss:$8 sps:$4 sm:$0xff]   ;;  %v754_v4 = vld [vmem:[%s1003_s1 + $0x60] ss:$8 sps:$4 sm:$0xff]   ;;  %v755_v5 = vld [vmem:[%s1003_s1 + $0x54] ss:$8 sps:$4 sm:$0xff]  }
   0xe   : > { %413 = vmatprep.subr.bf16.mxu0 %v749_v0  ;;  %708 = vmatprep.subr.bf16.mxu1 %v749_v0  ;;  %s677_s27 = sshll.u32 %s1011_s18, 2  ;;  %v757_v6 = vld [vmem:[%s1003_s1 + $0x50] ss:$8 sps:$4 sm:$0xff]   ;;  %v758_v7 = vld [vmem:[%s1003_s1 + $0x44] ss:$8 sps:$4 sm:$0xff]   ;;  %v276_v26 = vshrl.u32 %v275_v25, 7 }
   0xf   : > { %414 = vmatpush1.bf16.msra.mxu0 %v751_v1  ;;  %716 = vmatpush1.bf16.msra.mxu1 %v751_v1  ;;  %s873_s7 = scalar_lea.vmem %s1002_s0, %s677_s27  ;;  %v760_v8 = vld [vmem:[%s1003_s1 + $0x40] ss:$8 sps:$4 sm:$0xff]   ;;  %v761_v9 = vld [vmem:[%s1003_s1 + $0x34] ss:$8 sps:$4 sm:$0xff]   ;;  %v763_v10 = vld [vmem:[%s1003_s1 + $0x30] ss:$8 sps:$4 sm:$0xff]  }
  0x10   : > { %415 = vmatprep.subr.bf16.mxu0 %v752_v3  ;;  %709 = vmatprep.subr.bf16.mxu1 %v752_v3  ;;  %v764_v11 = vld [vmem:[%s1003_s1 + $0x24] ss:$8 sps:$4 sm:$0xff]   ;;  %v766_v12 = vld [vmem:[%s1003_s1 + $0x20] ss:$8 sps:$4 sm:$0xff]   ;;  %v767_v13 = vld [vmem:[%s1003_s1 + $0x14] ss:$8 sps:$4 sm:$0xff]  }
  0x11   : > { %v769_v14 = vld [vmem:[%s1003_s1 + $0x10] ss:$8 sps:$4 sm:$0xff]   ;;  %v770_v15 = vld [vmem:[%s1003_s1 + $0x4] ss:$8 sps:$4 sm:$0xff]   ;;  %v772_v16 = vld [vmem:[%s1003_s1] ss:$8 sps:$4 sm:$0xff]  }
  0x12   : > { %v773_v17 = vld [vmem:[%s873_s7] sm:$0xff]   ;;  %v775_v19 = vld [vmem:[%s873_s7 + $0x8] sm:$0xff]   ;;  %v777_v21 = vld [vmem:[%s873_s7 + $0x10] sm:$0xff]   ;;  %v277_v27 = vsub.s32 0, %v276_v26  ;;  %v281_v29 = vsub.s32 1, %v276_v26  ;;  %s707_s5 = sshll.u32 %s1011_s18, 4 }
  0x13   : > { %416 = vmatpush1.bf16.msra.mxu0 %v754_v4  ;;  %717 = vmatpush1.bf16.msra.mxu1 %v754_v4  ;;  %v774_v18 = vld [vmem:[%s873_s7 + $0x20] sm:$0xff]   ;;  %v776_v20 = vld [vmem:[%s873_s7 + $0x28] sm:$0xff]   ;;  %v778_v22 = vld [vmem:[%s873_s7 + $0x30] sm:$0xff]   ;;  %s927_s9 = scalar_lea.vmem %s1005_s3, %s707_s5 }
  0x14   : > { %417 = vmatprep.subr.bf16.mxu0 %v755_v5  ;;  %710 = vmatprep.subr.bf16.mxu1 %v755_v5  ;;  %v779_v23 = vld [vmem:[%s873_s7 + $0x18] sm:$0xff]   ;;  %v273_v28 = vld [vmem:[%s1004_s2] sm:$0x3] }
  0x15   : > { %v780_v24 = vld [vmem:[%s873_s7 + $0x38] sm:$0xff]   ;;  %v920_v30 = vrot.slane %v273_v28, %v277_v27  ;;  %v922_v31 = vrot.slane %v273_v28, %v281_v29 }
  0x17   : > { %418 = vmatpush1.bf16.msra.mxu0 %v757_v6  ;;  %718 = vmatpush1.bf16.msra.mxu1 %v757_v6 }
  0x18   : > { %419 = vmatprep.subr.bf16.mxu0 %v758_v7  ;;  %711 = vmatprep.subr.bf16.mxu1 %v758_v7 }
  0x1b   : > { %420 = vmatpush1.bf16.msra.mxu0 %v760_v8  ;;  %719 = vmatpush1.bf16.msra.mxu1 %v760_v8 }
  0x1c   : > { %421 = vmatprep.subr.bf16.mxu0 %v761_v9  ;;  %712 = vmatprep.subr.bf16.mxu1 %v761_v9 }
  0x1f   : > { %422 = vmatpush1.bf16.msra.mxu0 %v763_v10  ;;  %720 = vmatpush1.bf16.msra.mxu1 %v763_v10 }
  0x20   : > { %423 = vmatprep.subr.bf16.mxu0 %v764_v11  ;;  %713 = vmatprep.subr.bf16.mxu1 %v764_v11 }
  0x23   : > { %424 = vmatpush1.bf16.msra.mxu0 %v766_v12  ;;  %721 = vmatpush1.bf16.msra.mxu1 %v766_v12 }
  0x24   : > { %425 = vmatprep.subr.bf16.mxu0 %v767_v13  ;;  %714 = vmatprep.subr.bf16.mxu1 %v767_v13 }
  0x27   : > { %426 = vmatpush1.bf16.msra.mxu0 %v769_v14  ;;  %722 = vmatpush1.bf16.msra.mxu1 %v769_v14 }
  0x28   : > { %427 = vmatprep.subr.bf16.mxu0 %v770_v15  ;;  %715 = vmatprep.subr.bf16.mxu1 %v770_v15 }
  0x2b   : > { %428 = vmatpush1.bf16.msra.mxu0 %v772_v16  ;;  %723 = vmatpush1.bf16.msra.mxu1 %v772_v16 }
  0x2e   : > { %446 = vmatmul.mubr.bf16.vlgmr.msra.gmra.mxu0 %v773_v17  ;;  %486 = vmatmul.mubr.bf16.vlgmr.msra.gmra.mxu1 %v774_v18 }
  0x2f   : > { %455 = vmatprep.mubr.bf16.mxu0 %v805_v2  ;;  %495 = vmatprep.mubr.bf16.mxu1 %v805_v2 }
  0x36   : > { %456 = vmatmul.mubr.bf16.gmra.mxu0 %v775_v19  ;;  %496 = vmatmul.mubr.bf16.gmra.mxu1 %v776_v20 }
  0x37   : > { %465 = vmatprep.mubr.bf16.mxu0 %v805_v2  ;;  %505 = vmatprep.mubr.bf16.mxu1 %v805_v2 }
  0x3e   : > { %466 = vmatmul.mubr.bf16.gmra.mxu0 %v777_v21  ;;  %506 = vmatmul.mubr.bf16.gmra.mxu1 %v778_v22 }
  0x3f   : > { %475 = vmatprep.mubr.bf16.mxu0 %v805_v2  ;;  %515 = vmatprep.mubr.bf16.mxu1 %v805_v2 }
  0x46   : > { %476 = vmatmul.mubr.bf16.gmra.mxu0 %v779_v23  ;;  %516 = vmatmul.mubr.bf16.gmra.mxu1 %v780_v24 }
  0xee   : > { %v447_v32 = vpop.f32.mrf.mxu0  ;;  %v487_v33 = vpop.f32.mrf.mxu1 }
  0xef   : > { %v448_v34 = vadd.f32 %v447_v32, %v920_v30  ;;  %v488_v35 = vadd.f32 %v487_v33, %v920_v30 }
  0xf0   : > { %v449_v36 = vpop.f32.mrf.mxu0  ;;  %v489_v37 = vpop.f32.mrf.mxu1 }
  0xf1   : > { %526 = vst [vmem:[%s927_s9] sm:$0xff] %v448_v34  ;;  %542 = vst [vmem:[%s927_s9 + $0x80] sm:$0xff] %v488_v35  ;;  %v450_v38 = vadd.f32 %v449_v36, %v922_v31  ;;  %v490_v39 = vadd.f32 %v489_v37, %v922_v31 }
  0xf2   : > { %v451_v40 = vpop.f32.mrf.mxu0  ;;  %v491_v41 = vpop.f32.mrf.mxu1 }
  0xf3   : > { %527 = vst [vmem:[%s927_s9 + $0x8] sm:$0xff] %v450_v38  ;;  %543 = vst [vmem:[%s927_s9 + $0x88] sm:$0xff] %v490_v39  ;;  %v452_v42 = vadd.f32 %v451_v40, %v920_v30  ;;  %v492_v43 = vadd.f32 %v491_v41, %v920_v30 }
  0xf4   : > { %v453_v44 = vpop.f32.mrf.mxu0  ;;  %v493_v45 = vpop.f32.mrf.mxu1 }
  0xf5   : > { %528 = vst [vmem:[%s927_s9 + $0x10] sm:$0xff] %v452_v42  ;;  %544 = vst [vmem:[%s927_s9 + $0x90] sm:$0xff] %v492_v43  ;;  %v454_v46 = vadd.f32 %v453_v44, %v922_v31  ;;  %v494_v47 = vadd.f32 %v493_v45, %v922_v31 }
  0xf6   : > { %v457_v48 = vpop.f32.mrf.mxu0  ;;  %v497_v49 = vpop.f32.mrf.mxu1 }
  0xf7   : > { %529 = vst [vmem:[%s927_s9 + $0x18] sm:$0xff] %v454_v46  ;;  %545 = vst [vmem:[%s927_s9 + $0x98] sm:$0xff] %v494_v47  ;;  %v458_v50 = vadd.f32 %v457_v48, %v920_v30  ;;  %v498_v51 = vadd.f32 %v497_v49, %v920_v30 }
  0xf8   : > { %v459_v52 = vpop.f32.mrf.mxu0  ;;  %v499_v53 = vpop.f32.mrf.mxu1 }
  0xf9   : > { %530 = vst [vmem:[%s927_s9 + $0x20] sm:$0xff] %v458_v50  ;;  %546 = vst [vmem:[%s927_s9 + $0xa0] sm:$0xff] %v498_v51  ;;  %v460_v54 = vadd.f32 %v459_v52, %v922_v31  ;;  %v500_v55 = vadd.f32 %v499_v53, %v922_v31 }
  0xfa   : > { %v461_v56 = vpop.f32.mrf.mxu0  ;;  %v501_v57 = vpop.f32.mrf.mxu1 }
  0xfb   : > { %531 = vst [vmem:[%s927_s9 + $0x28] sm:$0xff] %v460_v54  ;;  %547 = vst [vmem:[%s927_s9 + $0xa8] sm:$0xff] %v500_v55  ;;  %v462_v58 = vadd.f32 %v461_v56, %v920_v30  ;;  %v502_v59 = vadd.f32 %v501_v57, %v920_v30 }
  0xfc   : > { %v463_v60 = vpop.f32.mrf.mxu0  ;;  %v503_v61 = vpop.f32.mrf.mxu1 }
  0xfd   : > { %532 = vst [vmem:[%s927_s9 + $0x30] sm:$0xff] %v462_v58  ;;  %548 = vst [vmem:[%s927_s9 + $0xb0] sm:$0xff] %v502_v59  ;;  %v464_v62 = vadd.f32 %v463_v60, %v922_v31  ;;  %v504_v63 = vadd.f32 %v503_v61, %v922_v31 }
  0xfe   : > { %v467_v0 = vpop.f32.mrf.mxu0  ;;  %v507_v1 = vpop.f32.mrf.mxu1 }
  0xff   : > { %533 = vst [vmem:[%s927_s9 + $0x38] sm:$0xff] %v464_v62  ;;  %549 = vst [vmem:[%s927_s9 + $0xb8] sm:$0xff] %v504_v63  ;;  %v468_v2 = vadd.f32 %v467_v0, %v920_v30  ;;  %v508_v3 = vadd.f32 %v507_v1, %v920_v30 }
 0x100   : > { %v469_v4 = vpop.f32.mrf.mxu0  ;;  %v509_v5 = vpop.f32.mrf.mxu1 }
 0x101   : > { %534 = vst [vmem:[%s927_s9 + $0x40] sm:$0xff] %v468_v2  ;;  %550 = vst [vmem:[%s927_s9 + $0xc0] sm:$0xff] %v508_v3  ;;  %v470_v6 = vadd.f32 %v469_v4, %v922_v31  ;;  %v510_v7 = vadd.f32 %v509_v5, %v922_v31 }
 0x102   : > { %v471_v8 = vpop.f32.mrf.mxu0  ;;  %v511_v9 = vpop.f32.mrf.mxu1 }
 0x103   : > { %535 = vst [vmem:[%s927_s9 + $0x48] sm:$0xff] %v470_v6  ;;  %551 = vst [vmem:[%s927_s9 + $0xc8] sm:$0xff] %v510_v7  ;;  %v472_v10 = vadd.f32 %v471_v8, %v920_v30  ;;  %v512_v11 = vadd.f32 %v511_v9, %v920_v30 }
 0x104   : > { %v473_v12 = vpop.f32.mrf.mxu0  ;;  %v513_v13 = vpop.f32.mrf.mxu1 }
 0x105   : > { %536 = vst [vmem:[%s927_s9 + $0x50] sm:$0xff] %v472_v10  ;;  %552 = vst [vmem:[%s927_s9 + $0xd0] sm:$0xff] %v512_v11  ;;  %v474_v14 = vadd.f32 %v473_v12, %v922_v31  ;;  %v514_v15 = vadd.f32 %v513_v13, %v922_v31 }
 0x106   : > { %v477_v16 = vpop.f32.mrf.mxu0  ;;  %v517_v17 = vpop.f32.mrf.mxu1 }
 0x107   : > { %537 = vst [vmem:[%s927_s9 + $0x58] sm:$0xff] %v474_v14  ;;  %553 = vst [vmem:[%s927_s9 + $0xd8] sm:$0xff] %v514_v15  ;;  %v478_v18 = vadd.f32 %v477_v16, %v920_v30  ;;  %v518_v19 = vadd.f32 %v517_v17, %v920_v30 }
 0x108   : > { %v479_v20 = vpop.f32.mrf.mxu0  ;;  %v519_v21 = vpop.f32.mrf.mxu1 }
 0x109   : > { %538 = vst [vmem:[%s927_s9 + $0x60] sm:$0xff] %v478_v18  ;;  %554 = vst [vmem:[%s927_s9 + $0xe0] sm:$0xff] %v518_v19  ;;  %v480_v22 = vadd.f32 %v479_v20, %v922_v31  ;;  %v520_v23 = vadd.f32 %v519_v21, %v922_v31 }
 0x10a   : > { %v481_v24 = vpop.f32.mrf.mxu0  ;;  %v521_v25 = vpop.f32.mrf.mxu1 }
 0x10b   : > { %539 = vst [vmem:[%s927_s9 + $0x68] sm:$0xff] %v480_v22  ;;  %555 = vst [vmem:[%s927_s9 + $0xe8] sm:$0xff] %v520_v23  ;;  %v482_v26 = vadd.f32 %v481_v24, %v920_v30  ;;  %v522_v27 = vadd.f32 %v521_v25, %v920_v30 }
 0x10c   : > { %v483_v28 = vpop.f32.mrf.mxu0  ;;  %v523_v29 = vpop.f32.mrf.mxu1 }
 0x10d   : > { %540 = vst [vmem:[%s927_s9 + $0x70] sm:$0xff] %v482_v26  ;;  %556 = vst [vmem:[%s927_s9 + $0xf0] sm:$0xff] %v522_v27  ;;  %v484_v32 = vadd.f32 %v483_v28, %v922_v31  ;;  %v524_v33 = vadd.f32 %v523_v29, %v922_v31 }
 0x10f   : > { %541 = vst [vmem:[%s927_s9 + $0x78] sm:$0xff] %v484_v32  ;;  %557 = vst [vmem:[%s927_s9 + $0xf8] sm:$0xff] %v524_v33 }
 0x110 PF: > { %s13_s14 = sadd.s32 1, %s803_s14   ;;  %s1006_s12 = smov %s799_s13 }
 0x111   : > { %p10_p5 = scmp.ge.s32.totalorder %s13_s14, 4   ;;  %s1007_s13 = smov %s1009_s15 }
 0x113   :  { %12 = sbr.rel (!%p10_p5) target bundleno = 2 (0x2), region = 68 }

// kernel: custom_text_encoder_forward.2
= control target key start
LH: loop header
LB: loop body
LE: loop exit
PB: predicated region body
PF: predicated region fallthrough
CT: control target
= control target key end

     0   :  { %s14471_s0 = inlined_call_operand.vmem [shape: bf16[256,128], index: 0, kind: input, shape index: {}]   ;;  %s14472_s1 = inlined_call_operand.vmem [shape: f32[2,128,128], index: 1, kind: input, shape index: {}]   ;;  %s14473_s2 = inlined_call_operand.vmem [shape: f32[2,1,128], index: 2, kind: input, shape index: {}]   ;;  %s14474_s3 = inlined_call_operand.vmem [shape: f32[2,1,128], index: 3, kind: input, shape index: {}]   ;;  %s14475_s4 = inlined_call_operand.hbm [shape: bf16[2,128,384], index: 4, kind: input, shape index: {}]   ;;  %s14476_s5 = inlined_call_operand.vmem [shape: f32[2,1,384], index: 5, kind: input, shape index: {}]   ;;  %s14477_s6 = inlined_call_operand.vmem [shape: bf16[2,128,128], index: 6, kind: input, shape index: {}]   ;;  %s14478_s7 = inlined_call_operand.vmem [shape: f32[2,1,128], index: 7, kind: input, shape index: {}]   ;;  %s14479_s8 = inlined_call_operand.vmem [shape: f32[2,1,128], index: 8, kind: input, shape index: {}]   ;;  %s14480_s9 = inlined_call_operand.vmem [shape: f32[2,1,128], index: 9, kind: input, shape index: {}]   ;;  %s14481_s10 = inlined_call_operand.vmem [shape: bf16[2,128,512], index: 10, kind: input, shape index: {}]   ;;  %s14482_s11 = inlined_call_operand.vmem [shape: f32[2,1,512], index: 11, kind: input, shape index: {}]   ;;  %s14483_s12 = inlined_call_operand.hbm [shape: bf16[2,512,128], index: 12, kind: input, shape index: {}]   ;;  %s14484_s13 = inlined_call_operand.vmem [shape: f32[2,1,128], index: 13, kind: input, shape index: {}]   ;;  %s14485_s14 = inlined_call_operand.vmem [shape: f32[1,128], index: 14, kind: input, shape index: {}]   ;;  %s14486_s15 = inlined_call_operand.vmem [shape: f32[1,128], index: 15, kind: input, shape index: {}]   ;;  %s14487_s16 = inlined_call_operand.vmem [shape: bf16[256,128], index: 16, kind: output, shape index: {}]  }
   0x1   :  { %14577 = sst [smem:[#allocation47_spill]] %s14471_s0 }
   0x2   :  { %14578 = sst [smem:[#allocation48_spill]] %s14475_s4 }
   0x3   :  { %14579 = sst [smem:[#allocation49_spill]] %s14476_s5 }
   0x4   :  { %14580 = sst [smem:[#allocation50_spill]] %s14477_s6 }
   0x5   :  { %14581 = sst [smem:[#allocation51_spill]] %s14479_s8 }
   0x6   :  { %14582 = sst [smem:[#allocation52_spill]] %s14483_s12 }
   0x7   :  { %14583 = sst [smem:[#allocation53_spill]] %s14485_s14 }
   0x8   :  { %14584 = sst [smem:[#allocation54_spill]] %s14486_s15 }
   0x9   :  { %14585 = sst [smem:[#allocation55_spill]] %s14487_s16 }
   0xa   :  { %21 = vsyncpa [#allocation4], 0 }
   0xb   :  { %23 = vsyncpa [#allocation4 + $0x1], 0 }
   0xc   :  { %24 = vsyncpa [#allocation6], 0 }
   0xd   :  { %26 = vsyncpa [#allocation6 + $0x1], 0  ;;  %s10507_s21 = smov 0   ;;  %s10509_s22 = smov 0  }
   0xe   :  { %s10511_s23 = smov 0   ;;  %s10513_s24 = smov 0  }
   0xf LB: > { %14586 = sst [smem:[#allocation9_spill]] %s10404_s22  ;;  %s10526_s25 = sadd.s32 4294967295, %s10412_s24   ;;  %s10412_s24 = sphi %s10513_s24, %s14794_s24   ;;  %s10408_s23 = sphi %s10511_s23, %s14797_s23   ;;  %s10404_s22 = sphi %s10509_s22, %s14796_s22   ;;  %s10400_s21 = sphi %s10507_s21, %s14795_s21  }
  0x10   : > { %14587 = sst [smem:[#allocation10_spill]] %s10408_s23  ;;  %s10529_s26 = sadd.s32 1, %s10412_s24  }
  0x11   : > { %14588 = sst [smem:[#allocation11_spill]] %s10529_s26  ;;  %s130_s27 = ssub.s32 %s10412_s24, %s10529_s26 }
  0x12   : > { %s133_s28 = sadd.s32 1, %s10408_s23  ;;  %p131_p0 = scmp.eq.s32.totalorder %s130_s27, 0 }
  0x13   : > { %p140_p1 = scmp.ne.s32.totalorder %s10408_s23, %s10404_s22  ;;  %p141_p2 = scmp.eq.s32.totalorder %s10412_s24, 0 }
  0x14   : > { %p146_p3 = scmp.ne.s32.totalorder %s10404_s22, %s10400_s21  ;;  %p147_p5 = scmp.eq.s32.totalorder %s10526_s25, 0 }
  0x15   : > { %s10539_s29 = scalar_select %p131_p0, %s10408_s23, %s133_s28  }
  0x16   : > { %p142_p4 = por %p141_p2, %p140_p1  ;;  %p9149_p6 = scmp.lt.s32.totalorder %s10412_s24, 2 }
  0x17   : > { %14589 = sst [smem:[#allocation12_spill]] %s10539_s29  ;;  %p10543_p7 = por %p147_p5, %p146_p3 }
  0x18   : > { %s10548_s0 = sand.u32 1, %s10408_s23   ;;  %s9135_s18 = smul.u32 3072, %s10412_s24 }
  0x19   : > { %s14590_s30 = scalar_select %p10543_p7, 1, 0 }
  0x1a   : > { %s9134_s17 = smul.u32 192, %s10548_s0  ;;  %p10552_p8 = pnand %p9149_p6, %p142_p4 }
  0x1b   : > { %s14592_s4 = sld [smem:[#allocation48_spill]]  ;;  %s492_s23 = scalar_lea.sflag [#allocation4], %s10548_s0 }
  0x1c   : > { %s495_s28 = scalar_lea.vmem [#allocation3], %s9134_s17  ;;  %p10320_p11 = pneg %p10552_p8 }
  0x1d   : > { %s502_s29 = sshll.u32 %s495_s28, 4  ;;  %s10561_s29 = int_to_ptr.vmem [resolvable:$true] %s502_s29 }
  0x21   : > { %s10559_s27 = scalar_lea.hbm %s14592_s4, %s9135_s18  ;;  %s10323_s21 = scalar_lea.hbm %s14592_s4, 6144 }
  0x22   : > { %s10318_s26 = scalar_lea.hbm %s10559_s27, 3072  ;;  %p10324_p0 = scmp.lt.s32.totalorder %s10559_s27, %s14592_s4 }
  0x23   : > { %p10319_p10 = scmp.ne.s32.totalorder %s10559_s27, %s10318_s26  ;;  %p10325_p1 = scmp.lt.s32.totalorder %s10323_s21, %s10318_s26 }
  0x25   : > { %p10321_p12 = pnand %p10320_p11, %p10319_p10  ;;  %p10326_p2 = por %p10325_p1, %p10324_p0 }
  0x27   : > { %p10322_p13 = pneg %p10321_p12 }
  0x29   : > { %p10327_p3 = pnand %p10326_p2, %p10322_p13 }
  0x2b   : > { %10330 = shalt.err (!%p10327_p3)
}
  0x2c   : > { %s10331_s17 = scalar_lea.vmem %s10561_s29, 3072  ;;  %s10414_s28 = smov [#allocation3]  }
  0x2d   : > { %p10332_p4 = scmp.ne.s32.totalorder %s10561_s29, %s10331_s17  ;;  %s10336_s20 = sshll.u32 %s10414_s28, 4  ;;  %s10337_s20 = int_to_ptr.vmem [resolvable:$false] %s10336_s20 }
  0x2e   : > { %s10338_s18 = scalar_lea.vmem %s10337_s20, 6144  ;;  %p10339_p10 = scmp.lt.s32.totalorder %s10561_s29, %s10337_s20 }
  0x2f   : > { %p10334_p5 = pnand %p10332_p4, %p10320_p11  ;;  %p10340_p12 = scmp.lt.s32.totalorder %s10338_s18, %s10331_s17 }
  0x31   : > { %p10335_p6 = pneg %p10334_p5  ;;  %p10341_p9 = por %p10340_p12, %p10339_p10 }
  0x33   : > { %p10342_p0 = pnand %p10341_p9, %p10335_p6 }
  0x35   : > { %10345 = shalt.err (!%p10342_p0)
}
  0x36   : > { %s10415_s15 = smov 192   ;;  %s10416_s16 = smov 12  }
  0x37   : > { %9145 = dma.hbm_to_vmem [thread:$0]  (!%p10552_p8), %s10559_s27, 3072, %s10561_s29, %s492_s23, %s10415_s15, %s10415_s15, %s10416_s16  }
  0x38   : > { %p585_p13 = scmp.lt.s32.totalorder %s10412_s24, 3  ;;  %s7799_s26 = sshll.u32 %s10548_s0, 8 }
  0x39   : > { %s8125_s21 = sshll.u32 %s10412_s24, 12  ;;  %p14593_p9 = scmp.ge.s32.totalorder %s10412_s24, 1 }
  0x3a   : > { %s14595_s12 = sld [smem:[#allocation52_spill]]  ;;  %s564_s4 = scalar_lea.vmem [#allocation5], %s7799_s26 }
  0x3b   : > { %p10596_p1 = pnand %p14593_p9, %p585_p13  ;;  %s571_s14 = sshll.u32 %s564_s4, 4  ;;  %s10605_s14 = int_to_ptr.vmem [resolvable:$true] %s571_s14 }
  0x3c   : > { %s561_s23 = scalar_lea.sflag [#allocation6], %s10548_s0 }
  0x40   : > { %s10603_s18 = scalar_lea.hbm %s14595_s12, %s8125_s21  ;;  %s10351_s15 = scalar_lea.hbm %s14595_s12, 8192 }
  0x41   : > { %s10346_s29 = scalar_lea.hbm %s10603_s18, 4096  ;;  %p10352_p5 = scmp.lt.s32.totalorder %s10603_s18, %s14595_s12 }
  0x42   : > { %p10347_p2 = scmp.ne.s32.totalorder %s10603_s18, %s10346_s29  ;;  %p10353_p6 = scmp.lt.s32.totalorder %s10351_s15, %s10346_s29 }
  0x44   : > { %p10349_p3 = pnand %p10347_p2, %p10320_p11  ;;  %p10354_p10 = por %p10353_p6, %p10352_p5 }
  0x46   : > { %p10350_p4 = pneg %p10349_p3 }
  0x48   : > { %p10355_p12 = pnand %p10354_p10, %p10350_p4 }
  0x4a   : > { %10358 = shalt.err (!%p10355_p12)
}
  0x4b   : > { %s10359_s4 = scalar_lea.vmem %s10605_s14, 4096  ;;  %s10417_s26 = smov [#allocation5]  }
  0x4c   : > { %p10360_p0 = scmp.ne.s32.totalorder %s10605_s14, %s10359_s4  ;;  %s10364_s28 = sshll.u32 %s10417_s26, 4  ;;  %s10365_s28 = int_to_ptr.vmem [resolvable:$false] %s10364_s28 }
  0x4d   : > { %s10366_s20 = scalar_lea.vmem %s10365_s28, 8192  ;;  %p10367_p2 = scmp.lt.s32.totalorder %s10605_s14, %s10365_s28 }
  0x4e   : > { %p10362_p13 = pnand %p10360_p0, %p10320_p11  ;;  %p10368_p3 = scmp.lt.s32.totalorder %s10366_s20, %s10359_s4 }
  0x50   : > { %p10363_p9 = pneg %p10362_p13  ;;  %p10369_p7 = por %p10368_p3, %p10367_p2 }
  0x52   : > { %p10370_p5 = pnand %p10369_p7, %p10363_p9 }
  0x54   : > { %10373 = shalt.err (!%p10370_p5)
}
  0x55   : > { %s10418_s29 = smov 64   ;;  %s10419_s24 = smov 4  }
  0x56   : > { %9148 = dma.hbm_to_vmem [thread:$0]  (!%p10552_p8), %s10603_s18, 4096, %s10605_s14, %s561_s23, %s10418_s29, %s10418_s29, %s10419_s24  }
  0x57   : > { %589 = sbr.rel (%p10596_p1) target bundleno = 3888 (0xf30), region = 84 }
  0x5c   : > { %s591_s27 = sand.u32 1, %s10404_s22   ;;  %p14596_p7 = scmp.ne.s32.totalorder %s14590_s30, 0 }
  0x5d   : > { %s9136_s15 = smul.u32 192, %s591_s27  ;;  %s592_s16 = scalar_lea.sflag [#allocation4], %s591_s27 }
  0x5f   : > { %s10635_s21 = scalar_lea.vmem [#allocation3], %s9136_s15 }
  0x60   : > { %10391 = dma.done.wait (%p14596_p7), %s592_s16, 3072  }
  0x61   : > { %10393 = vsyncadd (%p14596_p7), %s592_s16, 4294964224  ;;  %s7803_s4 = sshll.u32 %s591_s27, 8  ;;  %s601_s19 = scalar_lea.sflag [#allocation6], %s591_s27 }
  0x62   : > { %s10641_s0 = scalar_lea.vmem [#allocation5], %s7803_s4 }
  0x63   : > { %10395 = dma.done.wait (%p14596_p7), %s601_s19, 4096  }
  0x64   : > { %10397 = vsyncadd (%p14596_p7), %s601_s19, 4294963200  ;;  %p689_p8 = scmp.lt.s32.totalorder %s10526_s25, 1  ;;  %s14597_s6 = sld [smem:[#allocation50_spill]] }
  0x65   : > { %s14598_s5 = sld [smem:[#allocation49_spill]]  ;;  %p7809_p11 = scmp.ne.s32.totalorder %s10526_s25, 0 }
  0x66   : > { %s10649_s14 = scalar_select %p689_p8, %s10526_s25, 1 }
  0x67   : > { %s14599_s8 = sld [smem:[#allocation51_spill]] }
  0x68   : > { %s9137_s20 = smul.u32 3, %s10649_s14  ;;  %s8126_s29 = sshll.u32 %s10649_s14, 6 }
  0x69   : > { %s10685_s24 = scalar_lea.vmem %s14480_s9, %s10649_s14  ;;  %s7808_s4 = sshll.u32 %s10649_s14, 2 }
  0x6a   : > { %s10664_s15 = scalar_lea.vmem %s14597_s6, %s8126_s29  ;;  %s8127_s29 = sshll.u32 %s10649_s14, 8 }
  0x6b   : > { %s10673_s12 = scalar_lea.vmem %s14598_s5, %s9137_s20  ;;  %s10691_s16 = scalar_lea.vmem %s14481_s10, %s8127_s29 }
  0x6c   : > { %s10697_s18 = scalar_lea.vmem %s14482_s11, %s7808_s4  ;;  %s724_s19 = scalar_lea.vmem %s14484_s13, %s10649_s14 }
  0x6d   : > { %s10679_s23 = scalar_lea.vmem %s14599_s8, %s10649_s14  ;;  %729 = sbr.rel (%p7809_p11) target bundleno = 135 (0x87), region = 96 }
  0x6e   : > { %s14600_s5 = sld [smem:[#allocation47_spill]] (!%p7809_p11) }
  0x74   : > { %v8161_v0 = vld [vmem:[%s14600_s5] sm:$0xff]   ;;  %v8304_v1 = vld [vmem:[%s14600_s5 + $0x8] sm:$0xff]   ;;  %v8305_v2 = vld [vmem:[%s14600_s5 + $0x10] sm:$0xff]  }
  0x75   : > { %v8162_v3 = vunpack.c.l.bf16 %v8161_v0  ;;  %v8163_v4 = vunpack.c.h.bf16 %v8161_v0  ;;  %v8166_v5 = vunpack.c.l.bf16 %v8304_v1  ;;  %v8167_v6 = vunpack.c.h.bf16 %v8304_v1  ;;  %v8306_v7 = vld [vmem:[%s14600_s5 + $0x18] sm:$0xff]   ;;  %v8307_v8 = vld [vmem:[%s14600_s5 + $0x20] sm:$0xff]   ;;  %v8308_v9 = vld [vmem:[%s14600_s5 + $0x28] sm:$0xff]  }
  0x76   : > { %v8170_v10 = vunpack.c.l.bf16 %v8305_v2  ;;  %v8171_v11 = vunpack.c.h.bf16 %v8305_v2  ;;  %v8174_v12 = vunpack.c.l.bf16 %v8306_v7  ;;  %v8175_v13 = vunpack.c.h.bf16 %v8306_v7  ;;  %v8309_v14 = vld [vmem:[%s14600_s5 + $0x30] sm:$0xff]   ;;  %v8310_v15 = vld [vmem:[%s14600_s5 + $0x38] sm:$0xff]   ;;  %v8311_v16 = vld [vmem:[%s14600_s5 + $0x40] sm:$0xff]  }
  0x77   : > { %794 = vst [vmem:[#allocation2 + $0xb0] sm:$0xff] %v8162_v3  ;;  %795 = vst [vmem:[#allocation2] sm:$0xff] %v8163_v4  ;;  %v8178_v17 = vunpack.c.l.bf16 %v8307_v8  ;;  %v8179_v18 = vunpack.c.h.bf16 %v8307_v8  ;;  %v8182_v19 = vunpack.c.l.bf16 %v8308_v9  ;;  %v8183_v20 = vunpack.c.h.bf16 %v8308_v9  ;;  %v8312_v21 = vld [vmem:[%s14600_s5 + $0x48] sm:$0xff]   ;;  %v8313_v22 = vld [vmem:[%s14600_s5 + $0x50] sm:$0xff]  }
  0x78   : > { %796 = vst [vmem:[#allocation2 + $0xd8] sm:$0xff] %v8166_v5  ;;  %797 = vst [vmem:[#allocation2 + $0x18] sm:$0xff] %v8167_v6  ;;  %v8314_v23 = vld [vmem:[%s14600_s5 + $0x58] sm:$0xff]   ;;  %v8186_v24 = vunpack.c.l.bf16 %v8309_v14  ;;  %v8187_v25 = vunpack.c.h.bf16 %v8309_v14  ;;  %v8190_v26 = vunpack.c.l.bf16 %v8310_v15  ;;  %v8191_v27 = vunpack.c.h.bf16 %v8310_v15  ;;  %v8315_v28 = vld [vmem:[%s14600_s5 + $0x60] sm:$0xff]  }
  0x79   : > { %798 = vst [vmem:[#allocation2 + $0x50] sm:$0xff] %v8170_v10  ;;  %799 = vst [vmem:[#allocation2 + $0x68] sm:$0xff] %v8171_v11  ;;  %v8316_v29 = vld [vmem:[%s14600_s5 + $0x68] sm:$0xff]   ;;  %v8194_v30 = vunpack.c.l.bf16 %v8311_v16  ;;  %v8195_v31 = vunpack.c.h.bf16 %v8311_v16  ;;  %v8198_v32 = vunpack.c.l.bf16 %v8312_v21  ;;  %v8199_v33 = vunpack.c.h.bf16 %v8312_v21  ;;  %v8317_v34 = vld [vmem:[%s14600_s5 + $0x70] sm:$0xff]  }
  0x7a   : > { %800 = vst [vmem:[#allocation2 + $0x30] sm:$0xff] %v8174_v12  ;;  %801 = vst [vmem:[#allocation2 + $0x48] sm:$0xff] %v8175_v13  ;;  %v8318_v35 = vld [vmem:[%s14600_s5 + $0x78] sm:$0xff]   ;;  %v8202_v36 = vunpack.c.l.bf16 %v8313_v22  ;;  %v8203_v37 = vunpack.c.h.bf16 %v8313_v22  ;;  %v8206_v38 = vunpack.c.l.bf16 %v8314_v23  ;;  %v8207_v39 = vunpack.c.h.bf16 %v8314_v23 }
  0x7b   : > { %802 = vst [vmem:[#allocation2 + $0x80] sm:$0xff] %v8178_v17  ;;  %803 = vst [vmem:[#allocation2 + $0x88] sm:$0xff] %v8179_v18  ;;  %v8210_v40 = vunpack.c.l.bf16 %v8315_v28  ;;  %v8211_v41 = vunpack.c.h.bf16 %v8315_v28  ;;  %v8214_v42 = vunpack.c.l.bf16 %v8316_v29  ;;  %v8215_v43 = vunpack.c.h.bf16 %v8316_v29 }
  0x7c   : > { %804 = vst [vmem:[#allocation2 + $0xe8] sm:$0xff] %v8182_v19  ;;  %805 = vst [vmem:[#allocation2 + $0xb8] sm:$0xff] %v8183_v20  ;;  %v8218_v44 = vunpack.c.l.bf16 %v8317_v34  ;;  %v8219_v45 = vunpack.c.h.bf16 %v8317_v34  ;;  %v8222_v46 = vunpack.c.l.bf16 %v8318_v35  ;;  %v8223_v47 = vunpack.c.h.bf16 %v8318_v35 }
  0x7d   : > { %806 = vst [vmem:[#allocation2 + $0x60] sm:$0xff] %v8186_v24  ;;  %807 = vst [vmem:[#allocation2 + $0xf0] sm:$0xff] %v8187_v25 }
  0x7e   : > { %808 = vst [vmem:[#allocation2 + $0x8] sm:$0xff] %v8190_v26  ;;  %809 = vst [vmem:[#allocation2 + $0x78] sm:$0xff] %v8191_v27 }
  0x7f   : > { %810 = vst [vmem:[#allocation2 + $0x38] sm:$0xff] %v8194_v30  ;;  %811 = vst [vmem:[#allocation2 + $0x58] sm:$0xff] %v8195_v31 }
  0x80   : > { %812 = vst [vmem:[#allocation2 + $0x40] sm:$0xff] %v8198_v32  ;;  %813 = vst [vmem:[#allocation2 + $0xc8] sm:$0xff] %v8199_v33 }
  0x81   : > { %814 = vst [vmem:[#allocation2 + $0xe0] sm:$0xff] %v8202_v36  ;;  %815 = vst [vmem:[#allocation2 + $0x90] sm:$0xff] %v8203_v37 }
  0x82   : > { %816 = vst [vmem:[#allocation2 + $0x70] sm:$0xff] %v8206_v38  ;;  %817 = vst [vmem:[#allocation2 + $0xc0] sm:$0xff] %v8207_v39 }
  0x83   : > { %818 = vst [vmem:[#allocation2 + $0xa8] sm:$0xff] %v8210_v40  ;;  %819 = vst [vmem:[#allocation2 + $0xd0] sm:$0xff] %v8211_v41 }
  0x84   : > { %820 = vst [vmem:[#allocation2 + $0x10] sm:$0xff] %v8214_v42  ;;  %821 = vst [vmem:[#allocation2 + $0x28] sm:$0xff] %v8215_v43 }
  0x85   : > { %822 = vst [vmem:[#allocation2 + $0xa0] sm:$0xff] %v8218_v44  ;;  %823 = vst [vmem:[#allocation2 + $0xf8] sm:$0xff] %v8219_v45 }
  0x86   : > { %824 = vst [vmem:[#allocation2 + $0x20] sm:$0xff] %v8222_v46  ;;  %825 = vst [vmem:[#allocation2 + $0x98] sm:$0xff] %v8223_v47 }
  0x87 PF: > { %v826_v48 = vld [vmem:[#allocation2 + $0xb0] sm:$0xff]  ;;  %v828_v49 = vld [vmem:[#allocation2 + $0xd8] sm:$0xff]  ;;  %v827_v50 = vld [vmem:[#allocation2] sm:$0xff]  ;;  %s14601_s8 = scalar_lea.vmem %s14473_s2, %s10649_s14  ;;  %s14602_s29 = scalar_lea.vmem %s14474_s3, %s10649_s14  ;;  %vm1876_vm0 = vcmask 523264  }
  0x88   : > { %860 = vadd.xlane.f32.xlu0 %v826_v48  ;;  %864 = vadd.xlane.f32.xlu1 %v828_v49  ;;  %v829_v51 = vld [vmem:[#allocation2 + $0x18] sm:$0xff]  ;;  %v830_v52 = vld [vmem:[#allocation2 + $0x50] sm:$0xff]  ;;  %v831_v53 = vld [vmem:[#allocation2 + $0x68] sm:$0xff]  ;;  %s14697_s27 = scalar_lea.vmem %s14478_s7, %s10649_s14  ;;  %p8088_p1 = scmp.ne.s32.totalorder %s10526_s25, 1 }
  0x89   : > { %v832_v54 = vld [vmem:[#allocation2 + $0x30] sm:$0xff]  ;;  %v833_v55 = vld [vmem:[#allocation2 + $0x48] sm:$0xff]  ;;  %v10752_v56 = vld [vmem:[#allocation2 + $0x80] sm:$0xff]  ;;  %s14793_s17 = sld [smem:[#allocation55_spill]] (!%p8088_p1) }
  0x8a   : > { %v10754_v57 = vld [vmem:[#allocation2 + $0x88] sm:$0xff]  ;;  %v10758_v59 = vld [vmem:[#allocation2 + $0xb8] sm:$0xff]  ;;  %v10762_v60 = vld [vmem:[#allocation2 + $0x60] sm:$0xff] }
  0x8b   : > { %v10756_v58 = vld [vmem:[#allocation2 + $0xe8] sm:$0xff]  ;;  %v10764_v61 = vld [vmem:[#allocation2 + $0xf0] sm:$0xff]  ;;  %v10770_v63 = vld [vmem:[#allocation2 + $0x78] sm:$0xff] }
  0x8c   : > { %862 = vadd.xlane.f32.xlu0 %v827_v50  ;;  %866 = vadd.xlane.f32.xlu1 %v829_v51  ;;  %v10768_v62 = vld [vmem:[#allocation2 + $0x8] sm:$0xff]  ;;  %v9191_v37 = vld [vmem:[%s10635_s21 + $0x94] ss:$12 sps:$4 sm:$0xff]   ;;  %v9193_v38 = vld [vmem:[%s10635_s21 + $0x90] ss:$12 sps:$4 sm:$0xff]  }
  0x8d   : > { %v9188_v0 = vld [vmem:[%s10635_s21 + $0xac] ss:$12 sps:$4 sm:$0xff]   ;;  %v9190_v1 = vld [vmem:[%s10635_s21 + $0xa8] ss:$12 sps:$4 sm:$0xff]  }
  0x8e   : > { %1482 = vmatprep.subr.bf16.mxu0 %v9188_v0  ;;  %9086 = vmatprep.subr.bf16.mxu1 %v9188_v0  ;;  %v9194_v47 = vld [vmem:[%s10635_s21 + $0x7c] ss:$12 sps:$4 sm:$0xff]  }
  0x8f   : > { %1483 = vmatpush1.bf16.msra.mxu0 %v9190_v1  ;;  %9094 = vmatpush1.bf16.msra.mxu1 %v9190_v1  ;;  %v9199_v1 = vld [vmem:[%s10635_s21 + $0x60] ss:$12 sps:$4 sm:$0xff]  }
  0x90   : > { %868 = vadd.xlane.f32.xlu0 %v830_v52  ;;  %870 = vadd.xlane.f32.xlu1 %v831_v53 }
  0x91   : > { %1484 = vmatprep.subr.bf16.mxu0 %v9191_v37  ;;  %9087 = vmatprep.subr.bf16.mxu1 %v9191_v37  ;;  %v10901_v37 = vld [vmem:[#allocation2 + $0xe0] sm:$0xff] }
  0x93   : > { %1485 = vmatpush1.bf16.msra.mxu0 %v9193_v38  ;;  %9095 = vmatpush1.bf16.msra.mxu1 %v9193_v38  ;;  %v10905_v38 = vld [vmem:[#allocation2 + $0x90] sm:$0xff] }
  0x94   : > { %872 = vadd.xlane.f32.xlu0 %v832_v54  ;;  %874 = vadd.xlane.f32.xlu1 %v833_v55 }
  0x95   : > { %1486 = vmatprep.subr.bf16.mxu0 %v9194_v47  ;;  %9088 = vmatprep.subr.bf16.mxu1 %v9194_v47 }
  0x98   : > { %876 = vadd.xlane.f32.xlu0 %v10752_v56  ;;  %878 = vadd.xlane.f32.xlu1 %v10754_v57 }
  0x9c   : > { %880 = vadd.xlane.f32.xlu0 %v10756_v58  ;;  %882 = vadd.xlane.f32.xlu1 %v10758_v59 }
  0xa0   : > { %884 = vadd.xlane.f32.xlu0 %v10762_v60  ;;  %886 = vadd.xlane.f32.xlu1 %v10764_v61 }
  0xa4   : > { %888 = vadd.xlane.f32.xlu0 %v10768_v62  ;;  %890 = vadd.xlane.f32.xlu1 %v10770_v63 }
 0x111   : > { %v861_v2 = vpop.xlane.xlu0 %860  ;;  %v865_v3 = vpop.xlane.xlu1 %864 }
 0x112   : > { %v925_v4 = vmul.f32 0.0078125, %v861_v2  ;;  %v927_v5 = vmul.f32 0.0078125, %v865_v3 }
 0x114   : > { %v10778_v6 = vsub.f32 %v826_v48, %v925_v4  ;;  %v10780_v7 = vsub.f32 %v828_v49, %v927_v5 }
 0x115   : > { %v863_v8 = vpop.xlane.xlu0 %862  ;;  %v867_v9 = vpop.xlane.xlu1 %866 }
 0x116   : > { %v926_v10 = vmul.f32 0.0078125, %v863_v8  ;;  %v989_v11 = vmul.f32 %v10778_v6, %v10778_v6  ;;  %v928_v12 = vmul.f32 0.0078125, %v867_v9  ;;  %v991_v13 = vmul.f32 %v10780_v7, %v10780_v7  ;;  %v9200_v9 = vld [vmem:[%s10635_s21 + $0x4c] ss:$12 sps:$4 sm:$0xff]  }
 0x118   : > { %1021 = vadd.xlane.f32.xlu0 %v989_v11  ;;  %v10786_v14 = vsub.f32 %v827_v50, %v926_v10  ;;  %v10788_v15 = vsub.f32 %v829_v51, %v928_v12  ;;  %v9196_v51 = vld [vmem:[%s10635_s21 + $0x78] ss:$12 sps:$4 sm:$0xff]   ;;  %v9202_v11 = vld [vmem:[%s10635_s21 + $0x48] ss:$12 sps:$4 sm:$0xff]  }
 0x119   : > { %v869_v16 = vpop.xlane.xlu0 %868  ;;  %v871_v17 = vpop.xlane.xlu1 %870  ;;  %1487 = vmatpush1.bf16.msra.mxu0 %v9196_v51  ;;  %9096 = vmatpush1.bf16.msra.mxu1 %v9196_v51 }
 0x11a   : > { %v929_v18 = vmul.f32 0.0078125, %v869_v16  ;;  %v990_v19 = vmul.f32 %v10786_v14, %v10786_v14  ;;  %v930_v20 = vmul.f32 0.0078125, %v871_v17  ;;  %v992_v21 = vmul.f32 %v10788_v15, %v10788_v15  ;;  %v9205_v16 = vld [vmem:[%s10635_s21 + $0x30] ss:$12 sps:$4 sm:$0xff]  }
 0x11b   : > { %v9206_v17 = vld [vmem:[%s10635_s21 + $0x1c] ss:$12 sps:$4 sm:$0xff]  }
 0x11c   : > { %1025 = vadd.xlane.f32.xlu0 %v991_v13  ;;  %1023 = vadd.xlane.f32.xlu1 %v990_v19  ;;  %v10794_v22 = vsub.f32 %v830_v52, %v929_v18  ;;  %v10796_v23 = vsub.f32 %v831_v53, %v930_v20  ;;  %v9203_v13 = vld [vmem:[%s10635_s21 + $0x34] ss:$12 sps:$4 sm:$0xff]   ;;  %v9208_v18 = vld [vmem:[%s10635_s21 + $0x18] ss:$12 sps:$4 sm:$0xff]  }
 0x11d   : > { %v873_v24 = vpop.xlane.xlu0 %872  ;;  %v875_v25 = vpop.xlane.xlu1 %874  ;;  %v10865_v19 = vld [vmem:[#allocation2 + $0xd0] sm:$0xff] }
 0x11e   : > { %v931_v26 = vmul.f32 0.0078125, %v873_v24  ;;  %v993_v27 = vmul.f32 %v10794_v22, %v10794_v22  ;;  %v932_v28 = vmul.f32 0.0078125, %v875_v25  ;;  %v994_v29 = vmul.f32 %v10796_v23, %v10796_v23  ;;  %v10867_v20 = vld [vmem:[#allocation2 + $0x10] sm:$0xff]  ;;  %v9211_v24 = vld [vmem:[%s10635_s21] ss:$12 sps:$4 sm:$0xff]  }
 0x11f   : > { %v10873_v25 = vld [vmem:[#allocation2 + $0x28] sm:$0xff] }
 0x120   : > { %1027 = vadd.xlane.f32.xlu1 %v992_v21  ;;  %1029 = vadd.xlane.f32.xlu0 %v993_v27  ;;  %v10802_v30 = vsub.f32 %v832_v54, %v931_v26  ;;  %v10804_v31 = vsub.f32 %v833_v55, %v932_v28  ;;  %v9209_v21 = vld [vmem:[%s10635_s21 + $0x4] ss:$12 sps:$4 sm:$0xff]   ;;  %v10879_v27 = vld [vmem:[#allocation2 + $0xf8] sm:$0xff] }
 0x121   : > { %v877_v32 = vpop.xlane.xlu0 %876  ;;  %v879_v33 = vpop.xlane.xlu1 %878  ;;  %v10875_v26 = vld [vmem:[#allocation2 + $0xa0] sm:$0xff] }
 0x122   : > { %v933_v34 = vmul.f32 0.0078125, %v877_v32  ;;  %v995_v35 = vmul.f32 %v10802_v30, %v10802_v30  ;;  %v934_v36 = vmul.f32 0.0078125, %v879_v33  ;;  %v996_v39 = vmul.f32 %v10804_v31, %v10804_v31  ;;  %v10881_v28 = vld [vmem:[#allocation2 + $0x20] sm:$0xff]  ;;  %v10887_v32 = vld [vmem:[#allocation2 + $0x98] sm:$0xff] }
 0x123   : > { %v10889_v33 = vld [vmem:[#allocation2 + $0x38] sm:$0xff] }
 0x124   : > { %1031 = vadd.xlane.f32.xlu1 %v994_v29  ;;  %1033 = vadd.xlane.f32.xlu0 %v995_v35  ;;  %v10813_v40 = vsub.f32 %v10752_v56, %v933_v34  ;;  %v10816_v41 = vsub.f32 %v10754_v57, %v934_v36  ;;  %v9197_v57 = vld [vmem:[%s10635_s21 + $0x64] ss:$12 sps:$4 sm:$0xff]   ;;  %v14498_v29 = vmov 0   ;;  %v10893_v34 = vld [vmem:[#allocation2 + $0x58] sm:$0xff]  ;;  %v10899_v36 = vld [vmem:[#allocation2 + $0xc8] sm:$0xff] }
 0x125   : > { %v881_v42 = vpop.xlane.xlu0 %880  ;;  %v883_v43 = vpop.xlane.xlu1 %882  ;;  %1488 = vmatprep.subr.bf16.mxu0 %v9197_v57  ;;  %9089 = vmatprep.subr.bf16.mxu1 %v9197_v57  ;;  %v10895_v35 = vld [vmem:[#allocation2 + $0x40] sm:$0xff] }
 0x126   : > { %v935_v44 = vmul.f32 0.0078125, %v881_v42  ;;  %v997_v45 = vmul.f32 %v10813_v40, %v10813_v40  ;;  %v936_v46 = vmul.f32 0.0078125, %v883_v43  ;;  %v998_v48 = vmul.f32 %v10816_v41, %v10816_v41  ;;  %1489 = vmatpush1.bf16.msra.mxu0 %v9199_v1  ;;  %9097 = vmatpush1.bf16.msra.mxu1 %v9199_v1  ;;  %v10911_v42 = vld [vmem:[#allocation2 + $0xc0] sm:$0xff] }
 0x127   : > { %1490 = vmatprep.subr.bf16.mxu0 %v9200_v9  ;;  %9090 = vmatprep.subr.bf16.mxu1 %v9200_v9 }
 0x128   : > { %1035 = vadd.xlane.f32.xlu1 %v996_v39  ;;  %1037 = vadd.xlane.f32.xlu0 %v997_v45  ;;  %v10824_v49 = vsub.f32 %v10756_v58, %v935_v44  ;;  %v10827_v50 = vsub.f32 %v10758_v59, %v936_v46  ;;  %v10907_v39 = vld [vmem:[#allocation2 + $0x70] sm:$0xff] }
 0x129   : > { %v885_v52 = vpop.xlane.xlu0 %884  ;;  %v887_v53 = vpop.xlane.xlu1 %886  ;;  %1514 = vmatprep.mubr.bf16.mxu0 %v14498_v29  ;;  %1634 = vmatprep.mubr.bf16.mxu1 %v14498_v29 }
 0x12a   : > { %v937_v54 = vmul.f32 0.0078125, %v885_v52  ;;  %v999_v55 = vmul.f32 %v10824_v49, %v10824_v49  ;;  %v938_v56 = vmul.f32 0.0078125, %v887_v53  ;;  %v1000_v58 = vmul.f32 %v10827_v50, %v10827_v50  ;;  %1491 = vmatpush1.bf16.msra.mxu0 %v9202_v11  ;;  %9098 = vmatpush1.bf16.msra.mxu1 %v9202_v11 }
 0x12b   : > { %1492 = vmatprep.subr.bf16.mxu0 %v9203_v13  ;;  %9091 = vmatprep.subr.bf16.mxu1 %v9203_v13 }
 0x12c   : > { %1039 = vadd.xlane.f32.xlu1 %v998_v48  ;;  %1041 = vadd.xlane.f32.xlu0 %v999_v55  ;;  %v10836_v59 = vsub.f32 %v10762_v60, %v937_v54  ;;  %v10839_v0 = vsub.f32 %v10764_v61, %v938_v56 }
 0x12d   : > { %v889_v2 = vpop.xlane.xlu0 %888  ;;  %v891_v3 = vpop.xlane.xlu1 %890 }
 0x12e   : > { %v939_v4 = vmul.f32 0.0078125, %v889_v2  ;;  %v1001_v5 = vmul.f32 %v10836_v59, %v10836_v59  ;;  %v940_v8 = vmul.f32 0.0078125, %v891_v3  ;;  %v1002_v60 = vmul.f32 %v10839_v0, %v10839_v0  ;;  %1493 = vmatpush1.bf16.msra.mxu0 %v9205_v16  ;;  %9099 = vmatpush1.bf16.msra.mxu1 %v9205_v16 }
 0x12f   : > { %1494 = vmatprep.subr.bf16.mxu0 %v9206_v17  ;;  %9092 = vmatprep.subr.bf16.mxu1 %v9206_v17 }
 0x130   : > { %1043 = vadd.xlane.f32.xlu1 %v1000_v58  ;;  %1045 = vadd.xlane.f32.xlu0 %v1001_v5  ;;  %v10848_v61 = vsub.f32 %v10768_v62, %v939_v4  ;;  %v10851_v10 = vsub.f32 %v10770_v63, %v940_v8  ;;  %v10860_v63 = vld [vmem:[#allocation2 + $0xa8] sm:$0xff] }
 0x132   : > { %v1003_v12 = vmul.f32 %v10848_v61, %v10848_v61  ;;  %v1004_v62 = vmul.f32 %v10851_v10, %v10851_v10  ;;  %1495 = vmatpush1.bf16.msra.mxu0 %v9208_v18  ;;  %9100 = vmatpush1.bf16.msra.mxu1 %v9208_v18  ;;  %v10920_v18 = vld [vmem:[%s14601_s8] ss:$0 sm:$0xff] }
 0x133   : > { %1496 = vmatprep.subr.bf16.mxu0 %v9209_v21  ;;  %9093 = vmatprep.subr.bf16.mxu1 %v9209_v21 }
 0x134   : > { %1047 = vadd.xlane.f32.xlu1 %v1002_v60  ;;  %1049 = vadd.xlane.f32.xlu0 %v1003_v12 }
 0x136   : > { %1497 = vmatpush1.bf16.msra.mxu0 %v9211_v24  ;;  %9101 = vmatpush1.bf16.msra.mxu1 %v9211_v24 }
 0x138   : > { %1051 = vadd.xlane.f32.xlu1 %v1004_v62  ;;  %908 = vadd.xlane.f32.xlu0 %v10860_v63 }
 0x13c   : > { %910 = vadd.xlane.f32.xlu1 %v10865_v19  ;;  %912 = vadd.xlane.f32.xlu0 %v10867_v20 }
 0x140   : > { %914 = vadd.xlane.f32.xlu1 %v10873_v25  ;;  %916 = vadd.xlane.f32.xlu0 %v10875_v26 }
 0x144   : > { %918 = vadd.xlane.f32.xlu1 %v10879_v27  ;;  %920 = vadd.xlane.f32.xlu0 %v10881_v28 }
 0x148   : > { %922 = vadd.xlane.f32.xlu1 %v10887_v32  ;;  %892 = vadd.xlane.f32.xlu0 %v10889_v33 }
 0x14c   : > { %894 = vadd.xlane.f32.xlu1 %v10893_v34  ;;  %896 = vadd.xlane.f32.xlu0 %v10895_v35 }
 0x150   : > { %898 = vadd.xlane.f32.xlu1 %v10899_v36  ;;  %900 = vadd.xlane.f32.xlu0 %v10901_v37 }
 0x154   : > { %902 = vadd.xlane.f32.xlu1 %v10905_v38  ;;  %904 = vadd.xlane.f32.xlu0 %v10907_v39 }
 0x158   : > { %906 = vadd.xlane.f32.xlu1 %v10911_v42 }
 0x1a1   : > { %v1022_v43 = vpop.xlane.xlu0 %1021 }
 0x1a2   : > { %v1085_v44 = vmul.f32 0.0078125, %v1022_v43 }
 0x1a4   : > { %v1117_v45 = vadd.f32 1e-05, %v1085_v44 }
 0x1a5   : > { %v1024_v46 = vpop.xlane.xlu1 %1023  ;;  %v1026_v47 = vpop.xlane.xlu0 %1025 }
 0x1a6   : > { %9308 = vrsqrt.f32 %v1117_v45  ;;  %v1086_v48 = vmul.f32 0.0078125, %v1024_v46  ;;  %v1087_v51 = vmul.f32 0.0078125, %v1026_v47 }
 0x1a8   : > { %v1118_v52 = vadd.f32 1e-05, %v1086_v48  ;;  %v1119_v53 = vadd.f32 1e-05, %v1087_v51  ;;  %v10929_v48 = vld [vmem:[%s14602_s29] ss:$0 sm:$0xff] }
 0x1a9   : > { %v1028_v54 = vpop.xlane.xlu1 %1027  ;;  %v1030_v55 = vpop.xlane.xlu0 %1029 }
 0x1aa   : > { %9310 = vrsqrt.f32 %v1118_v52  ;;  %v1088_v56 = vmul.f32 0.0078125, %v1028_v54  ;;  %v1089_v57 = vmul.f32 0.0078125, %v1030_v55 }
 0x1ab   : > { %9312 = vrsqrt.f32 %v1119_v53 }
 0x1ac   : > { %v1120_v58 = vadd.f32 1e-05, %v1088_v56  ;;  %v1121_v4 = vadd.f32 1e-05, %v1089_v57 }
 0x1ad   : > { %v1032_v1 = vpop.xlane.xlu1 %1031  ;;  %v1034_v2 = vpop.xlane.xlu0 %1033 }
 0x1ae   : > { %9314 = vrsqrt.f32 %v1120_v58  ;;  %v1090_v3 = vmul.f32 0.0078125, %v1032_v1  ;;  %v1091_v12 = vmul.f32 0.0078125, %v1034_v2 }
 0x1b0   : > { %v1122_v5 = vadd.f32 1e-05, %v1090_v3  ;;  %v1123_v24 = vadd.f32 1e-05, %v1091_v12 }
 0x1b1   : > { %v1036_v8 = vpop.xlane.xlu1 %1035  ;;  %v1038_v9 = vpop.xlane.xlu0 %1037 }
 0x1b2   : > { %9316 = vrsqrt.f32 %v1122_v5  ;;  %v1092_v60 = vmul.f32 0.0078125, %v1036_v8  ;;  %v1093_v53 = vmul.f32 0.0078125, %v1038_v9 }
 0x1b3   : > { %v9309_v11 = vpop.eup %9308  ;;  %9318 = vrsqrt.f32 %v1121_v4 }
 0x1b4   : > { %v1181_v13 = vmul.f32 %v9309_v11, %v10778_v6  ;;  %v1124_v62 = vadd.f32 1e-05, %v1092_v60  ;;  %v1125_v4 = vadd.f32 1e-05, %v1093_v53 }
 0x1b5   : > { %v1040_v16 = vpop.xlane.xlu1 %1039  ;;  %v1042_v17 = vpop.xlane.xlu0 %1041 }
 0x1b6   : > { %v1219_v44 = vmul.f32 %v10920_v18, %v1181_v13  ;;  %9320 = vrsqrt.f32 %v1124_v62  ;;  %v1094_v46 = vmul.f32 0.0078125, %v1040_v16  ;;  %v1095_v16 = vmul.f32 0.0078125, %v1042_v17 }
 0x1b7   : > { %v9311_v21 = vpop.eup %9310  ;;  %9322 = vrsqrt.f32 %v1123_v24 }
 0x1b8   : > { %v1182_v43 = vmul.f32 %v9311_v21, %v10786_v14  ;;  %v9313_v45 = vpop.eup %9312  ;;  %v1257_v14 = vadd.f32 %v10929_v48, %v1219_v44  ;;  %v1126_v57 = vadd.f32 1e-05, %v1094_v46 }
 0x1b9   : > { %v1044_v47 = vpop.xlane.xlu1 %1043  ;;  %v1046_v6 = vpop.xlane.xlu0 %1045  ;;  %v1183_v55 = vmul.f32 %v9313_v45, %v10780_v7 }
 0x1ba   : > { %v1220_v51 = vmul.f32 %v10920_v18, %v1182_v43  ;;  %9324 = vrsqrt.f32 %v1126_v57  ;;  %v1096_v60 = vmul.f32 0.0078125, %v1044_v47 }
 0x1bb   : > { %v9315_v52 = vpop.eup %9314  ;;  %v1221_v9 = vmul.f32 %v10920_v18, %v1183_v55  ;;  %9326 = vrsqrt.f32 %v1125_v4 }
 0x1bc   : > { %v1258_v54 = vadd.f32 %v10929_v48, %v1220_v51  ;;  %v1184_v56 = vmul.f32 %v9315_v52, %v10788_v15  ;;  %v1128_v43 = vadd.f32 1e-05, %v1096_v60  ;;  %v1097_v60 = vmul.f32 0.0078125, %v1046_v6 }
 0x1bd   : > { %v1048_v58 = vpop.xlane.xlu1 %1047  ;;  %v10936_v1 = vpop.xlane.xlu0 %1049  ;;  %v1259_v21 = vadd.f32 %v10929_v48, %v1221_v9 }
 0x1be   : > { %v10938_v2 = vpack.c.bf16 %v1258_v54, %v1257_v14  ;;  %v1222_v5 = vmul.f32 %v10920_v18, %v1184_v56  ;;  %v1127_v14 = vadd.f32 1e-05, %v1095_v16  ;;  %9328 = vrsqrt.f32 %v1128_v43 }
 0x1bf   : > { %v9317_v3 = vpop.eup %9316  ;;  %v1098_v55 = vmul.f32 0.0078125, %v1048_v58 }
 0x1c0   : > { %v9319_v8 = vpop.eup %9318  ;;  %1515 = vmatmul.mubr.bf16.vlgmr.msra.gmra.mxu0 %v10938_v2  ;;  %v1186_v11 = vmul.f32 %v9317_v3, %v10796_v23  ;;  %v1260_v13 = vadd.f32 %v10929_v48, %v1222_v5  ;;  %9330 = vrsqrt.f32 %v1127_v14 }
 0x1c1   : > { %v10943_v7 = vpop.xlane.xlu1 %1051  ;;  %v909_v15 = vpop.xlane.xlu0 %908  ;;  %1524 = vmatprep.mubr.bf16.mxu0 %v14498_v29  ;;  %v1185_v62 = vmul.f32 %v9319_v8, %v10794_v22 }
 0x1c2   : > { %v949_v12 = vmul.f32 0.0078125, %v909_v15  ;;  %v1224_v46 = vmul.f32 %v10920_v18, %v1186_v11  ;;  %v10954_v52 = vpack.c.bf16 %v1260_v13, %v1259_v21  ;;  %v1130_v11 = vadd.f32 1e-05, %v1098_v55 }
 0x1c3   : > { %v9321_v47 = vpop.eup %9320  ;;  %v1223_v22 = vmul.f32 %v10920_v18, %v1185_v62 }
 0x1c4   : > { %v10951_v24 = vsub.f32 %v10860_v63, %v949_v12  ;;  %v9323_v17 = vpop.eup %9322  ;;  %v1262_v3 = vadd.f32 %v10929_v48, %v1224_v46  ;;  %v1188_v4 = vmul.f32 %v9321_v47, %v10804_v31  ;;  %9332 = vrsqrt.f32 %v1130_v11 }
 0x1c5   : > { %v911_v44 = vpop.xlane.xlu1 %910  ;;  %v913_v45 = vpop.xlane.xlu0 %912  ;;  %v1187_v58 = vmul.f32 %v9323_v17, %v10802_v30 }
 0x1c6   : > { %v950_v51 = vmul.f32 0.0078125, %v911_v44  ;;  %v951_v23 = vmul.f32 0.0078125, %v913_v45  ;;  %v1013_v53 = vmul.f32 %v10951_v24, %v10951_v24  ;;  %v1226_v16 = vmul.f32 %v10920_v18, %v1188_v4 }
 0x1c7   : > { %v9325_v21 = vpop.eup %9324  ;;  %v1225_v44 = vmul.f32 %v10920_v18, %v1187_v58  ;;  %v1129_v45 = vadd.f32 1e-05, %v1097_v60 }
 0x1c8   : > { %1525 = vmatmul.mubr.bf16.gmra.mxu0 %v10954_v52  ;;  %1069 = vadd.xlane.f32.xlu0 %v1013_v53  ;;  %v10961_v63 = vsub.f32 %v10865_v19, %v950_v51  ;;  %v10964_v54 = vsub.f32 %v10867_v20, %v951_v23  ;;  %v1261_v20 = vadd.f32 %v10929_v48, %v1223_v22  ;;  %v1100_v51 = vmul.f32 0.0078125, %v10943_v7 }
 0x1c9   : > { %v915_v56 = vpop.xlane.xlu1 %914  ;;  %v917_v57 = vpop.xlane.xlu0 %916  ;;  %1534 = vmatprep.mubr.bf16.mxu0 %v14498_v29  ;;  %v1264_v22 = vadd.f32 %v10929_v48, %v1226_v16  ;;  %v1190_v17 = vmul.f32 %v9325_v21, %v10816_v41  ;;  %9334 = vrsqrt.f32 %v1129_v45 }
 0x1ca   : > { %v952_v5 = vmul.f32 0.0078125, %v915_v56  ;;  %v953_v8 = vmul.f32 0.0078125, %v917_v57  ;;  %v1014_v9 = vmul.f32 %v10961_v63, %v10961_v63  ;;  %v1015_v19 = vmul.f32 %v10964_v54, %v10964_v54 }
 0x1cb   : > { %v10981_v62 = vpack.c.bf16 %v1262_v3, %v1261_v20  ;;  %v1263_v56 = vadd.f32 %v10929_v48, %v1225_v44  ;;  %v1099_v57 = vmul.f32 0.0078125, %v10936_v1  ;;  %v1132_v4 = vadd.f32 1e-05, %v1100_v51 }
 0x1cc   : > { %1071 = vadd.xlane.f32.xlu1 %v1014_v9  ;;  %1073 = vadd.xlane.f32.xlu0 %v1015_v19  ;;  %v10976_v15 = vsub.f32 %v10873_v25, %v952_v5  ;;  %v10979_v31 = vsub.f32 %v10875_v26, %v953_v8  ;;  %v9327_v26 = vpop.eup %9326  ;;  %v1228_v19 = vmul.f32 %v10920_v18, %v1190_v17 }
 0x1cd   : > { %v919_v12 = vpop.xlane.xlu1 %918  ;;  %v921_v13 = vpop.xlane.xlu0 %920  ;;  %v1189_v7 = vmul.f32 %v9327_v26, %v10813_v40  ;;  %v11013_v9 = vpack.c.bf16 %v1264_v22, %v1263_v56  ;;  %v1131_v60 = vadd.f32 1e-05, %v1099_v57  ;;  %9336 = vrsqrt.f32 %v1132_v4 }
 0x1ce   : > { %v954_v43 = vmul.f32 0.0078125, %v919_v12  ;;  %v955_v30 = vmul.f32 0.0078125, %v921_v13  ;;  %v1016_v6 = vmul.f32 %v10976_v15, %v10976_v15  ;;  %v1017_v25 = vmul.f32 %v10979_v31, %v10979_v31  ;;  %v9329_v20 = vpop.eup %9328 }
 0x1cf   : > { %v9331_v13 = vpop.eup %9330  ;;  %9338 = vrsqrt.f32 %v1131_v60 }
 0x1d0   : > { %1075 = vadd.xlane.f32.xlu1 %v1016_v6  ;;  %1535 = vmatmul.mubr.bf16.gmra.mxu0 %v10981_v62  ;;  %v10991_v46 = vsub.f32 %v10879_v27, %v954_v43  ;;  %v10994_v47 = vsub.f32 %v10881_v28, %v955_v30  ;;  %v1266_v43 = vadd.f32 %v10929_v48, %v1228_v19 }
 0x1d1   : > { %1077 = vadd.xlane.f32.xlu0 %v1017_v25  ;;  %v923_v23 = vpop.xlane.xlu1 %922  ;;  %v893_v53 = vpop.xlane.xlu0 %892  ;;  %1544 = vmatprep.mubr.bf16.mxu0 %v14498_v29  ;;  %v1192_v30 = vmul.f32 %v9329_v20, %v10827_v50  ;;  %v1191_v50 = vmul.f32 %v9331_v13, %v10824_v49 }
 0x1d2   : > { %v956_v14 = vmul.f32 0.0078125, %v923_v23  ;;  %v941_v55 = vmul.f32 0.0078125, %v893_v53  ;;  %v1018_v27 = vmul.f32 %v10991_v46, %v10991_v46  ;;  %v1019_v28 = vmul.f32 %v10994_v47, %v10994_v47  ;;  %v9333_v17 = vpop.eup %9332 }
 0x1d3   : > { %v1230_v22 = vmul.f32 %v10920_v18, %v1192_v30  ;;  %v1194_v57 = vmul.f32 %v9333_v17, %v10839_v0 }
 0x1d4   : > { %1079 = vadd.xlane.f32.xlu1 %v1018_v27  ;;  %v11008_v3 = vsub.f32 %v10887_v32, %v956_v14  ;;  %v11011_v41 = vsub.f32 %v10889_v33, %v941_v55  ;;  %v1227_v33 = vmul.f32 %v10920_v18, %v1189_v7 }
 0x1d5   : > { %1081 = vadd.xlane.f32.xlu0 %v1019_v28  ;;  %v895_v5 = vpop.xlane.xlu1 %894  ;;  %v897_v8 = vpop.xlane.xlu0 %896  ;;  %v1229_v28 = vmul.f32 %v10920_v18, %v1191_v50 }
 0x1d6   : > { %v942_v40 = vmul.f32 0.0078125, %v895_v5  ;;  %v943_v58 = vmul.f32 0.0078125, %v897_v8  ;;  %v1020_v1 = vmul.f32 %v11008_v3, %v11008_v3  ;;  %v1005_v32 = vmul.f32 %v11011_v41, %v11011_v41  ;;  %v9335_v56 = vpop.eup %9334 }
 0x1d7   : > { %v1265_v44 = vadd.f32 %v10929_v48, %v1227_v33  ;;  %v1268_v8 = vadd.f32 %v10929_v48, %v1230_v22  ;;  %v1267_v19 = vadd.f32 %v10929_v48, %v1229_v28  ;;  %v1193_v20 = vmul.f32 %v9335_v56, %v10836_v59 }
 0x1d8   : > { %1083 = vadd.xlane.f32.xlu1 %v1020_v1  ;;  %1545 = vmatmul.mubr.bf16.gmra.mxu0 %v11013_v9  ;;  %v11023_v11 = vsub.f32 %v10893_v34, %v942_v40  ;;  %v11026_v12 = vsub.f32 %v10895_v35, %v943_v58  ;;  %v1232_v1 = vmul.f32 %v10920_v18, %v1194_v57 }
 0x1d9   : > { %1053 = vadd.xlane.f32.xlu0 %v1005_v32  ;;  %v899_v16 = vpop.xlane.xlu1 %898  ;;  %v901_v21 = vpop.xlane.xlu0 %900  ;;  %1554 = vmatprep.mubr.bf16.mxu0 %v14498_v29  ;;  %v11043_v53 = vpack.c.bf16 %v1266_v43, %v1265_v44  ;;  %v11072_v58 = vpack.c.bf16 %v1268_v8, %v1267_v19  ;;  %v11086_v43 = vld [vmem:[%s10635_s21 + $0xb0] ss:$12 sps:$4 sm:$0xff]  }
 0x1da   : > { %v944_v6 = vmul.f32 0.0078125, %v899_v16  ;;  %v945_v25 = vmul.f32 0.0078125, %v901_v21  ;;  %v1006_v34 = vmul.f32 %v11023_v11, %v11023_v11  ;;  %v1007_v35 = vmul.f32 %v11026_v12, %v11026_v12  ;;  %v9337_v0 = vpop.eup %9336  ;;  %8734 = vmatprep.subr.bf16.mxu1 %v11086_v43 }
 0x1db   : > { %v1270_v59 = vadd.f32 %v10929_v48, %v1232_v1  ;;  %v1196_v33 = vmul.f32 %v9337_v0, %v10851_v10 }
 0x1dc   : > { %1055 = vadd.xlane.f32.xlu1 %v1006_v34  ;;  %v11037_v26 = vsub.f32 %v10899_v36, %v944_v6  ;;  %v11040_v45 = vsub.f32 %v10901_v37, %v945_v25  ;;  %v9339_v32 = vpop.eup %9338 }
 0x1dd   : > { %1057 = vadd.xlane.f32.xlu0 %v1007_v35  ;;  %v903_v51 = vpop.xlane.xlu1 %902  ;;  %v905_v23 = vpop.xlane.xlu0 %904  ;;  %v1195_v13 = vmul.f32 %v9339_v32, %v10848_v61  ;;  %v1234_v21 = vmul.f32 %v10920_v18, %v1196_v33 }
 0x1de   : > { %v946_v14 = vmul.f32 0.0078125, %v903_v51  ;;  %v947_v55 = vmul.f32 0.0078125, %v905_v23  ;;  %v1008_v27 = vmul.f32 %v11037_v26, %v11037_v26  ;;  %v1009_v36 = vmul.f32 %v11040_v45, %v11040_v45 }
 0x1df   : > { %v1233_v30 = vmul.f32 %v10920_v18, %v1195_v13  ;;  %v1272_v10 = vadd.f32 %v10929_v48, %v1234_v21 }
 0x1e0   : > { %1059 = vadd.xlane.f32.xlu1 %v1008_v27  ;;  %1555 = vmatmul.mubr.bf16.gmra.mxu0 %v11043_v53  ;;  %v11052_v49 = vsub.f32 %v10905_v38, %v946_v14  ;;  %v11055_v37 = vsub.f32 %v10907_v39, %v947_v55 }
 0x1e1   : > { %1061 = vadd.xlane.f32.xlu0 %v1009_v36  ;;  %v907_v7 = vpop.xlane.xlu1 %906  ;;  %1564 = vmatprep.mubr.bf16.mxu0 %v14498_v29  ;;  %v1271_v6 = vadd.f32 %v10929_v48, %v1233_v30 }
 0x1e2   : > { %v948_v4 = vmul.f32 0.0078125, %v907_v7  ;;  %v1010_v5 = vmul.f32 %v11052_v49, %v11052_v49  ;;  %v1011_v38 = vmul.f32 %v11055_v37, %v11055_v37 }
 0x1e3   : > { %v11094_v25 = vpack.c.bf16 %v1272_v10, %v1271_v6 }
 0x1e4   : > { %1063 = vadd.xlane.f32.xlu1 %v1010_v5  ;;  %v11066_v39 = vsub.f32 %v10911_v42, %v948_v4  ;;  %v1231_v42 = vmul.f32 %v10920_v18, %v1193_v20 }
 0x1e5   : > { %1065 = vadd.xlane.f32.xlu0 %v1011_v38 }
 0x1e6   : > { %v1012_v40 = vmul.f32 %v11066_v39, %v11066_v39  ;;  %v1269_v60 = vadd.f32 %v10929_v48, %v1231_v42 }
 0x1e8   : > { %1067 = vadd.xlane.f32.xlu1 %v1012_v40  ;;  %1565 = vmatmul.mubr.bf16.gmra.mxu0 %v11072_v58  ;;  %v11082_v16 = vpack.c.bf16 %v1270_v59, %v1269_v60 }
 0x1e9   : > { %1574 = vmatprep.mubr.bf16.mxu0 %v14498_v29 }
 0x1f0   : > { %1575 = vmatmul.mubr.bf16.gmra.mxu0 %v11082_v16 }
 0x1f1   : > { %1584 = vmatprep.mubr.bf16.mxu0 %v14498_v29 }
 0x1f8   : > { %1585 = vmatmul.mubr.bf16.gmra.mxu0 %v11094_v25 }
 0x1f9   : > { %1594 = vmatprep.mubr.bf16.mxu0 %v14498_v29 }
 0x251   : > { %v1070_v61 = vpop.xlane.xlu0 %1069 }
 0x252   : > { %v1109_v34 = vmul.f32 0.0078125, %v1070_v61 }
 0x254   : > { %v1141_v35 = vadd.f32 1e-05, %v1109_v34 }
 0x255   : > { %v1072_v44 = vpop.xlane.xlu1 %1071  ;;  %v1074_v50 = vpop.xlane.xlu0 %1073 }
 0x256   : > { %9340 = vrsqrt.f32 %v1141_v35  ;;  %v1110_v51 = vmul.f32 0.0078125, %v1072_v44  ;;  %v1111_v23 = vmul.f32 0.0078125, %v1074_v50 }
 0x258   : > { %v1142_v22 = vadd.f32 1e-05, %v1110_v51  ;;  %v1143_v17 = vadd.f32 1e-05, %v1111_v23 }
 0x259   : > { %v1076_v14 = vpop.xlane.xlu1 %1075 }
 0x25a   : > { %9342 = vrsqrt.f32 %v1142_v22  ;;  %v1112_v55 = vmul.f32 0.0078125, %v1076_v14  ;;  %v1078_v27 = vpop.xlane.xlu0 %1077 }
 0x25b   : > { %9344 = vrsqrt.f32 %v1143_v17  ;;  %v1113_v36 = vmul.f32 0.0078125, %v1078_v27 }
 0x25c   : > { %v1144_v28 = vadd.f32 1e-05, %v1112_v55 }
 0x25d   : > { %v1080_v56 = vpop.xlane.xlu1 %1079  ;;  %v1145_v4 = vadd.f32 1e-05, %v1113_v36 }
 0x25e   : > { %9346 = vrsqrt.f32 %v1144_v28  ;;  %v1114_v7 = vmul.f32 0.0078125, %v1080_v56  ;;  %v1082_v57 = vpop.xlane.xlu0 %1081 }
 0x25f   : > { %v1115_v38 = vmul.f32 0.0078125, %v1082_v57 }
 0x260   : > { %v1146_v5 = vadd.f32 1e-05, %v1114_v7  ;;  %v9213_v7 = vld [vmem:[%s10635_s21 + $0x98] ss:$12 sps:$4 sm:$0xff]  }
 0x261   : > { %v1084_v8 = vpop.xlane.xlu1 %1083  ;;  %v1147_v1 = vadd.f32 1e-05, %v1115_v38 }
 0x262   : > { %9348 = vrsqrt.f32 %v1146_v5  ;;  %v1116_v19 = vmul.f32 0.0078125, %v1084_v8  ;;  %v1054_v20 = vpop.xlane.xlu0 %1053 }
 0x263   : > { %v9341_v0 = vpop.eup %9340  ;;  %9350 = vrsqrt.f32 %v1145_v4  ;;  %v1101_v40 = vmul.f32 0.0078125, %v1054_v20 }
 0x264   : > { %v1205_v42 = vmul.f32 %v9341_v0, %v10951_v24  ;;  %v1148_v32 = vadd.f32 1e-05, %v1116_v19 }
 0x265   : > { %v1133_v59 = vadd.f32 1e-05, %v1101_v40  ;;  %v1056_v33 = vpop.xlane.xlu1 %1055  ;;  %v9214_v40 = vld [vmem:[%s10635_s21 + $0x80] ss:$12 sps:$4 sm:$0xff]  }
 0x266   : > { %v1102_v60 = vmul.f32 0.0078125, %v1056_v33  ;;  %v1058_v13 = vpop.xlane.xlu0 %1057  ;;  %v1243_v10 = vmul.f32 %v10920_v18, %v1205_v42 }
 0x267   : > { %v9343_v21 = vpop.eup %9342  ;;  %9352 = vrsqrt.f32 %v1133_v59  ;;  %v1103_v30 = vmul.f32 0.0078125, %v1058_v13 }
 0x268   : > { %v9345_v6 = vpop.eup %9344  ;;  %9354 = vrsqrt.f32 %v1147_v1  ;;  %v1134_v61 = vadd.f32 1e-05, %v1102_v60  ;;  %v1206_v34 = vmul.f32 %v9343_v21, %v10961_v63  ;;  %v1281_v22 = vadd.f32 %v10929_v48, %v1243_v10 }
 0x269   : > { %9356 = vrsqrt.f32 %v1148_v32  ;;  %v1135_v35 = vadd.f32 1e-05, %v1103_v30  ;;  %v1060_v44 = vpop.xlane.xlu1 %1059  ;;  %v1207_v17 = vmul.f32 %v9345_v6, %v10964_v54  ;;  %v9215_v6 = vld [vmem:[%s10635_s21 + $0x68] ss:$12 sps:$4 sm:$0xff]  }
 0x26a   : > { %9358 = vrsqrt.f32 %v1134_v61  ;;  %v1104_v24 = vmul.f32 0.0078125, %v1060_v44  ;;  %v1062_v50 = vpop.xlane.xlu0 %1061  ;;  %v1244_v51 = vmul.f32 %v10920_v18, %v1206_v34 }
 0x26b   : > { %v9347_v23 = vpop.eup %9346  ;;  %9360 = vrsqrt.f32 %v1135_v35  ;;  %v1105_v55 = vmul.f32 0.0078125, %v1062_v50  ;;  %v1245_v19 = vmul.f32 %v10920_v18, %v1207_v17 }
 0x26c   : > { %v1136_v14 = vadd.f32 1e-05, %v1104_v24  ;;  %v1282_v27 = vadd.f32 %v10929_v48, %v1244_v51  ;;  %v1208_v63 = vmul.f32 %v9347_v23, %v10976_v15  ;;  %v9216_v23 = vld [vmem:[%s10635_s21 + $0x50] ss:$12 sps:$4 sm:$0xff]  }
 0x26d   : > { %v1064_v36 = vpop.xlane.xlu1 %1063  ;;  %v1137_v38 = vadd.f32 1e-05, %v1105_v55  ;;  %v1283_v33 = vadd.f32 %v10929_v48, %v1245_v19 }
 0x26e   : > { %9362 = vrsqrt.f32 %v1136_v14  ;;  %v1106_v28 = vmul.f32 0.0078125, %v1064_v36  ;;  %v11106_v56 = vpack.c.bf16 %v1282_v27, %v1281_v22  ;;  %v1246_v57 = vmul.f32 %v10920_v18, %v1208_v63  ;;  %v1066_v54 = vpop.xlane.xlu0 %1065 }
 0x26f   : > { %v9349_v4 = vpop.eup %9348  ;;  %v1107_v42 = vmul.f32 0.0078125, %v1066_v54 }
 0x270   : > { %v9351_v5 = vpop.eup %9350  ;;  %v1138_v8 = vadd.f32 1e-05, %v1106_v28  ;;  %1635 = vmatmul.mubr.bf16.vlgmr.msra.gmra.mxu1 %v11106_v56  ;;  %v1284_v0 = vadd.f32 %v10929_v48, %v1246_v57  ;;  %v1210_v1 = vmul.f32 %v9349_v4, %v10991_v46  ;;  %v9217_v4 = vld [vmem:[%s10635_s21 + $0x38] ss:$12 sps:$4 sm:$0xff]  }
 0x271   : > { %v1068_v20 = vpop.xlane.xlu1 %1067  ;;  %8735 = vmatpush3.bf16.msra.mxu1 %v11086_v43  ;;  %1644 = vmatprep.mubr.bf16.mxu1 %v14498_v29  ;;  %v1209_v32 = vmul.f32 %v9351_v5, %v10979_v31  ;;  %v1339_v43 = vlaneseq  ;;  %v1139_v31 = vadd.f32 1e-05, %v1107_v42 }
 0x272   : > { %9364 = vrsqrt.f32 %v1138_v8  ;;  %v1108_v15 = vmul.f32 0.0078125, %v1068_v20  ;;  %8736 = vmatprep.subr.bf16.mxu1 %v9213_v7  ;;  %v11120_v10 = vpack.c.bf16 %v1284_v0, %v1283_v33  ;;  %v1248_v46 = vmul.f32 %v10920_v18, %v1210_v1 }
 0x273   : > { %9366 = vrsqrt.f32 %v1137_v38  ;;  %v1247_v34 = vmul.f32 %v10920_v18, %v1209_v32  ;;  %v11129_v24 = vshrl.u32 %v1339_v43, 7 }
 0x274   : > { %v9353_v59 = vpop.eup %9352  ;;  %v1140_v30 = vadd.f32 1e-05, %v1108_v15  ;;  %v1286_v51 = vadd.f32 %v10929_v48, %v1248_v46 }
 0x275   : > { %v9355_v60 = vpop.eup %9354  ;;  %8737 = vmatpush3.bf16.msra.mxu1 %v9213_v7  ;;  %v1197_v13 = vmul.f32 %v9353_v59, %v11011_v41  ;;  %14603 = vst [vmem:[#allocation13_spill] sm:$0xff] %v11129_v24  ;;  %v14497_v28 = vsub.s32 0, %v11129_v24  ;;  %v11143_v7 = vld [vmem:[%s10673_s12] sm:$0x7]  ;;  %s10421_s12 = smov 64  }
 0x276   : > { %v9357_v21 = vpop.eup %9356  ;;  %8738 = vmatprep.subr.bf16.mxu1 %v9214_v40  ;;  %9368 = vrsqrt.f32 %v1140_v30  ;;  %v1211_v14 = vmul.f32 %v9355_v60, %v10994_v47 }
 0x277   : > { %v9359_v61 = vpop.eup %9358  ;;  %v1235_v41 = vmul.f32 %v10920_v18, %v1197_v13  ;;  %v1212_v22 = vmul.f32 %v9357_v21, %v11008_v3  ;;  %9370 = vrsqrt.f32 %v1139_v31  ;;  %v11159_v19 = vrot.slane %v11143_v7, %v14497_v28 }
 0x278   : > { %v9361_v35 = vpop.eup %9360  ;;  %1645 = vmatmul.mubr.bf16.gmra.mxu1 %v11120_v10  ;;  %v1198_v44 = vmul.f32 %v9359_v61, %v11023_v11  ;;  %v1285_v11 = vadd.f32 %v10929_v48, %v1247_v34  ;;  %v1249_v8 = vmul.f32 %v10920_v18, %v1211_v14 }
 0x279   : > { %8739 = vmatpush3.bf16.msra.mxu1 %v9214_v40  ;;  %1654 = vmatprep.mubr.bf16.mxu1 %v14498_v29  ;;  %v1273_v55 = vadd.f32 %v10929_v48, %v1235_v41  ;;  %v1199_v63 = vmul.f32 %v9361_v35, %v11026_v12  ;;  %v1250_v5 = vmul.f32 %v10920_v18, %v1212_v22  ;;  %v9218_v40 = vld [vmem:[%s10635_s21 + $0x20] ss:$12 sps:$4 sm:$0xff]  }
 0x27a   : > { %8740 = vmatprep.subr.bf16.mxu1 %v9215_v6  ;;  %v1236_v50 = vmul.f32 %v10920_v18, %v1198_v44  ;;  %v11147_v57 = vpack.c.bf16 %v1286_v51, %v1285_v11  ;;  %v1287_v59 = vadd.f32 %v10929_v48, %v1249_v8 }
 0x27b   : > { %v9363_v17 = vpop.eup %9362  ;;  %v1288_v0 = vadd.f32 %v10929_v48, %v1250_v5 }
 0x27c   : > { %v1274_v27 = vadd.f32 %v10929_v48, %v1236_v50  ;;  %v1200_v36 = vmul.f32 %v9363_v17, %v11037_v26  ;;  %v1237_v26 = vmul.f32 %v10920_v18, %v1199_v63 }
 0x27d   : > { %8741 = vmatpush3.bf16.msra.mxu1 %v9215_v6  ;;  %v11176_v30 = vpack.c.bf16 %v1288_v0, %v1287_v59  ;;  %v9219_v6 = vld [vmem:[%s10635_s21 + $0x8] ss:$12 sps:$4 sm:$0xff]  }
 0x27e   : > { %v11145_v3 = vpack.c.bf16 %v1274_v27, %v1273_v55  ;;  %8742 = vmatprep.subr.bf16.mxu1 %v9216_v23  ;;  %v1238_v47 = vmul.f32 %v10920_v18, %v1200_v36  ;;  %v1275_v32 = vadd.f32 %v10929_v48, %v1237_v26 }
 0x27f   : > { %v9365_v38 = vpop.eup %9364 }
 0x280   : > { %v1516_v12 = vpop.f32.mrf.mxu0  ;;  %1595 = vmatmul.mubr.bf16.gmra.mxu0 %v11145_v3  ;;  %1655 = vmatmul.mubr.bf16.gmra.mxu1 %v11147_v57  ;;  %v9367_v54 = vpop.eup %9366  ;;  %v1276_v15 = vadd.f32 %v10929_v48, %v1238_v47  ;;  %v1202_v1 = vmul.f32 %v9365_v38, %v11052_v49 }
 0x281   : > { %8743 = vmatpush3.bf16.msra.mxu1 %v9216_v23  ;;  %1604 = vmatprep.mubr.bf16.mxu0 %v14498_v29  ;;  %v1201_v33 = vmul.f32 %v9367_v54, %v11040_v45  ;;  %v1517_v60 = vadd.f32 %v1516_v12, %v11159_v19 }
 0x282   : > { %v11162_v20 = vpop.f32.mrf.mxu0  ;;  %8744 = vmatprep.subr.bf16.mxu1 %v9217_v4  ;;  %1664 = vmatprep.mubr.bf16.mxu1 %v14498_v29  ;;  %v1298_v21 = vpack.c.bf16 %v1276_v15, %v1275_v32  ;;  %v1240_v49 = vmul.f32 %v10920_v18, %v1202_v1 }
 0x283   : > { %v9369_v46 = vpop.eup %9368  ;;  %v1239_v45 = vmul.f32 %v10920_v18, %v1201_v33 }
 0x284   : > { %v1520_v42 = vpop.f32.mrf.mxu0  ;;  %v9371_v31 = vpop.eup %9370  ;;  %v1278_v44 = vadd.f32 %v10929_v48, %v1240_v49  ;;  %v1204_v41 = vmul.f32 %v9369_v46, %v11066_v39 }
 0x285   : > { %v1521_v43 = vadd.f32 %v1520_v42, %v11159_v19  ;;  %8745 = vmatpush3.bf16.msra.mxu1 %v9217_v4  ;;  %v1277_v51 = vadd.f32 %v10929_v48, %v1239_v45  ;;  %v1203_v23 = vmul.f32 %v9371_v31, %v11055_v37 }
 0x286   : > { %v11174_v13 = vpop.f32.mrf.mxu0  ;;  %8746 = vmatprep.subr.bf16.mxu1 %v9218_v40 }
 0x287   : > { %v11180_v61 = vpack.c.bf16 %v1521_v43, %v1517_v60  ;;  %v1299_v17 = vpack.c.bf16 %v1278_v44, %v1277_v51  ;;  %v1241_v14 = vmul.f32 %v10920_v18, %v1203_v23 }
 0x288   : > { %v11182_v34 = vpop.f32.mrf.mxu0  ;;  %1605 = vmatmul.mubr.bf16.gmra.mxu0 %v1298_v21  ;;  %1665 = vmatmul.mubr.bf16.gmra.mxu1 %v11176_v30 }
 0x289   : > { %8747 = vmatpush3.bf16.msra.mxu1 %v9218_v40  ;;  %8750 = vmatprep.mubr.bf16.mxu1 %v10938_v2  ;;  %v1242_v2 = vmul.f32 %v10920_v18, %v1204_v41  ;;  %v1279_v27 = vadd.f32 %v10929_v48, %v1241_v14 }
 0x28a   : > { %v11187_v35 = vpop.f32.mrf.mxu0  ;;  %8748 = vmatprep.subr.bf16.mxu1 %v9219_v6  ;;  %1614 = vmatprep.mubr.bf16.mxu0 %v14498_v29 }
 0x28b   : > { %v1280_v37 = vadd.f32 %v10929_v48, %v1242_v2 }
 0x28c   : > { %v11192_v50 = vpop.f32.mrf.mxu0 }
 0x28d   : > { %8749 = vmatpush3.bf16.msra.mxu1 %v9219_v6  ;;  %v1300_v36 = vpack.c.bf16 %v1280_v37, %v1279_v27 }
 0x28e   : > { %v11196_v22 = vpop.f32.mrf.mxu0 }
 0x290   : > { %v11199_v11 = vpop.f32.mrf.mxu0  ;;  %1615 = vmatmul.mubr.bf16.gmra.mxu0 %v1299_v17  ;;  %8751 = vmatmul.mubr.bf16.vlgmr.msra.gmra.mxu1 %v10954_v52 }
 0x291   : > { %8754 = vmatprep.mubr.bf16.mxu1 %v10981_v62  ;;  %1624 = vmatprep.mubr.bf16.mxu0 %v14498_v29 }
 0x292   : > { %v1538_v39 = vpop.f32.mrf.mxu0 }
 0x294   : > { %v11206_v55 = vpop.f32.mrf.mxu0 }
 0x296   : > { %v1542_v63 = vpop.f32.mrf.mxu0 }
 0x298   : > { %v11209_v4 = vpop.f32.mrf.mxu0  ;;  %1625 = vmatmul.mubr.bf16.gmra.mxu0 %v1300_v36  ;;  %8755 = vmatmul.mubr.bf16.gmra.mxu1 %v11013_v9 }
 0x299   : > { %8758 = vmatprep.mubr.bf16.mxu1 %v11043_v53 }
 0x29a   : > { %v1548_v18 = vpop.f32.mrf.mxu0 }
 0x29c   : > { %v11213_v52 = vpop.f32.mrf.mxu0 }
 0x29e   : > { %v1552_v62 = vpop.f32.mrf.mxu0 }
 0x2a0   : > { %v11215_v47 = vpop.f32.mrf.mxu0  ;;  %8759 = vmatmul.mubr.bf16.gmra.mxu1 %v11072_v58  ;;  %v14495_v58 = vsub.s32 1, %v11129_v24 }
 0x2a1   : > { %8762 = vmatprep.mubr.bf16.mxu1 %v11082_v16 }
 0x2a2   : > { %v1558_v48 = vpop.f32.mrf.mxu0  ;;  %v11235_v15 = vrot.slane %v11143_v7, %v14495_v58 }
 0x2a4   : > { %v11219_v5 = vpop.f32.mrf.mxu0  ;;  %v1559_v6 = vadd.f32 %v1558_v48, %v11235_v15  ;;  %v1553_v31 = vadd.f32 %v1552_v62, %v11235_v15  ;;  %v1539_v41 = vadd.f32 %v1538_v39, %v11235_v15  ;;  %v1549_v51 = vadd.f32 %v1548_v18, %v11235_v15 }
 0x2a5   : > { %v1519_v14 = vadd.f32 %v11162_v20, %v11235_v15  ;;  %v1529_v39 = vadd.f32 %v11187_v35, %v11235_v15  ;;  %v1527_v20 = vadd.f32 %v11182_v34, %v11159_v19  ;;  %v1547_v34 = vadd.f32 %v11209_v4, %v11159_v19 }
 0x2a6   : > { %v1562_v38 = vpop.f32.mrf.mxu0  ;;  %v1863_v2 = vpack.c.bf16 %v1553_v31, %v1549_v51  ;;  %v1557_v62 = vadd.f32 %v11215_v47, %v11159_v19 }
 0x2a7   : > { %v1563_v60 = vadd.f32 %v1562_v38, %v11235_v15 }
 0x2a8   : > { %v11221_v12 = vpop.f32.mrf.mxu0  ;;  %8763 = vmatmul.mubr.bf16.gmra.mxu1 %v11094_v25 }
 0x2a9   : > { %8766 = vmatprep.mubr.bf16.mxu1 %v11145_v3  ;;  %v1864_v45 = vpack.c.bf16 %v1563_v60, %v1559_v6 }
 0x2aa   : > { %v1568_v9 = vpop.f32.mrf.mxu0 }
 0x2ab   : > { %v1569_v59 = vadd.f32 %v1568_v9, %v11235_v15 }
 0x2ac   : > { %v11225_v53 = vpop.f32.mrf.mxu0 }
 0x2ae   : > { %v1572_v26 = vpop.f32.mrf.mxu0 }
 0x2af   : > { %v1573_v1 = vadd.f32 %v1572_v26, %v11235_v15  ;;  %v1914_v26 = vsel %vm1876_vm0, %v1864_v45, 0 }
 0x2b0   : > { %v11227_v8 = vpop.f32.mrf.mxu0  ;;  %8767 = vmatmul.mubr.bf16.gmra.mxu1 %v1298_v21 }
 0x2b1   : > { %8770 = vmatprep.mubr.bf16.mxu1 %v1299_v17  ;;  %v1865_v43 = vpack.c.bf16 %v1573_v1, %v1569_v59  ;;  %v1533_v17 = vadd.f32 %v11196_v22, %v11235_v15  ;;  %v1531_v22 = vadd.f32 %v11192_v50, %v11159_v19  ;;  %v1551_v50 = vadd.f32 %v11213_v52, %v11159_v19 }
 0x2b2   : > { %v1578_v16 = vpop.f32.mrf.mxu0  ;;  %v1571_v52 = vadd.f32 %v11225_v53, %v11159_v19  ;;  %v1577_v47 = vadd.f32 %v11227_v8, %v11159_v19  ;;  %v1911_v8 = vsel %vm1876_vm0, %v1863_v2, 0 }
 0x2b3   : > { %v1579_v3 = vadd.f32 %v1578_v16, %v11235_v15  ;;  %v1861_v37 = vpack.c.bf16 %v1533_v17, %v1529_v39  ;;  %v1853_v27 = vpack.c.bf16 %v1531_v22, %v1527_v20  ;;  %v1855_v18 = vpack.c.bf16 %v1551_v50, %v1547_v34 }
 0x2b4   : > { %v11230_v54 = vpop.f32.mrf.mxu0 }
 0x2b6   : > { %v1582_v25 = vpop.f32.mrf.mxu0 }
 0x2b7   : > { %v1583_v0 = vadd.f32 %v1582_v25, %v11235_v15 }
 0x2b8   : > { %v11239_v40 = vpop.f32.mrf.mxu0  ;;  %8771 = vmatmul.mubr.bf16.gmra.mxu1 %v1300_v36 }
 0x2b9   : > { %v1866_v42 = vpack.c.bf16 %v1583_v0, %v1579_v3  ;;  %8774 = vmatprep.mubr.bf16.mxu1 %v11106_v56  ;;  %v1543_v56 = vadd.f32 %v1542_v63, %v11235_v15  ;;  %v1537_v63 = vadd.f32 %v11199_v11, %v11159_v19  ;;  %v1567_v11 = vadd.f32 %v11221_v12, %v11159_v19 }
 0x2ba   : > { %v1588_v32 = vpop.f32.mrf.mxu0  ;;  %v1587_v12 = vadd.f32 %v11239_v40, %v11159_v19 }
 0x2bb   : > { %2355 = vrot.lane.b32.xlu1 %v1866_v42, %s10421_s12  ;;  %v1589_v49 = vadd.f32 %v1588_v32, %v11235_v15  ;;  %v1920_v35 = vsel %vm1876_vm0, %v1866_v42, 0  ;;  %v1857_v48 = vpack.c.bf16 %v1571_v52, %v1567_v11 }
 0x2bc   : > { %v1590_v33 = vpop.f32.mrf.mxu0 }
 0x2bd   : > { %v1591_v38 = vadd.f32 %v1590_v33, %v11159_v19 }
 0x2be   : > { %v1592_v21 = vpop.f32.mrf.mxu0 }
 0x2bf   : > { %v1593_v46 = vadd.f32 %v1592_v21, %v11235_v15  ;;  %2353 = vrot.lane.b32.xlu1 %v1865_v43, %s10421_s12  ;;  %v1859_v53 = vpack.c.bf16 %v1591_v38, %v1587_v12 }
 0x2c0   : > { %8775 = vmatmul.mubr.bf16.gmra.mxu1 %v11120_v10  ;;  %v1523_v10 = vadd.f32 %v11174_v13, %v11235_v15 }
 0x2c1   : > { %v1867_v44 = vpack.c.bf16 %v1593_v46, %v1589_v49  ;;  %8778 = vmatprep.mubr.bf16.mxu1 %v11147_v57  ;;  %v1862_v57 = vpack.c.bf16 %v1543_v56, %v1539_v41 }
 0x2c2   : > { %v1860_v13 = vpack.c.bf16 %v1523_v10, %v1519_v14 }
 0x2c3   : > { %2351 = vrot.lane.b32.xlu1 %v1864_v45, %s10421_s12  ;;  %2357 = vrot.lane.b32.xlu0 %v1867_v44, %s10421_s12  ;;  %v1923_v23 = vsel %vm1876_vm0, %v1867_v44, 0  ;;  %v1908_v16 = vsel %vm1876_vm0, %v1862_v57, 0 }
 0x2c4   : > { %9102 = vmatprep.subr.msk.bf16.mxu1 %vm1876_vm0, %v1867_v44  ;;  %v1902_v25 = vsel %vm1876_vm0, %v1860_v13, 0 }
 0x2c5   : > { %8783 = vmatpush3.bf16.xpose.msra.mxu1 %v1923_v23 }
 0x2c6   : > { %9103 = vmatprep.subr.msk.bf16.mxu1 %vm1876_vm0, %v1866_v42 }
 0x2c7   : > { %2347 = vrot.lane.b32.xlu1 %v1862_v57, %s10421_s12  ;;  %2349 = vrot.lane.b32.xlu0 %v1863_v2, %s10421_s12 }
 0x2c8   : > { %8779 = vmatmul.mubr.bf16.gmra.mxu1 %v11176_v30  ;;  %v1541_v30 = vadd.f32 %v11206_v55, %v11159_v19  ;;  %v1561_v55 = vadd.f32 %v11219_v5, %v11159_v19  ;;  %v1581_v5 = vadd.f32 %v11230_v54, %v11159_v19  ;;  %v1905_v54 = vsel %vm1876_vm0, %v1861_v37, 0 }
 0x2c9   : > { %8798 = vmatprep.mubr.msk.bf16.mxu1 %vm1876_vm0, %v11180_v61 }
 0x2ca   : > { %v1854_v36 = vpack.c.bf16 %v1541_v30, %v1537_v63  ;;  %v1856_v4 = vpack.c.bf16 %v1561_v55, %v1557_v62  ;;  %v1858_v9 = vpack.c.bf16 %v1581_v5, %v1577_v47 }
 0x2cb   : > { %2343 = vrot.lane.b32.xlu1 %v1860_v13, %s10421_s12  ;;  %2345 = vrot.lane.b32.xlu0 %v1861_v37, %s10421_s12 }
 0x2cd   : > { %8785 = vmatpush3.bf16.xpose.msra.mxu1 %v1920_v35 }
 0x2ce   : > { %9104 = vmatprep.subr.msk.bf16.mxu1 %vm1876_vm0, %v1865_v43 }
 0x2cf   : > { %2321 = vrot.lane.b32.xlu1 %v1853_v27, %s10421_s12  ;;  %2319 = vrot.lane.b32.xlu0 %v11180_v61, %s10421_s12  ;;  %v1917_v61 = vsel %vm1876_vm0, %v1865_v43, 0 }
 0x2d3   : > { %2325 = vrot.lane.b32.xlu1 %v1855_v18, %s10421_s12  ;;  %2323 = vrot.lane.b32.xlu0 %v1854_v36, %s10421_s12 }
 0x2d5   : > { %8787 = vmatpush3.bf16.xpose.msra.mxu1 %v1917_v61 }
 0x2d6   : > { %9105 = vmatprep.subr.msk.bf16.mxu1 %vm1876_vm0, %v1864_v45 }
 0x2d7   : > { %2329 = vrot.lane.b32.xlu1 %v1857_v48, %s10421_s12  ;;  %2327 = vrot.lane.b32.xlu0 %v1856_v4, %s10421_s12 }
 0x2db   : > { %2333 = vrot.lane.b32.xlu1 %v1859_v53, %s10421_s12  ;;  %2331 = vrot.lane.b32.xlu0 %v1858_v9, %s10421_s12 }
 0x2dd   : > { %8789 = vmatpush3.bf16.xpose.msra.mxu1 %v1914_v26 }
 0x2de   : > { %9106 = vmatprep.subr.msk.bf16.mxu1 %vm1876_vm0, %v1863_v2 }
 0x2e5   : > { %8791 = vmatpush3.bf16.xpose.msra.mxu1 %v1911_v8 }
 0x2e6   : > { %9107 = vmatprep.subr.msk.bf16.mxu1 %vm1876_vm0, %v1862_v57 }
 0x2ed   : > { %8793 = vmatpush3.bf16.xpose.msra.mxu1 %v1908_v16 }
 0x2ee   : > { %9108 = vmatprep.subr.msk.bf16.mxu1 %vm1876_vm0, %v1861_v37 }
 0x2f5   : > { %8795 = vmatpush3.bf16.xpose.msra.mxu1 %v1905_v54  ;;  %v14496_v54 = vsub.s32 2, %v11129_v24 }
 0x2f6   : > { %9109 = vmatprep.subr.msk.bf16.mxu1 %vm1876_vm0, %v1860_v13 }
 0x2fd   : > { %8797 = vmatpush3.bf16.xpose.msra.mxu1 %v1902_v25 }
 0x304   : > { %8799 = vmatmul.mubr.msk.bf16.vlgmr.msra.gmra.mxu1 %vm1876_vm0, %v1853_v27 }
 0x305   : > { %8802 = vmatprep.mubr.msk.bf16.mxu1 %vm1876_vm0, %v1854_v36 }
 0x30c   : > { %8803 = vmatmul.mubr.msk.bf16.gmra.mxu1 %vm1876_vm0, %v1855_v18 }
 0x30d   : > { %8806 = vmatprep.mubr.msk.bf16.mxu1 %vm1876_vm0, %v1856_v4 }
 0x314   : > { %8807 = vmatmul.mubr.msk.bf16.gmra.mxu1 %vm1876_vm0, %v1857_v48 }
 0x315   : > { %8810 = vmatprep.mubr.msk.bf16.mxu1 %vm1876_vm0, %v1858_v9 }
 0x31c   : > { %8811 = vmatmul.mubr.msk.bf16.gmra.mxu1 %vm1876_vm0, %v1859_v53 }
 0x32d   : > { %v2356_v60 = vpop.permute.xlu1 %2355 }
 0x32e   : > { %v2402_v41 = vsel %vm1876_vm0, %v2356_v60, 0 }
 0x330   : > { %v1636_v3 = vpop.f32.mrf.mxu1 }
 0x331   : > { %v1637_v1 = vadd.f32 %v1636_v3, %v11159_v19  ;;  %v2354_v51 = vpop.permute.xlu1 %2353 }
 0x332   : > { %v11332_v0 = vpop.f32.mrf.mxu1  ;;  %v2399_v22 = vsel %vm1876_vm0, %v2354_v51, 0 }
 0x334   : > { %v1640_v40 = vpop.f32.mrf.mxu1 }
 0x335   : > { %v1641_v42 = vadd.f32 %v1640_v40, %v11159_v19  ;;  %v2358_v32 = vpop.permute.xlu0 %2357  ;;  %v2352_v37 = vpop.permute.xlu1 %2351 }
 0x336   : > { %v11336_v59 = vpop.f32.mrf.mxu1  ;;  %9110 = vmatprep.subr.msk.bf16.mxu0 %vm1876_vm0, %v2358_v32  ;;  %v2405_v33 = vsel %vm1876_vm0, %v2358_v32, 0  ;;  %v2396_v18 = vsel %vm1876_vm0, %v2352_v37, 0 }
 0x337   : > { %v11340_v43 = vpack.c.bf16 %v1641_v42, %v1637_v1  ;;  %8847 = vmatpush3.bf16.xpose.msra.mxu0 %v2405_v33  ;;  %v11396_v1 = vrot.slane %v11143_v7, %v14496_v54 }
 0x338   : > { %v1646_v21 = vpop.f32.mrf.mxu1  ;;  %9111 = vmatprep.subr.msk.bf16.mxu0 %vm1876_vm0, %v2356_v60 }
 0x339   : > { %14604 = vst [vmem:[#allocation14_spill] sm:$0xff] %v11340_v43  ;;  %v2350_v6 = vpop.permute.xlu0 %2349  ;;  %v1647_v56 = vadd.f32 %v1646_v21, %v11159_v19  ;;  %v2348_v38 = vpop.permute.xlu1 %2347 }
 0x33a   : > { %v11343_v49 = vpop.f32.mrf.mxu1  ;;  %v2393_v5 = vsel %vm1876_vm0, %v2350_v6, 0  ;;  %v2390_v16 = vsel %vm1876_vm0, %v2348_v38, 0 }
 0x33c   : > { %v1650_v46 = vpop.f32.mrf.mxu1 }
 0x33d   : > { %v1651_v31 = vadd.f32 %v1650_v46, %v11159_v19  ;;  %v2346_v45 = vpop.permute.xlu0 %2345  ;;  %v2344_v46 = vpop.permute.xlu1 %2343 }
 0x33e   : > { %v11347_v44 = vpop.f32.mrf.mxu1 }
 0x33f   : > { %v11350_v23 = vpack.c.bf16 %v1651_v31, %v1647_v56  ;;  %8849 = vmatpush3.bf16.xpose.msra.mxu0 %v2402_v41 }
 0x340   : > { %v1656_v10 = vpop.f32.mrf.mxu1  ;;  %9112 = vmatprep.subr.msk.bf16.mxu0 %vm1876_vm0, %v2354_v51  ;;  %v11364_v30 = vpop.f32.mrf.mxu0 }
 0x341   : > { %14605 = vst [vmem:[#allocation15_spill] sm:$0xff] %v11350_v23  ;;  %v2320_v17 = vpop.permute.xlu0 %2319  ;;  %v1657_v14 = vadd.f32 %v1656_v10, %v11159_v19 }
 0x342   : > { %v11353_v57 = vpop.f32.mrf.mxu1  ;;  %8862 = vmatprep.mubr.msk.bf16.mxu0 %vm1876_vm0, %v2320_v17  ;;  %v11371_v52 = vpop.f32.mrf.mxu0 }
 0x344   : > { %v1660_v2 = vpop.f32.mrf.mxu1  ;;  %v11376_v61 = vpop.f32.mrf.mxu0 }
 0x345   : > { %v1661_v39 = vadd.f32 %v1660_v2, %v11159_v19 }
 0x346   : > { %v11358_v13 = vpop.f32.mrf.mxu1  ;;  %v11381_v47 = vpop.f32.mrf.mxu0 }
 0x347   : > { %v11361_v20 = vpack.c.bf16 %v1661_v39, %v1657_v14  ;;  %8851 = vmatpush3.bf16.xpose.msra.mxu0 %v2399_v22 }
 0x348   : > { %v1666_v35 = vpop.f32.mrf.mxu1  ;;  %9113 = vmatprep.subr.msk.bf16.mxu0 %vm1876_vm0, %v2352_v37  ;;  %v11386_v53 = vpop.f32.mrf.mxu0 }
 0x349   : > { %14606 = vst [vmem:[#allocation16_spill] sm:$0xff] %v11361_v20  ;;  %v1667_v63 = vadd.f32 %v1666_v35, %v11159_v19 }
 0x34a   : > { %v1668_v27 = vpop.f32.mrf.mxu1  ;;  %v11390_v25 = vpop.f32.mrf.mxu0 }
 0x34b   : > { %v1669_v14 = vadd.f32 %v1668_v27, %v11235_v15 }
 0x34c   : > { %v1670_v50 = vpop.f32.mrf.mxu1  ;;  %v11398_v42 = vpop.f32.mrf.mxu0 }
 0x34d   : > { %v1671_v34 = vadd.f32 %v1670_v50, %v11159_v19 }
 0x34e   : > { %v1672_v36 = vpop.f32.mrf.mxu1  ;;  %v11406_v41 = vpop.f32.mrf.mxu0 }
 0x34f   : > { %v11369_v55 = vpack.c.bf16 %v1671_v34, %v1667_v63  ;;  %8853 = vmatpush3.bf16.xpose.msra.mxu0 %v2396_v18  ;;  %v1673_v10 = vadd.f32 %v1672_v36, %v11235_v15  ;;  %v2384_v18 = vsel %vm1876_vm0, %v2344_v46, 0 }
 0x350   : > { %v8752_v62 = vpop.f32.mrf.mxu1  ;;  %9114 = vmatprep.subr.msk.bf16.mxu0 %vm1876_vm0, %v2350_v6  ;;  %v2387_v6 = vsel %vm1876_vm0, %v2346_v45, 0  ;;  %v11417_v39 = vpop.f32.mrf.mxu0 }
 0x351   : > { %14607 = vst [vmem:[#allocation17_spill] sm:$0xff] %v11369_v55  ;;  %v1718_v22 = vadd.f32 %v8752_v62, %v11396_v1  ;;  %v2913_v63 = vpack.c.bf16 %v1673_v10, %v1669_v14 }
 0x352   : > { %v11374_v11 = vpop.f32.mrf.mxu1 }
 0x354   : > { %v8753_v4 = vpop.f32.mrf.mxu1 }
 0x356   : > { %v11378_v48 = vpop.f32.mrf.mxu1 }
 0x357   : > { %8855 = vmatpush3.bf16.xpose.msra.mxu0 %v2393_v5 }
 0x358   : > { %v8756_v12 = vpop.f32.mrf.mxu1  ;;  %9115 = vmatprep.subr.msk.bf16.mxu0 %vm1876_vm0, %v2348_v38  ;;  %v11430_v38 = vpop.f32.mrf.mxu0 }
 0x359   : > { %v1734_v51 = vadd.f32 %v8756_v12, %v11396_v1 }
 0x35a   : > { %v11384_v9 = vpop.f32.mrf.mxu1 }
 0x35c   : > { %v8757_v26 = vpop.f32.mrf.mxu1 }
 0x35d   : > { %v1737_v56 = vadd.f32 %v8757_v26, %v11396_v1 }
 0x35e   : > { %v1728_v8 = vpop.f32.mrf.mxu1 }
 0x35f   : > { %8857 = vmatpush3.bf16.xpose.msra.mxu0 %v2390_v16  ;;  %v11414_v2 = vpack.c.bf16 %v1737_v56, %v1734_v51  ;;  %v1726_v51 = vadd.f32 %v11384_v9, %v11396_v1  ;;  %v2968_v9 = vsel %vm1876_vm0, %v2913_v63, 0 }
 0x360   : > { %v8760_v3 = vpop.f32.mrf.mxu1  ;;  %9116 = vmatprep.subr.msk.bf16.mxu0 %vm1876_vm0, %v2346_v45  ;;  %v1721_v45 = vadd.f32 %v8753_v4, %v11396_v1 }
 0x361   : > { %v1750_v33 = vadd.f32 %v8760_v3, %v11396_v1 }
 0x362   : > { %v1741_v40 = vpop.f32.mrf.mxu1  ;;  %v11424_v34 = vpack.c.bf16 %v1721_v45, %v1718_v22  ;;  %v1713_v45 = vadd.f32 %v11378_v48, %v11396_v1  ;;  %v1710_v48 = vadd.f32 %v11374_v11, %v11396_v1 }
 0x363   : > { %v1742_v26 = vadd.f32 %v1741_v40, %v11396_v1  ;;  %v1659_v40 = vadd.f32 %v11353_v57, %v11235_v15 }
 0x364   : > { %v8761_v32 = vpop.f32.mrf.mxu1 }
 0x365   : > { %v1753_v60 = vadd.f32 %v8761_v32, %v11396_v1  ;;  %v1663_v32 = vadd.f32 %v11358_v13, %v11235_v15 }
 0x366   : > { %v1744_v21 = vpop.f32.mrf.mxu1 }
 0x367   : > { %v11404_v31 = vpack.c.bf16 %v1753_v60, %v1750_v33  ;;  %8859 = vmatpush3.bf16.xpose.msra.mxu0 %v2387_v6  ;;  %v1745_v27 = vadd.f32 %v1744_v21, %v11396_v1  ;;  %v1729_v60 = vadd.f32 %v1728_v8, %v11396_v1  ;;  %v2324_v8 = vpop.permute.xlu0 %2323  ;;  %v2912_v10 = vpack.c.bf16 %v1663_v32, %v1659_v40 }
 0x368   : > { %v8764_v7 = vpop.f32.mrf.mxu1  ;;  %9117 = vmatprep.subr.msk.bf16.mxu0 %vm1876_vm0, %v2344_v46  ;;  %v11444_v46 = vpop.f32.mrf.mxu0 }
 0x369   : > { %2706 = vrot.lane.b32.xlu1 %v11404_v31, %s10421_s12  ;;  %v1766_v35 = vadd.f32 %v8764_v7, %v11396_v1  ;;  %v1872_v21 = vpack.c.bf16 %v1745_v27, %v1742_v26  ;;  %v2322_v7 = vpop.permute.xlu1 %2321  ;;  %v11472_v27 = vpack.c.bf16 %v1713_v45, %v1710_v48 }
 0x36a   : > { %v1757_v17 = vpop.f32.mrf.mxu1 }
 0x36b   : > { %v1758_v4 = vadd.f32 %v1757_v17, %v11396_v1  ;;  %v1870_v17 = vpack.c.bf16 %v1729_v60, %v1726_v51 }
 0x36c   : > { %v8765_v37 = vpop.f32.mrf.mxu1 }
 0x36d   : > { %v1769_v50 = vadd.f32 %v8765_v37, %v11396_v1  ;;  %2702 = vrot.lane.b32.xlu1 %v11414_v2, %s10421_s12  ;;  %v11459_v37 = vpop.f32.mrf.mxu0 }
 0x36e   : > { %v1760_v36 = vpop.f32.mrf.mxu1 }
 0x36f   : > { %v1875_v5 = vpack.c.bf16 %v1769_v50, %v1766_v35  ;;  %v1761_v62 = vadd.f32 %v1760_v36, %v11396_v1  ;;  %8861 = vmatpush3.bf16.xpose.msra.mxu0 %v2384_v18  ;;  %v1653_v18 = vadd.f32 %v11347_v44, %v11235_v15  ;;  %v11476_v11 = vpop.f32.mrf.mxu0  ;;  %v2328_v44 = vpop.permute.xlu0 %2327 }
 0x370   : > { %v8768_v12 = vpop.f32.mrf.mxu1  ;;  %9118 = vmatprep.subr.msk.bf16.mxu0 %vm1876_vm0, %v2913_v63 }
 0x371   : > { %v1874_v16 = vpack.c.bf16 %v1761_v62, %v1758_v4  ;;  %v1782_v3 = vadd.f32 %v8768_v12, %v11396_v1  ;;  %2698 = vrot.lane.b32.xlu1 %v11424_v34, %s10421_s12  ;;  %2710 = vrot.lane.b32.xlu0 %v1875_v5, %s10421_s12  ;;  %v1649_v62 = vadd.f32 %v11343_v49, %v11235_v15  ;;  %v2326_v12 = vpop.permute.xlu1 %2325  ;;  %v2965_v49 = vsel %vm1876_vm0, %v2912_v10, 0 }
 0x372   : > { %8814 = vmatprep.subr.bf16.mxu1 %v1875_v5  ;;  %v1773_v33 = vpop.f32.mrf.mxu1 }
 0x373   : > { %v1774_v6 = vadd.f32 %v1773_v33, %v11396_v1  ;;  %8815 = vmatpush3.bf16.msra.mxu1 %v1875_v5  ;;  %v1628_v33 = vpop.f32.mrf.mxu0 }
 0x374   : > { %8816 = vmatprep.subr.bf16.mxu1 %v1874_v16  ;;  %v8769_v56 = vpop.f32.mrf.mxu1 }
 0x375   : > { %v1785_v13 = vadd.f32 %v8769_v56, %v11396_v1  ;;  %2704 = vrot.lane.b32.xlu0 %v1872_v21, %s10421_s12  ;;  %3402 = vrot.lane.b32.xlu1 %v2913_v63, %s10421_s12  ;;  %v11502_v51 = vpop.f32.mrf.mxu0  ;;  %v2330_v45 = vpop.permute.xlu1 %2329 }
 0x376   : > { %v1776_v57 = vpop.f32.mrf.mxu1  ;;  %8863 = vmatmul.mubr.msk.bf16.vlgmr.msra.gmra.mxu0 %vm1876_vm0, %v2322_v7 }
 0x377   : > { %v11454_v14 = vpack.c.bf16 %v1785_v13, %v1782_v3  ;;  %v1777_v22 = vadd.f32 %v1776_v57, %v11396_v1  ;;  %8817 = vmatpush3.bf16.msra.mxu1 %v1874_v16  ;;  %8866 = vmatprep.mubr.msk.bf16.mxu0 %vm1876_vm0, %v2324_v8  ;;  %v11484_v3 = vpack.c.bf16 %v1653_v18, %v1649_v62 }
 0x378   : > { %8818 = vmatprep.subr.bf16.mxu1 %v11404_v31  ;;  %8911 = vmatpush3.bf16.xpose.msra.mxu0 %v2968_v9  ;;  %v8772_v35 = vpop.f32.mrf.mxu1  ;;  %v1639_v8 = vadd.f32 %v11332_v0, %v11235_v15  ;;  %v1632_v0 = vpop.f32.mrf.mxu0 }
 0x379   : > { %14608 = vst [vmem:[#allocation18_spill] sm:$0xff] %v11454_v14  ;;  %v11464_v50 = vpack.c.bf16 %v1777_v22, %v1774_v6  ;;  %v1798_v36 = vadd.f32 %v8772_v35, %v11396_v1  ;;  %9119 = vmatprep.subr.msk.bf16.mxu0 %vm1876_vm0, %v2912_v10  ;;  %2700 = vrot.lane.b32.xlu0 %v1870_v17, %s10421_s12  ;;  %v2332_v22 = vpop.permute.xlu0 %2331  ;;  %v2962_v35 = vsel %vm1876_vm0, %v11484_v3, 0 }
 0x37a   : > { %2708 = vrot.lane.b32.xlu1 %v1874_v16, %s10421_s12  ;;  %v1789_v63 = vpop.f32.mrf.mxu1 }
 0x37b   : > { %14609 = vst [vmem:[#allocation19_spill] sm:$0xff] %v11464_v50  ;;  %v1790_v4 = vadd.f32 %v1789_v63, %v11396_v1  ;;  %8819 = vmatpush3.bf16.msra.mxu1 %v11404_v31 }
 0x37c   : > { %8820 = vmatprep.subr.bf16.mxu1 %v1872_v21  ;;  %v8773_v5 = vpop.f32.mrf.mxu1 }
 0x37d   : > { %v1801_v26 = vadd.f32 %v8773_v5, %v11396_v1  ;;  %2696 = vrot.lane.b32.xlu0 %v11472_v27, %s10421_s12  ;;  %v1633_v5 = vadd.f32 %v1632_v0, %v11235_v15 }
 0x37e   : > { %v1792_v16 = vpop.f32.mrf.mxu1  ;;  %8867 = vmatmul.mubr.msk.bf16.gmra.mxu0 %vm1876_vm0, %v2326_v12 }
 0x37f   : > { %v11486_v31 = vpack.c.bf16 %v1801_v26, %v1798_v36  ;;  %v1793_v32 = vadd.f32 %v1792_v16, %v11396_v1  ;;  %8821 = vmatpush3.bf16.msra.mxu1 %v1872_v21  ;;  %8870 = vmatprep.mubr.msk.bf16.mxu0 %vm1876_vm0, %v2328_v44  ;;  %v1643_v21 = vadd.f32 %v11336_v59, %v11235_v15  ;;  %v2334_v26 = vpop.permute.xlu1 %2333 }
 0x380   : > { %8822 = vmatprep.subr.bf16.mxu1 %v11414_v2  ;;  %8913 = vmatpush3.bf16.xpose.msra.mxu0 %v2965_v49  ;;  %v8776_v60 = vpop.f32.mrf.mxu1  ;;  %v1601_v36 = vadd.f32 %v11376_v61, %v11159_v19  ;;  %v1629_v44 = vadd.f32 %v1628_v33, %v11235_v15 }
 0x381   : > { %14610 = vst [vmem:[#allocation20_spill] sm:$0xff] %v11486_v31  ;;  %v11492_v6 = vpack.c.bf16 %v1793_v32, %v1790_v4  ;;  %v1814_v40 = vadd.f32 %v8776_v60, %v11396_v1  ;;  %9120 = vmatprep.subr.msk.bf16.mxu0 %vm1876_vm0, %v11484_v3  ;;  %3400 = vrot.lane.b32.xlu0 %v2912_v10, %s10421_s12 }
 0x382   : > { %v1805_v56 = vpop.f32.mrf.mxu1  ;;  %v11508_v9 = vpack.c.bf16 %v1643_v21, %v1639_v8  ;;  %v1597_v4 = vadd.f32 %v11364_v30, %v11159_v19  ;;  %v11535_v30 = vpack.c.bf16 %v1633_v5, %v1629_v44  ;;  %v1613_v21 = vadd.f32 %v11406_v41, %v11235_v15 }
 0x383   : > { %14611 = vst [vmem:[#allocation21_spill] sm:$0xff] %v11492_v6  ;;  %v1806_v7 = vadd.f32 %v1805_v56, %v11396_v1  ;;  %8823 = vmatpush3.bf16.msra.mxu1 %v11414_v2  ;;  %v1599_v8 = vadd.f32 %v11371_v52, %v11235_v15  ;;  %v1617_v52 = vadd.f32 %v11417_v39, %v11159_v19 }
 0x384   : > { %8824 = vmatprep.subr.bf16.mxu1 %v1870_v17  ;;  %v8777_v13 = vpop.f32.mrf.mxu1  ;;  %14612 = vst [vmem:[#allocation22_spill] sm:$0xff] %v11508_v9  ;;  %v11530_v12 = vpack.c.bf16 %v1601_v36, %v1597_v4 }
 0x385   : > { %v1817_v57 = vadd.f32 %v8777_v13, %v11396_v1 }
 0x386   : > { %v1808_v10 = vpop.f32.mrf.mxu1  ;;  %8871 = vmatmul.mubr.msk.bf16.gmra.mxu0 %vm1876_vm0, %v2330_v45  ;;  %14615 = vst [vmem:[#allocation25_spill] sm:$0xff] %v11530_v12 }
 0x387   : > { %v11510_v59 = vpack.c.bf16 %v1817_v57, %v1814_v40  ;;  %v1809_v2 = vadd.f32 %v1808_v10, %v11396_v1  ;;  %8825 = vmatpush3.bf16.msra.mxu1 %v1870_v17  ;;  %8874 = vmatprep.mubr.msk.bf16.mxu0 %vm1876_vm0, %v2332_v22  ;;  %v1623_v40 = vadd.f32 %v11459_v37, %v11235_v15 }
 0x388   : > { %8826 = vmatprep.subr.bf16.mxu1 %v11424_v34  ;;  %8915 = vmatpush3.bf16.xpose.msra.mxu0 %v2962_v35  ;;  %v8780_v48 = vpop.f32.mrf.mxu1  ;;  %v1603_v37 = vadd.f32 %v11381_v47, %v11235_v15  ;;  %v1611_v57 = vadd.f32 %v11398_v42, %v11159_v19  ;;  %v1621_v47 = vadd.f32 %v11444_v46, %v11159_v19 }
 0x389   : > { %14613 = vst [vmem:[#allocation23_spill] sm:$0xff] %v11510_v59  ;;  %v11519_v63 = vpack.c.bf16 %v1809_v2, %v1806_v7  ;;  %v1830_v18 = vadd.f32 %v8780_v48, %v11396_v1  ;;  %9121 = vmatprep.subr.msk.bf16.mxu0 %vm1876_vm0, %v11508_v9  ;;  %v1609_v7 = vadd.f32 %v11390_v25, %v11235_v15  ;;  %v11610_v2 = vld [vmem:[%s14472_s1 + $0x10] sm:$0xff]  ;;  %v11622_v48 = vld [vmem:[%s14472_s1] sm:$0xff]  ;;  %v7863_v59 = vld [vmem:[%s14472_s1 + $0xd8] sm:$0xff] }
 0x38a   : > { %v1821_v17 = vpop.f32.mrf.mxu1  ;;  %v11573_v45 = vpack.c.bf16 %v1603_v37, %v1599_v8  ;;  %v11591_v10 = vpack.c.bf16 %v1621_v47, %v1617_v52  ;;  %v1631_v42 = vadd.f32 %v11502_v51, %v11159_v19  ;;  %v1627_v46 = vadd.f32 %v11476_v11, %v11159_v19 }
 0x38b   : > { %14614 = vst [vmem:[#allocation24_spill] sm:$0xff] %v11519_v63  ;;  %v1822_v62 = vadd.f32 %v1821_v17, %v11396_v1  ;;  %8827 = vmatpush3.bf16.msra.mxu1 %v11424_v34  ;;  %v2959_v34 = vsel %vm1876_vm0, %v11508_v9, 0  ;;  %v11563_v13 = vpack.c.bf16 %v1613_v21, %v1609_v7 }
 0x38c   : > { %8828 = vmatprep.subr.bf16.mxu1 %v11472_v27  ;;  %v8781_v61 = vpop.f32.mrf.mxu1  ;;  %14618 = vst [vmem:[#allocation28_spill] sm:$0xff] %v11573_v45  ;;  %v2947_v41 = vsel %vm1876_vm0, %v11573_v45, 0  ;;  %14620 = vst [vmem:[#allocation30_spill] sm:$0xff] %v11591_v10 }
 0x38d   : > { %v1833_v16 = vadd.f32 %v8781_v61, %v11396_v1  ;;  %14617 = vst [vmem:[#allocation27_spill] sm:$0xff] %v11563_v13  ;;  %v2950_v25 = vsel %vm1876_vm0, %v11563_v13, 0  ;;  %v11636_v61 = vld [vmem:[%s14472_s1 + $0x18] sm:$0xff] }
 0x38e   : > { %v1824_v32 = vpop.f32.mrf.mxu1  ;;  %8875 = vmatmul.mubr.msk.bf16.gmra.mxu0 %vm1876_vm0, %v2334_v26 }
 0x38f   : > { %v11537_v49 = vpack.c.bf16 %v1833_v16, %v1830_v18  ;;  %v1825_v60 = vadd.f32 %v1824_v32, %v11396_v1  ;;  %8829 = vmatpush3.bf16.msra.mxu1 %v11472_v27  ;;  %8926 = vmatprep.mubr.msk.bf16.mxu0 %vm1876_vm0, %v11530_v12  ;;  %v1619_v1 = vadd.f32 %v11430_v38, %v11235_v15  ;;  %v2956_v27 = vsel %vm1876_vm0, %v11535_v30, 0  ;;  %v11628_v18 = vld [vmem:[%s14472_s1 + $0x8] sm:$0xff] }
 0x390   : > { %8917 = vmatpush3.bf16.xpose.msra.mxu0 %v2959_v34  ;;  %v1607_v15 = vadd.f32 %v11386_v53, %v11159_v19  ;;  %v11601_v53 = vpack.c.bf16 %v1631_v42, %v1627_v46  ;;  %v11651_v34 = vld [vmem:[%s14472_s1 + $0x30] sm:$0xff]  ;;  %v11691_v46 = vld [vmem:[%s14472_s1 + $0x58] sm:$0xff] }
 0x391   : > { %v11545_v33 = vpack.c.bf16 %v1825_v60, %v1822_v62  ;;  %9122 = vmatprep.subr.msk.bf16.mxu0 %vm1876_vm0, %v11535_v30  ;;  %v11553_v56 = vpack.c.bf16 %v1623_v40, %v1619_v1  ;;  %v11656_v40 = vld [vmem:[%s14472_s1 + $0x38] sm:$0xff]  ;;  %v11686_v42 = vld [vmem:[%s14472_s1 + $0x50] sm:$0xff] }
 0x392   : > { %v11589_v22 = vpack.c.bf16 %v1611_v57, %v1607_v15  ;;  %14621 = vst [vmem:[#allocation31_spill] sm:$0xff] %v11601_v53 }
 0x393   : > { %14616 = vst [vmem:[#allocation26_spill] sm:$0xff] %v11545_v33  ;;  %v2953_v38 = vsel %vm1876_vm0, %v11553_v56, 0 }
 0x394   : > { %14619 = vst [vmem:[#allocation29_spill] sm:$0xff] %v11589_v22 }
 0x398   : > { %8919 = vmatpush3.bf16.xpose.msra.mxu0 %v2956_v27 }
 0x399   : > { %9123 = vmatprep.subr.msk.bf16.mxu0 %vm1876_vm0, %v11553_v56 }
 0x3a0   : > { %8921 = vmatpush3.bf16.xpose.msra.mxu0 %v2953_v38 }
 0x3a1   : > { %9124 = vmatprep.subr.msk.bf16.mxu0 %vm1876_vm0, %v11563_v13 }
 0x3a8   : > { %8923 = vmatpush3.bf16.xpose.msra.mxu0 %v2950_v25  ;;  %v11668_v25 = vld [vmem:[%s14472_s1 + $0x20] sm:$0xff] }
 0x3a9   : > { %9125 = vmatprep.subr.msk.bf16.mxu0 %vm1876_vm0, %v11573_v45 }
 0x3b0   : > { %8925 = vmatpush3.bf16.xpose.msra.mxu0 %v2947_v41  ;;  %v11673_v41 = vld [vmem:[%s14472_s1 + $0x28] sm:$0xff] }
 0x3b7   : > { %8927 = vmatmul.mubr.msk.bf16.vlgmr.msra.gmra.mxu0 %vm1876_vm0, %v11589_v22 }
 0x3b8   : > { %8930 = vmatprep.mubr.msk.bf16.mxu0 %vm1876_vm0, %v11591_v10 }
 0x3bf   : > { %8931 = vmatmul.mubr.msk.bf16.gmra.mxu0 %vm1876_vm0, %v11601_v53 }
 0x3c0   : > { %8934 = vmatprep.mubr.msk.bf16.mxu0 %vm1876_vm0, %v11340_v43 }
 0x3c4   : > { %v8800_v39 = vpop.f32.mrf.mxu1 }
 0x3c5   : > { %v2024_v35 = vmul.f32 0.125, %v8800_v39 }
 0x3c6   : > { %v1959_v0 = vpop.f32.mrf.mxu1 }
 0x3c7   : > { %v2022_v51 = vmul.f32 0.125, %v1959_v0  ;;  %8935 = vmatmul.mubr.msk.bf16.gmra.mxu0 %vm1876_vm0, %v11350_v23  ;;  %v11615_v19 = vadd.f32 %v2024_v35, %v11610_v2 }
 0x3c8   : > { %v8801_v11 = vpop.f32.mrf.mxu1  ;;  %8938 = vmatprep.mubr.msk.bf16.mxu0 %vm1876_vm0, %v11361_v20 }
 0x3c9   : > { %2058 = vmax.xlane.f32.xlu0 %v11615_v19  ;;  %v2025_v17 = vmul.f32 0.125, %v8801_v11  ;;  %v11631_v5 = vadd.f32 %v2022_v51, %v11622_v48 }
 0x3ca   : > { %v1962_v36 = vpop.f32.mrf.mxu1 }
 0x3cb   : > { %v2023_v4 = vmul.f32 0.125, %v1962_v36  ;;  %v11646_v32 = vadd.f32 %v2025_v17, %v11636_v61 }
 0x3cc   : > { %v8804_v62 = vpop.f32.mrf.mxu1 }
 0x3cd   : > { %2054 = vmax.xlane.f32.xlu0 %v11631_v5  ;;  %v11640_v26 = vadd.f32 %v2023_v4, %v11628_v18  ;;  %v2028_v16 = vmul.f32 0.125, %v8804_v62  ;;  %v11704_v4 = vld [vmem:[%s14472_s1 + $0x40] sm:$0xff]  ;;  %v11709_v62 = vld [vmem:[%s14472_s1 + $0x48] sm:$0xff] }
 0x3ce   : > { %v1975_v44 = vpop.f32.mrf.mxu1 }
 0x3cf   : > { %2056 = vmax.xlane.f32.xlu1 %v11640_v26  ;;  %8939 = vmatmul.mubr.msk.bf16.gmra.mxu0 %vm1876_vm0, %v11369_v55  ;;  %v2026_v21 = vmul.f32 0.125, %v1975_v44  ;;  %v11660_v38 = vadd.f32 %v2028_v16, %v11651_v34 }
 0x3d0   : > { %v8805_v60 = vpop.f32.mrf.mxu1 }
 0x3d1   : > { %v2029_v1 = vmul.f32 0.125, %v8805_v60  ;;  %2060 = vmax.xlane.f32.xlu0 %v11646_v32  ;;  %v11678_v15 = vadd.f32 %v2026_v21, %v11668_v25  ;;  %v11722_v21 = vld [vmem:[%s14472_s1 + $0x70] sm:$0xff] }
 0x3d2   : > { %v1978_v27 = vpop.f32.mrf.mxu1 }
 0x3d3   : > { %v2027_v7 = vmul.f32 0.125, %v1978_v27  ;;  %v11663_v37 = vadd.f32 %v2029_v1, %v11656_v40 }
 0x3d4   : > { %v8808_v8 = vpop.f32.mrf.mxu1 }
 0x3d5   : > { %2066 = vmax.xlane.f32.xlu0 %v11660_v38  ;;  %2068 = vmax.xlane.f32.xlu1 %v11663_v37  ;;  %v2032_v47 = vmul.f32 0.125, %v8808_v8  ;;  %v11681_v52 = vadd.f32 %v2027_v7, %v11673_v41  ;;  %v11727_v7 = vld [vmem:[%s14472_s1 + $0x78] sm:$0xff] }
 0x3d6   : > { %v1991_v57 = vpop.f32.mrf.mxu1 }
 0x3d7   : > { %v11696_v51 = vadd.f32 %v2032_v47, %v11686_v42  ;;  %v2030_v11 = vmul.f32 0.125, %v1991_v57 }
 0x3d8   : > { %v8809_v39 = vpop.f32.mrf.mxu1 }
 0x3d9   : > { %v2033_v35 = vmul.f32 0.125, %v8809_v39  ;;  %2062 = vmax.xlane.f32.xlu0 %v11678_v15  ;;  %2064 = vmax.xlane.f32.xlu1 %v11681_v52  ;;  %v11714_v60 = vadd.f32 %v2030_v11, %v11704_v4 }
 0x3da   : > { %v1994_v0 = vpop.f32.mrf.mxu1 }
 0x3db   : > { %v11699_v36 = vadd.f32 %v2033_v35, %v11691_v46  ;;  %v2031_v17 = vmul.f32 0.125, %v1994_v0  ;;  %v11763_v24 = vpop.permute.xlu1 %2706 }
 0x3dc   : > { %v8812_v44 = vpop.f32.mrf.mxu1 }
 0x3dd   : > { %2074 = vmax.xlane.f32.xlu0 %v11696_v51  ;;  %2076 = vmax.xlane.f32.xlu1 %v11699_v36  ;;  %v11717_v1 = vadd.f32 %v2031_v17, %v11709_v62  ;;  %v2036_v27 = vmul.f32 0.125, %v8812_v44  ;;  %v11742_v44 = vld [vmem:[%s14472_s1 + $0x60] sm:$0xff] }
 0x3de   : > { %v2007_v16 = vpop.f32.mrf.mxu1 }
 0x3df   : > { %v11732_v39 = vadd.f32 %v2036_v27, %v11722_v21  ;;  %v2034_v35 = vmul.f32 0.125, %v2007_v16 }
 0x3e0   : > { %v8813_v8 = vpop.f32.mrf.mxu1 }
 0x3e1   : > { %v2037_v57 = vmul.f32 0.125, %v8813_v8  ;;  %2070 = vmax.xlane.f32.xlu0 %v11714_v60  ;;  %2072 = vmax.xlane.f32.xlu1 %v11717_v1  ;;  %v11747_v8 = vld [vmem:[%s14472_s1 + $0x68] sm:$0xff]  ;;  %v11753_v16 = vadd.f32 %v2034_v35, %v11742_v44 }
 0x3e2   : > { %v2010_v47 = vpop.f32.mrf.mxu1 }
 0x3e3   : > { %v11735_v0 = vadd.f32 %v2037_v57, %v11727_v7  ;;  %v2035_v11 = vmul.f32 0.125, %v2010_v47  ;;  %v11737_v17 = vpop.permute.xlu0 %2710 }
 0x3e4   : > { %8878 = vmatprep.subr.bf16.mxu1 %v11737_v17 }
 0x3e5   : > { %2082 = vmax.xlane.f32.xlu0 %v11732_v39  ;;  %2084 = vmax.xlane.f32.xlu1 %v11735_v0  ;;  %v11756_v27 = vadd.f32 %v2035_v11, %v11747_v8 }
 0x3e7   : > { %v11766_v35 = vpop.permute.xlu0 %2704 }
 0x3e9   : > { %2078 = vmax.xlane.f32.xlu0 %v11753_v16  ;;  %2080 = vmax.xlane.f32.xlu1 %v11756_v27 }
 0x436   : > { %v8864_v57 = vpop.f32.mrf.mxu0 }
 0x437   : > { %v2506_v47 = vmul.f32 0.125, %v8864_v57 }
 0x438   : > { %v2441_v58 = vpop.f32.mrf.mxu0 }
 0x439   : > { %v11761_v54 = vadd.f32 %v2506_v47, %v11610_v2  ;;  %v2504_v28 = vmul.f32 0.125, %v2441_v58 }
 0x43a   : > { %v8865_v29 = vpop.f32.mrf.mxu0 }
 0x43b   : > { %v2507_v55 = vmul.f32 0.125, %v8865_v29  ;;  %2540 = vmax.xlane.f32.xlu0 %v11761_v54  ;;  %v11769_v23 = vadd.f32 %v2504_v28, %v11622_v48  ;;  %v11776_v29 = vpop.permute.xlu1 %2702  ;;  %v11784_v48 = vpop.permute.xlu0 %2700 }
 0x43c   : > { %v2444_v11 = vpop.f32.mrf.mxu0 }
 0x43d   : > { %v11772_v13 = vadd.f32 %v2507_v55, %v11636_v61  ;;  %v2505_v57 = vmul.f32 0.125, %v2444_v11 }
 0x43e   : > { %v8868_v20 = vpop.f32.mrf.mxu0 }
 0x43f   : > { %v2510_v2 = vmul.f32 0.125, %v8868_v20  ;;  %2536 = vmax.xlane.f32.xlu0 %v11769_v23  ;;  %2542 = vmax.xlane.f32.xlu1 %v11772_v13  ;;  %v11779_v47 = vadd.f32 %v2505_v57, %v11628_v18 }
 0x440   : > { %v2457_v58 = vpop.f32.mrf.mxu0 }
 0x441   : > { %v11782_v43 = vadd.f32 %v2510_v2, %v11651_v34  ;;  %v2508_v28 = vmul.f32 0.125, %v2457_v58  ;;  %v11794_v34 = vpop.permute.xlu1 %2698  ;;  %v11798_v58 = vpop.permute.xlu0 %2696 }
 0x442   : > { %v8869_v55 = vpop.f32.mrf.mxu0 }
 0x443   : > { %v2511_v61 = vmul.f32 0.125, %v8869_v55  ;;  %2538 = vmax.xlane.f32.xlu1 %v11779_v47  ;;  %2548 = vmax.xlane.f32.xlu0 %v11782_v43  ;;  %v11789_v11 = vadd.f32 %v2508_v28, %v11668_v25 }
 0x444   : > { %v2460_v20 = vpop.f32.mrf.mxu0 }
 0x445   : > { %v11792_v53 = vadd.f32 %v2511_v61, %v11656_v40  ;;  %v2509_v18 = vmul.f32 0.125, %v2460_v20 }
 0x446   : > { %v8872_v57 = vpop.f32.mrf.mxu0 }
 0x447   : > { %v2514_v2 = vmul.f32 0.125, %v8872_v57  ;;  %2544 = vmax.xlane.f32.xlu0 %v11789_v11  ;;  %2550 = vmax.xlane.f32.xlu1 %v11792_v53  ;;  %v11801_v10 = vadd.f32 %v2509_v18, %v11673_v41  ;;  %v11808_v57 = vpop.permute.xlu1 %3402  ;;  %v11816_v18 = vpop.permute.xlu0 %3400 }
 0x448   : > { %v2473_v55 = vpop.f32.mrf.mxu0  ;;  %14622 = vst [vmem:[#allocation32_spill] sm:$0xff] %v11808_v57  ;;  %14623 = vst [vmem:[#allocation33_spill] sm:$0xff] %v11816_v18 }
 0x449   : > { %v11804_v25 = vadd.f32 %v2514_v2, %v11686_v42  ;;  %v2512_v40 = vmul.f32 0.125, %v2473_v55 }
 0x44a   : > { %v8873_v28 = vpop.f32.mrf.mxu0 }
 0x44b   : > { %v2515_v61 = vmul.f32 0.125, %v8873_v28  ;;  %2546 = vmax.xlane.f32.xlu1 %v11801_v10  ;;  %2556 = vmax.xlane.f32.xlu0 %v11804_v25  ;;  %v11811_v22 = vadd.f32 %v2512_v40, %v11704_v4 }
 0x44c   : > { %v2476_v20 = vpop.f32.mrf.mxu0 }
 0x44d   : > { %v11814_v50 = vadd.f32 %v2515_v61, %v11691_v46  ;;  %v2513_v41 = vmul.f32 0.125, %v2476_v20 }
 0x44e   : > { %v8876_v42 = vpop.f32.mrf.mxu0 }
 0x44f   : > { %v2518_v2 = vmul.f32 0.125, %v8876_v42  ;;  %2552 = vmax.xlane.f32.xlu0 %v11811_v22  ;;  %2558 = vmax.xlane.f32.xlu1 %v11814_v50  ;;  %v11821_v28 = vadd.f32 %v2513_v41, %v11709_v62  ;;  %v11829_v42 = vpop.permute.xlu1 %2708 }
 0x450   : > { %v2489_v55 = vpop.f32.mrf.mxu0 }
 0x451   : > { %v11824_v57 = vadd.f32 %v2518_v2, %v11722_v21  ;;  %v2516_v4 = vmul.f32 0.125, %v2489_v55 }
 0x452   : > { %v2059_v40 = vpop.xlane.xlu0 %2058  ;;  %v8877_v46 = vpop.f32.mrf.mxu0 }
 0x453   : > { %v2088_v61 = vsub.f32 %v11615_v19, %v2059_v40  ;;  %v2519_v20 = vmul.f32 0.125, %v8877_v46  ;;  %2554 = vmax.xlane.f32.xlu1 %v11821_v28  ;;  %2564 = vmax.xlane.f32.xlu0 %v11824_v57  ;;  %v11832_v12 = vadd.f32 %v2516_v4, %v11742_v44 }
 0x454   : > { %v2492_v18 = vpop.f32.mrf.mxu0 }
 0x455   : > { %v2106_v62 = vmul.f32 1.442695, %v2088_v61  ;;  %v11835_v21 = vadd.f32 %v2519_v20, %v11727_v7  ;;  %v2517_v41 = vmul.f32 0.125, %v2492_v18 }
 0x456   : > { %v2055_v2 = vpop.xlane.xlu0 %2054 }
 0x457   : > { %9372 = vpow2.f32 %v2106_v62  ;;  %v2086_v19 = vsub.f32 %v11631_v5, %v2055_v2  ;;  %2560 = vmax.xlane.f32.xlu0 %v11832_v12  ;;  %2566 = vmax.xlane.f32.xlu1 %v11835_v21  ;;  %v11841_v40 = vadd.f32 %v2517_v41, %v11747_v8 }
 0x458   : > { %v2057_v55 = vpop.xlane.xlu1 %2056 }
 0x459   : > { %v2102_v46 = vmul.f32 1.442695, %v2086_v19  ;;  %v2087_v4 = vsub.f32 %v11640_v26, %v2057_v55 }
 0x45a   : > { %v2061_v44 = vpop.xlane.xlu0 %2060 }
 0x45b   : > { %9374 = vpow2.f32 %v2102_v46  ;;  %v2089_v7 = vsub.f32 %v11646_v32, %v2061_v44  ;;  %2562 = vmax.xlane.f32.xlu1 %v11841_v40  ;;  %v2104_v20 = vmul.f32 1.442695, %v2087_v4 }
 0x45d   : > { %v2108_v18 = vmul.f32 1.442695, %v2089_v7 }
 0x45e   : > { %v2069_v61 = vpop.xlane.xlu1 %2068  ;;  %v2067_v5 = vpop.xlane.xlu0 %2066 }
 0x45f   : > { %9376 = vpow2.f32 %v2108_v18  ;;  %v2093_v62 = vsub.f32 %v11663_v37, %v2069_v61  ;;  %v2092_v2 = vsub.f32 %v11660_v38, %v2067_v5 }
 0x460   : > { %9378 = vpow2.f32 %v2104_v20 }
 0x461   : > { %v2114_v8 = vmul.f32 1.442695, %v2092_v2  ;;  %v2116_v46 = vmul.f32 1.442695, %v2093_v62 }
 0x462   : > { %v2065_v41 = vpop.xlane.xlu1 %2064  ;;  %v2063_v19 = vpop.xlane.xlu0 %2062 }
 0x463   : > { %v2091_v26 = vsub.f32 %v11681_v52, %v2065_v41  ;;  %v2090_v32 = vsub.f32 %v11678_v15, %v2063_v19  ;;  %9380 = vpow2.f32 %v2114_v8 }
 0x464   : > { %v11850_v55 = vpop.eup %9372  ;;  %9382 = vpow2.f32 %v2116_v46 }
 0x465   : > { %v2110_v44 = vmul.f32 1.442695, %v2090_v32  ;;  %2138 = vadd.xlane.f32.xlu0 %v11850_v55  ;;  %v2112_v37 = vmul.f32 1.442695, %v2091_v26 }
 0x466   : > { %v2077_v4 = vpop.xlane.xlu1 %2076  ;;  %v2075_v7 = vpop.xlane.xlu0 %2074 }
 0x467   : > { %v2097_v38 = vsub.f32 %v11699_v36, %v2077_v4  ;;  %v2096_v18 = vsub.f32 %v11696_v51, %v2075_v7  ;;  %9384 = vpow2.f32 %v2110_v44 }
 0x468   : > { %v11855_v61 = vpop.eup %9374  ;;  %9386 = vpow2.f32 %v2112_v37 }
 0x469   : > { %v2122_v52 = vmul.f32 1.442695, %v2096_v18  ;;  %2134 = vadd.xlane.f32.xlu0 %v11855_v61  ;;  %v2124_v20 = vmul.f32 1.442695, %v2097_v38 }
 0x46a   : > { %v2073_v15 = vpop.xlane.xlu1 %2072  ;;  %v2071_v5 = vpop.xlane.xlu0 %2070 }
 0x46b   : > { %v2095_v62 = vsub.f32 %v11717_v1, %v2073_v15  ;;  %v2094_v2 = vsub.f32 %v11714_v60, %v2071_v5  ;;  %9388 = vpow2.f32 %v2122_v52 }
 0x46c   : > { %v11860_v8 = vpop.eup %9376  ;;  %9390 = vpow2.f32 %v2124_v20 }
 0x46d   : > { %v2118_v36 = vmul.f32 1.442695, %v2094_v2  ;;  %2140 = vadd.xlane.f32.xlu1 %v11860_v8  ;;  %v2120_v41 = vmul.f32 1.442695, %v2095_v62  ;;  %v11863_v19 = vpop.eup %9378  ;;  %v7854_v2 = vld [vmem:[%s14472_s1 + $0x90] sm:$0xff] }
 0x46e   : > { %v2083_v51 = vpop.xlane.xlu0 %2082  ;;  %v2085_v46 = vpop.xlane.xlu1 %2084 }
 0x46f   : > { %9392 = vpow2.f32 %v2118_v36  ;;  %v2100_v26 = vsub.f32 %v11732_v39, %v2083_v51  ;;  %v2101_v60 = vsub.f32 %v11735_v0, %v2085_v46 }
 0x470   : > { %v11866_v32 = vpop.eup %9380  ;;  %9394 = vpow2.f32 %v2120_v41 }
 0x471   : > { %2136 = vadd.xlane.f32.xlu1 %v11863_v19  ;;  %2146 = vadd.xlane.f32.xlu0 %v11866_v32  ;;  %v11871_v1 = vpop.eup %9382  ;;  %v2130_v44 = vmul.f32 1.442695, %v2100_v26  ;;  %v2132_v7 = vmul.f32 1.442695, %v2101_v60  ;;  %v7855_v60 = vld [vmem:[%s14472_s1 + $0x98] sm:$0xff] }
 0x472   : > { %v2081_v38 = vpop.xlane.xlu1 %2080 }
 0x473   : > { %9396 = vpow2.f32 %v2130_v44  ;;  %v2099_v0 = vsub.f32 %v11756_v27, %v2081_v38 }
 0x474   : > { %v11873_v4 = vpop.eup %9384  ;;  %9398 = vpow2.f32 %v2132_v7 }
 0x475   : > { %2148 = vadd.xlane.f32.xlu1 %v11871_v1  ;;  %2142 = vadd.xlane.f32.xlu0 %v11873_v4  ;;  %v11877_v37 = vpop.eup %9386  ;;  %v2128_v51 = vmul.f32 1.442695, %v2099_v0 }
 0x477   : > { %v8928_v39 = vpop.f32.mrf.mxu0  ;;  %9400 = vpow2.f32 %v2128_v51 }
 0x478   : > { %v11879_v18 = vpop.eup %9388  ;;  %v3069_v20 = vmul.f32 0.125, %v8928_v39 }
 0x479   : > { %v3004_v52 = vpop.f32.mrf.mxu0  ;;  %2144 = vadd.xlane.f32.xlu1 %v11877_v37  ;;  %2154 = vadd.xlane.f32.xlu0 %v11879_v18  ;;  %v11884_v5 = vpop.eup %9390 }
 0x47a   : > { %v11897_v26 = vadd.f32 %v7854_v2, %v3069_v20  ;;  %v3067_v39 = vmul.f32 0.125, %v3004_v52  ;;  %v7853_v52 = vld [vmem:[%s14472_s1 + $0x88] sm:$0xff] }
 0x47b   : > { %v8929_v15 = vpop.f32.mrf.mxu0 }
 0x47c   : > { %v11886_v62 = vpop.eup %9392  ;;  %v3070_v41 = vmul.f32 0.125, %v8929_v15  ;;  %v7852_v15 = vld [vmem:[%s14472_s1 + $0x80] sm:$0xff] }
 0x47d   : > { %v3007_v36 = vpop.f32.mrf.mxu0  ;;  %2156 = vadd.xlane.f32.xlu1 %v11884_v5  ;;  %2150 = vadd.xlane.f32.xlu0 %v11886_v62  ;;  %v11895_v27 = vpop.eup %9394  ;;  %v11917_v14 = vadd.f32 %v7852_v15, %v3067_v39  ;;  %v7859_v39 = vld [vmem:[%s14472_s1 + $0xb8] sm:$0xff] }
 0x47e   : > { %v11906_v7 = vadd.f32 %v7855_v60, %v3070_v41  ;;  %v3068_v20 = vmul.f32 0.125, %v3007_v36 }
 0x47f   : > { %v11893_v46 = vpop.f32.mrf.mxu0 }
 0x480   : > { %v11908_v0 = vpop.eup %9396  ;;  %v11924_v41 = vadd.f32 %v7853_v52, %v3068_v20  ;;  %v7857_v20 = vld [vmem:[%s14472_s1 + $0xa8] sm:$0xff] }
 0x481   : > { %v11902_v44 = vpop.f32.mrf.mxu0  ;;  %2152 = vadd.xlane.f32.xlu1 %v11895_v27  ;;  %3103 = vmax.xlane.f32.xlu0 %v11897_v26  ;;  %14624 = vst [vmem:[#allocation34_spill] sm:$0xff] %v11908_v0  ;;  %v11915_v2 = vpop.eup %9398 }
 0x483   : > { %v8933_v38 = vpop.f32.mrf.mxu0 }
 0x484   : > { %v3074_v45 = vmul.f32 0.125, %v8933_v38  ;;  %v11927_v36 = vpop.eup %9400 }
 0x485   : > { %3105 = vmax.xlane.f32.xlu1 %v11906_v7  ;;  %2162 = vadd.xlane.f32.xlu0 %v11908_v0  ;;  %v3023_v51 = vpop.f32.mrf.mxu0  ;;  %14625 = vst [vmem:[#allocation35_spill] sm:$0xff] %v11927_v36 }
 0x486   : > { %v11933_v6 = vadd.f32 %v7859_v39, %v3074_v45  ;;  %v3072_v31 = vmul.f32 0.125, %v3023_v51  ;;  %v7861_v39 = vld [vmem:[%s14472_s1 + $0xc8] sm:$0xff] }
 0x487   : > { %v8936_v60 = vpop.f32.mrf.mxu0 }
 0x488   : > { %v11939_v38 = vadd.f32 %v7857_v20, %v3072_v31 }
 0x489   : > { %2164 = vadd.xlane.f32.xlu1 %v11915_v2  ;;  %3099 = vmax.xlane.f32.xlu0 %v11917_v14  ;;  %v3036_v15 = vpop.f32.mrf.mxu0 }
 0x48b   : > { %v8937_v52 = vpop.f32.mrf.mxu0 }
 0x48c   : > { %v3078_v63 = vmul.f32 0.125, %v8937_v52  ;;  %v7866_v52 = vld [vmem:[%s14472_s1 + $0xf0] sm:$0xff] }
 0x48d   : > { %3101 = vmax.xlane.f32.xlu1 %v11924_v41  ;;  %v3039_v33 = vpop.f32.mrf.mxu0 }
 0x48e   : > { %v11945_v45 = vadd.f32 %v7863_v59, %v3078_v63  ;;  %v3076_v51 = vmul.f32 0.125, %v3039_v33  ;;  %v7864_v33 = vld [vmem:[%s14472_s1 + $0xe0] sm:$0xff] }
 0x48f   : > { %v8940_v9 = vpop.f32.mrf.mxu0 }
 0x490   : > { %14626 = vst [vmem:[#allocation36_spill] sm:$0xff] %v11945_v45  ;;  %v11951_v31 = vadd.f32 %v7861_v39, %v3076_v51  ;;  %v3081_v20 = vmul.f32 0.125, %v8940_v9  ;;  %v2079_v9 = vpop.xlane.xlu0 %2078 }
 0x491   : > { %2160 = vadd.xlane.f32.xlu1 %v11927_v36  ;;  %v3052_v0 = vpop.f32.mrf.mxu0 }
 0x492   : > { %14627 = vst [vmem:[#allocation37_spill] sm:$0xff] %v11951_v31  ;;  %v11959_v59 = vadd.f32 %v7866_v52, %v3081_v20  ;;  %v3079_v63 = vmul.f32 0.125, %v3052_v0  ;;  %v2098_v20 = vsub.f32 %v11753_v16, %v2079_v9 }
 0x493   : > { %v8941_v51 = vpop.f32.mrf.mxu0 }
 0x494   : > { %14628 = vst [vmem:[#allocation38_spill] sm:$0xff] %v11959_v59  ;;  %v11965_v39 = vadd.f32 %v7864_v33, %v3079_v63  ;;  %v3073_v33 = vmul.f32 0.125, %v11893_v46 }
 0x495   : > { %3113 = vmax.xlane.f32.xlu1 %v11933_v6  ;;  %v3055_v36 = vpop.f32.mrf.mxu0 }
 0x496   : > { %v3080_v52 = vmul.f32 0.125, %v3055_v36  ;;  %v7858_v36 = vld [vmem:[%s14472_s1 + $0xb0] sm:$0xff] }
 0x499   : > { %3109 = vmax.xlane.f32.xlu1 %v11939_v38 }
 0x49d   : > { %3121 = vmax.xlane.f32.xlu1 %v11945_v45  ;;  %v3082_v45 = vmul.f32 0.125, %v8941_v51  ;;  %v3071_v51 = vmul.f32 0.125, %v11902_v44 }
 0x49f   : > { %3398 = vrot.lane.b32.xlu0 %v11484_v3, %s10421_s12  ;;  %v7867_v3 = vld [vmem:[%s14472_s1 + $0xf8] sm:$0xff] }
 0x4a0   : > { %v11972_v0 = vadd.f32 %v7867_v3, %v3082_v45  ;;  %v11988_v45 = vadd.f32 %v7858_v36, %v3073_v33  ;;  %v7862_v3 = vld [vmem:[%s14472_s1 + $0xd0] sm:$0xff] }
 0x4a1   : > { %3117 = vmax.xlane.f32.xlu1 %v11951_v31  ;;  %v2126_v31 = vmul.f32 1.442695, %v2098_v20 }
 0x4a2   : > { %14629 = vst [vmem:[#allocation39_spill] sm:$0xff] %v11972_v0 }
 0x4a3   : > { %9402 = vpow2.f32 %v2126_v31  ;;  %v7856_v31 = vld [vmem:[%s14472_s1 + $0xa0] sm:$0xff] }
 0x4a4   : > { %v11995_v9 = vadd.f32 %v7856_v31, %v3071_v51  ;;  %v7860_v31 = vld [vmem:[%s14472_s1 + $0xc0] sm:$0xff] }
 0x4a5   : > { %3127 = vmax.xlane.f32.xlu1 %v11959_v59  ;;  %v7865_v59 = vld [vmem:[%s14472_s1 + $0xe8] sm:$0xff] }
 0x4a6   : > { %v11978_v63 = vadd.f32 %v7865_v59, %v3080_v52  ;;  %v3077_v59 = vmul.f32 0.125, %v8936_v60 }
 0x4a8   : > { %14630 = vst [vmem:[#allocation40_spill] sm:$0xff] %v11978_v63  ;;  %v12002_v44 = vadd.f32 %v7862_v3, %v3077_v59 }
 0x4a9   : > { %3123 = vmax.xlane.f32.xlu1 %v11965_v39 }
 0x4ad   : > { %3129 = vmax.xlane.f32.xlu1 %v11972_v0 }
 0x4b0   : > { %v11982_v16 = vpop.eup %9402 }
 0x4b1   : > { %3125 = vmax.xlane.f32.xlu1 %v11978_v63  ;;  %v3075_v63 = vmul.f32 0.125, %v3036_v15 }
 0x4be   : > { %2158 = vadd.xlane.f32.xlu0 %v11982_v16 }
 0x4c2   : > { %3111 = vmax.xlane.f32.xlu0 %v11988_v45 }
 0x4c4   : > { %v2541_v46 = vpop.xlane.xlu0 %2540 }
 0x4c5   : > { %v2570_v20 = vsub.f32 %v11761_v54, %v2541_v46 }
 0x4c6   : > { %3107 = vmax.xlane.f32.xlu0 %v11995_v9 }
 0x4c7   : > { %v2588_v52 = vmul.f32 1.442695, %v2570_v20  ;;  %v12010_v20 = vadd.f32 %v7860_v31, %v3075_v63 }
 0x4c8   : > { %v2543_v33 = vpop.xlane.xlu1 %2542  ;;  %v2537_v36 = vpop.xlane.xlu0 %2536 }
 0x4c9   : > { %9404 = vpow2.f32 %v2588_v52  ;;  %v2571_v60 = vsub.f32 %v11772_v13, %v2543_v33  ;;  %v2568_v51 = vsub.f32 %v11769_v23, %v2537_v36 }
 0x4ca   : > { %3119 = vmax.xlane.f32.xlu0 %v12002_v44 }
 0x4cb   : > { %v2584_v0 = vmul.f32 1.442695, %v2568_v51  ;;  %v2590_v59 = vmul.f32 1.442695, %v2571_v60 }
 0x4cc   : > { %v2539_v54 = vpop.xlane.xlu1 %2538  ;;  %v2549_v46 = vpop.xlane.xlu0 %2548 }
 0x4cd   : > { %v2574_v3 = vsub.f32 %v11782_v43, %v2549_v46  ;;  %9406 = vpow2.f32 %v2584_v0  ;;  %v2569_v15 = vsub.f32 %v11779_v47, %v2539_v54 }
 0x4ce   : > { %3115 = vmax.xlane.f32.xlu0 %v12010_v20  ;;  %9408 = vpow2.f32 %v2590_v59 }
 0x4cf   : > { %v2596_v13 = vmul.f32 1.442695, %v2574_v3  ;;  %v2586_v36 = vmul.f32 1.442695, %v2569_v15 }
 0x4d0   : > { %v2551_v23 = vpop.xlane.xlu1 %2550  ;;  %v2545_v52 = vpop.xlane.xlu0 %2544 }
 0x4d1   : > { %v2575_v33 = vsub.f32 %v11792_v53, %v2551_v23  ;;  %9410 = vpow2.f32 %v2596_v13  ;;  %v2572_v51 = vsub.f32 %v11789_v11, %v2545_v52 }
 0x4d3   : > { %v2598_v63 = vmul.f32 1.442695, %v2575_v33  ;;  %v2592_v47 = vmul.f32 1.442695, %v2572_v51 }
 0x4d4   : > { %v2547_v31 = vpop.xlane.xlu1 %2546  ;;  %v2557_v60 = vpop.xlane.xlu0 %2556 }
 0x4d5   : > { %9412 = vpow2.f32 %v2598_v63  ;;  %v2573_v43 = vsub.f32 %v11801_v10, %v2547_v31  ;;  %v2578_v54 = vsub.f32 %v11804_v25, %v2557_v60 }
 0x4d6   : > { %v12018_v0 = vpop.eup %9404  ;;  %9414 = vpow2.f32 %v2586_v36 }
 0x4d7   : > { %v2594_v46 = vmul.f32 1.442695, %v2573_v43  ;;  %2620 = vadd.xlane.f32.xlu0 %v12018_v0  ;;  %v2604_v11 = vmul.f32 1.442695, %v2578_v54 }
 0x4d8   : > { %v2559_v53 = vpop.xlane.xlu1 %2558  ;;  %v2553_v59 = vpop.xlane.xlu0 %2552 }
 0x4d9   : > { %9416 = vpow2.f32 %v2594_v46  ;;  %v2576_v3 = vsub.f32 %v11811_v22, %v2553_v59  ;;  %v2579_v25 = vsub.f32 %v11814_v50, %v2559_v53 }
 0x4da   : > { %9418 = vpow2.f32 %v2592_v47  ;;  %v12023_v15 = vpop.eup %9406 }
 0x4db   : > { %2616 = vadd.xlane.f32.xlu1 %v12023_v15  ;;  %v12027_v52 = vpop.eup %9408  ;;  %9420 = vpow2.f32 %v2604_v11  ;;  %v2600_v33 = vmul.f32 1.442695, %v2576_v3  ;;  %v2606_v31 = vmul.f32 1.442695, %v2579_v25 }
 0x4dc   : > { %v2555_v10 = vpop.xlane.xlu1 %2554  ;;  %v2565_v23 = vpop.xlane.xlu0 %2564 }
 0x4dd   : > { %v2577_v13 = vsub.f32 %v11821_v28, %v2555_v10  ;;  %v2582_v28 = vsub.f32 %v11824_v57, %v2565_v23 }
 0x4de   : > { %v12030_v36 = vpop.eup %9410 }
 0x4df   : > { %v2602_v51 = vmul.f32 1.442695, %v2577_v13  ;;  %2622 = vadd.xlane.f32.xlu1 %v12027_v52  ;;  %2628 = vadd.xlane.f32.xlu0 %v12030_v36  ;;  %v2612_v46 = vmul.f32 1.442695, %v2582_v28 }
 0x4e0   : > { %v2567_v22 = vpop.xlane.xlu1 %2566  ;;  %v2561_v43 = vpop.xlane.xlu0 %2560 }
 0x4e1   : > { %9422 = vpow2.f32 %v2602_v51  ;;  %v2580_v53 = vsub.f32 %v11832_v12, %v2561_v43  ;;  %v2583_v57 = vsub.f32 %v11835_v21, %v2567_v22 }
 0x4e2   : > { %v12034_v63 = vpop.eup %9412  ;;  %9424 = vpow2.f32 %v2600_v33 }
 0x4e3   : > { %v12037_v60 = vpop.eup %9414  ;;  %2630 = vadd.xlane.f32.xlu0 %v12034_v63  ;;  %9426 = vpow2.f32 %v2606_v31  ;;  %v2608_v3 = vmul.f32 1.442695, %v2580_v53  ;;  %v2614_v13 = vmul.f32 1.442695, %v2583_v57 }
 0x4e4   : > { %2618 = vadd.xlane.f32.xlu1 %v12037_v60  ;;  %v2563_v50 = vpop.xlane.xlu1 %2562 }
 0x4e5   : > { %v2581_v47 = vsub.f32 %v11841_v40, %v2563_v50 }
 0x4e6   : > { %v12042_v54 = vpop.eup %9416 }
 0x4e7   : > { %v12045_v59 = vpop.eup %9418  ;;  %v2610_v11 = vmul.f32 1.442695, %v2581_v47  ;;  %2626 = vadd.xlane.f32.xlu0 %v12042_v54 }
 0x4e8   : > { %2624 = vadd.xlane.f32.xlu1 %v12045_v59  ;;  %v12050_v10 = vpop.eup %9420 }
 0x4e9   : > { %9428 = vpow2.f32 %v2610_v11  ;;  %14631 = vst [vmem:[#allocation41_spill] sm:$0xff] %v12050_v10 }
 0x4ea   : > { %9430 = vpow2.f32 %v2612_v46 }
 0x4eb   : > { %2636 = vadd.xlane.f32.xlu0 %v12050_v10  ;;  %9432 = vpow2.f32 %v2608_v3 }
 0x4ec   : > { %9434 = vpow2.f32 %v2614_v13 }
 0x4ee   : > { %v12053_v40 = vpop.eup %9422  ;;  %v2139_v23 = vpop.xlane.xlu0 %2138 }
 0x4ef   : > { %v12055_v12 = vpop.eup %9424  ;;  %2634 = vadd.xlane.f32.xlu1 %v12053_v40 }
 0x4f0   : > { %2632 = vadd.xlane.f32.xlu0 %v12055_v12  ;;  %v12059_v25 = vpop.eup %9426 }
 0x4f1   : > { %14632 = vst [vmem:[#allocation42_spill] sm:$0xff] %v12059_v25 }
 0x4f2   : > { %v2135_v33 = vpop.xlane.xlu0 %2134 }
 0x4f4   : > { %2638 = vadd.xlane.f32.xlu0 %v12059_v25 }
 0x4f6   : > { %v12062_v21 = vpop.eup %9428  ;;  %v2141_v51 = vpop.xlane.xlu1 %2140 }
 0x4f7   : > { %14633 = vst [vmem:[#allocation43_spill] sm:$0xff] %v12062_v21  ;;  %v12064_v22 = vpop.eup %9430  ;;  %2642 = vadd.xlane.f32.xlu1 %v12062_v21  ;;  %9436 = vrcp.f32 %v2141_v51 }
 0x4f8   : > { %14634 = vst [vmem:[#allocation44_spill] sm:$0xff] %v12064_v22  ;;  %2644 = vadd.xlane.f32.xlu0 %v12064_v22  ;;  %9438 = vrcp.f32 %v2135_v33  ;;  %v12068_v28 = vpop.eup %9432 }
 0x4f9   : > { %9440 = vrcp.f32 %v2139_v23  ;;  %14635 = vst [vmem:[#allocation45_spill] sm:$0xff] %v12068_v28  ;;  %v12071_v47 = vpop.eup %9434 }
 0x4fa   : > { %v2137_v31 = vpop.xlane.xlu1 %2136  ;;  %v2147_v43 = vpop.xlane.xlu0 %2146  ;;  %14636 = vst [vmem:[#allocation46_spill] sm:$0xff] %v12071_v47 }
 0x4fb   : > { %9442 = vrcp.f32 %v2137_v31 }
 0x4fc   : > { %2640 = vadd.xlane.f32.xlu0 %v12068_v28 }
 0x4fe   : > { %v2149_v50 = vpop.xlane.xlu1 %2148  ;;  %v2143_v46 = vpop.xlane.xlu0 %2142 }
 0x4ff   : > { %9444 = vrcp.f32 %v2149_v50 }
 0x500   : > { %2646 = vadd.xlane.f32.xlu0 %v12071_v47  ;;  %9446 = vrcp.f32 %v2143_v46 }
 0x501   : > { %9448 = vrcp.f32 %v2147_v43 }
 0x502   : > { %v2145_v53 = vpop.xlane.xlu1 %2144  ;;  %v2155_v11 = vpop.xlane.xlu0 %2154 }
 0x503   : > { %9450 = vrcp.f32 %v2145_v53 }
 0x504   : > { %v9437_v57 = vpop.eup %9436 }
 0x505   : > { %v9439_v3 = vpop.eup %9438  ;;  %v2185_v31 = vmul.f32 %v9437_v57, %v11860_v8 }
 0x506   : > { %v2157_v13 = vpop.xlane.xlu1 %2156  ;;  %v9441_v23 = vpop.eup %9440  ;;  %v2182_v22 = vmul.f32 %v9439_v3, %v11855_v61 }
 0x507   : > { %v2151_v33 = vpop.xlane.xlu0 %2150  ;;  %9452 = vrcp.f32 %v2157_v13  ;;  %v2184_v43 = vmul.f32 %v9441_v23, %v11850_v55 }
 0x508   : > { %v9443_v51 = vpop.eup %9442  ;;  %9454 = vrcp.f32 %v2151_v33 }
 0x509   : > { %v2183_v50 = vmul.f32 %v9443_v51, %v11863_v19  ;;  %9456 = vrcp.f32 %v2155_v11  ;;  %v2199_v28 = vpack.c.bf16 %v2185_v31, %v2184_v43 }
 0x50a   : > { %v2153_v46 = vpop.xlane.xlu1 %2152 }
 0x50b   : > { %9458 = vrcp.f32 %v2153_v46  ;;  %v3104_v53 = vpop.xlane.xlu0 %3103  ;;  %v2198_v47 = vpack.c.bf16 %v2183_v50, %v2182_v22 }
 0x50c   : > { %v3133_v21 = vsub.f32 %v11897_v26, %v3104_v53  ;;  %v9445_v25 = vpop.eup %9444 }
 0x50d   : > { %8830 = vmatprep.mubr.bf16.mxu1 %v2198_v47  ;;  %v9447_v13 = vpop.eup %9446  ;;  %v2189_v55 = vmul.f32 %v9445_v25, %v11871_v1 }
 0x50e   : > { %v3151_v10 = vmul.f32 1.442695, %v3133_v21  ;;  %v3106_v8 = vpop.xlane.xlu1 %3105  ;;  %8831 = vmatmul.mubr.bf16.vlgmr.msra.gmra.mxu1 %v2199_v28  ;;  %v9449_v57 = vpop.eup %9448  ;;  %v2186_v26 = vmul.f32 %v9447_v13, %v11873_v4 }
 0x50f   : > { %8879 = vmatpush3.bf16.msra.mxu1 %v11737_v17  ;;  %v12080_v61 = vpop.xlane.xlu0 %2162  ;;  %v2188_v21 = vmul.f32 %v9449_v57, %v11866_v32  ;;  %v3134_v17 = vsub.f32 %v11906_v7, %v3106_v8 }
 0x510   : > { %v9451_v19 = vpop.eup %9450  ;;  %9460 = vpow2.f32 %v3151_v10  ;;  %8880 = vmatprep.subr.bf16.mxu1 %v11829_v42 }
 0x511   : > { %v2187_v22 = vmul.f32 %v9451_v19, %v11877_v37  ;;  %v2201_v10 = vpack.c.bf16 %v2189_v55, %v2188_v21 }
 0x512   : > { %v2165_v47 = vpop.xlane.xlu1 %2164 }
 0x513   : > { %8881 = vmatpush3.bf16.msra.mxu1 %v11829_v42  ;;  %v3100_v28 = vpop.xlane.xlu0 %3099  ;;  %v2200_v11 = vpack.c.bf16 %v2187_v22, %v2186_v26  ;;  %v3153_v42 = vmul.f32 1.442695, %v3134_v17 }
 0x514   : > { %v3131_v3 = vsub.f32 %v11917_v14, %v3100_v28  ;;  %8882 = vmatprep.subr.bf16.mxu1 %v11763_v24  ;;  %v9453_v23 = vpop.eup %9452 }
 0x515   : > { %8834 = vmatprep.mubr.bf16.mxu1 %v2200_v11  ;;  %v9455_v1 = vpop.eup %9454  ;;  %v2193_v14 = vmul.f32 %v9453_v23, %v11884_v5 }
 0x516   : > { %v3147_v4 = vmul.f32 1.442695, %v3131_v3  ;;  %v3102_v25 = vpop.xlane.xlu1 %3101  ;;  %8835 = vmatmul.mubr.bf16.gmra.mxu1 %v2201_v10  ;;  %v9457_v37 = vpop.eup %9456  ;;  %v2190_v7 = vmul.f32 %v9455_v1, %v11886_v62  ;;  %v14638_v1 = vld [vmem:[#allocation34_spill] sm:$0xff] }
 0x517   : > { %8883 = vmatpush3.bf16.msra.mxu1 %v11763_v24  ;;  %v3132_v33 = vsub.f32 %v11924_v41, %v3102_v25  ;;  %v2192_v31 = vmul.f32 %v9457_v37, %v11879_v18 }
 0x518   : > { %v9459_v32 = vpop.eup %9458  ;;  %9462 = vpow2.f32 %v3147_v4  ;;  %8884 = vmatprep.subr.bf16.mxu1 %v11766_v35 }
 0x519   : > { %v2191_v51 = vmul.f32 %v9459_v32, %v11895_v27  ;;  %9464 = vpow2.f32 %v3153_v42  ;;  %v3149_v24 = vmul.f32 1.442695, %v3132_v33  ;;  %v2203_v46 = vpack.c.bf16 %v2193_v14, %v2192_v31  ;;  %v12124_v27 = vpop.permute.xlu0 %3398 }
 0x51b   : > { %8885 = vmatpush3.bf16.msra.mxu1 %v11766_v35  ;;  %v2202_v50 = vpack.c.bf16 %v2191_v51, %v2190_v7  ;;  %9466 = vpow2.f32 %v3149_v24  ;;  %v14640_v51 = vld [vmem:[#allocation37_spill] sm:$0xff]  ;;  %v14641_v24 = vld [vmem:[#allocation38_spill] sm:$0xff] }
 0x51c   : > { %8886 = vmatprep.subr.bf16.mxu1 %v11776_v29  ;;  %9468 = vrcp.f32 %v2165_v47 }
 0x51d   : > { %v12100_v43 = vpop.eup %9460  ;;  %8838 = vmatprep.mubr.bf16.mxu1 %v2202_v50 }
 0x51e   : > { %3183 = vadd.xlane.f32.xlu1 %v12100_v43  ;;  %8839 = vmatmul.mubr.bf16.gmra.mxu1 %v2203_v46 }
 0x51f   : > { %8887 = vmatpush3.bf16.msra.mxu1 %v11776_v29 }
 0x520   : > { %8888 = vmatprep.subr.bf16.mxu1 %v11784_v48 }
 0x523   : > { %8889 = vmatpush3.bf16.msra.mxu1 %v11784_v48  ;;  %v2161_v48 = vpop.xlane.xlu1 %2160 }
 0x524   : > { %8890 = vmatprep.subr.bf16.mxu1 %v11794_v34  ;;  %9470 = vrcp.f32 %v2161_v48 }
 0x525   : > { %v12107_v35 = vpop.eup %9462  ;;  %9472 = vrcp.f32 %v12080_v61 }
 0x526   : > { %3179 = vadd.xlane.f32.xlu1 %v12107_v35  ;;  %v12112_v18 = vpop.eup %9464 }
 0x527   : > { %8891 = vmatpush3.bf16.msra.mxu1 %v11794_v34  ;;  %v3114_v5 = vpop.xlane.xlu1 %3113 }
 0x528   : > { %8892 = vmatprep.subr.bf16.mxu1 %v11798_v58  ;;  %v12117_v29 = vpop.eup %9466 }
 0x529   : > { %v9469_v26 = vpop.eup %9468 }
 0x52a   : > { %3185 = vadd.xlane.f32.xlu1 %v12112_v18 }
 0x52b   : > { %8893 = vmatpush3.bf16.msra.mxu1 %v11798_v58  ;;  %v3110_v62 = vpop.xlane.xlu1 %3109 }
 0x52c   : > { %8942 = vmatprep.subr.bf16.mxu1 %v11537_v49  ;;  %v3136_v55 = vsub.f32 %v11939_v38, %v3110_v62  ;;  %v14637_v38 = vld [vmem:[#allocation35_spill] sm:$0xff] }
 0x52e   : > { %3181 = vadd.xlane.f32.xlu1 %v12117_v29  ;;  %v3157_v11 = vmul.f32 1.442695, %v3136_v55 }
 0x52f   : > { %v3122_v34 = vpop.xlane.xlu1 %3121 }
 0x531   : > { %v9471_v47 = vpop.eup %9470 }
 0x532   : > { %v9473_v28 = vpop.eup %9472  ;;  %v2195_v23 = vmul.f32 %v9471_v47, %v14637_v38 }
 0x533   : > { %v3118_v41 = vpop.xlane.xlu1 %3117  ;;  %v2196_v4 = vmul.f32 %v9473_v28, %v14638_v1 }
 0x534   : > { %v3140_v31 = vsub.f32 %v14640_v51, %v3118_v41 }
 0x537   : > { %v3128_v8 = vpop.xlane.xlu1 %3127 }
 0x538   : > { %v3145_v46 = vsub.f32 %v14641_v24, %v3128_v8 }
 0x53b   : > { %v3124_v17 = vpop.xlane.xlu1 %3123 }
 0x53c   : > { %v3143_v41 = vsub.f32 %v11965_v39, %v3124_v17 }
 0x53f   : > { %3394 = vrot.lane.b32.xlu1 %v11535_v30, %s10421_s12  ;;  %v3138_v30 = vsub.f32 %v11933_v6, %v3114_v5  ;;  %v2197_v6 = vmul.f32 %v9469_v26, %v11915_v2  ;;  %v3130_v33 = vpop.xlane.xlu1 %3129  ;;  %v3165_v5 = vmul.f32 1.442695, %v3140_v31 }
 0x541   : > { %v3161_v61 = vmul.f32 1.442695, %v3138_v30  ;;  %v2205_v42 = vpack.c.bf16 %v2197_v6, %v2196_v4  ;;  %v3171_v30 = vmul.f32 1.442695, %v3143_v41 }
 0x543   : > { %3392 = vrot.lane.b32.xlu1 %v11553_v56, %s10421_s12  ;;  %v12142_v50 = vpop.xlane.xlu1 %3125 }
 0x547   : > { %v2159_v58 = vpop.xlane.xlu0 %2158 }
 0x548   : > { %9474 = vrcp.f32 %v2159_v58 }
 0x54b   : > { %v3112_v53 = vpop.xlane.xlu0 %3111 }
 0x54c   : > { %v3137_v13 = vsub.f32 %v11988_v45, %v3112_v53  ;;  %v3175_v53 = vmul.f32 1.442695, %v3145_v46 }
 0x54e   : > { %v3159_v57 = vmul.f32 1.442695, %v3137_v13 }
 0x54f   : > { %v3108_v19 = vpop.xlane.xlu0 %3107 }
 0x550   : > { %9476 = vpow2.f32 %v3159_v57  ;;  %v3135_v56 = vsub.f32 %v11995_v9, %v3108_v19  ;;  %v14642_v19 = vld [vmem:[#allocation39_spill] sm:$0xff] }
 0x551   : > { %v3146_v55 = vsub.f32 %v14642_v19, %v3130_v33 }
 0x552   : > { %v3155_v22 = vmul.f32 1.442695, %v3135_v56 }
 0x553   : > { %v3120_v21 = vpop.xlane.xlu0 %3119  ;;  %v3177_v39 = vmul.f32 1.442695, %v3146_v55 }
 0x554   : > { %9478 = vpow2.f32 %v3155_v22  ;;  %v3141_v45 = vsub.f32 %v12002_v44, %v3120_v21  ;;  %v14639_v44 = vld [vmem:[#allocation36_spill] sm:$0xff] }
 0x555   : > { %v9475_v3 = vpop.eup %9474  ;;  %9480 = vpow2.f32 %v3161_v61  ;;  %v3142_v14 = vsub.f32 %v14639_v44, %v3122_v34 }
 0x556   : > { %v2194_v10 = vmul.f32 %v9475_v3, %v11982_v16  ;;  %9482 = vpow2.f32 %v3157_v11  ;;  %v3167_v25 = vmul.f32 1.442695, %v3141_v45 }
 0x557   : > { %v3116_v9 = vpop.xlane.xlu0 %3115  ;;  %v3169_v7 = vmul.f32 1.442695, %v3142_v14 }
 0x558   : > { %v3139_v37 = vsub.f32 %v12010_v20, %v3116_v9  ;;  %v2204_v32 = vpack.c.bf16 %v2195_v23, %v2194_v10  ;;  %9484 = vpow2.f32 %v3167_v25 }
 0x55a   : > { %8842 = vmatprep.mubr.bf16.mxu1 %v2204_v32  ;;  %v3163_v2 = vmul.f32 1.442695, %v3139_v37  ;;  %v14643_v37 = vld [vmem:[#allocation22_spill] sm:$0xff] }
 0x55b   : > { %8843 = vmatmul.mubr.bf16.gmra.mxu1 %v2205_v42 }
 0x55c   : > { %9486 = vpow2.f32 %v3163_v2 }
 0x55d   : > { %v12138_v16 = vpop.eup %9476  ;;  %9488 = vpow2.f32 %v3169_v7 }
 0x55e   : > { %3191 = vadd.xlane.f32.xlu0 %v12138_v16  ;;  %9490 = vpow2.f32 %v3165_v5 }
 0x55f   : > { %9492 = vpow2.f32 %v3175_v53  ;;  %v14645_v53 = vld [vmem:[#allocation40_spill] sm:$0xff] }
 0x560   : > { %v2621_v62 = vpop.xlane.xlu0 %2620  ;;  %v3144_v41 = vsub.f32 %v14645_v53, %v12142_v50 }
 0x561   : > { %v12144_v20 = vpop.eup %9478 }
 0x562   : > { %3187 = vadd.xlane.f32.xlu0 %v12144_v20  ;;  %v12148_v48 = vpop.eup %9480 }
 0x563   : > { %v12150_v58 = vpop.eup %9482 }
 0x564   : > { %v2617_v34 = vpop.xlane.xlu1 %2616 }
 0x565   : > { %v12155_v57 = vpop.eup %9484 }
 0x566   : > { %3193 = vadd.xlane.f32.xlu0 %v12148_v48 }
 0x567   : > { %3189 = vadd.xlane.f32.xlu1 %v12150_v58 }
 0x568   : > { %v2623_v13 = vpop.xlane.xlu1 %2622  ;;  %v2629_v8 = vpop.xlane.xlu0 %2628 }
 0x569   : > { %9494 = vrcp.f32 %v2623_v13  ;;  %v12159_v22 = vpop.eup %9486  ;;  %v14646_v13 = vld [vmem:[#allocation23_spill] sm:$0xff] }
 0x56a   : > { %9496 = vrcp.f32 %v2617_v34  ;;  %v12162_v21 = vpop.eup %9488 }
 0x56b   : > { %3199 = vadd.xlane.f32.xlu1 %v12155_v57  ;;  %9498 = vrcp.f32 %v2621_v62  ;;  %v12165_v11 = vpop.eup %9490 }
 0x56c   : > { %v2631_v26 = vpop.xlane.xlu0 %2630  ;;  %v12167_v17 = vpop.eup %9492 }
 0x56d   : > { %v2619_v56 = vpop.xlane.xlu1 %2618 }
 0x56e   : > { %9500 = vrcp.f32 %v2619_v56 }
 0x56f   : > { %3195 = vadd.xlane.f32.xlu1 %v12159_v22  ;;  %9502 = vpow2.f32 %v3171_v30 }
 0x570   : > { %9504 = vrcp.f32 %v2631_v26  ;;  %v2627_v61 = vpop.xlane.xlu0 %2626  ;;  %v14647_v26 = vld [vmem:[#allocation24_spill] sm:$0xff] }
 0x571   : > { %v2625_v47 = vpop.xlane.xlu1 %2624 }
 0x572   : > { %9506 = vrcp.f32 %v2625_v47 }
 0x573   : > { %9508 = vrcp.f32 %v2627_v61  ;;  %3201 = vadd.xlane.f32.xlu1 %v12162_v21  ;;  %v14649_v61 = vld [vmem:[#allocation42_spill] sm:$0xff] }
 0x574   : > { %9510 = vpow2.f32 %v3177_v39  ;;  %v2637_v28 = vpop.xlane.xlu0 %2636  ;;  %v14648_v39 = vld [vmem:[#allocation41_spill] sm:$0xff] }
 0x575   : > { %9512 = vrcp.f32 %v2629_v8 }
 0x576   : > { %v9495_v45 = vpop.eup %9494 }
 0x577   : > { %3197 = vadd.xlane.f32.xlu1 %v12165_v11  ;;  %v9497_v6 = vpop.eup %9496  ;;  %v2667_v9 = vmul.f32 %v9495_v45, %v12027_v52 }
 0x578   : > { %v2635_v3 = vpop.xlane.xlu1 %2634  ;;  %v9499_v38 = vpop.eup %9498  ;;  %v2664_v1 = vmul.f32 %v9497_v6, %v12023_v15  ;;  %v14651_v6 = vld [vmem:[#allocation21_spill] sm:$0xff] }
 0x579   : > { %9514 = vrcp.f32 %v2635_v3  ;;  %v2633_v10 = vpop.xlane.xlu0 %2632  ;;  %v2666_v42 = vmul.f32 %v9499_v38, %v12018_v0  ;;  %v14644_v0 = vld [vmem:[#allocation26_spill] sm:$0xff]  ;;  %v14653_v38 = vld [vmem:[#allocation45_spill] sm:$0xff] }
 0x57a   : > { %9516 = vrcp.f32 %v2633_v10  ;;  %v14652_v10 = vld [vmem:[#allocation28_spill] sm:$0xff] }
 0x57b   : > { %v9501_v23 = vpop.eup %9500  ;;  %3207 = vadd.xlane.f32.xlu1 %v12167_v17  ;;  %9518 = vrcp.f32 %v2637_v28  ;;  %v2681_v52 = vpack.c.bf16 %v2667_v9, %v2666_v42  ;;  %v14654_v9 = vld [vmem:[#allocation43_spill] sm:$0xff]  ;;  %v14655_v42 = vld [vmem:[#allocation18_spill] sm:$0xff] }
 0x57c   : > { %v2665_v4 = vmul.f32 %v9501_v23, %v12037_v60  ;;  %v12174_v25 = vpop.eup %9502  ;;  %3396 = vrot.lane.b32.xlu0 %v14643_v37, %s10421_s12 }
 0x57d   : > { %v2639_v32 = vpop.xlane.xlu0 %2638  ;;  %v9505_v33 = vpop.eup %9504 }
 0x57e   : > { %9520 = vrcp.f32 %v2639_v32  ;;  %v2680_v44 = vpack.c.bf16 %v2665_v4, %v2664_v1  ;;  %v2671_v5 = vmul.f32 %v9505_v33, %v12034_v63  ;;  %v14656_v33 = vld [vmem:[#allocation25_spill] sm:$0xff] }
 0x57f   : > { %v9507_v14 = vpop.eup %9506  ;;  %3203 = vadd.xlane.f32.xlu1 %v12174_v25 }
 0x580   : > { %v9509_v2 = vpop.eup %9508  ;;  %8894 = vmatprep.mubr.bf16.mxu1 %v2680_v44  ;;  %v2668_v15 = vmul.f32 %v9507_v14, %v12045_v59  ;;  %v2643_v7 = vpop.xlane.xlu1 %2642  ;;  %v14657_v44 = vld [vmem:[#allocation44_spill] sm:$0xff] }
 0x581   : > { %v12181_v60 = vpop.eup %9510  ;;  %8895 = vmatmul.mubr.bf16.vlgmr.msra.gmra.mxu1 %v2681_v52  ;;  %v2645_v51 = vpop.xlane.xlu0 %2644  ;;  %v2669_v31 = vmul.f32 %v9509_v2, %v12042_v54  ;;  %9522 = vrcp.f32 %v2643_v7  ;;  %v14658_v52 = vld [vmem:[#allocation46_spill] sm:$0xff] }
 0x582   : > { %v9513_v24 = vpop.eup %9512  ;;  %8943 = vmatpush3.bf16.msra.mxu1 %v11537_v49 }
 0x583   : > { %3209 = vadd.xlane.f32.xlu1 %v12181_v60  ;;  %8944 = vmatprep.subr.bf16.mxu1 %v14644_v0  ;;  %v2682_v46 = vpack.c.bf16 %v2669_v31, %v2668_v15  ;;  %v2670_v62 = vmul.f32 %v9513_v24, %v12030_v36  ;;  %v3173_v36 = vmul.f32 1.442695, %v3144_v41  ;;  %v14660_v31 = vld [vmem:[#allocation29_spill] sm:$0xff]  ;;  %v14661_v24 = vld [vmem:[#allocation32_spill] sm:$0xff]  ;;  %v14666_v41 = vld [vmem:[#allocation27_spill] sm:$0xff] }
 0x585   : > { %8898 = vmatprep.mubr.bf16.mxu1 %v2682_v46  ;;  %v2641_v59 = vpop.xlane.xlu0 %2640  ;;  %v2683_v8 = vpack.c.bf16 %v2671_v5, %v2670_v62  ;;  %v14662_v46 = vld [vmem:[#allocation30_spill] sm:$0xff]  ;;  %v14663_v5 = vld [vmem:[#allocation31_spill] sm:$0xff] }
 0x586   : > { %v9515_v34 = vpop.eup %9514  ;;  %8945 = vmatpush3.bf16.msra.mxu1 %v14644_v0  ;;  %9524 = vrcp.f32 %v2641_v59  ;;  %v14664_v59 = vld [vmem:[#allocation14_spill] sm:$0xff] }
 0x587   : > { %v9517_v54 = vpop.eup %9516  ;;  %8946 = vmatprep.subr.bf16.mxu1 %v14646_v13  ;;  %v2673_v30 = vmul.f32 %v9515_v34, %v12053_v40  ;;  %9526 = vrcp.f32 %v2645_v51  ;;  %v14659_v51 = vld [vmem:[#allocation19_spill] sm:$0xff]  ;;  %v14665_v34 = vld [vmem:[#allocation16_spill] sm:$0xff] }
 0x588   : > { %v2672_v63 = vmul.f32 %v9517_v54, %v12055_v12  ;;  %v9519_v19 = vpop.eup %9518  ;;  %v14650_v12 = vld [vmem:[#allocation20_spill] sm:$0xff] }
 0x589   : > { %8899 = vmatmul.mubr.bf16.gmra.mxu1 %v2683_v8  ;;  %v2647_v55 = vpop.xlane.xlu0 %2646  ;;  %v2674_v47 = vmul.f32 %v9519_v19, %v14648_v39  ;;  %v14667_v8 = vld [vmem:[#allocation15_spill] sm:$0xff] }
 0x58a   : > { %8947 = vmatpush3.bf16.msra.mxu1 %v14646_v13  ;;  %9528 = vrcp.f32 %v2647_v55  ;;  %v2684_v50 = vpack.c.bf16 %v2673_v30, %v2672_v63  ;;  %v14668_v63 = vld [vmem:[#allocation17_spill] sm:$0xff] }
 0x58b   : > { %v9521_v56 = vpop.eup %9520  ;;  %8948 = vmatprep.subr.bf16.mxu1 %v14647_v26  ;;  %9530 = vpow2.f32 %v3173_v36 }
 0x58c   : > { %8902 = vmatprep.mubr.bf16.mxu1 %v2684_v50  ;;  %v2675_v28 = vmul.f32 %v9521_v56, %v14649_v61 }
 0x58e   : > { %8949 = vmatpush3.bf16.msra.mxu1 %v14647_v26  ;;  %v2685_v40 = vpack.c.bf16 %v2675_v28, %v2674_v47  ;;  %v9523_v45 = vpop.eup %9522  ;;  %v14669_v28 = vld [vmem:[#allocation33_spill] sm:$0xff] }
 0x58f   : > { %8950 = vmatprep.subr.bf16.mxu1 %v14650_v12  ;;  %v2677_v1 = vmul.f32 %v9523_v45, %v14654_v9 }
 0x591   : > { %8903 = vmatmul.mubr.bf16.gmra.mxu1 %v2685_v40 }
 0x592   : > { %8951 = vmatpush3.bf16.msra.mxu1 %v14650_v12 }
 0x593   : > { %v9525_v3 = vpop.eup %9524  ;;  %8952 = vmatprep.subr.bf16.mxu1 %v14651_v6 }
 0x594   : > { %3388 = vrot.lane.b32.xlu1 %v14652_v10, %s10421_s12  ;;  %v2676_v23 = vmul.f32 %v9525_v3, %v14653_v38  ;;  %v9527_v4 = vpop.eup %9526 }
 0x595   : > { %v2678_v14 = vmul.f32 %v9527_v4, %v14657_v44 }
 0x596   : > { %8953 = vmatpush3.bf16.msra.mxu1 %v14651_v6  ;;  %v2686_v37 = vpack.c.bf16 %v2677_v1, %v2676_v23  ;;  %v3444_v23 = vsel %vm1876_vm0, %v12124_v27, 0 }
 0x597   : > { %v9529_v32 = vpop.eup %9528  ;;  %8954 = vmatprep.subr.bf16.mxu1 %v14655_v42 }
 0x598   : > { %3364 = vrot.lane.b32.xlu1 %v14656_v33, %s10421_s12  ;;  %8906 = vmatprep.mubr.bf16.mxu1 %v2686_v37  ;;  %v2679_v2 = vmul.f32 %v9529_v32, %v14658_v52  ;;  %v12214_v7 = vpop.eup %9530 }
 0x59a   : > { %8955 = vmatpush3.bf16.msra.mxu1 %v14655_v42  ;;  %v2687_v15 = vpack.c.bf16 %v2679_v2, %v2678_v14 }
 0x59b   : > { %8956 = vmatprep.subr.bf16.mxu1 %v14659_v51  ;;  %3205 = vadd.xlane.f32.xlu0 %v12214_v7 }
 0x59c   : > { %3366 = vrot.lane.b32.xlu1 %v14660_v31, %s10421_s12  ;;  %8907 = vmatmul.mubr.bf16.gmra.mxu1 %v2687_v15 }
 0x59e   : > { %8957 = vmatpush3.bf16.msra.mxu1 %v14659_v51 }
 0x59f   : > { %9126 = vmatprep.subr.msk.bf16.mxu1 %vm1876_vm0, %v14661_v24 }
 0x5a0   : > { %3368 = vrot.lane.b32.xlu1 %v14662_v46, %s10421_s12 }
 0x5a4   : > { %3370 = vrot.lane.b32.xlu1 %v14663_v5, %s10421_s12 }
 0x5a7   : > { %v3184_v62 = vpop.xlane.xlu1 %3183 }
 0x5a8   : > { %3372 = vrot.lane.b32.xlu1 %v14664_v59, %s10421_s12 }
 0x5ac   : > { %3376 = vrot.lane.b32.xlu1 %v14665_v34, %s10421_s12 }
 0x5af   : > { %v3180_v53 = vpop.xlane.xlu1 %3179 }
 0x5b0   : > { %3753 = vrot.lane.b32.xlu1 %v14644_v0, %s10421_s12 }
 0x5b1   : > { %3390 = vrot.lane.b32.xlu0 %v14666_v41, %s10421_s12 }
 0x5b3   : > { %v3186_v54 = vpop.xlane.xlu1 %3185 }
 0x5b4   : > { %9532 = vrcp.f32 %v3186_v54 }
 0x5b5   : > { %9534 = vrcp.f32 %v3180_v53  ;;  %3374 = vrot.lane.b32.xlu0 %v14667_v8, %s10421_s12 }
 0x5b6   : > { %9536 = vrcp.f32 %v3184_v62 }
 0x5b7   : > { %v3182_v30 = vpop.xlane.xlu1 %3181 }
 0x5b8   : > { %9538 = vrcp.f32 %v3182_v30 }
 0x5b9   : > { %3378 = vrot.lane.b32.xlu0 %v14668_v63, %s10421_s12 }
 0x5bb   : > { %v3395_v33 = vpop.permute.xlu1 %3394 }
 0x5bc   : > { %v3438_v34 = vsel %vm1876_vm0, %v3395_v33, 0 }
 0x5bd   : > { %3755 = vrot.lane.b32.xlu0 %v11537_v49, %s10421_s12 }
 0x5bf   : > { %v3393_v14 = vpop.permute.xlu1 %3392 }
 0x5c1   : > { %v9533_v19 = vpop.eup %9532  ;;  %3751 = vrot.lane.b32.xlu0 %v14646_v13, %s10421_s12  ;;  %v3450_v13 = vsel %vm1876_vm0, %v14661_v24, 0 }
 0x5c2   : > { %v9535_v0 = vpop.eup %9534  ;;  %v3230_v50 = vmul.f32 %v9533_v19, %v12112_v18 }
 0x5c3   : > { %v9537_v55 = vpop.eup %9536  ;;  %v3227_v56 = vmul.f32 %v9535_v0, %v12107_v35 }
 0x5c4   : > { %v3229_v47 = vmul.f32 %v9537_v55, %v12100_v43 }
 0x5c5   : > { %v9539_v36 = vpop.eup %9538  ;;  %3749 = vrot.lane.b32.xlu0 %v14647_v26, %s10421_s12 }
 0x5c6   : > { %v3228_v39 = vmul.f32 %v9539_v36, %v12117_v29  ;;  %v3244_v49 = vpack.c.bf16 %v3230_v50, %v3229_v47  ;;  %v3447_v29 = vsel %vm1876_vm0, %v14669_v28, 0  ;;  %v3435_v50 = vsel %vm1876_vm0, %v3393_v14, 0 }
 0x5c8   : > { %v3243_v61 = vpack.c.bf16 %v3228_v39, %v3227_v56 }
 0x5ca   : > { %8958 = vmatprep.mubr.bf16.mxu1 %v3243_v61 }
 0x5cb   : > { %8959 = vmatmul.mubr.bf16.vlgmr.msra.gmra.mxu1 %v3244_v49 }
 0x5cc   : > { %8975 = vmatpush3.bf16.xpose.msra.mxu1 %v3450_v13 }
 0x5cd   : > { %9127 = vmatprep.subr.msk.bf16.mxu1 %vm1876_vm0, %v14669_v28 }
 0x5ce   : > { %v12253_v18 = vpop.f32.mrf.mxu1 }
 0x5d0   : > { %v12255_v26 = vpop.f32.mrf.mxu1 }
 0x5d2   : > { %v12257_v35 = vpop.f32.mrf.mxu1 }
 0x5d4   : > { %8977 = vmatpush3.bf16.xpose.msra.mxu1 %v3447_v29  ;;  %v12263_v40 = vpop.f32.mrf.mxu1 }
 0x5d5   : > { %9128 = vmatprep.subr.msk.bf16.mxu1 %vm1876_vm0, %v12124_v27 }
 0x5d6   : > { %v12267_v45 = vpop.f32.mrf.mxu1 }
 0x5d8   : > { %v12269_v3 = vpop.f32.mrf.mxu1 }
 0x5da   : > { %v12271_v10 = vpop.f32.mrf.mxu1 }
 0x5dc   : > { %8979 = vmatpush3.bf16.xpose.msra.mxu1 %v3444_v23  ;;  %v12277_v9 = vpop.f32.mrf.mxu1 }
 0x5de   : > { %v12279_v1 = vpop.f32.mrf.mxu1 }
 0x5e0   : > { %v12281_v4 = vpop.f32.mrf.mxu1 }
 0x5e2   : > { %v12283_v37 = vpop.f32.mrf.mxu1 }
 0x5e7   : > { %v3192_v44 = vpop.xlane.xlu0 %3191 }
 0x5eb   : > { %v3188_v52 = vpop.xlane.xlu0 %3187 }
 0x5ec   : > { %9540 = vrcp.f32 %v3188_v52 }
 0x5ed   : > { %9542 = vrcp.f32 %v3192_v44 }
 0x5ef   : > { %v3194_v27 = vpop.xlane.xlu0 %3193 }
 0x5f0   : > { %v3190_v2 = vpop.xlane.xlu1 %3189 }
 0x5f1   : > { %9544 = vrcp.f32 %v3190_v2 }
 0x5f2   : > { %9546 = vrcp.f32 %v3194_v27 }
 0x5f3   : > { %v3397_v31 = vpop.permute.xlu0 %3396 }
 0x5f4   : > { %v3200_v15 = vpop.xlane.xlu1 %3199  ;;  %9129 = vmatprep.subr.msk.bf16.mxu1 %vm1876_vm0, %v3397_v31  ;;  %v3441_v24 = vsel %vm1876_vm0, %v3397_v31, 0 }
 0x5f5   : > { %8981 = vmatpush3.bf16.xpose.msra.mxu1 %v3441_v24 }
 0x5f6   : > { %9130 = vmatprep.subr.msk.bf16.mxu1 %vm1876_vm0, %v3395_v33 }
 0x5f8   : > { %v3196_v46 = vpop.xlane.xlu1 %3195 }
 0x5f9   : > { %v9541_v5 = vpop.eup %9540 }
 0x5fa   : > { %v9543_v62 = vpop.eup %9542  ;;  %v3231_v54 = vmul.f32 %v9541_v5, %v12144_v20 }
 0x5fb   : > { %v3233_v63 = vmul.f32 %v9543_v62, %v12138_v16 }
 0x5fc   : > { %v3202_v59 = vpop.xlane.xlu1 %3201 }
 0x5fd   : > { %9548 = vrcp.f32 %v3202_v59  ;;  %8983 = vmatpush3.bf16.xpose.msra.mxu1 %v3438_v34 }
 0x5fe   : > { %v9545_v53 = vpop.eup %9544  ;;  %9550 = vrcp.f32 %v3196_v46  ;;  %9131 = vmatprep.subr.msk.bf16.mxu1 %vm1876_vm0, %v3393_v14  ;;  %v12301_v14 = vpop.f32.mrf.mxu1 }
 0x5ff   : > { %v9547_v41 = vpop.eup %9546  ;;  %v3232_v8 = vmul.f32 %v9545_v53, %v12150_v58  ;;  %9552 = vrcp.f32 %v3200_v15 }
 0x600   : > { %v3198_v30 = vpop.xlane.xlu1 %3197  ;;  %v3234_v19 = vmul.f32 %v9547_v41, %v12148_v48 }
 0x601   : > { %9554 = vrcp.f32 %v3198_v30  ;;  %v3245_v0 = vpack.c.bf16 %v3232_v8, %v3231_v54 }
 0x602   : > { %v3246_v55 = vpack.c.bf16 %v3234_v19, %v3233_v63 }
 0x603   : > { %8962 = vmatprep.mubr.bf16.mxu1 %v3245_v0 }
 0x604   : > { %v3208_v36 = vpop.xlane.xlu1 %3207  ;;  %8963 = vmatmul.mubr.bf16.gmra.mxu1 %v3246_v55 }
 0x605   : > { %8985 = vmatpush3.bf16.xpose.msra.mxu1 %v3435_v50 }
 0x608   : > { %v3204_v56 = vpop.xlane.xlu1 %3203 }
 0x60a   : > { %v9549_v39 = vpop.eup %9548 }
 0x60b   : > { %v9551_v20 = vpop.eup %9550  ;;  %v3238_v49 = vmul.f32 %v9549_v39, %v12162_v21 }
 0x60c   : > { %v3210_v47 = vpop.xlane.xlu1 %3209  ;;  %v9553_v58 = vpop.eup %9552  ;;  %v3235_v16 = vmul.f32 %v9551_v20, %v12159_v22 }
 0x60d   : > { %v3237_v28 = vmul.f32 %v9553_v58, %v12155_v57  ;;  %9556 = vrcp.f32 %v3210_v47 }
 0x60e   : > { %v9555_v61 = vpop.eup %9554  ;;  %9558 = vrcp.f32 %v3204_v56 }
 0x60f   : > { %v3236_v48 = vmul.f32 %v9555_v61, %v12165_v11  ;;  %v3248_v23 = vpack.c.bf16 %v3238_v49, %v3237_v28  ;;  %9560 = vrcp.f32 %v3208_v36 }
 0x610   : > { %v3389_v13 = vpop.permute.xlu1 %3388 }
 0x611   : > { %v3247_v29 = vpack.c.bf16 %v3236_v48, %v3235_v16  ;;  %v3429_v41 = vsel %vm1876_vm0, %v3389_v13, 0 }
 0x613   : > { %8966 = vmatprep.mubr.bf16.mxu1 %v3247_v29 }
 0x614   : > { %v3365_v33 = vpop.permute.xlu1 %3364  ;;  %8967 = vmatmul.mubr.bf16.gmra.mxu1 %v3248_v23  ;;  %v10205_v23 = vld [vmem:[%s14472_s1 + $0x80] sm:$0xff] }
 0x618   : > { %v3367_v44 = vpop.permute.xlu1 %3366 }
 0x61a   : > { %v9557_v5 = vpop.eup %9556 }
 0x61b   : > { %v12303_v52 = vpop.f32.mrf.mxu1  ;;  %v9559_v59 = vpop.eup %9558  ;;  %v3242_v8 = vmul.f32 %v9557_v5, %v12181_v60 }
 0x61c   : > { %14670 = vst [vmem:[#allocation35_spill] sm:$0xff] %v12303_v52  ;;  %v3369_v21 = vpop.permute.xlu1 %3368  ;;  %v9561_v53 = vpop.eup %9560  ;;  %v3239_v30 = vmul.f32 %v9559_v59, %v12174_v25 }
 0x61d   : > { %v12305_v2 = vpop.f32.mrf.mxu1  ;;  %v3241_v0 = vmul.f32 %v9561_v53, %v12167_v17 }
 0x61f   : > { %v12307_v27 = vpop.f32.mrf.mxu1  ;;  %v3250_v50 = vpack.c.bf16 %v3242_v8, %v3241_v0  ;;  %v10204_v0 = vld [vmem:[%s14472_s1 + $0x90] sm:$0xff] }
 0x620   : > { %v3371_v57 = vpop.permute.xlu1 %3370 }
 0x621   : > { %v12320_v60 = vpop.f32.mrf.mxu1 }
 0x624   : > { %v3206_v11 = vpop.xlane.xlu0 %3205  ;;  %v3373_v24 = vpop.permute.xlu1 %3372 }
 0x625   : > { %9562 = vrcp.f32 %v3206_v11 }
 0x628   : > { %v3391_v15 = vpop.permute.xlu0 %3390  ;;  %v3377_v62 = vpop.permute.xlu1 %3376 }
 0x629   : > { %9132 = vmatprep.subr.msk.bf16.mxu1 %vm1876_vm0, %v3391_v15  ;;  %v3432_v31 = vsel %vm1876_vm0, %v3391_v15, 0 }
 0x62a   : > { %8987 = vmatpush3.bf16.xpose.msra.mxu1 %v3432_v31 }
 0x62b   : > { %9133 = vmatprep.subr.msk.bf16.mxu1 %vm1876_vm0, %v3389_v13 }
 0x62c   : > { %v3375_v46 = vpop.permute.xlu0 %3374  ;;  %v3754_v36 = vpop.permute.xlu1 %3753 }
 0x630   : > { %v3379_v34 = vpop.permute.xlu0 %3378 }
 0x632   : > { %v9563_v54 = vpop.eup %9562  ;;  %8989 = vmatpush3.bf16.xpose.msra.mxu1 %v3429_v41 }
 0x633   : > { %v3240_v63 = vmul.f32 %v9563_v54, %v12214_v7 }
 0x634   : > { %v3756_v19 = vpop.permute.xlu0 %3755 }
 0x635   : > { %9006 = vmatprep.subr.bf16.mxu0 %v3756_v19  ;;  %v3249_v55 = vpack.c.bf16 %v3240_v63, %v3239_v30 }
 0x636   : > { %9007 = vmatpush3.bf16.msra.mxu0 %v3756_v19 }
 0x637   : > { %8970 = vmatprep.mubr.bf16.mxu1 %v3249_v55  ;;  %9008 = vmatprep.subr.bf16.mxu0 %v3754_v36 }
 0x638   : > { %8971 = vmatmul.mubr.bf16.gmra.mxu1 %v3250_v50  ;;  %v3752_v56 = vpop.permute.xlu0 %3751 }
 0x639   : > { %8990 = vmatprep.mubr.msk.bf16.mxu1 %vm1876_vm0, %v3365_v33  ;;  %v14671_v33 = vmov 0  }
 0x63a   : > { %9009 = vmatpush3.bf16.msra.mxu0 %v3754_v36 }
 0x63b   : > { %9010 = vmatprep.subr.bf16.mxu0 %v3752_v56 }
 0x63c   : > { %v3750_v25 = vpop.permute.xlu0 %3749 }
 0x63e   : > { %9011 = vmatpush3.bf16.msra.mxu0 %v3752_v56 }
 0x63f   : > { %9012 = vmatprep.subr.bf16.mxu0 %v3750_v25 }
 0x640   : > { %8991 = vmatmul.mubr.msk.bf16.vlgmr.msra.gmra.mxu1 %vm1876_vm0, %v3367_v44 }
 0x641   : > { %v12323_v17 = vpop.f32.mrf.mxu1  ;;  %8994 = vmatprep.mubr.msk.bf16.mxu1 %vm1876_vm0, %v3369_v21 }
 0x642   : > { %9013 = vmatpush3.bf16.msra.mxu0 %v3750_v25 }
 0x643   : > { %v12326_v7 = vpop.f32.mrf.mxu1 }
 0x645   : > { %v12328_v39 = vpop.f32.mrf.mxu1 }
 0x647   : > { %v12332_v47 = vpop.f32.mrf.mxu1 }
 0x648   : > { %8995 = vmatmul.mubr.msk.bf16.gmra.mxu1 %vm1876_vm0, %v3371_v57 }
 0x649   : > { %v12335_v58 = vpop.f32.mrf.mxu1  ;;  %8998 = vmatprep.mubr.msk.bf16.mxu1 %vm1876_vm0, %v3373_v24 }
 0x64b   : > { %v12338_v61 = vpop.f32.mrf.mxu1 }
 0x64d   : > { %v12340_v49 = vpop.f32.mrf.mxu1 }
 0x64f   : > { %v12344_v48 = vpop.f32.mrf.mxu1 }
 0x650   : > { %8999 = vmatmul.mubr.msk.bf16.gmra.mxu1 %vm1876_vm0, %v3375_v46 }
 0x651   : > { %v12347_v13 = vpop.f32.mrf.mxu1  ;;  %9002 = vmatprep.mubr.msk.bf16.mxu1 %vm1876_vm0, %v3377_v62 }
 0x653   : > { %v12350_v28 = vpop.f32.mrf.mxu1 }
 0x655   : > { %v12352_v29 = vpop.f32.mrf.mxu1 }
 0x657   : > { %v12358_v44 = vpop.f32.mrf.mxu1 }
 0x658   : > { %9003 = vmatmul.mubr.msk.bf16.gmra.mxu1 %vm1876_vm0, %v3379_v34 }
 0x659   : > { %4914 = vmatprep.mubr.bf16.mxu1 %v14671_v33 }
 0x65c   : > { %v12360_v21 = vpop.f32.mrf.mxu1 }
 0x65e   : > { %v12362_v57 = vpop.f32.mrf.mxu1 }
 0x660   : > { %v12364_v11 = vpop.f32.mrf.mxu1 }
 0x662   : > { %v12368_v31 = vpop.f32.mrf.mxu1 }
 0x68b   : > { %v12370_v24 = vpop.f32.mrf.mxu1 }
 0x68c   : > { %14672 = vst [vmem:[#allocation34_spill] sm:$0xff] %v12370_v24 }
 0x68d   : > { %v12372_v46 = vpop.f32.mrf.mxu1 }
 0x68e   : > { %14673 = vst [vmem:[#allocation36_spill] sm:$0xff] %v12372_v46 }
 0x68f   : > { %v12374_v5 = vpop.f32.mrf.mxu1 }
 0x690   : > { %14674 = vst [vmem:[#allocation37_spill] sm:$0xff] %v12374_v5 }
 0x691   : > { %v12378_v62 = vpop.f32.mrf.mxu1 }
 0x692   : > { %14675 = vst [vmem:[#allocation38_spill] sm:$0xff] %v12378_v62 }
 0x6c4   : > { %v12380_v34 = vpop.f32.mrf.mxu1 }
 0x6c5   : > { %14676 = vst [vmem:[#allocation39_spill] sm:$0xff] %v12380_v34  ;;  %v10215_v34 = vld [vmem:[%s14472_s1 + $0xc8] sm:$0xff] }
 0x6c6   : > { %v12382_v53 = vpop.f32.mrf.mxu1 }
 0x6c7   : > { %14677 = vst [vmem:[#allocation22_spill] sm:$0xff] %v12382_v53 }
 0x6c8   : > { %v12384_v41 = vpop.f32.mrf.mxu1 }
 0x6c9   : > { %14678 = vst [vmem:[#allocation26_spill] sm:$0xff] %v12384_v41 }
 0x6ca   : > { %v12388_v8 = vpop.f32.mrf.mxu1 }
 0x6cb   : > { %14679 = vst [vmem:[#allocation40_spill] sm:$0xff] %v12388_v8 }
 0x6d4   : > { %v12390_v30 = vpop.f32.mrf.mxu1 }
 0x6d5   : > { %14680 = vst [vmem:[#allocation23_spill] sm:$0xff] %v12390_v30  ;;  %v10210_v30 = vld [vmem:[%s14472_s1 + $0xa0] sm:$0xff] }
 0x6d6   : > { %v12392_v63 = vpop.f32.mrf.mxu1 }
 0x6d7   : > { %14681 = vst [vmem:[#allocation24_spill] sm:$0xff] %v12392_v63 }
 0x6d8   : > { %v12394_v19 = vpop.f32.mrf.mxu1 }
 0x6d9   : > { %14682 = vst [vmem:[#allocation41_spill] sm:$0xff] %v12394_v19 }
 0x6da   : > { %v12398_v55 = vpop.f32.mrf.mxu1 }
 0x6db   : > { %14683 = vst [vmem:[#allocation42_spill] sm:$0xff] %v12398_v55  ;;  %v10213_v55 = vld [vmem:[%s14472_s1 + $0xd8] sm:$0xff] }
 0x6f8   : > { %v12400_v36 = vpop.f32.mrf.mxu1 }
 0x6f9   : > { %14684 = vst [vmem:[#allocation20_spill] sm:$0xff] %v12400_v36  ;;  %v10208_v36 = vld [vmem:[%s14472_s1 + $0xb0] sm:$0xff] }
 0x6fa   : > { %v12402_v50 = vpop.f32.mrf.mxu1 }
 0x6fb   : > { %14685 = vst [vmem:[#allocation21_spill] sm:$0xff] %v12402_v50 }
 0x6fc   : > { %v12404_v56 = vpop.f32.mrf.mxu1 }
 0x6fd   : > { %14686 = vst [vmem:[#allocation28_spill] sm:$0xff] %v12404_v56 }
 0x6fe   : > { %v12408_v54 = vpop.f32.mrf.mxu1 }
 0x6ff   : > { %14687 = vst [vmem:[#allocation45_spill] sm:$0xff] %v12408_v54 }
 0x700   : > { %v8992_v59 = vpop.f32.mrf.mxu1 }
 0x701   : > { %v3551_v22 = vmul.f32 0.125, %v8992_v59 }
 0x702   : > { %v3486_v32 = vpop.f32.mrf.mxu1 }
 0x703   : > { %v12413_v38 = vadd.f32 %v10204_v0, %v3551_v22  ;;  %v3549_v43 = vmul.f32 0.125, %v3486_v32  ;;  %v10206_v22 = vld [vmem:[%s14472_s1 + $0x98] sm:$0xff]  ;;  %v10207_v0 = vld [vmem:[%s14472_s1 + $0x88] sm:$0xff] }
 0x704   : > { %v8993_v15 = vpop.f32.mrf.mxu1 }
 0x705   : > { %v12418_v16 = vadd.f32 %v10205_v23, %v3549_v43  ;;  %v3552_v25 = vmul.f32 0.125, %v8993_v15  ;;  %3585 = vmax.xlane.f32.xlu0 %v12413_v38 }
 0x706   : > { %v3489_v20 = vpop.f32.mrf.mxu1 }
 0x707   : > { %v3550_v59 = vmul.f32 0.125, %v3489_v20  ;;  %3581 = vmax.xlane.f32.xlu1 %v12418_v16  ;;  %v12425_v32 = vadd.f32 %v10206_v22, %v3552_v25 }
 0x708   : > { %v8996_v33 = vpop.f32.mrf.mxu1 }
 0x709   : > { %v12430_v43 = vadd.f32 %v10207_v0, %v3550_v59  ;;  %v3555_v23 = vmul.f32 0.125, %v8996_v33  ;;  %v10209_v59 = vld [vmem:[%s14472_s1 + $0xb8] sm:$0xff] }
 0x70a   : > { %v3502_v15 = vpop.f32.mrf.mxu1 }
 0x70b   : > { %3587 = vmax.xlane.f32.xlu1 %v12425_v32  ;;  %3583 = vmax.xlane.f32.xlu0 %v12430_v43  ;;  %v12437_v56 = vadd.f32 %v10208_v36, %v3555_v23  ;;  %v3553_v25 = vmul.f32 0.125, %v3502_v15  ;;  %v10211_v15 = vld [vmem:[%s14472_s1 + $0xa8] sm:$0xff] }
 0x70c   : > { %v8997_v20 = vpop.f32.mrf.mxu1 }
 0x70d   : > { %v3556_v22 = vmul.f32 0.125, %v8997_v20  ;;  %v12448_v19 = vadd.f32 %v10210_v30, %v3553_v25 }
 0x70e   : > { %v3505_v54 = vpop.f32.mrf.mxu1 }
 0x70f   : > { %v12442_v33 = vadd.f32 %v10209_v59, %v3556_v22  ;;  %v3554_v0 = vmul.f32 0.125, %v3505_v54  ;;  %3593 = vmax.xlane.f32.xlu0 %v12437_v56  ;;  %v10212_v22 = vld [vmem:[%s14472_s1 + $0xd0] sm:$0xff] }
 0x710   : > { %v9000_v50 = vpop.f32.mrf.mxu1 }
 0x711   : > { %v3559_v36 = vmul.f32 0.125, %v9000_v50  ;;  %3595 = vmax.xlane.f32.xlu1 %v12442_v33  ;;  %v12454_v20 = vadd.f32 %v10211_v15, %v3554_v0 }
 0x712   : > { %v3518_v23 = vpop.f32.mrf.mxu1 }
 0x713   : > { %3589 = vmax.xlane.f32.xlu0 %v12448_v19  ;;  %v12460_v59 = vadd.f32 %v10212_v22, %v3559_v36  ;;  %v3557_v30 = vmul.f32 0.125, %v3518_v23  ;;  %v10214_v36 = vld [vmem:[%s14472_s1 + $0xc0] sm:$0xff] }
 0x714   : > { %v9001_v54 = vpop.f32.mrf.mxu1 }
 0x715   : > { %v3560_v50 = vmul.f32 0.125, %v9001_v54  ;;  %3591 = vmax.xlane.f32.xlu1 %v12454_v20  ;;  %v12472_v22 = vadd.f32 %v10214_v36, %v3557_v30 }
 0x716   : > { %v3521_v25 = vpop.f32.mrf.mxu1 }
 0x717   : > { %v12466_v0 = vadd.f32 %v10213_v55, %v3560_v50  ;;  %v3558_v15 = vmul.f32 0.125, %v3521_v25  ;;  %3601 = vmax.xlane.f32.xlu0 %v12460_v59  ;;  %v10216_v50 = vld [vmem:[%s14472_s1 + $0xf0] sm:$0xff] }
 0x718   : > { %v9004_v63 = vpop.f32.mrf.mxu1 }
 0x719   : > { %v3563_v23 = vmul.f32 0.125, %v9004_v63  ;;  %3603 = vmax.xlane.f32.xlu1 %v12466_v0  ;;  %v12478_v55 = vadd.f32 %v10215_v34, %v3558_v15  ;;  %v10217_v63 = vld [vmem:[%s14472_s1 + $0xe0] sm:$0xff] }
 0x71a   : > { %v3534_v54 = vpop.f32.mrf.mxu1 }
 0x71b   : > { %3597 = vmax.xlane.f32.xlu0 %v12472_v22  ;;  %v12484_v25 = vadd.f32 %v10216_v50, %v3563_v23  ;;  %v3561_v30 = vmul.f32 0.125, %v3534_v54  ;;  %v10218_v54 = vld [vmem:[%s14472_s1 + $0xf8] sm:$0xff] }
 0x71c   : > { %v9005_v34 = vpop.f32.mrf.mxu1 }
 0x71d   : > { %3599 = vmax.xlane.f32.xlu1 %v12478_v55  ;;  %v12491_v36 = vadd.f32 %v10217_v63, %v3561_v30  ;;  %v3564_v15 = vmul.f32 0.125, %v9005_v34  ;;  %v10219_v30 = vld [vmem:[%s14472_s1 + $0xe8] sm:$0xff] }
 0x71e   : > { %v3537_v23 = vpop.f32.mrf.mxu1 }
 0x71f   : > { %3609 = vmax.xlane.f32.xlu0 %v12484_v25  ;;  %v12501_v50 = vadd.f32 %v10218_v54, %v3564_v15  ;;  %v3562_v41 = vmul.f32 0.125, %v3537_v23 }
 0x723   : > { %3605 = vmax.xlane.f32.xlu0 %v12491_v36 }
 0x72e   : > { %3745 = vrot.lane.b32.xlu1 %v14651_v6, %s10421_s12  ;;  %v12507_v6 = vadd.f32 %v10219_v30, %v3562_v41 }
 0x739   : > { %3747 = vrot.lane.b32.xlu0 %v14650_v12, %s10421_s12 }
 0x752   : > { %3611 = vmax.xlane.f32.xlu1 %v12501_v50 }
 0x756   : > { %3607 = vmax.xlane.f32.xlu1 %v12507_v6 }
 0x78e   : > { %v3586_v12 = vpop.xlane.xlu0 %3585 }
 0x78f   : > { %v3615_v63 = vsub.f32 %v12413_v38, %v3586_v12 }
 0x790   : > { %v3582_v34 = vpop.xlane.xlu1 %3581 }
 0x791   : > { %v3633_v8 = vmul.f32 1.442695, %v3615_v63  ;;  %v3613_v53 = vsub.f32 %v12418_v16, %v3582_v34 }
 0x793   : > { %9564 = vpow2.f32 %v3633_v8  ;;  %v3629_v15 = vmul.f32 1.442695, %v3613_v53 }
 0x794   : > { %v3588_v23 = vpop.xlane.xlu1 %3587  ;;  %v3584_v54 = vpop.xlane.xlu0 %3583 }
 0x795   : > { %v3616_v24 = vsub.f32 %v12425_v32, %v3588_v23  ;;  %9566 = vpow2.f32 %v3629_v15  ;;  %v3614_v41 = vsub.f32 %v12430_v43, %v3584_v54 }
 0x797   : > { %v3635_v5 = vmul.f32 1.442695, %v3616_v24  ;;  %v3631_v38 = vmul.f32 1.442695, %v3614_v41 }
 0x798   : > { %v3594_v30 = vpop.xlane.xlu0 %3593 }
 0x799   : > { %v3619_v62 = vsub.f32 %v12437_v56, %v3594_v30  ;;  %9568 = vpow2.f32 %v3635_v5 }
 0x79a   : > { %v3596_v46 = vpop.xlane.xlu1 %3595 }
 0x79b   : > { %v3641_v12 = vmul.f32 1.442695, %v3619_v62  ;;  %v3620_v16 = vsub.f32 %v12442_v33, %v3596_v46 }
 0x79c   : > { %v3590_v63 = vpop.xlane.xlu0 %3589 }
 0x79d   : > { %9570 = vpow2.f32 %v3641_v12  ;;  %v3617_v53 = vsub.f32 %v12448_v19, %v3590_v63  ;;  %v3643_v15 = vmul.f32 1.442695, %v3620_v16 }
 0x79e   : > { %v3592_v8 = vpop.xlane.xlu1 %3591  ;;  %9572 = vpow2.f32 %v3631_v38 }
 0x79f   : > { %v3637_v32 = vmul.f32 1.442695, %v3617_v53  ;;  %v3618_v24 = vsub.f32 %v12454_v20, %v3592_v8 }
 0x7a0   : > { %v12518_v34 = vpop.eup %9564  ;;  %v3602_v43 = vpop.xlane.xlu0 %3601 }
 0x7a1   : > { %9574 = vpow2.f32 %v3637_v32  ;;  %v3639_v56 = vmul.f32 1.442695, %v3618_v24  ;;  %3665 = vadd.xlane.f32.xlu1 %v12518_v34 }
 0x7a2   : > { %v12521_v5 = vpop.eup %9566  ;;  %v3604_v46 = vpop.xlane.xlu1 %3603 }
 0x7a3   : > { %9576 = vpow2.f32 %v3639_v56  ;;  %v3624_v32 = vsub.f32 %v12466_v0, %v3604_v46 }
 0x7a4   : > { %v3598_v62 = vpop.xlane.xlu0 %3597  ;;  %9578 = vpow2.f32 %v3643_v15  ;;  %v3623_v15 = vsub.f32 %v12460_v59, %v3602_v43 }
 0x7a5   : > { %3661 = vadd.xlane.f32.xlu1 %v12521_v5  ;;  %v3621_v53 = vsub.f32 %v12472_v22, %v3598_v62 }
 0x7a6   : > { %v12524_v19 = vpop.eup %9568  ;;  %v3600_v54 = vpop.xlane.xlu1 %3599  ;;  %v3649_v52 = vmul.f32 1.442695, %v3623_v15  ;;  %v14689_v15 = vpack.c.bf16 %v12340_v49, %v12335_v58 }
 0x7a7   : > { %v3622_v8 = vsub.f32 %v12478_v55, %v3600_v54  ;;  %v3645_v24 = vmul.f32 1.442695, %v3621_v53  ;;  %v14688_v53 = vpack.c.bf16 %v12328_v39, %v12323_v17  ;;  %v2823_v17 = vpack.c.bf16 %v12368_v31, %v12362_v57 }
 0x7a8   : > { %v3610_v33 = vpop.xlane.xlu0 %3609  ;;  %v14691_v39 = vpack.c.bf16 %v12364_v11, %v12360_v21 }
 0x7a9   : > { %3667 = vadd.xlane.f32.xlu1 %v12524_v19  ;;  %v3647_v56 = vmul.f32 1.442695, %v3622_v8  ;;  %9580 = vpow2.f32 %v3645_v24  ;;  %v2817_v8 = vpack.c.bf16 %v12332_v47, %v12326_v7  ;;  %v2821_v24 = vpack.c.bf16 %v12358_v44, %v12350_v28 }
 0x7aa   : > { %v12527_v20 = vpop.eup %9570  ;;  %v3746_v16 = vpop.permute.xlu1 %3745  ;;  %v14690_v7 = vpack.c.bf16 %v12352_v29, %v12347_v13 }
 0x7ab   : > { %3673 = vadd.xlane.f32.xlu0 %v12527_v20  ;;  %v12530_v23 = vpop.eup %9572  ;;  %9582 = vpow2.f32 %v3647_v56  ;;  %v9220_v56 = vld [vmem:[%s10664_s15 + $0x38] sm:$0xff]  }
 0x7ac   : > { %v3606_v41 = vpop.xlane.xlu0 %3605 }
 0x7ad   : > { %3663 = vadd.xlane.f32.xlu1 %v12530_v23 }
 0x7ae   : > { %v12533_v30 = vpop.eup %9574 }
 0x7af   : > { %3669 = vadd.xlane.f32.xlu0 %v12533_v30 }
 0x7b0   : > { %v12536_v38 = vpop.eup %9576  ;;  %v3748_v12 = vpop.permute.xlu0 %3747 }
 0x7b1   : > { %3671 = vadd.xlane.f32.xlu1 %v12536_v38  ;;  %9014 = vmatprep.subr.bf16.mxu0 %v3748_v12  ;;  %v12539_v63 = vpop.eup %9578 }
 0x7b2   : > { %9015 = vmatpush3.bf16.msra.mxu0 %v3748_v12  ;;  %v3651_v12 = vmul.f32 1.442695, %v3624_v32  ;;  %v2819_v32 = vpack.c.bf16 %v12344_v48, %v12338_v61 }
 0x7b3   : > { %3675 = vadd.xlane.f32.xlu0 %v12539_v63  ;;  %9016 = vmatprep.subr.bf16.mxu0 %v3746_v16 }
 0x7b4   : > { %9584 = vpow2.f32 %v3651_v12 }
 0x7b5   : > { %9586 = vpow2.f32 %v3649_v52 }
 0x7b6   : > { %9017 = vmatpush3.bf16.msra.mxu0 %v3746_v16  ;;  %v3625_v16 = vsub.f32 %v12491_v36, %v3606_v41  ;;  %v12554_v54 = vpop.eup %9580 }
 0x7b8   : > { %v3653_v22 = vmul.f32 1.442695, %v3625_v16  ;;  %v12557_v36 = vpop.eup %9582 }
 0x7ba   : > { %9588 = vpow2.f32 %v3653_v22 }
 0x7c1   : > { %v12560_v52 = vpop.eup %9584 }
 0x7c2   : > { %3741 = vrot.lane.b32.xlu1 %v14659_v51, %s10421_s12 }
 0x7c9   : > { %3743 = vrot.lane.b32.xlu0 %v14655_v42, %s10421_s12  ;;  %v3627_v42 = vsub.f32 %v12484_v25, %v3610_v33  ;;  %v12563_v25 = vpop.eup %9586 }
 0x7cb   : > { %v3657_v46 = vmul.f32 1.442695, %v3627_v42 }
 0x7db   : > { %v3612_v51 = vpop.xlane.xlu1 %3611 }
 0x7dc   : > { %v3628_v55 = vsub.f32 %v12501_v50, %v3612_v51  ;;  %v12566_v50 = vpop.eup %9588 }
 0x7de   : > { %v3659_v43 = vmul.f32 1.442695, %v3628_v55 }
 0x7df   : > { %v3608_v62 = vpop.xlane.xlu1 %3607 }
 0x7e0   : > { %v3626_v0 = vsub.f32 %v12507_v6, %v3608_v62 }
 0x7e2   : > { %v3655_v59 = vmul.f32 1.442695, %v3626_v0 }
 0x7e4   : > { %9590 = vpow2.f32 %v3655_v59  ;;  %v9221_v59 = vld [vmem:[%s10664_s15 + $0x30] sm:$0xff]  }
 0x7e5   : > { %9592 = vpow2.f32 %v3657_v46 }
 0x7e6   : > { %3677 = vadd.xlane.f32.xlu1 %v12554_v54  ;;  %9594 = vpow2.f32 %v3659_v43 }
 0x7e8   : > { %3679 = vadd.xlane.f32.xlu0 %v12557_v36 }
 0x7ea   : > { %3683 = vadd.xlane.f32.xlu1 %v12560_v52 }
 0x7ec   : > { %3681 = vadd.xlane.f32.xlu0 %v12563_v25 }
 0x7f0   : > { %3685 = vadd.xlane.f32.xlu0 %v12566_v50 }
 0x7f1   : > { %v12569_v6 = vpop.eup %9590 }
 0x7f2   : > { %3687 = vadd.xlane.f32.xlu1 %v12569_v6  ;;  %v12572_v33 = vpop.eup %9592 }
 0x7f3   : > { %v12575_v41 = vpop.eup %9594 }
 0x7f4   : > { %3689 = vadd.xlane.f32.xlu0 %v12572_v33 }
 0x7f6   : > { %3691 = vadd.xlane.f32.xlu1 %v12575_v41 }
 0x807   : > { %2835 = vrot.lane.b32.xlu1 %v14688_v53, %s10421_s12 }
 0x80a   : > { %2833 = vrot.lane.b32.xlu0 %v2817_v8, %s10421_s12  ;;  %v9222_v8 = vld [vmem:[%s10664_s15 + $0x28] sm:$0xff]  }
 0x80b   : > { %2837 = vrot.lane.b32.xlu1 %v2819_v32, %s10421_s12 }
 0x80e   : > { %2839 = vrot.lane.b32.xlu0 %v14689_v15, %s10421_s12  ;;  %v9225_v15 = vld [vmem:[%s10664_s15 + $0x10] sm:$0xff]  }
 0x80f   : > { %2841 = vrot.lane.b32.xlu1 %v2821_v24, %s10421_s12  ;;  %v9224_v24 = vld [vmem:[%s10664_s15 + $0x18] sm:$0xff]  }
 0x812   : > { %2843 = vrot.lane.b32.xlu0 %v14690_v7, %s10421_s12 }
 0x813   : > { %2845 = vrot.lane.b32.xlu1 %v2823_v17, %s10421_s12  ;;  %v9227_v17 = vld [vmem:[%s10664_s15] sm:$0xff]  }
 0x816   : > { %2847 = vrot.lane.b32.xlu0 %v14691_v39, %s10421_s12 }
 0x82a   : > { %v3666_v47 = vpop.xlane.xlu1 %3665 }
 0x82e   : > { %v3662_v58 = vpop.xlane.xlu1 %3661 }
 0x832   : > { %v3668_v61 = vpop.xlane.xlu1 %3667 }
 0x833   : > { %9596 = vrcp.f32 %v3668_v61 }
 0x834   : > { %v3674_v49 = vpop.xlane.xlu0 %3673  ;;  %9598 = vrcp.f32 %v3662_v58 }
 0x835   : > { %9600 = vrcp.f32 %v3666_v47 }
 0x836   : > { %v3664_v48 = vpop.xlane.xlu1 %3663 }
 0x837   : > { %9602 = vrcp.f32 %v3664_v48 }
 0x838   : > { %v3670_v28 = vpop.xlane.xlu0 %3669 }
 0x839   : > { %9604 = vrcp.f32 %v3670_v28 }
 0x83a   : > { %v3672_v13 = vpop.xlane.xlu1 %3671 }
 0x83b   : > { %9606 = vrcp.f32 %v3672_v13 }
 0x83c   : > { %v3676_v29 = vpop.xlane.xlu0 %3675 }
 0x83d   : > { %9608 = vrcp.f32 %v3676_v29 }
 0x83e   : > { %9610 = vrcp.f32 %v3674_v49  ;;  %v3742_v11 = vpop.permute.xlu1 %3741 }
 0x840   : > { %v3744_v44 = vpop.permute.xlu0 %3743  ;;  %v9597_v21 = vpop.eup %9596 }
 0x841   : > { %9018 = vmatprep.subr.bf16.mxu0 %v3744_v44  ;;  %v9599_v57 = vpop.eup %9598  ;;  %v3712_v16 = vmul.f32 %v9597_v21, %v12524_v19 }
 0x842   : > { %9019 = vmatpush3.bf16.msra.mxu0 %v3744_v44  ;;  %v9601_v31 = vpop.eup %9600  ;;  %v3709_v51 = vmul.f32 %v9599_v57, %v12521_v5 }
 0x843   : > { %9020 = vmatprep.subr.bf16.mxu0 %v3742_v11  ;;  %v3711_v62 = vmul.f32 %v9601_v31, %v12518_v34 }
 0x844   : > { %v9603_v12 = vpop.eup %9602 }
 0x845   : > { %v3710_v42 = vmul.f32 %v9603_v12, %v12530_v23  ;;  %v3726_v46 = vpack.c.bf16 %v3712_v16, %v3711_v62 }
 0x846   : > { %v9605_v22 = vpop.eup %9604  ;;  %9021 = vmatpush3.bf16.msra.mxu0 %v3742_v11 }
 0x847   : > { %v3725_v55 = vpack.c.bf16 %v3710_v42, %v3709_v51  ;;  %9038 = vmatprep.subr.bf16.mxu0 %v9220_v56  ;;  %v3713_v43 = vmul.f32 %v9605_v22, %v12533_v30 }
 0x848   : > { %v9607_v0 = vpop.eup %9606 }
 0x849   : > { %9022 = vmatprep.mubr.bf16.mxu0 %v3725_v55  ;;  %v3714_v19 = vmul.f32 %v9607_v0, %v12536_v38  ;;  %v9223_v38 = vld [vmem:[%s10664_s15 + $0x20] sm:$0xff]  }
 0x84a   : > { %v9609_v53 = vpop.eup %9608  ;;  %9023 = vmatmul.mubr.bf16.vlgmr.msra.gmra.mxu0 %v3726_v46 }
 0x84b   : > { %v9611_v5 = vpop.eup %9610  ;;  %v3727_v23 = vpack.c.bf16 %v3714_v19, %v3713_v43  ;;  %9039 = vmatpush3.bf16.msra.mxu0 %v9220_v56  ;;  %v3716_v34 = vmul.f32 %v9609_v53, %v12539_v63  ;;  %v9226_v63 = vld [vmem:[%s10664_s15 + $0x8] sm:$0xff]   ;;  %v14692_v19 = vpack.c.bf16 %v12257_v35, %v12253_v18  ;;  %v2307_v53 = vpack.c.bf16 %v12301_v14, %v12281_v4 }
 0x84c   : > { %9040 = vmatprep.subr.bf16.mxu0 %v9221_v59  ;;  %v3715_v32 = vmul.f32 %v9611_v5, %v12527_v20  ;;  %v14693_v5 = vpack.c.bf16 %v12271_v10, %v12267_v45  ;;  %v14695_v10 = vld [vmem:[#allocation35_spill] sm:$0xff] }
 0x84d   : > { %9026 = vmatprep.mubr.bf16.mxu0 %v3727_v23  ;;  %v14696_v14 = vpack.c.bf16 %v12307_v27, %v14695_v10  ;;  %v14705_v10 = vld [vmem:[#allocation38_spill] sm:$0xff] }
 0x84e   : > { %v3728_v30 = vpack.c.bf16 %v3716_v34, %v3715_v32  ;;  %v14694_v34 = vpack.c.bf16 %v12283_v37, %v12279_v1 }
 0x84f   : > { %9041 = vmatpush3.bf16.msra.mxu0 %v9221_v59 }
 0x850   : > { %9042 = vmatprep.subr.bf16.mxu0 %v9222_v8 }
 0x852   : > { %9027 = vmatmul.mubr.bf16.gmra.mxu0 %v3728_v30 }
 0x853   : > { %9043 = vmatpush3.bf16.msra.mxu0 %v9222_v8 }
 0x854   : > { %9044 = vmatprep.subr.bf16.mxu0 %v9223_v38 }
 0x857   : > { %9045 = vmatpush3.bf16.msra.mxu0 %v9223_v38 }
 0x858   : > { %9046 = vmatprep.subr.bf16.mxu0 %v9224_v24 }
 0x85b   : > { %9047 = vmatpush3.bf16.msra.mxu0 %v9224_v24 }
 0x85c   : > { %9048 = vmatprep.subr.bf16.mxu0 %v9225_v15 }
 0x85f   : > { %9049 = vmatpush3.bf16.msra.mxu0 %v9225_v15 }
 0x860   : > { %9050 = vmatprep.subr.bf16.mxu0 %v9226_v63 }
 0x863   : > { %9051 = vmatpush3.bf16.msra.mxu0 %v9226_v63 }
 0x864   : > { %9052 = vmatprep.subr.bf16.mxu0 %v9227_v17 }
 0x867   : > { %9053 = vmatpush3.bf16.msra.mxu0 %v9227_v17 }
 0x86f   : > { %v3678_v20 = vpop.xlane.xlu1 %3677 }
 0x870   : > { %9612 = vrcp.f32 %v3678_v20 }
 0x871   : > { %v3680_v7 = vpop.xlane.xlu0 %3679 }
 0x872   : > { %9614 = vrcp.f32 %v3680_v7 }
 0x873   : > { %v3684_v39 = vpop.xlane.xlu1 %3683 }
 0x874   : > { %9616 = vrcp.f32 %v3684_v39 }
 0x875   : > { %v3682_v47 = vpop.xlane.xlu0 %3681 }
 0x876   : > { %9618 = vrcp.f32 %v3682_v47 }
 0x879   : > { %v3686_v58 = vpop.xlane.xlu0 %3685 }
 0x87a   : > { %9620 = vrcp.f32 %v3686_v58 }
 0x87b   : > { %v3688_v61 = vpop.xlane.xlu1 %3687 }
 0x87c   : > { %9622 = vrcp.f32 %v3688_v61 }
 0x87d   : > { %v9613_v49 = vpop.eup %9612  ;;  %v3690_v48 = vpop.xlane.xlu0 %3689 }
 0x87e   : > { %9624 = vrcp.f32 %v3690_v48  ;;  %v3717_v29 = vmul.f32 %v9613_v49, %v12554_v54 }
 0x87f   : > { %v9615_v28 = vpop.eup %9614  ;;  %v3692_v13 = vpop.xlane.xlu1 %3691 }
 0x880   : > { %9626 = vrcp.f32 %v3692_v13  ;;  %v3718_v44 = vmul.f32 %v9615_v28, %v12557_v36 }
 0x881   : > { %v9617_v21 = vpop.eup %9616  ;;  %v2834_v46 = vpop.permute.xlu0 %2833 }
 0x882   : > { %v3729_v57 = vpack.c.bf16 %v3718_v44, %v3717_v29  ;;  %v3720_v56 = vmul.f32 %v9617_v21, %v12560_v52  ;;  %v2303_v52 = vpack.c.bf16 %v12263_v40, %v12255_v26 }
 0x883   : > { %v9619_v11 = vpop.eup %9618  ;;  %v2836_v59 = vpop.permute.xlu1 %2835 }
 0x884   : > { %9030 = vmatprep.mubr.bf16.mxu0 %v3729_v57  ;;  %v3719_v31 = vmul.f32 %v9619_v11, %v12563_v25  ;;  %v2851_v43 = vsel %vm1876_vm0, %v2303_v52, %v2834_v46 }
 0x885   : > { %v2840_v26 = vpop.permute.xlu0 %2839 }
 0x886   : > { %v3730_v12 = vpack.c.bf16 %v3720_v56, %v3719_v31  ;;  %v2863_v23 = vsel %vm1876_vm0, %v14693_v5, %v2840_v26 }
 0x887   : > { %v9621_v16 = vpop.eup %9620 }
 0x888   : > { %9031 = vmatmul.mubr.bf16.gmra.mxu0 %v3730_v12  ;;  %v3721_v42 = vmul.f32 %v9621_v16, %v12566_v50  ;;  %v2838_v50 = vpop.permute.xlu1 %2837 }
 0x889   : > { %v9623_v51 = vpop.eup %9622  ;;  %v2844_v18 = vpop.permute.xlu0 %2843 }
 0x88a   : > { %v3722_v22 = vmul.f32 %v9623_v51, %v12569_v6  ;;  %v2305_v6 = vpack.c.bf16 %v12277_v9, %v12269_v3  ;;  %v2309_v9 = vpack.c.bf16 %v12320_v60, %v12305_v2  ;;  %v2871_v8 = vsel %vm1876_vm0, %v14694_v34, %v2844_v18  ;;  %v10226_v18 = vld [vmem:[#allocation2 + $0x68] sm:$0xff]  ;;  %v10227_v34 = vld [vmem:[#allocation2 + $0x80] sm:$0xff] }
 0x88b   : > { %v9625_v62 = vpop.eup %9624 }
 0x88c   : > { %v3731_v54 = vpack.c.bf16 %v3722_v22, %v3721_v42  ;;  %v3723_v36 = vmul.f32 %v9625_v62, %v12572_v33  ;;  %v2855_v33 = vsel %vm1876_vm0, %v14692_v19, %v2836_v59  ;;  %v2842_v40 = vpop.permute.xlu1 %2841  ;;  %v10220_v22 = vld [vmem:[#allocation2] sm:$0xff] }
 0x88d   : > { %v9627_v55 = vpop.eup %9626  ;;  %v2867_v3 = vsel %vm1876_vm0, %v2307_v53, %v2842_v40  ;;  %v2848_v45 = vpop.permute.xlu0 %2847  ;;  %v10225_v40 = vld [vmem:[#allocation2 + $0x30] sm:$0xff] }
 0x88e   : > { %9034 = vmatprep.mubr.bf16.mxu0 %v3731_v54  ;;  %v3724_v0 = vmul.f32 %v9627_v55, %v12575_v41  ;;  %v2859_v41 = vsel %vm1876_vm0, %v2305_v6, %v2838_v50  ;;  %v2879_v32 = vsel %vm1876_vm0, %v14696_v14, %v2848_v45  ;;  %v12671_v55 = vld [vmem:[%s14697_s27] ss:$0 sm:$0xff]  ;;  %v10223_v50 = vld [vmem:[#allocation2 + $0x50] sm:$0xff]  ;;  %v14704_v45 = vld [vmem:[#allocation36_spill] sm:$0xff] }
 0x88f   : > { %v3348_v14 = vpack.c.bf16 %v14705_v10, %v14704_v45 }
 0x890   : > { %v3732_v25 = vpack.c.bf16 %v3724_v0, %v3723_v36  ;;  %v2846_v35 = vpop.permute.xlu1 %2845  ;;  %v10221_v36 = vld [vmem:[#allocation2 + $0xd8] sm:$0xff] }
 0x891   : > { %v2875_v4 = vsel %vm1876_vm0, %v2309_v9, %v2846_v35 }
 0x892   : > { %9035 = vmatmul.mubr.bf16.gmra.mxu0 %v3732_v25  ;;  %v10222_v25 = vld [vmem:[#allocation2 + $0xb0] sm:$0xff] }
 0x893   : > { %9054 = vmatprep.mubr.bf16.mxu0 %v2851_v43 }
 0x89a   : > { %9055 = vmatmul.mubr.bf16.vlgmr.msra.gmra.mxu0 %v2855_v33 }
 0x89b   : > { %9058 = vmatprep.mubr.bf16.mxu0 %v2859_v41  ;;  %v10224_v41 = vld [vmem:[#allocation2 + $0x18] sm:$0xff] }
 0x8a2   : > { %9059 = vmatmul.mubr.bf16.gmra.mxu0 %v2863_v23 }
 0x8a3   : > { %9062 = vmatprep.mubr.bf16.mxu0 %v2867_v3 }
 0x8aa   : > { %9063 = vmatmul.mubr.bf16.gmra.mxu0 %v2871_v8 }
 0x8ab   : > { %9066 = vmatprep.mubr.bf16.mxu0 %v2875_v4 }
 0x8b2   : > { %9067 = vmatmul.mubr.bf16.gmra.mxu0 %v2879_v32 }
 0x90a   : > { %v9024_v30 = vpop.f32.mrf.mxu0 }
 0x90c   : > { %v3799_v38 = vpop.f32.mrf.mxu0 }
 0x90e   : > { %v9025_v24 = vpop.f32.mrf.mxu0 }
 0x90f   : > { %v3863_v2 = vpack.c.bf16 %v9025_v24, %v9024_v30  ;;  %v10228_v30 = vld [vmem:[#allocation2 + $0x48] sm:$0xff] }
 0x910   : > { %v3802_v60 = vpop.f32.mrf.mxu0 }
 0x911   : > { %v3862_v15 = vpack.c.bf16 %v3802_v60, %v3799_v38  ;;  %3880 = vrot.lane.b32.xlu0 %v3863_v2, %s10421_s12  ;;  %v10229_v60 = vld [vmem:[#allocation2 + $0xe8] sm:$0xff] }
 0x912   : > { %v9028_v1 = vpop.f32.mrf.mxu0 }
 0x913   : > { %3878 = vrot.lane.b32.xlu1 %v3862_v15, %s10421_s12 }
 0x914   : > { %v3815_v37 = vpop.f32.mrf.mxu0 }
 0x916   : > { %v9029_v63 = vpop.f32.mrf.mxu0 }
 0x917   : > { %v3865_v17 = vpack.c.bf16 %v9029_v63, %v9028_v1 }
 0x918   : > { %v3818_v20 = vpop.f32.mrf.mxu0 }
 0x919   : > { %v3864_v7 = vpack.c.bf16 %v3818_v20, %v3815_v37  ;;  %3884 = vrot.lane.b32.xlu0 %v3865_v17, %s10421_s12  ;;  %v14708_v17 = vld [vmem:[#allocation37_spill] sm:$0xff]  ;;  %v14709_v20 = vld [vmem:[#allocation34_spill] sm:$0xff] }
 0x91b   : > { %3882 = vrot.lane.b32.xlu1 %v3864_v7, %s10421_s12  ;;  %v14710_v7 = vpack.c.bf16 %v14708_v17, %v14709_v20  ;;  %v14734_v20 = vmov 0  }
 0x948   : > { %v9032_v27 = vpop.f32.mrf.mxu0 }
 0x94a   : > { %v3831_v39 = vpop.f32.mrf.mxu0 }
 0x94c   : > { %v9033_v47 = vpop.f32.mrf.mxu0 }
 0x94d   : > { %v3867_v58 = vpack.c.bf16 %v9033_v47, %v9032_v27  ;;  %v10230_v47 = vld [vmem:[#allocation2 + $0x88] sm:$0xff] }
 0x94e   : > { %v3834_v61 = vpop.f32.mrf.mxu0 }
 0x94f   : > { %v3866_v49 = vpack.c.bf16 %v3834_v61, %v3831_v39  ;;  %3888 = vrot.lane.b32.xlu0 %v3867_v58, %s10421_s12 }
 0x951   : > { %3886 = vrot.lane.b32.xlu1 %v3866_v49, %s10421_s12  ;;  %v10231_v49 = vld [vmem:[#allocation2 + $0x60] sm:$0xff] }
 0x952   : > { %v9036_v48 = vpop.f32.mrf.mxu0 }
 0x954   : > { %v3847_v28 = vpop.f32.mrf.mxu0 }
 0x956   : > { %v9037_v13 = vpop.f32.mrf.mxu0 }
 0x957   : > { %v3869_v29 = vpack.c.bf16 %v9037_v13, %v9036_v48  ;;  %v14713_v13 = vld [vmem:[#allocation22_spill] sm:$0xff] }
 0x958   : > { %v3850_v44 = vpop.f32.mrf.mxu0 }
 0x959   : > { %v3868_v21 = vpack.c.bf16 %v3850_v44, %v3847_v28  ;;  %3892 = vrot.lane.b32.xlu0 %v3869_v29, %s10421_s12  ;;  %v14714_v29 = vld [vmem:[#allocation40_spill] sm:$0xff] }
 0x95a   : > { %v9056_v57 = vpop.f32.mrf.mxu0  ;;  %v3350_v44 = vpack.c.bf16 %v14714_v29, %v14713_v13  ;;  %v10237_v29 = vld [vmem:[#allocation2 + $0x40] sm:$0xff] }
 0x95b   : > { %3890 = vrot.lane.b32.xlu1 %v3868_v21, %s10421_s12  ;;  %v4153_v0 = vadd.f32 %v10221_v36, %v9056_v57  ;;  %v10232_v57 = vld [vmem:[#allocation2 + $0xb8] sm:$0xff] }
 0x95c   : > { %v4024_v11 = vpop.f32.mrf.mxu0 }
 0x95d   : > { %v4151_v59 = vadd.f32 %v10222_v25, %v4024_v11  ;;  %v12678_v43 = vadd.f32 %v12671_v55, %v4153_v0  ;;  %v10234_v25 = vld [vmem:[#allocation2 + $0xf0] sm:$0xff] }
 0x95e   : > { %v9057_v31 = vpop.f32.mrf.mxu0 }
 0x95f   : > { %14699 = vst [vmem:[#allocation18_spill] sm:$0xff] %v12678_v43  ;;  %v12682_v33 = vadd.f32 %v12671_v55, %v4151_v59  ;;  %v4154_v26 = vadd.f32 %v10224_v41, %v9057_v31 }
 0x960   : > { %v4027_v56 = vpop.f32.mrf.mxu0 }
 0x961   : > { %v4152_v62 = vadd.f32 %v10220_v22, %v4027_v56  ;;  %14700 = vst [vmem:[#allocation25_spill] sm:$0xff] %v12682_v33  ;;  %v12690_v3 = vadd.f32 %v12671_v55, %v4154_v26 }
 0x962   : > { %v9060_v12 = vpop.f32.mrf.mxu0 }
 0x963   : > { %v12674_v46 = vadd.f32 %v12671_v55, %v4152_v62  ;;  %v4157_v53 = vadd.f32 %v10225_v40, %v9060_v12  ;;  %14702 = vst [vmem:[#allocation46_spill] sm:$0xff] %v12690_v3  ;;  %v10233_v12 = vld [vmem:[#allocation2 + $0x8] sm:$0xff]  ;;  %v14724_v40 = vld [vmem:[#allocation24_spill] sm:$0xff] }
 0x964   : > { %v4040_v16 = vpop.f32.mrf.mxu0  ;;  %v14717_v62 = vld [vmem:[#allocation26_spill] sm:$0xff] }
 0x965   : > { %14698 = vst [vmem:[#allocation43_spill] sm:$0xff] %v12674_v46  ;;  %v4155_v6 = vadd.f32 %v10223_v50, %v4040_v16  ;;  %v12693_v9 = vadd.f32 %v12671_v55, %v4157_v53  ;;  %v14725_v53 = vld [vmem:[#allocation42_spill] sm:$0xff] }
 0x966   : > { %v9061_v51 = vpop.f32.mrf.mxu0 }
 0x967   : > { %v12685_v5 = vadd.f32 %v12671_v55, %v4155_v6  ;;  %14703 = vst [vmem:[#allocation19_spill] sm:$0xff] %v12693_v9  ;;  %v4158_v38 = vadd.f32 %v10228_v30, %v9061_v51  ;;  %v10235_v6 = vld [vmem:[#allocation2 + $0x78] sm:$0xff] }
 0x968   : > { %v4043_v42 = vpop.f32.mrf.mxu0 }
 0x969   : > { %14701 = vst [vmem:[#allocation44_spill] sm:$0xff] %v12685_v5  ;;  %v4156_v35 = vadd.f32 %v10226_v18, %v4043_v42  ;;  %v12713_v39 = vadd.f32 %v12671_v55, %v4158_v38 }
 0x96a   : > { %v9064_v54 = vpop.f32.mrf.mxu0 }
 0x96b   : > { %v12700_v24 = vadd.f32 %v12671_v55, %v4156_v35  ;;  %v4161_v15 = vadd.f32 %v10229_v60, %v9064_v54  ;;  %14711 = vst [vmem:[#allocation30_spill] sm:$0xff] %v12713_v39  ;;  %v14718_v54 = vld [vmem:[#allocation39_spill] sm:$0xff] }
 0x96c   : > { %v4056_v52 = vpop.f32.mrf.mxu0  ;;  %v14719_v36 = vpack.c.bf16 %v14717_v62, %v14718_v54  ;;  %v10239_v62 = vld [vmem:[#allocation2 + $0xc8] sm:$0xff] }
 0x96d   : > { %v4159_v8 = vadd.f32 %v10227_v34, %v4056_v52  ;;  %14706 = vst [vmem:[#allocation29_spill] sm:$0xff] %v12700_v24  ;;  %v12716_v61 = vadd.f32 %v12671_v55, %v4161_v15  ;;  %v14731_v15 = vld [vmem:[#allocation28_spill] sm:$0xff] }
 0x96e   : > { %v9065_v19 = vpop.f32.mrf.mxu0 }
 0x96f   : > { %v12703_v1 = vadd.f32 %v12671_v55, %v4159_v8  ;;  %14712 = vst [vmem:[#allocation31_spill] sm:$0xff] %v12716_v61  ;;  %v4162_v11 = vadd.f32 %v10232_v57, %v9065_v19  ;;  %v14726_v8 = vld [vmem:[#allocation41_spill] sm:$0xff] }
 0x970   : > { %v4059_v23 = vpop.f32.mrf.mxu0 }
 0x971   : > { %14707 = vst [vmem:[#allocation32_spill] sm:$0xff] %v12703_v1  ;;  %v4160_v58 = vadd.f32 %v10230_v47, %v4059_v23  ;;  %v12736_v52 = vadd.f32 %v12671_v55, %v4162_v11  ;;  %v3352_v23 = vpack.c.bf16 %v14725_v53, %v14724_v40  ;;  %v10238_v11 = vld [vmem:[#allocation2 + $0x58] sm:$0xff]  ;;  %v10240_v53 = vld [vmem:[#allocation2 + $0xe0] sm:$0xff] }
 0x972   : > { %v9068_v4 = vpop.f32.mrf.mxu0 }
 0x973   : > { %v12723_v31 = vadd.f32 %v12671_v55, %v4160_v58  ;;  %v4165_v16 = vadd.f32 %v10233_v12, %v9068_v4  ;;  %14720 = vst [vmem:[#allocation27_spill] sm:$0xff] %v12736_v52  ;;  %v14727_v4 = vld [vmem:[#allocation23_spill] sm:$0xff]  ;;  %v10236_v58 = vld [vmem:[#allocation2 + $0x38] sm:$0xff] }
 0x974   : > { %v4072_v37 = vpop.f32.mrf.mxu0  ;;  %v14728_v45 = vpack.c.bf16 %v14726_v8, %v14727_v4 }
 0x975   : > { %v4163_v48 = vadd.f32 %v10231_v49, %v4072_v37  ;;  %14715 = vst [vmem:[#allocation14_spill] sm:$0xff] %v12723_v31  ;;  %v12739_v50 = vadd.f32 %v12671_v55, %v4165_v16  ;;  %v14732_v37 = vld [vmem:[#allocation20_spill] sm:$0xff] }
 0x976   : > { %v9069_v28 = vpop.f32.mrf.mxu0 }
 0x977   : > { %v12726_v51 = vadd.f32 %v12671_v55, %v4163_v48  ;;  %14721 = vst [vmem:[#allocation15_spill] sm:$0xff] %v12739_v50  ;;  %v4166_v19 = vadd.f32 %v10235_v6, %v9069_v28 }
 0x978   : > { %4226 = vadd.xlane.f32.xlu0 %v12674_v46  ;;  %v4075_v42 = vpop.f32.mrf.mxu0 }
 0x979   : > { %14716 = vst [vmem:[#allocation16_spill] sm:$0xff] %v12726_v51  ;;  %v4164_v59 = vadd.f32 %v10234_v25, %v4075_v42  ;;  %v12748_v26 = vadd.f32 %v12671_v55, %v4166_v19 }
 0x97b   : > { %v12744_v41 = vadd.f32 %v12671_v55, %v4164_v59  ;;  %14723 = vst [vmem:[#allocation33_spill] sm:$0xff] %v12748_v26 }
 0x97c   : > { %4228 = vadd.xlane.f32.xlu0 %v12678_v43 }
 0x97d   : > { %14722 = vst [vmem:[#allocation17_spill] sm:$0xff] %v12744_v41 }
 0x97f   : > { %4224 = vadd.xlane.f32.xlu1 %v12682_v33 }
 0x980   : > { %4232 = vadd.xlane.f32.xlu0 %v12685_v5 }
 0x983   : > { %4230 = vadd.xlane.f32.xlu1 %v12690_v3  ;;  %v3881_v32 = vpop.permute.xlu0 %3880 }
 0x984   : > { %4236 = vadd.xlane.f32.xlu0 %v12693_v9  ;;  %v3900_v27 = vsel %vm1876_vm0, %v14710_v7, %v3881_v32  ;;  %v14730_v32 = vld [vmem:[#allocation45_spill] sm:$0xff] }
 0x985   : > { %v3879_v2 = vpop.permute.xlu1 %3878 }
 0x986   : > { %v3896_v63 = vsel %vm1876_vm0, %v3348_v14, %v3879_v2  ;;  %v14729_v14 = vld [vmem:[#allocation21_spill] sm:$0xff] }
 0x987   : > { %4234 = vadd.xlane.f32.xlu1 %v12700_v24  ;;  %9070 = vmatprep.mubr.bf16.mxu0 %v3896_v63  ;;  %v3354_v30 = vpack.c.bf16 %v14730_v32, %v14729_v14  ;;  %v14733_v63 = vpack.c.bf16 %v14731_v15, %v14732_v37  ;;  %v10241_v32 = vld [vmem:[#allocation2 + $0x90] sm:$0xff] }
 0x988   : > { %4240 = vadd.xlane.f32.xlu0 %v12703_v1  ;;  %9071 = vmatmul.mubr.bf16.gmra.mxu0 %v3900_v27 }
 0x98b   : > { %4238 = vadd.xlane.f32.xlu1 %v12713_v39  ;;  %v3885_v21 = vpop.permute.xlu0 %3884 }
 0x98c   : > { %4244 = vadd.xlane.f32.xlu0 %v12716_v61  ;;  %v3908_v0 = vsel %vm1876_vm0, %v14719_v36, %v3885_v21 }
 0x98d   : > { %v3883_v56 = vpop.permute.xlu1 %3882 }
 0x98e   : > { %v3904_v22 = vsel %vm1876_vm0, %v3350_v44, %v3883_v56 }
 0x98f   : > { %4242 = vadd.xlane.f32.xlu1 %v12723_v31  ;;  %9074 = vmatprep.mubr.bf16.mxu0 %v3904_v22 }
 0x990   : > { %4248 = vadd.xlane.f32.xlu0 %v12726_v51  ;;  %9075 = vmatmul.mubr.bf16.gmra.mxu0 %v3908_v0 }
 0x993   : > { %4246 = vadd.xlane.f32.xlu1 %v12736_v52 }
 0x994   : > { %4252 = vadd.xlane.f32.xlu0 %v12739_v50 }
 0x997   : > { %4250 = vadd.xlane.f32.xlu1 %v12744_v41 }
 0x99b   : > { %4254 = vadd.xlane.f32.xlu1 %v12748_v26 }
 0x9c1   : > { %v3889_v18 = vpop.permute.xlu0 %3888 }
 0x9c2   : > { %v3916_v10 = vsel %vm1876_vm0, %v14728_v45, %v3889_v18 }
 0x9c3   : > { %v3887_v35 = vpop.permute.xlu1 %3886 }
 0x9c4   : > { %v3912_v34 = vsel %vm1876_vm0, %v3352_v23, %v3887_v35 }
 0x9c5   : > { %9078 = vmatprep.mubr.bf16.mxu0 %v3912_v34 }
 0x9c6   : > { %9079 = vmatmul.mubr.bf16.gmra.mxu0 %v3916_v10 }
 0x9cb   : > { %v3893_v38 = vpop.permute.xlu0 %3892 }
 0x9cc   : > { %v3924_v17 = vsel %vm1876_vm0, %v14733_v63, %v3893_v38 }
 0x9cd   : > { %v3891_v2 = vpop.permute.xlu1 %3890 }
 0x9ce   : > { %v3920_v60 = vsel %vm1876_vm0, %v3354_v30, %v3891_v2 }
 0x9cf   : > { %9082 = vmatprep.mubr.bf16.mxu0 %v3920_v60  ;;  %v10242_v60 = vld [vmem:[#allocation2 + $0x70] sm:$0xff] }
 0x9d0   : > { %9083 = vmatmul.mubr.bf16.gmra.mxu0 %v3924_v17 }
 0x9d1   : > { %5107 = vmatprep.mubr.bf16.mxu0 %v14734_v20 }
 0xa01   : > { %v4227_v48 = vpop.xlane.xlu0 %4226 }
 0xa02   : > { %v4289_v12 = vmul.f32 0.0078125, %v4227_v48 }
 0xa04   : > { %v12782_v59 = vsub.f32 %v12674_v46, %v4289_v12  ;;  %v9237_v12 = vld [vmem:[%s10691_s16 + $0xc8] ss:$16 sps:$4 sm:$0xff]  }
 0xa05   : > { %v4229_v0 = vpop.xlane.xlu0 %4228 }
 0xa06   : > { %v4290_v19 = vmul.f32 0.0078125, %v4229_v0  ;;  %v4353_v8 = vmul.f32 %v12782_v59, %v12782_v59  ;;  %v9242_v0 = vld [vmem:[%s10691_s16 + $0xa4] ss:$16 sps:$4 sm:$0xff]  }
 0xa08   : > { %v4225_v27 = vpop.xlane.xlu1 %4224  ;;  %v12793_v4 = vsub.f32 %v12678_v43, %v4290_v19  ;;  %v9243_v19 = vld [vmem:[%s10691_s16 + $0xa8] ss:$16 sps:$4 sm:$0xff]  }
 0xa09   : > { %v4288_v13 = vmul.f32 0.0078125, %v4225_v27  ;;  %v4233_v45 = vpop.xlane.xlu0 %4232  ;;  %v9233_v27 = vld [vmem:[%s10691_s16 + $0xec] ss:$16 sps:$4 sm:$0xff]  }
 0xa0a   : > { %v4292_v38 = vmul.f32 0.0078125, %v4233_v45  ;;  %v4354_v63 = vmul.f32 %v12793_v4, %v12793_v4  ;;  %5075 = vmatprep.subr.bf16.mxu0 %v9233_v27  ;;  %v9257_v45 = vld [vmem:[%s10691_s16 + $0x6c] ss:$16 sps:$4 sm:$0xff]   ;;  %v9267_v27 = vld [vmem:[%s10691_s16 + $0x28] ss:$16 sps:$4 sm:$0xff]  }
 0xa0b   : > { %v12771_v42 = vsub.f32 %v12682_v33, %v4288_v13  ;;  %v10243_v13 = vld [vmem:[#allocation2 + $0xc0] sm:$0xff] }
 0xa0c   : > { %v4231_v35 = vpop.xlane.xlu1 %4230 }
 0xa0d   : > { %v4352_v18 = vmul.f32 %v12771_v42, %v12771_v42  ;;  %v4291_v10 = vmul.f32 0.0078125, %v4231_v35  ;;  %v9246_v35 = vld [vmem:[%s10691_s16 + $0x80] ss:$16 sps:$4 sm:$0xff]  }
 0xa0f   : > { %v12800_v2 = vsub.f32 %v12690_v3, %v4291_v10  ;;  %v9252_v10 = vld [vmem:[%s10691_s16 + $0x60] ss:$16 sps:$4 sm:$0xff]  }
 0xa10   : > { %v4235_v17 = vpop.xlane.xlu1 %4234 }
 0xa11   : > { %v4293_v48 = vmul.f32 0.0078125, %v4235_v17  ;;  %v9269_v17 = vld [vmem:[%s10691_s16 + $0x2c] ss:$16 sps:$4 sm:$0xff]  }
 0xa48   : > { %v9072_v7 = vpop.f32.mrf.mxu0 }
 0xa49   : > { %v4169_v44 = vadd.f32 %v10237_v29, %v9072_v7  ;;  %v9230_v7 = vld [vmem:[%s10691_s16 + $0xe4] ss:$16 sps:$4 sm:$0xff]  }
 0xa4a   : > { %v4088_v47 = vpop.f32.mrf.mxu0  ;;  %4882 = vmatprep.subr.bf16.mxu1 %v9230_v7  ;;  %v9264_v7 = vld [vmem:[%s10691_s16 + $0x20] ss:$16 sps:$4 sm:$0xff]  }
 0xa4b   : > { %v4167_v49 = vadd.f32 %v10236_v58, %v4088_v47  ;;  %v12774_v22 = vadd.f32 %v12671_v55, %v4169_v44  ;;  %v9228_v47 = vld [vmem:[%s10691_s16 + $0xe0] ss:$16 sps:$4 sm:$0xff]   ;;  %v9231_v58 = vld [vmem:[%s10691_s16 + $0xe8] ss:$16 sps:$4 sm:$0xff]   ;;  %v4355_v44 = vmul.f32 %v12800_v2, %v12800_v2 }
 0xa4c   : > { %v9073_v28 = vpop.f32.mrf.mxu0  ;;  %4883 = vmatpush1.bf16.msra.mxu1 %v9228_v47  ;;  %5076 = vmatpush1.bf16.msra.mxu0 %v9231_v58  ;;  %v9270_v47 = vld [vmem:[%s10691_s16] ss:$16 sps:$4 sm:$0xff]   ;;  %v9272_v58 = vld [vmem:[%s10691_s16 + $0x4] ss:$16 sps:$4 sm:$0xff]  }
 0xa4d   : > { %v12767_v21 = vadd.f32 %v12671_v55, %v4167_v49  ;;  %14736 = vst [vmem:[#allocation36_spill] sm:$0xff] %v12774_v22  ;;  %v4170_v54 = vadd.f32 %v10239_v62, %v9073_v28  ;;  %v12813_v49 = vsub.f32 %v12685_v5, %v4292_v38  ;;  %v9263_v38 = vld [vmem:[%s10691_s16 + $0x4c] ss:$16 sps:$4 sm:$0xff]  }
 0xa4e   : > { %v4091_v57 = vpop.f32.mrf.mxu0 }
 0xa4f   : > { %14735 = vst [vmem:[#allocation35_spill] sm:$0xff] %v12767_v21  ;;  %v4168_v56 = vadd.f32 %v10238_v11, %v4091_v57  ;;  %4256 = vadd.xlane.f32.xlu0 %v12767_v21  ;;  %v12785_v40 = vadd.f32 %v12671_v55, %v4170_v54  ;;  %v9236_v57 = vld [vmem:[%s10691_s16 + $0xc4] ss:$16 sps:$4 sm:$0xff]   ;;  %v9239_v11 = vld [vmem:[%s10691_s16 + $0xcc] ss:$16 sps:$4 sm:$0xff]   ;;  %v4356_v54 = vmul.f32 %v12813_v49, %v12813_v49 }
 0xa50   : > { %v9076_v16 = vpop.f32.mrf.mxu0  ;;  %4884 = vmatprep.subr.bf16.mxu1 %v9236_v57  ;;  %5077 = vmatprep.subr.bf16.mxu0 %v9239_v11  ;;  %v4239_v11 = vpop.xlane.xlu1 %4238 }
 0xa51   : > { %v12777_v36 = vadd.f32 %v12671_v55, %v4168_v56  ;;  %14738 = vst [vmem:[#allocation37_spill] sm:$0xff] %v12785_v40  ;;  %v4173_v15 = vadd.f32 %v10242_v60, %v9076_v16  ;;  %v9234_v56 = vld [vmem:[%s10691_s16 + $0xc0] ss:$16 sps:$4 sm:$0xff]   ;;  %v12826_v16 = vsub.f32 %v12700_v24, %v4293_v48  ;;  %5078 = vmatpush1.bf16.msra.mxu0 %v9237_v12  ;;  %v9273_v48 = vld [vmem:[%s10691_s16 + $0x8] ss:$16 sps:$4 sm:$0xff]  }
 0xa52   : > { %v4104_v25 = vpop.f32.mrf.mxu0  ;;  %4885 = vmatpush1.bf16.msra.mxu1 %v9234_v56  ;;  %v9258_v60 = vld [vmem:[%s10691_s16 + $0x40] ss:$16 sps:$4 sm:$0xff]   ;;  %v10244_v12 = vld [vmem:[#allocation2 + $0xa8] sm:$0xff] }
 0xa53   : > { %14737 = vst [vmem:[#allocation38_spill] sm:$0xff] %v12777_v36  ;;  %4260 = vadd.xlane.f32.xlu0 %v12774_v22  ;;  %4258 = vadd.xlane.f32.xlu1 %v12777_v36  ;;  %v4171_v23 = vadd.f32 %v10240_v53, %v4104_v25  ;;  %v12816_v28 = vadd.f32 %v12671_v55, %v4173_v15  ;;  %v9245_v25 = vld [vmem:[%s10691_s16 + $0xac] ss:$16 sps:$4 sm:$0xff]   ;;  %v9261_v15 = vld [vmem:[%s10691_s16 + $0x48] ss:$16 sps:$4 sm:$0xff]  }
 0xa54   : > { %v9077_v6 = vpop.f32.mrf.mxu0  ;;  %4886 = vmatprep.subr.bf16.mxu1 %v9242_v0  ;;  %5079 = vmatprep.subr.bf16.mxu0 %v9245_v25  ;;  %v4357_v53 = vmul.f32 %v12826_v16, %v12826_v16 }
 0xa55   : > { %v12796_v14 = vadd.f32 %v12671_v55, %v4171_v23  ;;  %14741 = vst [vmem:[#allocation40_spill] sm:$0xff] %v12816_v28  ;;  %v4174_v29 = vadd.f32 %v10243_v13, %v9077_v6  ;;  %v9240_v6 = vld [vmem:[%s10691_s16 + $0xa0] ss:$16 sps:$4 sm:$0xff]   ;;  %5080 = vmatpush1.bf16.msra.mxu0 %v9243_v19  ;;  %v9248_v23 = vld [vmem:[%s10691_s16 + $0x84] ss:$16 sps:$4 sm:$0xff]   ;;  %v4295_v19 = vmul.f32 0.0078125, %v4239_v11 }
 0xa56   : > { %v4107_v34 = vpop.f32.mrf.mxu0  ;;  %4887 = vmatpush1.bf16.msra.mxu1 %v9240_v6  ;;  %v9275_v13 = vld [vmem:[%s10691_s16 + $0xc] ss:$16 sps:$4 sm:$0xff]   ;;  %v10248_v11 = vld [vmem:[#allocation2 + $0xa0] sm:$0xff] }
 0xa57   : > { %4384 = vadd.xlane.f32.xlu0 %v4352_v18  ;;  %4262 = vadd.xlane.f32.xlu1 %v12785_v40  ;;  %14739 = vst [vmem:[#allocation34_spill] sm:$0xff] %v12796_v14  ;;  %v4172_v30 = vadd.f32 %v10241_v32, %v4107_v34  ;;  %v12829_v62 = vadd.f32 %v12671_v55, %v4174_v29  ;;  %v9251_v18 = vld [vmem:[%s10691_s16 + $0x8c] ss:$16 sps:$4 sm:$0xff]   ;;  %v9249_v34 = vld [vmem:[%s10691_s16 + $0x88] ss:$16 sps:$4 sm:$0xff]   ;;  %v4237_v29 = vpop.xlane.xlu0 %4236 }
 0xa58   : > { %4888 = vmatprep.subr.bf16.mxu1 %v9248_v23  ;;  %5081 = vmatprep.subr.bf16.mxu0 %v9251_v18  ;;  %v9255_v32 = vld [vmem:[%s10691_s16 + $0x68] ss:$16 sps:$4 sm:$0xff]   ;;  %v4294_v57 = vmul.f32 0.0078125, %v4237_v29  ;;  %v10245_v18 = vld [vmem:[#allocation2 + $0xd0] sm:$0xff] }
 0xa59   : > { %v12803_v37 = vadd.f32 %v12671_v55, %v4172_v30  ;;  %14742 = vst [vmem:[#allocation26_spill] sm:$0xff] %v12829_v62  ;;  %5082 = vmatpush1.bf16.msra.mxu0 %v9249_v34  ;;  %v9260_v30 = vld [vmem:[%s10691_s16 + $0x44] ss:$16 sps:$4 sm:$0xff]  }
 0xa5a   : > { %4889 = vmatpush1.bf16.msra.mxu1 %v9246_v35  ;;  %5083 = vmatprep.subr.bf16.mxu0 %v9257_v45  ;;  %v12861_v25 = vsub.f32 %v12693_v9, %v4294_v57  ;;  %v10246_v45 = vld [vmem:[#allocation2 + $0x10] sm:$0xff] }
 0xa5b   : > { %4264 = vadd.xlane.f32.xlu0 %v12796_v14  ;;  %4386 = vadd.xlane.f32.xlu1 %v4353_v8  ;;  %14740 = vst [vmem:[#allocation22_spill] sm:$0xff] %v12803_v37  ;;  %v9254_v8 = vld [vmem:[%s10691_s16 + $0x64] ss:$16 sps:$4 sm:$0xff]   ;;  %v4241_v6 = vpop.xlane.xlu0 %4240 }
 0xa5c   : > { %4890 = vmatprep.subr.bf16.mxu1 %v9254_v8  ;;  %v4296_v34 = vmul.f32 0.0078125, %v4241_v6  ;;  %v12868_v8 = vsub.f32 %v12713_v39, %v4295_v19 }
 0xa5d   : > { %5084 = vmatpush1.bf16.msra.mxu0 %v9255_v32 }
 0xa5e   : > { %4891 = vmatpush1.bf16.msra.mxu1 %v9252_v10  ;;  %5085 = vmatprep.subr.bf16.mxu0 %v9263_v38  ;;  %v4243_v38 = vpop.xlane.xlu1 %4242 }
 0xa5f   : > { %4266 = vadd.xlane.f32.xlu1 %v12803_v37  ;;  %4388 = vadd.xlane.f32.xlu0 %v4354_v63  ;;  %v9266_v63 = vld [vmem:[%s10691_s16 + $0x24] ss:$16 sps:$4 sm:$0xff]  }
 0xa60   : > { %4892 = vmatprep.subr.bf16.mxu1 %v9260_v30  ;;  %v4358_v30 = vmul.f32 %v12861_v25, %v12861_v25 }
 0xa61   : > { %5086 = vmatpush1.bf16.msra.mxu0 %v9261_v15  ;;  %v12877_v15 = vsub.f32 %v12703_v1, %v4296_v34 }
 0xa62   : > { %4893 = vmatpush1.bf16.msra.mxu1 %v9258_v60  ;;  %5087 = vmatprep.subr.bf16.mxu0 %v9269_v17  ;;  %v4245_v17 = vpop.xlane.xlu0 %4244 }
 0xa63   : > { %4390 = vadd.xlane.f32.xlu1 %v4355_v44  ;;  %4268 = vadd.xlane.f32.xlu0 %v12816_v28  ;;  %v4298_v29 = vmul.f32 0.0078125, %v4245_v17  ;;  %v10250_v17 = vld [vmem:[#allocation2 + $0x20] sm:$0xff] }
 0xa64   : > { %4894 = vmatprep.subr.bf16.mxu1 %v9266_v63 }
 0xa65   : > { %5088 = vmatpush1.bf16.msra.mxu0 %v9267_v27  ;;  %v12895_v19 = vsub.f32 %v12716_v61, %v4298_v29 }
 0xa66   : > { %4895 = vmatpush1.bf16.msra.mxu1 %v9264_v7  ;;  %5089 = vmatprep.subr.bf16.mxu0 %v9275_v13  ;;  %v4297_v7 = vmul.f32 0.0078125, %v4243_v38  ;;  %v4249_v6 = vpop.xlane.xlu0 %4248 }
 0xa67   : > { %4270 = vadd.xlane.f32.xlu1 %v12829_v62  ;;  %4392 = vadd.xlane.f32.xlu0 %v4356_v54 }
 0xa68   : > { %4896 = vmatprep.subr.bf16.mxu1 %v9272_v58 }
 0xa69   : > { %5090 = vmatpush1.bf16.msra.mxu0 %v9273_v48  ;;  %v4359_v48 = vmul.f32 %v12868_v8, %v12868_v8 }
 0xa6a   : > { %4897 = vmatpush1.bf16.msra.mxu1 %v9270_v47  ;;  %v10247_v47 = vld [vmem:[#allocation2 + $0x28] sm:$0xff] }
 0xa6b   : > { %4394 = vadd.xlane.f32.xlu1 %v4357_v53 }
 0xa86   : > { %v9080_v44 = vpop.f32.mrf.mxu0 }
 0xa87   : > { %v4177_v10 = vadd.f32 %v10246_v45, %v9080_v44  ;;  %v12886_v44 = vsub.f32 %v12723_v31, %v4297_v7 }
 0xa88   : > { %v4120_v56 = vpop.f32.mrf.mxu0 }
 0xa89   : > { %v4175_v54 = vadd.f32 %v10244_v12, %v4120_v56  ;;  %v12880_v27 = vadd.f32 %v12671_v55, %v4177_v10  ;;  %v4360_v12 = vmul.f32 %v12877_v15, %v12877_v15  ;;  %v4361_v45 = vmul.f32 %v12886_v44, %v12886_v44 }
 0xa8a   : > { %v9081_v0 = vpop.f32.mrf.mxu0  ;;  %v4300_v10 = vmul.f32 0.0078125, %v4249_v6 }
 0xa8b   : > { %v12864_v53 = vadd.f32 %v12671_v55, %v4175_v54  ;;  %14745 = vst [vmem:[#allocation42_spill] sm:$0xff] %v12880_v27  ;;  %v4178_v58 = vadd.f32 %v10247_v47, %v9081_v0  ;;  %v4247_v54 = vpop.xlane.xlu1 %4246 }
 0xa8c   : > { %v4123_v23 = vpop.f32.mrf.mxu0 }
 0xa8d   : > { %14743 = vst [vmem:[#allocation39_spill] sm:$0xff] %v12864_v53  ;;  %v4176_v35 = vadd.f32 %v10245_v18, %v4123_v23  ;;  %4272 = vadd.xlane.f32.xlu0 %v12864_v53  ;;  %v12889_v57 = vadd.f32 %v12671_v55, %v4178_v58  ;;  %v4299_v23 = vmul.f32 0.0078125, %v4247_v54  ;;  %v4362_v58 = vmul.f32 %v12895_v19, %v12895_v19 }
 0xa8f   : > { %v12871_v32 = vadd.f32 %v12671_v55, %v4176_v35  ;;  %14746 = vst [vmem:[#allocation41_spill] sm:$0xff] %v12889_v57  ;;  %v10249_v35 = vld [vmem:[#allocation2 + $0xf8] sm:$0xff]  ;;  %v12904_v38 = vsub.f32 %v12736_v52, %v4299_v23 }
 0xa90   : > { %v9084_v60 = vpop.f32.mrf.mxu0 }
 0xa91   : > { %14744 = vst [vmem:[#allocation24_spill] sm:$0xff] %v12871_v32  ;;  %4274 = vadd.xlane.f32.xlu1 %v12871_v32  ;;  %4396 = vadd.xlane.f32.xlu0 %v4358_v30  ;;  %v4251_v30 = vpop.xlane.xlu1 %4250  ;;  %v4181_v7 = vadd.f32 %v10250_v17, %v9084_v60  ;;  %v4363_v60 = vmul.f32 %v12904_v38, %v12904_v38 }
 0xa92   : > { %v4136_v63 = vpop.f32.mrf.mxu0 }
 0xa93   : > { %v4179_v56 = vadd.f32 %v10248_v11, %v4136_v63  ;;  %v4253_v63 = vpop.xlane.xlu0 %4252  ;;  %v4301_v11 = vmul.f32 0.0078125, %v4251_v30 }
 0xa94   : > { %v9085_v13 = vpop.f32.mrf.mxu0  ;;  %v4302_v29 = vmul.f32 0.0078125, %v4253_v63 }
 0xa95   : > { %4398 = vadd.xlane.f32.xlu1 %v4359_v48  ;;  %4276 = vadd.xlane.f32.xlu0 %v12880_v27  ;;  %v12898_v18 = vadd.f32 %v12671_v55, %v4179_v56  ;;  %v12913_v48 = vsub.f32 %v12726_v51, %v4300_v10  ;;  %v12916_v56 = vadd.f32 %v12671_v55, %v4181_v7 }
 0xa96   : > { %v4139_v0 = vpop.f32.mrf.mxu0  ;;  %v12924_v23 = vsub.f32 %v12739_v50, %v4302_v29 }
 0xa97   : > { %14747 = vst [vmem:[#allocation23_spill] sm:$0xff] %v12898_v18  ;;  %v4180_v34 = vadd.f32 %v10249_v35, %v4139_v0  ;;  %14749 = vst [vmem:[#allocation45_spill] sm:$0xff] %v12916_v56  ;;  %v4255_v0 = vpop.xlane.xlu1 %4254  ;;  %v4364_v6 = vmul.f32 %v12913_v48, %v12913_v48  ;;  %v12927_v35 = vsub.f32 %v12744_v41, %v4301_v11 }
 0xa98   : > { %v4366_v30 = vmul.f32 %v12924_v23, %v12924_v23 }
 0xa99   : > { %4278 = vadd.xlane.f32.xlu1 %v12889_v57  ;;  %4400 = vadd.xlane.f32.xlu0 %v4360_v12  ;;  %v12907_v47 = vadd.f32 %v12671_v55, %v4180_v34  ;;  %v10251_v12 = vld [vmem:[#allocation2 + $0x98] sm:$0xff]  ;;  %v4303_v34 = vmul.f32 0.0078125, %v4255_v0  ;;  %v4365_v10 = vmul.f32 %v12927_v35, %v12927_v35 }
 0xa9a   : > { %v4182_v54 = vadd.f32 %v10251_v12, %v9085_v13 }
 0xa9b   : > { %14748 = vst [vmem:[#allocation21_spill] sm:$0xff] %v12907_v47  ;;  %v12934_v13 = vsub.f32 %v12748_v26, %v4303_v34 }
 0xa9d   : > { %4402 = vadd.xlane.f32.xlu1 %v4361_v45  ;;  %4280 = vadd.xlane.f32.xlu0 %v12898_v18  ;;  %v12930_v45 = vadd.f32 %v12671_v55, %v4182_v54  ;;  %v4367_v63 = vmul.f32 %v12934_v13, %v12934_v13 }
 0xa9f   : > { %14750 = vst [vmem:[#allocation28_spill] sm:$0xff] %v12930_v45 }
 0xaa1   : > { %4282 = vadd.xlane.f32.xlu1 %v12907_v47  ;;  %4404 = vadd.xlane.f32.xlu0 %v4362_v58 }
 0xaa5   : > { %4406 = vadd.xlane.f32.xlu1 %v4363_v60  ;;  %4284 = vadd.xlane.f32.xlu0 %v12916_v56 }
 0xaa9   : > { %4286 = vadd.xlane.f32.xlu1 %v12930_v45  ;;  %4408 = vadd.xlane.f32.xlu0 %v4364_v6 }
 0xaad   : > { %4410 = vadd.xlane.f32.xlu1 %v4365_v10  ;;  %4412 = vadd.xlane.f32.xlu0 %v4366_v30 }
 0xab1   : > { %4414 = vadd.xlane.f32.xlu1 %v4367_v63 }
 0xad8   : > { %v4257_v55 = vpop.xlane.xlu0 %4256 }
 0xad9   : > { %v4304_v17 = vmul.f32 0.0078125, %v4257_v55 }
 0xadb   : > { %v12943_v7 = vsub.f32 %v12767_v21, %v4304_v17 }
 0xadc   : > { %v4259_v58 = vpop.xlane.xlu1 %4258  ;;  %v4261_v29 = vpop.xlane.xlu0 %4260 }
 0xadd   : > { %v4305_v11 = vmul.f32 0.0078125, %v4259_v58  ;;  %v4306_v12 = vmul.f32 0.0078125, %v4261_v29  ;;  %v4368_v54 = vmul.f32 %v12943_v7, %v12943_v7 }
 0xadf   : > { %v12948_v60 = vsub.f32 %v12777_v36, %v4305_v11  ;;  %v12951_v0 = vsub.f32 %v12774_v22, %v4306_v12  ;;  %4416 = vadd.xlane.f32.xlu0 %v4368_v54 }
 0xae0   : > { %v4263_v6 = vpop.xlane.xlu1 %4262  ;;  %v4385_v34 = vpop.xlane.xlu0 %4384 }
 0xae1   : > { %v4307_v10 = vmul.f32 0.0078125, %v4263_v6  ;;  %v4448_v30 = vmul.f32 0.0078125, %v4385_v34  ;;  %v4369_v63 = vmul.f32 %v12948_v60, %v12948_v60  ;;  %v4370_v55 = vmul.f32 %v12951_v0, %v12951_v0 }
 0xae3   : > { %v12958_v17 = vsub.f32 %v12785_v40, %v4307_v10  ;;  %v4480_v58 = vadd.f32 1e-05, %v4448_v30  ;;  %4418 = vadd.xlane.f32.xlu1 %v4369_v63  ;;  %4420 = vadd.xlane.f32.xlu0 %v4370_v55 }
 0xae4   : > { %v4387_v29 = vpop.xlane.xlu1 %4386  ;;  %v4265_v11 = vpop.xlane.xlu0 %4264 }
 0xae5   : > { %9628 = vrsqrt.f32 %v4480_v58  ;;  %v4449_v12 = vmul.f32 0.0078125, %v4387_v29  ;;  %v4308_v54 = vmul.f32 0.0078125, %v4265_v11  ;;  %v4371_v6 = vmul.f32 %v12958_v17, %v12958_v17 }
 0xae7   : > { %v4481_v34 = vadd.f32 1e-05, %v4449_v12  ;;  %v12963_v22 = vsub.f32 %v12796_v14, %v4308_v54  ;;  %4422 = vadd.xlane.f32.xlu1 %v4371_v6 }
 0xae8   : > { %v4267_v36 = vpop.xlane.xlu1 %4266  ;;  %v4389_v21 = vpop.xlane.xlu0 %4388 }
 0xae9   : > { %9630 = vrsqrt.f32 %v4481_v34  ;;  %v4309_v10 = vmul.f32 0.0078125, %v4267_v36  ;;  %v4450_v30 = vmul.f32 0.0078125, %v4389_v21  ;;  %v4372_v63 = vmul.f32 %v12963_v22, %v12963_v22 }
 0xaeb   : > { %v12968_v55 = vsub.f32 %v12803_v37, %v4309_v10  ;;  %v4482_v58 = vadd.f32 1e-05, %v4450_v30  ;;  %4424 = vadd.xlane.f32.xlu0 %v4372_v63 }
 0xaec   : > { %v4391_v29 = vpop.xlane.xlu1 %4390  ;;  %v4269_v11 = vpop.xlane.xlu0 %4268 }
 0xaed   : > { %9632 = vrsqrt.f32 %v4482_v58  ;;  %v4451_v12 = vmul.f32 0.0078125, %v4391_v29  ;;  %v4310_v54 = vmul.f32 0.0078125, %v4269_v11  ;;  %v4373_v6 = vmul.f32 %v12968_v55, %v12968_v55 }
 0xaef   : > { %v4483_v34 = vadd.f32 1e-05, %v4451_v12  ;;  %v12973_v21 = vsub.f32 %v12816_v28, %v4310_v54  ;;  %4426 = vadd.xlane.f32.xlu1 %v4373_v6  ;;  %v12982_v54 = vld [vmem:[%s10679_s23] ss:$0 sm:$0xff] }
 0xaf0   : > { %v4271_v36 = vpop.xlane.xlu1 %4270  ;;  %v4393_v14 = vpop.xlane.xlu0 %4392 }
 0xaf1   : > { %9634 = vrsqrt.f32 %v4483_v34  ;;  %v4311_v10 = vmul.f32 0.0078125, %v4271_v36  ;;  %v4452_v30 = vmul.f32 0.0078125, %v4393_v14  ;;  %v4374_v63 = vmul.f32 %v12973_v21, %v12973_v21 }
 0xaf2   : > { %v9629_v58 = vpop.eup %9628 }
 0xaf3   : > { %v4544_v29 = vmul.f32 %v9629_v58, %v12771_v42  ;;  %v12979_v11 = vsub.f32 %v12829_v62, %v4311_v10  ;;  %v4484_v12 = vadd.f32 1e-05, %v4452_v30  ;;  %4428 = vadd.xlane.f32.xlu0 %v4374_v63  ;;  %v12989_v42 = vld [vmem:[%s10685_s24] ss:$0 sm:$0xff] }
 0xaf4   : > { %v4395_v6 = vpop.xlane.xlu1 %4394 }
 0xaf5   : > { %9636 = vrsqrt.f32 %v4484_v12  ;;  %v4453_v28 = vmul.f32 0.0078125, %v4395_v6  ;;  %v4375_v14 = vmul.f32 %v12979_v11, %v12979_v11  ;;  %v4582_v36 = vmul.f32 %v12982_v54, %v4544_v29 }
 0xaf6   : > { %v9631_v34 = vpop.eup %9630 }
 0xaf7   : > { %v4545_v37 = vmul.f32 %v9631_v34, %v12782_v59  ;;  %v4485_v40 = vadd.f32 1e-05, %v4453_v28  ;;  %4430 = vadd.xlane.f32.xlu1 %v4375_v14  ;;  %v4620_v63 = vadd.f32 %v12989_v42, %v4582_v36 }
 0xaf9   : > { %v4583_v10 = vmul.f32 %v12982_v54, %v4545_v37  ;;  %9638 = vrsqrt.f32 %v4485_v40 }
 0xafa   : > { %v9633_v30 = vpop.eup %9632 }
 0xafb   : > { %v4621_v58 = vadd.f32 %v12989_v42, %v4583_v10  ;;  %v4546_v12 = vmul.f32 %v9633_v30, %v12793_v4 }
 0xafd   : > { %v4652_v6 = vpack.c.bf16 %v4621_v58, %v4620_v63  ;;  %v4584_v28 = vmul.f32 %v12982_v54, %v4546_v12 }
 0xafe   : > { %v9635_v62 = vpop.eup %9634 }
 0xaff   : > { %4915 = vmatmul.mubr.bf16.vlgmr.msra.gmra.mxu1 %v4652_v6  ;;  %5108 = vmatmul.mubr.bf16.vlgmr.msra.gmra.mxu0 %v4652_v6  ;;  %v4547_v59 = vmul.f32 %v9635_v62, %v12800_v2  ;;  %v4622_v29 = vadd.f32 %v12989_v42, %v4584_v28 }
 0xb00   : > { %4924 = vmatprep.mubr.bf16.mxu1 %v14734_v20  ;;  %5117 = vmatprep.mubr.bf16.mxu0 %v14734_v20 }
 0xb01   : > { %v4585_v40 = vmul.f32 %v12982_v54, %v4547_v59 }
 0xb02   : > { %v9637_v37 = vpop.eup %9636 }
 0xb03   : > { %v4623_v14 = vadd.f32 %v12989_v42, %v4585_v40  ;;  %v4548_v4 = vmul.f32 %v9637_v37, %v12813_v49 }
 0xb05   : > { %v4653_v34 = vpack.c.bf16 %v4623_v14, %v4622_v29  ;;  %v4586_v62 = vmul.f32 %v12982_v54, %v4548_v4 }
 0xb06   : > { %v9639_v36 = vpop.eup %9638 }
 0xb07   : > { %4925 = vmatmul.mubr.bf16.gmra.mxu1 %v4653_v34  ;;  %5118 = vmatmul.mubr.bf16.gmra.mxu0 %v4653_v34  ;;  %v4549_v2 = vmul.f32 %v9639_v36, %v12826_v16  ;;  %v4624_v30 = vadd.f32 %v12989_v42, %v4586_v62 }
 0xb08   : > { %4934 = vmatprep.mubr.bf16.mxu1 %v14734_v20  ;;  %5127 = vmatprep.mubr.bf16.mxu0 %v14734_v20 }
 0xb09   : > { %v4587_v10 = vmul.f32 %v12982_v54, %v4549_v2 }
 0xb0b   : > { %v4625_v63 = vadd.f32 %v12989_v42, %v4587_v10 }
 0xb0d   : > { %v4654_v58 = vpack.c.bf16 %v4625_v63, %v4624_v30 }
 0xb0f   : > { %4935 = vmatmul.mubr.bf16.gmra.mxu1 %v4654_v58  ;;  %5128 = vmatmul.mubr.bf16.gmra.mxu0 %v4654_v58 }
 0xb10   : > { %4944 = vmatprep.mubr.bf16.mxu1 %v14734_v20  ;;  %5137 = vmatprep.mubr.bf16.mxu0 %v14734_v20 }
 0xb16   : > { %v4273_v49 = vpop.xlane.xlu0 %4272 }
 0xb17   : > { %v4312_v16 = vmul.f32 0.0078125, %v4273_v49 }
 0xb19   : > { %v13013_v12 = vsub.f32 %v12864_v53, %v4312_v16 }
 0xb1a   : > { %v4275_v6 = vpop.xlane.xlu1 %4274  ;;  %v4397_v59 = vpop.xlane.xlu0 %4396 }
 0xb1b   : > { %v4313_v28 = vmul.f32 0.0078125, %v4275_v6  ;;  %v4454_v40 = vmul.f32 0.0078125, %v4397_v59  ;;  %v4376_v37 = vmul.f32 %v13013_v12, %v13013_v12 }
 0xb1d   : > { %v13018_v29 = vsub.f32 %v12871_v32, %v4313_v28  ;;  %v4486_v14 = vadd.f32 1e-05, %v4454_v40  ;;  %4432 = vadd.xlane.f32.xlu0 %v4376_v37 }
 0xb1e   : > { %v4399_v4 = vpop.xlane.xlu1 %4398  ;;  %v4277_v34 = vpop.xlane.xlu0 %4276 }
 0xb1f   : > { %9640 = vrsqrt.f32 %v4486_v14  ;;  %v4455_v36 = vmul.f32 0.0078125, %v4399_v4  ;;  %v4314_v2 = vmul.f32 0.0078125, %v4277_v34  ;;  %v4377_v62 = vmul.f32 %v13018_v29, %v13018_v29 }
 0xb21   : > { %v4487_v10 = vadd.f32 1e-05, %v4455_v36  ;;  %v13023_v30 = vsub.f32 %v12880_v27, %v4314_v2  ;;  %4434 = vadd.xlane.f32.xlu1 %v4377_v62 }
 0xb22   : > { %v4279_v63 = vpop.xlane.xlu1 %4278  ;;  %v4401_v58 = vpop.xlane.xlu0 %4400 }
 0xb23   : > { %9642 = vrsqrt.f32 %v4487_v10  ;;  %v4315_v49 = vmul.f32 0.0078125, %v4279_v63  ;;  %v4456_v16 = vmul.f32 0.0078125, %v4401_v58  ;;  %v4378_v6 = vmul.f32 %v13023_v30, %v13023_v30 }
 0xb25   : > { %v13028_v59 = vsub.f32 %v12889_v57, %v4315_v49  ;;  %v4488_v28 = vadd.f32 1e-05, %v4456_v16  ;;  %4436 = vadd.xlane.f32.xlu0 %v4378_v6 }
 0xb26   : > { %v4403_v40 = vpop.xlane.xlu1 %4402  ;;  %v4281_v37 = vpop.xlane.xlu0 %4280 }
 0xb27   : > { %9644 = vrsqrt.f32 %v4488_v28  ;;  %v4457_v14 = vmul.f32 0.0078125, %v4403_v40  ;;  %v4316_v4 = vmul.f32 0.0078125, %v4281_v37  ;;  %v4379_v34 = vmul.f32 %v13028_v59, %v13028_v59 }
 0xb29   : > { %v4489_v36 = vadd.f32 1e-05, %v4457_v14  ;;  %v13033_v2 = vsub.f32 %v12898_v18, %v4316_v4  ;;  %4438 = vadd.xlane.f32.xlu1 %v4379_v34 }
 0xb2a   : > { %v4283_v62 = vpop.xlane.xlu1 %4282  ;;  %v4405_v10 = vpop.xlane.xlu0 %4404 }
 0xb2b   : > { %9646 = vrsqrt.f32 %v4489_v36  ;;  %v4317_v63 = vmul.f32 0.0078125, %v4283_v62  ;;  %v4458_v58 = vmul.f32 0.0078125, %v4405_v10  ;;  %v4380_v49 = vmul.f32 %v13033_v2, %v13033_v2 }
 0xb2c   : > { %v9641_v16 = vpop.eup %9640 }
 0xb2d   : > { %v13038_v6 = vsub.f32 %v12907_v47, %v4317_v63  ;;  %v4490_v28 = vadd.f32 1e-05, %v4458_v58  ;;  %4440 = vadd.xlane.f32.xlu0 %v4380_v49  ;;  %v4550_v14 = vmul.f32 %v9641_v16, %v12861_v25 }
 0xb2e   : > { %v4407_v40 = vpop.xlane.xlu1 %4406  ;;  %v4285_v37 = vpop.xlane.xlu0 %4284 }
 0xb2f   : > { %9648 = vrsqrt.f32 %v4490_v28  ;;  %v4459_v4 = vmul.f32 0.0078125, %v4407_v40  ;;  %v4318_v34 = vmul.f32 0.0078125, %v4285_v37  ;;  %v4381_v36 = vmul.f32 %v13038_v6, %v13038_v6 }
 0xb30   : > { %v9643_v62 = vpop.eup %9642  ;;  %v4588_v47 = vmul.f32 %v12982_v54, %v4550_v14 }
 0xb31   : > { %v4491_v10 = vadd.f32 1e-05, %v4459_v4  ;;  %v13044_v18 = vsub.f32 %v12916_v56, %v4318_v34  ;;  %4442 = vadd.xlane.f32.xlu1 %v4381_v36  ;;  %v4551_v63 = vmul.f32 %v9643_v62, %v12868_v8 }
 0xb32   : > { %v4287_v58 = vpop.xlane.xlu1 %4286  ;;  %v4409_v49 = vpop.xlane.xlu0 %4408  ;;  %v4626_v14 = vadd.f32 %v12989_v42, %v4588_v47 }
 0xb33   : > { %9650 = vrsqrt.f32 %v4491_v10  ;;  %v4319_v25 = vmul.f32 0.0078125, %v4287_v58  ;;  %v4460_v16 = vmul.f32 0.0078125, %v4409_v49  ;;  %v4382_v28 = vmul.f32 %v13044_v18, %v13044_v18 }
 0xb34   : > { %v9645_v40 = vpop.eup %9644  ;;  %v4589_v37 = vmul.f32 %v12982_v54, %v4551_v63 }
 0xb35   : > { %v13052_v4 = vsub.f32 %v12930_v45, %v4319_v25  ;;  %v4492_v34 = vadd.f32 1e-05, %v4460_v16  ;;  %4444 = vadd.xlane.f32.xlu0 %v4382_v28  ;;  %v4552_v8 = vmul.f32 %v9645_v40, %v12877_v15 }
 0xb36   : > { %v4411_v36 = vpop.xlane.xlu1 %4410  ;;  %v4413_v62 = vpop.xlane.xlu0 %4412  ;;  %v4627_v10 = vadd.f32 %v12989_v42, %v4589_v37 }
 0xb37   : > { %9652 = vrsqrt.f32 %v4492_v34  ;;  %v4461_v58 = vmul.f32 0.0078125, %v4411_v36  ;;  %v4462_v49 = vmul.f32 0.0078125, %v4413_v62  ;;  %v4383_v56 = vmul.f32 %v13052_v4, %v13052_v4 }
 0xb38   : > { %v9647_v63 = vpop.eup %9646  ;;  %v4655_v57 = vpack.c.bf16 %v4627_v10, %v4626_v14  ;;  %v4590_v15 = vmul.f32 %v12982_v54, %v4552_v8 }
 0xb39   : > { %v4493_v25 = vadd.f32 1e-05, %v4461_v58  ;;  %4446 = vadd.xlane.f32.xlu1 %v4383_v56  ;;  %v4553_v16 = vmul.f32 %v9647_v63, %v12886_v44  ;;  %v4494_v28 = vadd.f32 1e-05, %v4462_v49 }
 0xb3a   : > { %4945 = vmatmul.mubr.bf16.gmra.mxu1 %v4655_v57  ;;  %5138 = vmatmul.mubr.bf16.gmra.mxu0 %v4655_v57  ;;  %v4415_v47 = vpop.xlane.xlu1 %4414  ;;  %v4628_v56 = vadd.f32 %v12989_v42, %v4590_v15 }
 0xb3b   : > { %9654 = vrsqrt.f32 %v4493_v25  ;;  %v4463_v40 = vmul.f32 0.0078125, %v4415_v47  ;;  %4954 = vmatprep.mubr.bf16.mxu1 %v14734_v20  ;;  %5147 = vmatprep.mubr.bf16.mxu0 %v14734_v20  ;;  %v4591_v37 = vmul.f32 %v12982_v54, %v4553_v16 }
 0xb3c   : > { %v9649_v34 = vpop.eup %9648  ;;  %9656 = vrsqrt.f32 %v4494_v28 }
 0xb3d   : > { %v4495_v36 = vadd.f32 1e-05, %v4463_v40  ;;  %v4629_v44 = vadd.f32 %v12989_v42, %v4591_v37  ;;  %v4554_v8 = vmul.f32 %v9649_v34, %v12895_v19 }
 0xb3f   : > { %9658 = vrsqrt.f32 %v4495_v36  ;;  %v4656_v57 = vpack.c.bf16 %v4629_v44, %v4628_v56  ;;  %v4592_v10 = vmul.f32 %v12982_v54, %v4554_v8 }
 0xb40   : > { %v9651_v62 = vpop.eup %9650 }
 0xb41   : > { %v4555_v14 = vmul.f32 %v9651_v62, %v12904_v38  ;;  %v4630_v63 = vadd.f32 %v12989_v42, %v4592_v10  ;;  %v9276_v62 = vld [vmem:[%s10641_s0 + $0x78] sm:$0xff]  }
 0xb42   : > { %4955 = vmatmul.mubr.bf16.gmra.mxu1 %v4656_v57  ;;  %5148 = vmatmul.mubr.bf16.gmra.mxu0 %v4656_v57  ;;  %v9278_v10 = vld [vmem:[%s10641_s0 + $0x38] sm:$0xff]  }
 0xb43   : > { %4964 = vmatprep.mubr.bf16.mxu1 %v14734_v20  ;;  %5157 = vmatprep.mubr.bf16.mxu0 %v14734_v20  ;;  %v4593_v58 = vmul.f32 %v12982_v54, %v4555_v14  ;;  %v9277_v14 = vld [vmem:[%s10641_s0 + $0xf8] sm:$0xff]  }
 0xb44   : > { %v9653_v49 = vpop.eup %9652  ;;  %8510 = vmatprep.subr.bf16.mxu1 %v9276_v62  ;;  %8622 = vmatprep.subr.bf16.mxu0 %v9277_v14  ;;  %v9292_v14 = vld [vmem:[%s10641_s0 + $0x58] sm:$0xff]  }
 0xb45   : > { %v4631_v19 = vadd.f32 %v12989_v42, %v4593_v58  ;;  %v4556_v25 = vmul.f32 %v9653_v49, %v12913_v48  ;;  %v9279_v58 = vld [vmem:[%s10641_s0 + $0xb8] sm:$0xff]   ;;  %8511 = vmatpush3.bf16.msra.mxu1 %v9278_v10  ;;  %v9280_v49 = vld [vmem:[%s10641_s0 + $0x70] sm:$0xff]  }
 0xb46   : > { %8623 = vmatpush3.bf16.msra.mxu0 %v9279_v58  ;;  %8512 = vmatprep.subr.bf16.mxu1 %v9280_v49  ;;  %v9293_v10 = vld [vmem:[%s10641_s0 + $0xd8] sm:$0xff]  }
 0xb47   : > { %v4657_v16 = vpack.c.bf16 %v4631_v19, %v4630_v63  ;;  %v4594_v28 = vmul.f32 %v12982_v54, %v4556_v25  ;;  %v9281_v63 = vld [vmem:[%s10641_s0 + $0xf0] sm:$0xff]   ;;  %v9294_v49 = vld [vmem:[%s10641_s0 + $0x18] sm:$0xff]  }
 0xb48   : > { %v9655_v15 = vpop.eup %9654  ;;  %v9282_v19 = vld [vmem:[%s10641_s0 + $0x30] sm:$0xff]   ;;  %8624 = vmatprep.subr.bf16.mxu0 %v9281_v63  ;;  %v9295_v63 = vld [vmem:[%s10641_s0 + $0x98] sm:$0xff]  }
 0xb49   : > { %v4557_v38 = vmul.f32 %v9655_v15, %v12927_v35  ;;  %v9657_v47 = vpop.eup %9656  ;;  %v4632_v34 = vadd.f32 %v12989_v42, %v4594_v28  ;;  %v9283_v25 = vld [vmem:[%s10641_s0 + $0xb0] sm:$0xff]   ;;  %8513 = vmatpush3.bf16.msra.mxu1 %v9282_v19  ;;  %v9284_v15 = vld [vmem:[%s10641_s0 + $0x68] sm:$0xff]  }
 0xb4a   : > { %4965 = vmatmul.mubr.bf16.gmra.mxu1 %v4657_v16  ;;  %5158 = vmatmul.mubr.bf16.gmra.mxu0 %v4657_v16  ;;  %v4558_v35 = vmul.f32 %v9657_v47, %v12924_v23  ;;  %v9286_v47 = vld [vmem:[%s10641_s0 + $0x28] sm:$0xff]  }
 0xb4b   : > { %4974 = vmatprep.mubr.bf16.mxu1 %v14734_v20  ;;  %5167 = vmatprep.mubr.bf16.mxu0 %v14734_v20  ;;  %v4595_v40 = vmul.f32 %v12982_v54, %v4557_v38  ;;  %v9285_v38 = vld [vmem:[%s10641_s0 + $0xe8] sm:$0xff]  }
 0xb4c   : > { %v9659_v37 = vpop.eup %9658  ;;  %v4596_v8 = vmul.f32 %v12982_v54, %v4558_v35  ;;  %8625 = vmatpush3.bf16.msra.mxu0 %v9283_v25  ;;  %8514 = vmatprep.subr.bf16.mxu1 %v9284_v15  ;;  %v9289_v35 = vld [vmem:[%s10641_s0 + $0xe0] sm:$0xff]   ;;  %v9297_v15 = vld [vmem:[%s10641_s0 + $0xd0] sm:$0xff]  }
 0xb4d   : > { %v4633_v48 = vadd.f32 %v12989_v42, %v4595_v40  ;;  %v4559_v36 = vmul.f32 %v9659_v37, %v12934_v13  ;;  %v9287_v40 = vld [vmem:[%s10641_s0 + $0xa8] sm:$0xff]   ;;  %8626 = vmatprep.subr.bf16.mxu0 %v9285_v38  ;;  %8515 = vmatpush3.bf16.msra.mxu1 %v9286_v47  ;;  %v9299_v47 = vld [vmem:[%s10641_s0 + $0x90] sm:$0xff]  }
 0xb4e   : > { %v4634_v23 = vadd.f32 %v12989_v42, %v4596_v8  ;;  %v9290_v8 = vld [vmem:[%s10641_s0 + $0x20] sm:$0xff]  }
 0xb4f   : > { %v4658_v56 = vpack.c.bf16 %v4633_v48, %v4632_v34  ;;  %v4597_v44 = vmul.f32 %v12982_v54, %v4559_v36  ;;  %v9288_v36 = vld [vmem:[%s10641_s0 + $0x60] sm:$0xff]  }
 0xb50   : > { %8627 = vmatpush3.bf16.msra.mxu0 %v9287_v40  ;;  %8516 = vmatprep.subr.bf16.mxu1 %v9288_v36 }
 0xb51   : > { %v4635_v13 = vadd.f32 %v12989_v42, %v4597_v44  ;;  %8628 = vmatprep.subr.bf16.mxu0 %v9289_v35  ;;  %8517 = vmatpush3.bf16.msra.mxu1 %v9290_v8  ;;  %v9302_v35 = vld [vmem:[%s10641_s0 + $0x8] sm:$0xff]  }
 0xb52   : > { %4975 = vmatmul.mubr.bf16.gmra.mxu1 %v4658_v56  ;;  %5168 = vmatmul.mubr.bf16.gmra.mxu0 %v4658_v56 }
 0xb53   : > { %4984 = vmatprep.mubr.bf16.mxu1 %v14734_v20  ;;  %5177 = vmatprep.mubr.bf16.mxu0 %v14734_v20  ;;  %v4659_v57 = vpack.c.bf16 %v4635_v13, %v4634_v23  ;;  %v9291_v13 = vld [vmem:[%s10641_s0 + $0xa0] sm:$0xff]  }
 0xb54   : > { %8629 = vmatpush3.bf16.msra.mxu0 %v9291_v13  ;;  %8518 = vmatprep.subr.bf16.mxu1 %v9292_v14 }
 0xb55   : > { %8630 = vmatprep.subr.bf16.mxu0 %v9293_v10  ;;  %8519 = vmatpush3.bf16.msra.mxu1 %v9294_v49  ;;  %v9306_v10 = vld [vmem:[%s10641_s0] sm:$0xff]  }
 0xb58   : > { %8631 = vmatpush3.bf16.msra.mxu0 %v9295_v63 }
 0xb59   : > { %8632 = vmatprep.subr.bf16.mxu0 %v9297_v15 }
 0xb5a   : > { %4985 = vmatmul.mubr.bf16.gmra.mxu1 %v4659_v57  ;;  %5178 = vmatmul.mubr.bf16.gmra.mxu0 %v4659_v57 }
 0xb5b   : > { %4994 = vmatprep.mubr.bf16.mxu1 %v14734_v20  ;;  %5187 = vmatprep.mubr.bf16.mxu0 %v14734_v20 }
 0xb5c   : > { %8633 = vmatpush3.bf16.msra.mxu0 %v9299_v47 }
 0xb68   : > { %v4417_v16 = vpop.xlane.xlu0 %4416 }
 0xb69   : > { %v4464_v28 = vmul.f32 0.0078125, %v4417_v16  ;;  %v9296_v16 = vld [vmem:[%s10641_s0 + $0x50] sm:$0xff]  }
 0xb6a   : > { %8520 = vmatprep.subr.bf16.mxu1 %v9296_v16 }
 0xb6b   : > { %v4496_v37 = vadd.f32 1e-05, %v4464_v28  ;;  %v9298_v28 = vld [vmem:[%s10641_s0 + $0x10] sm:$0xff]  }
 0xb6c   : > { %v4419_v34 = vpop.xlane.xlu1 %4418  ;;  %v4421_v48 = vpop.xlane.xlu0 %4420  ;;  %8521 = vmatpush3.bf16.msra.mxu1 %v9298_v28 }
 0xb6d   : > { %9660 = vrsqrt.f32 %v4496_v37  ;;  %v4465_v56 = vmul.f32 0.0078125, %v4419_v34  ;;  %v4466_v44 = vmul.f32 0.0078125, %v4421_v48  ;;  %v9300_v34 = vld [vmem:[%s10641_s0 + $0x48] sm:$0xff]  }
 0xb6e   : > { %v9301_v48 = vld [vmem:[%s10641_s0 + $0xc8] sm:$0xff]   ;;  %8522 = vmatprep.subr.bf16.mxu1 %v9300_v34 }
 0xb6f   : > { %v4497_v23 = vadd.f32 1e-05, %v4465_v56  ;;  %v4498_v57 = vadd.f32 1e-05, %v4466_v44  ;;  %v9303_v56 = vld [vmem:[%s10641_s0 + $0x88] sm:$0xff]   ;;  %8634 = vmatprep.subr.bf16.mxu0 %v9301_v48 }
 0xb70   : > { %v4423_v62 = vpop.xlane.xlu1 %4422  ;;  %8523 = vmatpush3.bf16.msra.mxu1 %v9302_v35  ;;  %8635 = vmatpush3.bf16.msra.mxu0 %v9303_v56 }
 0xb71   : > { %9662 = vrsqrt.f32 %v4497_v23  ;;  %v4467_v58 = vmul.f32 0.0078125, %v4423_v62  ;;  %v9305_v62 = vld [vmem:[%s10641_s0 + $0xc0] sm:$0xff]  }
 0xb72   : > { %9664 = vrsqrt.f32 %v4498_v57  ;;  %v9304_v57 = vld [vmem:[%s10641_s0 + $0x40] sm:$0xff]   ;;  %8636 = vmatprep.subr.bf16.mxu0 %v9305_v62 }
 0xb73   : > { %v4499_v19 = vadd.f32 1e-05, %v4467_v58  ;;  %v9307_v58 = vld [vmem:[%s10641_s0 + $0x80] sm:$0xff]   ;;  %8524 = vmatprep.subr.bf16.mxu1 %v9304_v57 }
 0xb74   : > { %v4425_v25 = vpop.xlane.xlu0 %4424  ;;  %8525 = vmatpush3.bf16.msra.mxu1 %v9306_v10  ;;  %8637 = vmatpush3.bf16.msra.mxu0 %v9307_v58 }
 0xb75   : > { %9666 = vrsqrt.f32 %v4499_v19  ;;  %v4468_v38 = vmul.f32 0.0078125, %v4425_v25 }
 0xb77   : > { %v4500_v40 = vadd.f32 1e-05, %v4468_v38 }
 0xb78   : > { %v4427_v37 = vpop.xlane.xlu1 %4426 }
 0xb79   : > { %v4469_v36 = vmul.f32 0.0078125, %v4427_v37  ;;  %9668 = vrsqrt.f32 %v4500_v40 }
 0xb7a   : > { %v9661_v44 = vpop.eup %9660 }
 0xb7b   : > { %v4501_v8 = vadd.f32 1e-05, %v4469_v36  ;;  %v4560_v13 = vmul.f32 %v9661_v44, %v12943_v7 }
 0xb7c   : > { %v4429_v23 = vpop.xlane.xlu0 %4428 }
 0xb7d   : > { %9670 = vrsqrt.f32 %v4501_v8  ;;  %v4470_v14 = vmul.f32 0.0078125, %v4429_v23  ;;  %v4598_v63 = vmul.f32 %v12982_v54, %v4560_v13 }
 0xb7e   : > { %v9663_v49 = vpop.eup %9662 }
 0xb7f   : > { %v9665_v19 = vpop.eup %9664  ;;  %v4502_v25 = vadd.f32 1e-05, %v4470_v14  ;;  %v4561_v16 = vmul.f32 %v9663_v49, %v12948_v60  ;;  %v4636_v47 = vadd.f32 %v12989_v42, %v4598_v63 }
 0xb80   : > { %v4431_v7 = vpop.xlane.xlu1 %4430  ;;  %v4562_v40 = vmul.f32 %v9665_v19, %v12951_v0 }
 0xb81   : > { %v4471_v15 = vmul.f32 0.0078125, %v4431_v7  ;;  %v4599_v38 = vmul.f32 %v12982_v54, %v4561_v16  ;;  %9672 = vrsqrt.f32 %v4502_v25 }
 0xb82   : > { %v9667_v28 = vpop.eup %9666  ;;  %v4600_v35 = vmul.f32 %v12982_v54, %v4562_v40 }
 0xb83   : > { %v4503_v37 = vadd.f32 1e-05, %v4471_v15  ;;  %v4637_v34 = vadd.f32 %v12989_v42, %v4599_v38  ;;  %v4563_v48 = vmul.f32 %v9667_v28, %v12958_v17 }
 0xb84   : > { %v4638_v8 = vadd.f32 %v12989_v42, %v4600_v35 }
 0xb85   : > { %9674 = vrsqrt.f32 %v4503_v37  ;;  %v4660_v36 = vpack.c.bf16 %v4637_v34, %v4636_v47  ;;  %v4601_v60 = vmul.f32 %v12982_v54, %v4563_v48 }
 0xb86   : > { %v9669_v56 = vpop.eup %9668 }
 0xb87   : > { %4995 = vmatmul.mubr.bf16.gmra.mxu1 %v4660_v36  ;;  %5188 = vmatmul.mubr.bf16.gmra.mxu0 %v4660_v36  ;;  %v4639_v0 = vadd.f32 %v12989_v42, %v4601_v60  ;;  %v4564_v17 = vmul.f32 %v9669_v56, %v12963_v22 }
 0xb88   : > { %5004 = vmatprep.mubr.bf16.mxu1 %v14734_v20  ;;  %5197 = vmatprep.mubr.bf16.mxu0 %v14734_v20 }
 0xb89   : > { %v4661_v23 = vpack.c.bf16 %v4639_v0, %v4638_v8  ;;  %v4602_v62 = vmul.f32 %v12982_v54, %v4564_v17  ;;  %v4700_v8 = vld [vmem:[%s10697_s18] sm:$0xf]  ;;  %s14792_s18 = sld [smem:[#allocation54_spill]] (!%p8088_p1) }
 0xb8a   : > { %v9671_v44 = vpop.eup %9670 }
 0xb8b   : > { %v4565_v13 = vmul.f32 %v9671_v44, %v12968_v55  ;;  %v4640_v49 = vadd.f32 %v12989_v42, %v4602_v62 }
 0xb8d   : > { %v4603_v57 = vmul.f32 %v12982_v54, %v4565_v13 }
 0xb8e   : > { %v9673_v14 = vpop.eup %9672 }
 0xb8f   : > { %5005 = vmatmul.mubr.bf16.gmra.mxu1 %v4661_v23  ;;  %5198 = vmatmul.mubr.bf16.gmra.mxu0 %v4661_v23  ;;  %v4641_v10 = vadd.f32 %v12989_v42, %v4603_v57  ;;  %v4566_v22 = vmul.f32 %v9673_v14, %v12973_v21  ;;  %v14751_v23 = vld [vmem:[#allocation13_spill] sm:$0xff] }
 0xb90   : > { %5014 = vmatprep.mubr.bf16.mxu1 %v14734_v20  ;;  %5207 = vmatprep.mubr.bf16.mxu0 %v14734_v20  ;;  %v4716_v57 = vsub.s32 3, %v14751_v23 }
 0xb91   : > { %v4662_v63 = vpack.c.bf16 %v4641_v10, %v4640_v49  ;;  %v4604_v25 = vmul.f32 %v12982_v54, %v4566_v22  ;;  %v14753_v22 = vsub.s32 2, %v14751_v23 }
 0xb92   : > { %v9675_v58 = vpop.eup %9674 }
 0xb93   : > { %v4567_v55 = vmul.f32 %v9675_v58, %v12979_v11  ;;  %v4642_v7 = vadd.f32 %v12989_v42, %v4604_v25  ;;  %v14752_v58 = vsub.s32 0, %v14751_v23 }
 0xb95   : > { %v4605_v19 = vmul.f32 %v12982_v54, %v4567_v55  ;;  %v13161_v49 = vrot.slane %v4700_v8, %v14752_v58  ;;  %v13165_v55 = vrot.slane %v4700_v8, %v14753_v22 }
 0xb97   : > { %5015 = vmatmul.mubr.bf16.gmra.mxu1 %v4662_v63  ;;  %5208 = vmatmul.mubr.bf16.gmra.mxu0 %v4662_v63  ;;  %v4643_v16 = vadd.f32 %v12989_v42, %v4605_v19 }
 0xb98   : > { %5024 = vmatprep.mubr.bf16.mxu1 %v14734_v20  ;;  %5217 = vmatprep.mubr.bf16.mxu0 %v14734_v20 }
 0xb99   : > { %v4663_v15 = vpack.c.bf16 %v4643_v16, %v4642_v7  ;;  %v14754_v16 = vsub.s32 1, %v14751_v23 }
 0xb9b   : > { %v13171_v7 = vrot.slane %v4700_v8, %v14754_v16 }
 0xb9f   : > { %5025 = vmatmul.mubr.bf16.gmra.mxu1 %v4663_v15  ;;  %5218 = vmatmul.mubr.bf16.gmra.mxu0 %v4663_v15  ;;  %v13173_v15 = vrot.slane %v4700_v8, %v4716_v57 }
 0xba0   : > { %5034 = vmatprep.mubr.bf16.mxu1 %v14734_v20  ;;  %5227 = vmatprep.mubr.bf16.mxu0 %v14734_v20 }
 0xba6   : > { %v4433_v21 = vpop.xlane.xlu0 %4432 }
 0xba7   : > { %v4472_v11 = vmul.f32 0.0078125, %v4433_v21 }
 0xba9   : > { %v4504_v38 = vadd.f32 1e-05, %v4472_v11 }
 0xbaa   : > { %v4435_v28 = vpop.xlane.xlu1 %4434 }
 0xbab   : > { %9676 = vrsqrt.f32 %v4504_v38  ;;  %v4473_v47 = vmul.f32 0.0078125, %v4435_v28 }
 0xbad   : > { %v4505_v40 = vadd.f32 1e-05, %v4473_v47 }
 0xbae   : > { %v4437_v37 = vpop.xlane.xlu0 %4436 }
 0xbaf   : > { %9678 = vrsqrt.f32 %v4505_v40  ;;  %v4474_v34 = vmul.f32 0.0078125, %v4437_v37 }
 0xbb1   : > { %v4506_v48 = vadd.f32 1e-05, %v4474_v34 }
 0xbb2   : > { %v4439_v36 = vpop.xlane.xlu1 %4438 }
 0xbb3   : > { %9680 = vrsqrt.f32 %v4506_v48  ;;  %v4475_v60 = vmul.f32 0.0078125, %v4439_v36 }
 0xbb5   : > { %v4507_v35 = vadd.f32 1e-05, %v4475_v60 }
 0xbb6   : > { %v4441_v56 = vpop.xlane.xlu0 %4440 }
 0xbb7   : > { %9682 = vrsqrt.f32 %v4507_v35  ;;  %v4476_v44 = vmul.f32 0.0078125, %v4441_v56 }
 0xbb8   : > { %v9677_v0 = vpop.eup %9676 }
 0xbb9   : > { %v4568_v17 = vmul.f32 %v9677_v0, %v13013_v12  ;;  %v4508_v10 = vadd.f32 1e-05, %v4476_v44 }
 0xbba   : > { %v4443_v13 = vpop.xlane.xlu1 %4442 }
 0xbbb   : > { %v4477_v62 = vmul.f32 0.0078125, %v4443_v13  ;;  %v4606_v63 = vmul.f32 %v12982_v54, %v4568_v17  ;;  %9684 = vrsqrt.f32 %v4508_v10 }
 0xbbc   : > { %v9679_v14 = vpop.eup %9678 }
 0xbbd   : > { %v4509_v19 = vadd.f32 1e-05, %v4477_v62  ;;  %v4569_v25 = vmul.f32 %v9679_v14, %v13018_v29  ;;  %v4644_v29 = vadd.f32 %v12989_v42, %v4606_v63 }
 0xbbe   : > { %v4445_v12 = vpop.xlane.xlu0 %4444 }
 0xbbf   : > { %v4478_v21 = vmul.f32 0.0078125, %v4445_v12  ;;  %v4916_v11 = vpop.f32.mrf.mxu1  ;;  %v5109_v38 = vpop.f32.mrf.mxu0  ;;  %v4607_v28 = vmul.f32 %v12982_v54, %v4569_v25  ;;  %9686 = vrsqrt.f32 %v4509_v19 }
 0xbc0   : > { %v9681_v47 = vpop.eup %9680  ;;  %v13177_v40 = vadd.f32 %v4916_v11, %v13161_v49  ;;  %v13180_v37 = vadd.f32 %v5109_v38, %v13165_v55 }
 0xbc1   : > { %v4510_v34 = vadd.f32 1e-05, %v4478_v21  ;;  %v4918_v48 = vpop.f32.mrf.mxu1  ;;  %v5111_v36 = vpop.f32.mrf.mxu0  ;;  %v4645_v60 = vadd.f32 %v12989_v42, %v4607_v28  ;;  %v4570_v35 = vmul.f32 %v9681_v47, %v13023_v30 }
 0xbc2   : > { %v7927_v56 = vmul.f32 -1.702, %v13177_v40  ;;  %v7929_v0 = vmul.f32 -1.702, %v13180_v37  ;;  %v13188_v44 = vadd.f32 %v4918_v48, %v13171_v7  ;;  %v13191_v8 = vadd.f32 %v5111_v36, %v13173_v15  ;;  %v4447_v17 = vpop.xlane.xlu1 %4446 }
 0xbc3   : > { %9688 = vrsqrt.f32 %v4510_v34  ;;  %v4479_v13 = vmul.f32 0.0078125, %v4447_v17  ;;  %v4920_v23 = vpop.f32.mrf.mxu1  ;;  %v5113_v57 = vpop.f32.mrf.mxu0  ;;  %v4664_v62 = vpack.c.bf16 %v4645_v60, %v4644_v29  ;;  %v13194_v14 = vmul.f32 %v12982_v54, %v4570_v35 }
 0xbc4   : > { %v9683_v30 = vpop.eup %9682  ;;  %v5524_v10 = vmul.f32 1.442695, %v7927_v56  ;;  %v5528_v58 = vmul.f32 1.442695, %v7929_v0  ;;  %v7928_v22 = vmul.f32 -1.702, %v13188_v44  ;;  %v13198_v63 = vadd.f32 %v4920_v23, %v13161_v49 }
 0xbc5   : > { %v7930_v19 = vmul.f32 -1.702, %v13191_v8  ;;  %v4511_v25 = vadd.f32 1e-05, %v4479_v13  ;;  %v13202_v12 = vadd.f32 %v5113_v57, %v13165_v55  ;;  %v4922_v16 = vpop.f32.mrf.mxu1  ;;  %5035 = vmatmul.mubr.bf16.gmra.mxu1 %v4664_v62  ;;  %v5115_v21 = vpop.f32.mrf.mxu0  ;;  %5228 = vmatmul.mubr.bf16.gmra.mxu0 %v4664_v62  ;;  %v4571_v11 = vmul.f32 %v9683_v30, %v13028_v59 }
 0xbc6   : > { %9690 = vpow2.f32 %v5524_v10  ;;  %v5526_v38 = vmul.f32 1.442695, %v7928_v22  ;;  %v7931_v28 = vmul.f32 -1.702, %v13198_v63  ;;  %v13207_v47 = vadd.f32 %v4922_v16, %v13171_v7  ;;  %5044 = vmatprep.mubr.bf16.mxu1 %v14734_v20  ;;  %5237 = vmatprep.mubr.bf16.mxu0 %v14734_v20 }
 0xbc7   : > { %9692 = vpow2.f32 %v5528_v58  ;;  %v5530_v29 = vmul.f32 1.442695, %v7930_v19  ;;  %v7933_v34 = vmul.f32 -1.702, %v13202_v12  ;;  %v13213_v48 = vadd.f32 %v5115_v21, %v13173_v15  ;;  %v4926_v36 = vpop.f32.mrf.mxu1  ;;  %v5119_v59 = vpop.f32.mrf.mxu0 }
 0xbc8   : > { %9694 = vpow2.f32 %v5526_v38  ;;  %v5532_v60 = vmul.f32 1.442695, %v7931_v28  ;;  %v7932_v35 = vmul.f32 -1.702, %v13207_v47  ;;  %v13217_v56 = vadd.f32 %v4926_v36, %v13161_v49 }
 0xbc9   : > { %9696 = vpow2.f32 %v5530_v29  ;;  %v5536_v0 = vmul.f32 1.442695, %v7933_v34  ;;  %v7934_v17 = vmul.f32 -1.702, %v13213_v48  ;;  %v13221_v13 = vadd.f32 %v5119_v59, %v13165_v55  ;;  %v4928_v23 = vpop.f32.mrf.mxu1  ;;  %v5121_v57 = vpop.f32.mrf.mxu0 }
 0xbca   : > { %9698 = vrsqrt.f32 %v4511_v25  ;;  %v5534_v62 = vmul.f32 1.442695, %v7932_v35  ;;  %v7935_v30 = vmul.f32 -1.702, %v13217_v56  ;;  %v13225_v10 = vadd.f32 %v4928_v23, %v13171_v7  ;;  %v13235_v29 = vpop.eup %9684 }
 0xbcb   : > { %9700 = vpow2.f32 %v5532_v60  ;;  %v5538_v58 = vmul.f32 1.442695, %v7934_v17  ;;  %v7937_v22 = vmul.f32 -1.702, %v13221_v13  ;;  %v13229_v19 = vadd.f32 %v5121_v57, %v13173_v15  ;;  %v4930_v16 = vpop.f32.mrf.mxu1  ;;  %v5123_v21 = vpop.f32.mrf.mxu0 }
 0xbcc   : > { %9702 = vpow2.f32 %v5536_v0  ;;  %v5540_v38 = vmul.f32 1.442695, %v7935_v30  ;;  %v7936_v28 = vmul.f32 -1.702, %v13225_v10  ;;  %v13233_v25 = vadd.f32 %v4930_v16, %v13161_v49  ;;  %v13241_v17 = vpop.eup %9686 }
 0xbcd   : > { %9704 = vpow2.f32 %v5534_v62  ;;  %v5544_v34 = vmul.f32 1.442695, %v7937_v22  ;;  %v7938_v36 = vmul.f32 -1.702, %v13229_v19  ;;  %v13239_v59 = vadd.f32 %v5123_v21, %v13165_v55  ;;  %v4932_v60 = vpop.f32.mrf.mxu1  ;;  %v5125_v35 = vpop.f32.mrf.mxu0 }
 0xbce   : > { %9706 = vpow2.f32 %v5538_v58  ;;  %v5542_v0 = vmul.f32 1.442695, %v7936_v28  ;;  %v7939_v23 = vmul.f32 -1.702, %v13233_v25  ;;  %v13245_v57 = vadd.f32 %v4932_v60, %v13171_v7 }
 0xbcf   : > { %9708 = vpow2.f32 %v5540_v38  ;;  %v5546_v30 = vmul.f32 1.442695, %v7938_v36  ;;  %v7941_v62 = vmul.f32 -1.702, %v13239_v59  ;;  %v4609_v22 = vmul.f32 %v12982_v54, %v4571_v11  ;;  %v4936_v16 = vpop.f32.mrf.mxu1  ;;  %v5129_v28 = vpop.f32.mrf.mxu0 }
 0xbd0   : > { %v13249_v21 = vpop.eup %9688  ;;  %9710 = vpow2.f32 %v5544_v34  ;;  %v5548_v45 = vmul.f32 1.442695, %v7939_v23  ;;  %v7940_v27 = vmul.f32 -1.702, %v13245_v57  ;;  %v4646_v58 = vadd.f32 %v12989_v42, %v13194_v14 }
 0xbd1   : > { %9712 = vpow2.f32 %v5542_v0  ;;  %v5552_v60 = vmul.f32 1.442695, %v7941_v62  ;;  %v4647_v38 = vadd.f32 %v12989_v42, %v4609_v22  ;;  %v13256_v36 = vadd.f32 %v5125_v35, %v13173_v15  ;;  %v4938_v34 = vpop.f32.mrf.mxu1 }
 0xbd2   : > { %9714 = vpow2.f32 %v5546_v30  ;;  %v5550_v54 = vmul.f32 1.442695, %v7940_v27  ;;  %v13259_v11 = vadd.f32 %v4936_v16, %v13161_v49  ;;  %v13263_v14 = vadd.f32 %v5129_v28, %v13165_v55  ;;  %v5131_v30 = vpop.f32.mrf.mxu0 }
 0xbd3   : > { %v9691_v23 = vpop.eup %9690  ;;  %9716 = vpow2.f32 %v5548_v45  ;;  %v4665_v32 = vpack.c.bf16 %v4647_v38, %v4646_v58  ;;  %v7942_v53 = vmul.f32 -1.702, %v13256_v36  ;;  %v13266_v27 = vadd.f32 %v4938_v34, %v13171_v7  ;;  %v4940_v58 = vpop.f32.mrf.mxu1 }
 0xbd4   : > { %v9693_v0 = vpop.eup %9692  ;;  %v5780_v62 = vadd.f32 1.0, %v9691_v23  ;;  %9718 = vpow2.f32 %v5552_v60  ;;  %v7943_v38 = vmul.f32 -1.702, %v13259_v11  ;;  %v13274_v26 = vadd.f32 %v5131_v30, %v13173_v15 }
 0xbd5   : > { %v9695_v42 = vpop.eup %9694  ;;  %v5782_v35 = vadd.f32 1.0, %v9693_v0  ;;  %9720 = vpow2.f32 %v5550_v54  ;;  %5045 = vmatmul.mubr.bf16.gmra.mxu1 %v4665_v32  ;;  %5238 = vmatmul.mubr.bf16.gmra.mxu0 %v4665_v32  ;;  %v5554_v16 = vmul.f32 1.442695, %v7942_v53  ;;  %v7945_v32 = vmul.f32 -1.702, %v13263_v14  ;;  %v5133_v53 = vpop.f32.mrf.mxu0 }
 0xbd6   : > { %v9697_v22 = vpop.eup %9696  ;;  %9722 = vrcp.f32 %v5780_v62  ;;  %v5781_v45 = vadd.f32 1.0, %v9695_v42  ;;  %5054 = vmatprep.mubr.bf16.mxu1 %v14734_v20  ;;  %5247 = vmatprep.mubr.bf16.mxu0 %v14734_v20  ;;  %v7944_v0 = vmul.f32 -1.702, %v13266_v27  ;;  %v13279_v52 = vadd.f32 %v4940_v58, %v13161_v49  ;;  %v10252_v58 = vld [vmem:[%s10679_s23] ss:$0 sm:$0xff] }
 0xbd7   : > { %v9699_v28 = vpop.eup %9698  ;;  %9724 = vrcp.f32 %v5782_v35  ;;  %v5783_v60 = vadd.f32 1.0, %v9697_v22  ;;  %v4942_v35 = vpop.f32.mrf.mxu1  ;;  %v4572_v22 = vmul.f32 %v13235_v29, %v13033_v2  ;;  %v4573_v29 = vmul.f32 %v13241_v17, %v13038_v6  ;;  %v10253_v17 = vld [vmem:[%s10685_s24] ss:$0 sm:$0xff] }
 0xbd8   : > { %v9701_v54 = vpop.eup %9700  ;;  %9726 = vrcp.f32 %v5781_v45  ;;  %v5556_v45 = vmul.f32 1.442695, %v7943_v38  ;;  %v13285_v2 = vadd.f32 %v4942_v35, %v13171_v7  ;;  %v4574_v35 = vmul.f32 %v13249_v21, %v13044_v18 }
 0xbd9   : > { %v9703_v34 = vpop.eup %9702  ;;  %9728 = vrcp.f32 %v5783_v60  ;;  %v5784_v23 = vadd.f32 1.0, %v9701_v54  ;;  %v5560_v60 = vmul.f32 1.442695, %v7945_v32  ;;  %v7947_v6 = vmul.f32 -1.702, %v13279_v52 }
 0xbda   : > { %v9705_v62 = vpop.eup %9704  ;;  %v5786_v42 = vadd.f32 1.0, %v9703_v34  ;;  %9730 = vpow2.f32 %v5554_v16  ;;  %v13282_v16 = vadd.f32 %v5133_v53, %v13165_v55  ;;  %v4612_v18 = vmul.f32 %v10252_v58, %v4574_v35 }
 0xbdb   : > { %v9707_v50 = vpop.eup %9706  ;;  %9732 = vrcp.f32 %v5784_v23  ;;  %v5785_v41 = vadd.f32 1.0, %v9705_v62  ;;  %v4610_v23 = vmul.f32 %v10252_v58, %v4572_v22  ;;  %v4575_v22 = vmul.f32 %v9699_v28, %v13052_v4 }
 0xbdc   : > { %v9709_v54 = vpop.eup %9708  ;;  %9734 = vrcp.f32 %v5786_v42  ;;  %v5787_v51 = vadd.f32 1.0, %v9707_v50  ;;  %v7946_v50 = vmul.f32 -1.702, %v13274_v26  ;;  %v4611_v42 = vmul.f32 %v10252_v58, %v4573_v29 }
 0xbdd   : > { %v9711_v30 = vpop.eup %9710  ;;  %9736 = vrcp.f32 %v5785_v41  ;;  %v5788_v34 = vadd.f32 1.0, %v9709_v54  ;;  %v5135_v41 = vpop.f32.mrf.mxu0  ;;  %v4613_v39 = vmul.f32 %v10252_v58, %v4575_v22  ;;  %v4650_v58 = vadd.f32 %v10253_v17, %v4612_v18 }
 0xbde   : > { %v9713_v38 = vpop.eup %9712  ;;  %9738 = vrcp.f32 %v5787_v51  ;;  %v5790_v32 = vadd.f32 1.0, %v9711_v30  ;;  %v4648_v51 = vadd.f32 %v10253_v17, %v4610_v23  ;;  %v4649_v1 = vadd.f32 %v10253_v17, %v4611_v42 }
 0xbdf   : > { %v9715_v62 = vpop.eup %9714  ;;  %9740 = vrcp.f32 %v5788_v34  ;;  %v5789_v53 = vadd.f32 1.0, %v9713_v38  ;;  %v13297_v38 = vadd.f32 %v5135_v41, %v13173_v15  ;;  %v5558_v23 = vmul.f32 1.442695, %v7944_v0 }
 0xbe0   : > { %v9717_v54 = vpop.eup %9716  ;;  %9742 = vrcp.f32 %v5790_v32  ;;  %v5791_v61 = vadd.f32 1.0, %v9715_v62  ;;  %v4666_v62 = vpack.c.bf16 %v4649_v1, %v4648_v51  ;;  %v5562_v4 = vmul.f32 1.442695, %v7946_v50 }
 0xbe1   : > { %v9719_v30 = vpop.eup %9718  ;;  %9744 = vrcp.f32 %v5789_v53  ;;  %v5792_v31 = vadd.f32 1.0, %v9717_v54  ;;  %v7949_v53 = vmul.f32 -1.702, %v13282_v16  ;;  %v4651_v28 = vadd.f32 %v10253_v17, %v4613_v39 }
 0xbe2   : > { %v9721_v34 = vpop.eup %9720  ;;  %9746 = vrcp.f32 %v5791_v61  ;;  %v5794_v29 = vadd.f32 1.0, %v9719_v30  ;;  %v7948_v61 = vmul.f32 -1.702, %v13285_v2  ;;  %5055 = vmatmul.mubr.bf16.gmra.mxu1 %v4666_v62  ;;  %5248 = vmatmul.mubr.bf16.gmra.mxu0 %v4666_v62  ;;  %v5564_v0 = vmul.f32 1.442695, %v7947_v6 }
 0xbe3   : > { %v9723_v21 = vpop.eup %9722  ;;  %9748 = vrcp.f32 %v5792_v31  ;;  %v5793_v32 = vadd.f32 1.0, %v9721_v34  ;;  %v7950_v31 = vmul.f32 -1.702, %v13297_v38  ;;  %5064 = vmatprep.mubr.bf16.mxu1 %v14734_v20  ;;  %5257 = vmatprep.mubr.bf16.mxu0 %v14734_v20  ;;  %v5568_v50 = vmul.f32 1.442695, %v7949_v53 }
 0xbe4   : > { %v9725_v9 = vpop.eup %9724  ;;  %9750 = vrcp.f32 %v5794_v29  ;;  %v5566_v30 = vmul.f32 1.442695, %v7948_v61  ;;  %v4667_v39 = vpack.c.bf16 %v4651_v28, %v4650_v58 }
 0xbe5   : > { %v9727_v42 = vpop.eup %9726  ;;  %9752 = vrcp.f32 %v5793_v32 }
 0xbe6   : > { %v9729_v41 = vpop.eup %9728  ;;  %9754 = vpow2.f32 %v5556_v45  ;;  %v5570_v45 = vmul.f32 1.442695, %v7950_v31  ;;  %v6165_v29 = vmul.f32 %v9727_v42, %v13188_v44 }
 0xbe7   : > { %v9731_v1 = vpop.eup %9730  ;;  %9756 = vpow2.f32 %v5560_v60  ;;  %v6167_v6 = vmul.f32 %v9729_v41, %v13191_v8 }
 0xbe8   : > { %v9733_v35 = vpop.eup %9732  ;;  %v5795_v54 = vadd.f32 1.0, %v9731_v1  ;;  %9758 = vpow2.f32 %v5558_v23 }
 0xbe9   : > { %v9735_v51 = vpop.eup %9734  ;;  %9760 = vpow2.f32 %v5562_v4  ;;  %v6168_v44 = vmul.f32 %v9733_v35, %v13198_v63  ;;  %v6166_v4 = vmul.f32 %v9725_v9, %v13180_v37 }
 0xbea   : > { %v9737_v22 = vpop.eup %9736  ;;  %9762 = vrcp.f32 %v5795_v54  ;;  %5065 = vmatmul.mubr.bf16.gmra.mxu1 %v4667_v39  ;;  %5258 = vmatmul.mubr.bf16.gmra.mxu0 %v4667_v39 }
 0xbeb   : > { %v9739_v34 = vpop.eup %9738  ;;  %v6169_v20 = vmul.f32 %v9737_v22, %v13207_v47  ;;  %9764 = vpow2.f32 %v5564_v0  ;;  %v6170_v47 = vmul.f32 %v9735_v51, %v13202_v12 }
 0xbec   : > { %v9741_v60 = vpop.eup %9740  ;;  %v6171_v17 = vmul.f32 %v9739_v34, %v13213_v48  ;;  %9766 = vpow2.f32 %v5568_v50  ;;  %v6164_v48 = vmul.f32 %v9723_v21, %v13177_v40 }
 0xbed   : > { %v9743_v18 = vpop.eup %9742  ;;  %9768 = vpow2.f32 %v5566_v30  ;;  %v6293_v32 = vpack.c.bf16 %v6169_v20, %v6165_v29  ;;  %v6294_v31 = vpack.c.bf16 %v6170_v47, %v6166_v4  ;;  %v6172_v51 = vmul.f32 %v9741_v60, %v13217_v56 }
 0xbee   : > { %v9745_v62 = vpop.eup %9744  ;;  %9770 = vpow2.f32 %v5570_v45  ;;  %v6295_v23 = vpack.c.bf16 %v6171_v17, %v6167_v6  ;;  %v6292_v41 = vpack.c.bf16 %v6168_v44, %v6164_v48  ;;  %v6174_v30 = vmul.f32 %v9743_v18, %v13221_v13 }
 0xbef   : > { %v9747_v53 = vpop.eup %9746  ;;  %6644 = vmatprep.mubr.bf16.mxu1 %v6293_v32  ;;  %v6173_v1 = vmul.f32 %v9745_v62, %v13225_v10 }
 0xbf0   : > { %v9749_v42 = vpop.eup %9748  ;;  %6805 = vmatprep.mubr.bf16.mxu0 %v6295_v23 }
 0xbf1   : > { %v9751_v8 = vpop.eup %9750  ;;  %v6176_v12 = vmul.f32 %v9749_v42, %v13233_v25  ;;  %v6175_v25 = vmul.f32 %v9747_v53, %v13229_v19 }
 0xbf2   : > { %v9753_v61 = vpop.eup %9752  ;;  %6645 = vmatmul.mubr.bf16.vlgmr.msra.gmra.mxu1 %v6292_v41  ;;  %6806 = vmatmul.mubr.bf16.vlgmr.msra.gmra.mxu0 %v6294_v31  ;;  %v6178_v9 = vmul.f32 %v9751_v8, %v13239_v59 }
 0xbf3   : > { %v9755_v28 = vpop.eup %9754  ;;  %v6177_v0 = vmul.f32 %v9753_v61, %v13245_v57  ;;  %v6296_v45 = vpack.c.bf16 %v6176_v12, %v6172_v51 }
 0xbf4   : > { %v9757_v58 = vpop.eup %9756  ;;  %v5796_v63 = vadd.f32 1.0, %v9755_v28  ;;  %v6298_v29 = vpack.c.bf16 %v6178_v9, %v6174_v30 }
 0xbf5   : > { %v9759_v35 = vpop.eup %9758  ;;  %v5798_v54 = vadd.f32 1.0, %v9757_v58  ;;  %v6297_v50 = vpack.c.bf16 %v6177_v0, %v6173_v1 }
 0xbf6   : > { %v9761_v40 = vpop.eup %9760  ;;  %9772 = vrcp.f32 %v5796_v63  ;;  %v5797_v37 = vadd.f32 1.0, %v9759_v35 }
 0xbf7   : > { %v9763_v21 = vpop.eup %9762  ;;  %9774 = vrcp.f32 %v5798_v54  ;;  %v5799_v10 = vadd.f32 1.0, %v9761_v40  ;;  %6652 = vmatprep.mubr.bf16.mxu1 %v6297_v50 }
 0xbf8   : > { %v9765_v57 = vpop.eup %9764  ;;  %v6179_v39 = vmul.f32 %v9763_v21, %v13256_v36  ;;  %9776 = vrcp.f32 %v5797_v37 }
 0xbf9   : > { %v9767_v22 = vpop.eup %9766  ;;  %v5800_v34 = vadd.f32 1.0, %v9765_v57  ;;  %9778 = vrcp.f32 %v5799_v10 }
 0xbfa   : > { %v9769_v59 = vpop.eup %9768  ;;  %v5802_v20 = vadd.f32 1.0, %v9767_v22  ;;  %v6299_v6 = vpack.c.bf16 %v6179_v39, %v6175_v25  ;;  %v4946_v56 = vpop.f32.mrf.mxu1  ;;  %6653 = vmatmul.mubr.bf16.gmra.mxu1 %v6296_v45 }
 0xbfb   : > { %v5139_v60 = vpop.f32.mrf.mxu0  ;;  %v9771_v17 = vpop.eup %9770  ;;  %9780 = vrcp.f32 %v5800_v34  ;;  %v5801_v32 = vadd.f32 1.0, %v9769_v59  ;;  %v13321_v13 = vadd.f32 %v4946_v56, %v13161_v49 }
 0xbfc   : > { %v13324_v19 = vadd.f32 %v5139_v60, %v13165_v55  ;;  %9782 = vrcp.f32 %v5802_v20  ;;  %v5803_v36 = vadd.f32 1.0, %v9771_v17  ;;  %6813 = vmatprep.mubr.bf16.mxu0 %v6299_v6  ;;  %v4948_v18 = vpop.f32.mrf.mxu1 }
 0xbfd   : > { %v5141_v62 = vpop.f32.mrf.mxu0  ;;  %9784 = vrcp.f32 %v5801_v32  ;;  %6814 = vmatmul.mubr.bf16.gmra.mxu0 %v6298_v29  ;;  %v7951_v23 = vmul.f32 -1.702, %v13321_v13  ;;  %v13329_v44 = vadd.f32 %v4948_v18, %v13171_v7 }
 0xbfe   : > { %v7953_v53 = vmul.f32 -1.702, %v13324_v19  ;;  %9786 = vrcp.f32 %v5803_v36  ;;  %v13332_v47 = vadd.f32 %v5141_v62, %v13173_v15  ;;  %v4950_v42 = vpop.f32.mrf.mxu1 }
 0xbff   : > { %v5143_v8 = vpop.f32.mrf.mxu0  ;;  %v5572_v48 = vmul.f32 1.442695, %v7951_v23  ;;  %v7952_v61 = vmul.f32 -1.702, %v13329_v44  ;;  %v13336_v28 = vadd.f32 %v4950_v42, %v13161_v49 }
 0xc00   : > { %v5576_v4 = vmul.f32 1.442695, %v7953_v53  ;;  %v7954_v41 = vmul.f32 -1.702, %v13332_v47  ;;  %v13340_v31 = vadd.f32 %v5143_v8, %v13165_v55  ;;  %v4952_v1 = vpop.f32.mrf.mxu1 }
 0xc01   : > { %v5145_v0 = vpop.f32.mrf.mxu0  ;;  %9788 = vpow2.f32 %v5572_v48  ;;  %v5574_v58 = vmul.f32 1.442695, %v7952_v61  ;;  %v7955_v63 = vmul.f32 -1.702, %v13336_v28  ;;  %v13344_v35 = vadd.f32 %v4952_v1, %v13171_v7 }
 0xc02   : > { %9790 = vpow2.f32 %v5576_v4  ;;  %v5578_v12 = vmul.f32 1.442695, %v7954_v41  ;;  %v7957_v54 = vmul.f32 -1.702, %v13340_v31  ;;  %v13348_v50 = vadd.f32 %v5145_v0, %v13173_v15  ;;  %v4956_v40 = vpop.f32.mrf.mxu1 }
 0xc03   : > { %v5149_v9 = vpop.f32.mrf.mxu0  ;;  %v9773_v37 = vpop.eup %9772  ;;  %9792 = vpow2.f32 %v5574_v58  ;;  %v5580_v21 = vmul.f32 1.442695, %v7955_v63  ;;  %v7956_v51 = vmul.f32 -1.702, %v13344_v35  ;;  %v13352_v10 = vadd.f32 %v4956_v40, %v13161_v49 }
 0xc04   : > { %v9775_v57 = vpop.eup %9774  ;;  %9794 = vpow2.f32 %v5578_v12  ;;  %v5584_v30 = vmul.f32 1.442695, %v7957_v54  ;;  %v7958_v25 = vmul.f32 -1.702, %v13348_v50  ;;  %v4958_v39 = vpop.f32.mrf.mxu1  ;;  %v6180_v29 = vmul.f32 %v9773_v37, %v13259_v11 }
 0xc05   : > { %v5151_v22 = vpop.f32.mrf.mxu0  ;;  %9796 = vpow2.f32 %v5580_v21  ;;  %v5582_v45 = vmul.f32 1.442695, %v7956_v51  ;;  %v7959_v34 = vmul.f32 -1.702, %v13352_v10  ;;  %v9777_v59 = vpop.eup %9776  ;;  %v13358_v6 = vadd.f32 %v5149_v9, %v13165_v55 }
 0xc06   : > { %9798 = vpow2.f32 %v5584_v30  ;;  %v5586_v20 = vmul.f32 1.442695, %v7958_v25  ;;  %v4960_v56 = vpop.f32.mrf.mxu1  ;;  %v9779_v17 = vpop.eup %9778  ;;  %v6182_v32 = vmul.f32 %v9775_v57, %v13263_v14  ;;  %v13362_v18 = vadd.f32 %v4958_v39, %v13171_v7 }
 0xc07   : > { %v5153_v60 = vpop.f32.mrf.mxu0  ;;  %9800 = vpow2.f32 %v5582_v45  ;;  %v5588_v36 = vmul.f32 1.442695, %v7959_v34  ;;  %v7961_v23 = vmul.f32 -1.702, %v13358_v6  ;;  %v13366_v11 = vadd.f32 %v5151_v22, %v13173_v15 }
 0xc08   : > { %v9781_v62 = vpop.eup %9780  ;;  %9802 = vpow2.f32 %v5586_v20  ;;  %v13369_v53 = vadd.f32 %v4960_v56, %v13161_v49  ;;  %v4962_v42 = vpop.f32.mrf.mxu1  ;;  %v6181_v14 = vmul.f32 %v9777_v59, %v13266_v27  ;;  %v7960_v4 = vmul.f32 -1.702, %v13362_v18 }
 0xc09   : > { %v5155_v8 = vpop.f32.mrf.mxu0  ;;  %v9783_v48 = vpop.eup %9782  ;;  %9804 = vpow2.f32 %v5588_v36  ;;  %v13374_v61 = vadd.f32 %v5153_v60, %v13165_v55  ;;  %v6184_v1 = vmul.f32 %v9781_v62, %v13279_v52  ;;  %v5592_v0 = vmul.f32 1.442695, %v7961_v23 }
 0xc0a   : > { %v9785_v41 = vpop.eup %9784  ;;  %v7962_v58 = vmul.f32 -1.702, %v13366_v11  ;;  %v7963_v63 = vmul.f32 -1.702, %v13369_v53  ;;  %v4966_v12 = vpop.f32.mrf.mxu1  ;;  %v6186_v9 = vmul.f32 %v9783_v48, %v13282_v16  ;;  %v5590_v37 = vmul.f32 1.442695, %v7960_v4 }
 0xc0b   : > { %v5159_v54 = vpop.f32.mrf.mxu0  ;;  %v9787_v40 = vpop.eup %9786  ;;  %v6185_v27 = vmul.f32 %v9785_v41, %v13285_v2  ;;  %v7965_v21 = vmul.f32 -1.702, %v13374_v61  ;;  %v6183_v51 = vmul.f32 %v9779_v17, %v13274_v26  ;;  %9806 = vpow2.f32 %v5592_v0 }
 0xc0c   : > { %v6187_v57 = vmul.f32 %v9787_v40, %v13297_v38  ;;  %v5594_v52 = vmul.f32 1.442695, %v7962_v58  ;;  %v4968_v30 = vpop.f32.mrf.mxu1  ;;  %9808 = vpow2.f32 %v5590_v37  ;;  %v5596_v39 = vmul.f32 1.442695, %v7963_v63 }
 0xc0d   : > { %v6301_v25 = vpack.c.bf16 %v6185_v27, %v6181_v14  ;;  %v5600_v22 = vmul.f32 1.442695, %v7965_v21  ;;  %v5161_v45 = vpop.f32.mrf.mxu0  ;;  %v6300_v59 = vpack.c.bf16 %v6184_v1, %v6180_v29  ;;  %v13385_v2 = vadd.f32 %v4962_v42, %v13171_v7 }
 0xc0e   : > { %v9789_v34 = vpop.eup %9788  ;;  %v6303_v16 = vpack.c.bf16 %v6187_v57, %v6183_v51  ;;  %9810 = vpow2.f32 %v5594_v52  ;;  %v6302_v56 = vpack.c.bf16 %v6186_v9, %v6182_v32  ;;  %v13388_v38 = vadd.f32 %v5155_v8, %v13173_v15  ;;  %v4970_v36 = vpop.f32.mrf.mxu1 }
 0xc0f   : > { %v9791_v20 = vpop.eup %9790  ;;  %v5804_v26 = vadd.f32 1.0, %v9789_v34  ;;  %6660 = vmatprep.mubr.bf16.mxu1 %v6301_v25  ;;  %9812 = vpow2.f32 %v5596_v39  ;;  %v5163_v23 = vpop.f32.mrf.mxu0  ;;  %v7964_v48 = vmul.f32 -1.702, %v13385_v2  ;;  %v13392_v14 = vadd.f32 %v4966_v12, %v13161_v49 }
 0xc10   : > { %v9793_v60 = vpop.eup %9792  ;;  %v5806_v17 = vadd.f32 1.0, %v9791_v20  ;;  %6821 = vmatprep.mubr.bf16.mxu0 %v6303_v16  ;;  %6661 = vmatmul.mubr.bf16.gmra.mxu1 %v6300_v59  ;;  %9814 = vpow2.f32 %v5600_v22  ;;  %v7966_v41 = vmul.f32 -1.702, %v13388_v38  ;;  %v4972_v58 = vpop.f32.mrf.mxu1  ;;  %v13396_v9 = vadd.f32 %v5159_v54, %v13165_v55 }
 0xc11   : > { %v9795_v29 = vpop.eup %9794  ;;  %9816 = vrcp.f32 %v5804_v26  ;;  %v5805_v62 = vadd.f32 1.0, %v9793_v60  ;;  %6822 = vmatmul.mubr.bf16.gmra.mxu0 %v6302_v56  ;;  %v5165_v27 = vpop.f32.mrf.mxu0  ;;  %v5598_v21 = vmul.f32 1.442695, %v7964_v48  ;;  %v7967_v51 = vmul.f32 -1.702, %v13392_v14 }
 0xc12   : > { %v9797_v42 = vpop.eup %9796  ;;  %9818 = vrcp.f32 %v5806_v17  ;;  %v5807_v32 = vadd.f32 1.0, %v9795_v29  ;;  %v5602_v52 = vmul.f32 1.442695, %v7966_v41  ;;  %v13400_v25 = vadd.f32 %v4968_v30, %v13171_v7  ;;  %v4976_v22 = vpop.f32.mrf.mxu1 }
 0xc13   : > { %v9799_v8 = vpop.eup %9798  ;;  %9820 = vrcp.f32 %v5805_v62  ;;  %v5808_v4 = vadd.f32 1.0, %v9797_v42  ;;  %v13403_v39 = vadd.f32 %v5161_v45, %v13173_v15  ;;  %v7969_v34 = vmul.f32 -1.702, %v13396_v9  ;;  %v5169_v16 = vpop.f32.mrf.mxu0 }
 0xc14   : > { %v9801_v1 = vpop.eup %9800  ;;  %9822 = vrcp.f32 %v5807_v32  ;;  %v5810_v0 = vadd.f32 1.0, %v9799_v8  ;;  %v13407_v59 = vadd.f32 %v4970_v36, %v13161_v49  ;;  %v5604_v26 = vmul.f32 1.442695, %v7967_v51  ;;  %v4978_v48 = vpop.f32.mrf.mxu1 }
 0xc15   : > { %v9803_v63 = vpop.eup %9802  ;;  %9824 = vrcp.f32 %v5808_v4  ;;  %v5809_v40 = vadd.f32 1.0, %v9801_v1  ;;  %v13410_v30 = vadd.f32 %v5163_v23, %v13165_v55  ;;  %v7968_v45 = vmul.f32 -1.702, %v13400_v25  ;;  %v5171_v1 = vpop.f32.mrf.mxu0 }
 0xc16   : > { %v9805_v37 = vpop.eup %9804  ;;  %9826 = vrcp.f32 %v5810_v0  ;;  %v5811_v12 = vadd.f32 1.0, %v9803_v63  ;;  %v13414_v29 = vadd.f32 %v4972_v58, %v13171_v7  ;;  %v7970_v42 = vmul.f32 -1.702, %v13403_v39 }
 0xc17   : > { %9828 = vrcp.f32 %v5809_v40  ;;  %v5812_v57 = vadd.f32 1.0, %v9805_v37  ;;  %v13418_v32 = vadd.f32 %v5165_v27, %v13173_v15  ;;  %v7971_v4 = vmul.f32 -1.702, %v13407_v59 }
 0xc18   : > { %9830 = vrcp.f32 %v5811_v12  ;;  %v9807_v54 = vpop.eup %9806  ;;  %v13422_v41 = vadd.f32 %v4976_v22, %v13161_v49  ;;  %v5608_v63 = vmul.f32 1.442695, %v7969_v34  ;;  %v7973_v40 = vmul.f32 -1.702, %v13410_v30  ;;  %v4980_v22 = vpop.f32.mrf.mxu1 }
 0xc19   : > { %9832 = vrcp.f32 %v5812_v57  ;;  %v9809_v20 = vpop.eup %9808  ;;  %v5814_v56 = vadd.f32 1.0, %v9807_v54  ;;  %v5606_v27 = vmul.f32 1.442695, %v7968_v45  ;;  %v7972_v12 = vmul.f32 -1.702, %v13414_v29 }
 0xc1a   : > { %9834 = vpow2.f32 %v5598_v21  ;;  %v5813_v17 = vadd.f32 1.0, %v9809_v20  ;;  %v5610_v51 = vmul.f32 1.442695, %v7970_v42  ;;  %v7974_v57 = vmul.f32 -1.702, %v13418_v32 }
 0xc1b   : > { %v9811_v60 = vpop.eup %9810  ;;  %9836 = vpow2.f32 %v5602_v52  ;;  %v13428_v52 = vadd.f32 %v5169_v16, %v13165_v55  ;;  %v5612_v20 = vmul.f32 1.442695, %v7971_v4  ;;  %v7975_v34 = vmul.f32 -1.702, %v13422_v41 }
 0xc1c   : > { %v9813_v62 = vpop.eup %9812  ;;  %9838 = vrcp.f32 %v5814_v56  ;;  %v5815_v36 = vadd.f32 1.0, %v9811_v60  ;;  %v13432_v56 = vadd.f32 %v4978_v48, %v13171_v7  ;;  %v5173_v60 = vpop.f32.mrf.mxu0  ;;  %v5616_v45 = vmul.f32 1.442695, %v7973_v40 }
 0xc1d   : > { %v9815_v8 = vpop.eup %9814  ;;  %9840 = vrcp.f32 %v5813_v17  ;;  %v5816_v23 = vadd.f32 1.0, %v9813_v62  ;;  %v13435_v62 = vadd.f32 %v5171_v1, %v13173_v15  ;;  %v5614_v16 = vmul.f32 1.442695, %v7972_v12 }
 0xc1e   : > { %v9817_v0 = vpop.eup %9816  ;;  %9842 = vrcp.f32 %v5815_v36  ;;  %v5818_v58 = vadd.f32 1.0, %v9815_v8  ;;  %v13438_v42 = vadd.f32 %v4980_v22, %v13161_v49  ;;  %v5618_v8 = vmul.f32 1.442695, %v7974_v57  ;;  %v5175_v5 = vpop.f32.mrf.mxu0 }
 0xc1f   : > { %v9819_v37 = vpop.eup %9818  ;;  %9844 = vrcp.f32 %v5816_v23  ;;  %v7977_v23 = vmul.f32 -1.702, %v13428_v52  ;;  %v13442_v48 = vadd.f32 %v5173_v60, %v13165_v55  ;;  %v7976_v1 = vmul.f32 -1.702, %v13432_v56 }
 0xc20   : > { %v9821_v21 = vpop.eup %9820  ;;  %9846 = vrcp.f32 %v5818_v58  ;;  %v5620_v58 = vmul.f32 1.442695, %v7975_v34  ;;  %v7978_v40 = vmul.f32 -1.702, %v13435_v62 }
 0xc21   : > { %v9823_v54 = vpop.eup %9822  ;;  %9848 = vpow2.f32 %v5604_v26  ;;  %v5624_v24 = vmul.f32 1.442695, %v7977_v23  ;;  %v7981_v60 = vmul.f32 -1.702, %v13442_v48  ;;  %v5622_v3 = vmul.f32 1.442695, %v7976_v1 }
 0xc22   : > { %v9825_v17 = vpop.eup %9824  ;;  %9850 = vpow2.f32 %v5608_v63 }
 0xc23   : > { %v9827_v36 = vpop.eup %9826  ;;  %9852 = vpow2.f32 %v5606_v27  ;;  %v4982_v27 = vpop.f32.mrf.mxu1  ;;  %v13452_v46 = vmul.f32 %v9825_v17, %v13336_v28  ;;  %v6189_v28 = vmul.f32 %v9821_v21, %v13329_v44  ;;  %v5632_v17 = vmul.f32 1.442695, %v7981_v60 }
 0xc24   : > { %v9829_v26 = vpop.eup %9828  ;;  %9854 = vpow2.f32 %v5610_v51  ;;  %v7979_v51 = vmul.f32 -1.702, %v13438_v42  ;;  %v13458_v23 = vmul.f32 %v9827_v36, %v13340_v31 }
 0xc25   : > { %v9831_v4 = vpop.eup %9830  ;;  %9856 = vpow2.f32 %v5612_v20 }
 0xc26   : > { %v9833_v63 = vpop.eup %9832  ;;  %9858 = vpow2.f32 %v5616_v45  ;;  %v13449_v45 = vadd.f32 %v4982_v27, %v13171_v7  ;;  %v13463_v27 = vmul.f32 %v9819_v37, %v13324_v19  ;;  %v6193_v37 = vmul.f32 %v9829_v26, %v13344_v35 }
 0xc27   : > { %v9835_v12 = vpop.eup %9834  ;;  %9860 = vpow2.f32 %v5614_v16  ;;  %v5626_v16 = vmul.f32 1.442695, %v7978_v40  ;;  %v5179_v40 = vpop.f32.mrf.mxu0 }
 0xc28   : > { %v9837_v57 = vpop.eup %9836  ;;  %v5817_v22 = vadd.f32 1.0, %v9835_v12  ;;  %9862 = vpow2.f32 %v5618_v8  ;;  %v13455_v8 = vmul.f32 %v9817_v0, %v13321_v13  ;;  %v5628_v12 = vmul.f32 1.442695, %v7979_v51 }
 0xc29   : > { %v9839_v20 = vpop.eup %9838  ;;  %v5819_v34 = vadd.f32 1.0, %v9837_v57  ;;  %9864 = vpow2.f32 %v5620_v58  ;;  %v4986_v58 = vpop.f32.mrf.mxu1  ;;  %v6191_v13 = vmul.f32 %v9823_v54, %v13332_v47  ;;  %v7980_v31 = vmul.f32 -1.702, %v13449_v45 }
 0xc2a   : > { %v9841_v43 = vpop.eup %9840  ;;  %9866 = vrcp.f32 %v5817_v22  ;;  %v13471_v0 = vadd.f32 %v5175_v5, %v13173_v15  ;;  %v6304_v19 = vpack.c.bf16 %v13452_v46, %v13455_v8  ;;  %v6306_v47 = vpack.c.bf16 %v13458_v23, %v13463_v27 }
 0xc2b   : > { %v9843_v33 = vpop.eup %9842  ;;  %9868 = vrcp.f32 %v5819_v34  ;;  %v13482_v21 = vadd.f32 %v5179_v40, %v13165_v55  ;;  %v6195_v54 = vmul.f32 %v9831_v4, %v13348_v50  ;;  %v13486_v46 = vmul.f32 %v9833_v63, %v13352_v10  ;;  %v4988_v26 = vpop.f32.mrf.mxu1 }
 0xc2c   : > { %v13460_v1 = vpop.eup %9844  ;;  %9870 = vpow2.f32 %v5624_v24  ;;  %v13477_v24 = vadd.f32 %v4986_v58, %v13161_v49  ;;  %v5630_v60 = vmul.f32 1.442695, %v7980_v31  ;;  %v7982_v34 = vmul.f32 -1.702, %v13471_v0 }
 0xc2d   : > { %v13466_v57 = vpop.eup %9846  ;;  %9872 = vpow2.f32 %v5622_v3  ;;  %v13490_v23 = vmul.f32 %v9839_v20, %v13358_v6  ;;  %v7985_v63 = vmul.f32 -1.702, %v13482_v21  ;;  %v13495_v58 = vadd.f32 %v4988_v26, %v13171_v7  ;;  %v4990_v31 = vpop.f32.mrf.mxu1 }
 0xc2e   : > { %v9849_v36 = vpop.eup %9848  ;;  %9874 = vpow2.f32 %v5626_v16  ;;  %v5181_v16 = vpop.f32.mrf.mxu0  ;;  %v7983_v50 = vmul.f32 -1.702, %v13477_v24  ;;  %v6305_v6 = vpack.c.bf16 %v6193_v37, %v6189_v28  ;;  %v6200_v37 = vmul.f32 %v13460_v1, %v13369_v53 }
 0xc2f   : > { %v9851_v44 = vpop.eup %9850  ;;  %v5820_v3 = vadd.f32 1.0, %v9849_v36  ;;  %9876 = vpow2.f32 %v5628_v12 }
 0xc30   : > { %v9853_v5 = vpop.eup %9852  ;;  %v5822_v35 = vadd.f32 1.0, %v9851_v44  ;;  %9878 = vpow2.f32 %v5632_v17  ;;  %v6197_v17 = vmul.f32 %v9841_v43, %v13362_v18  ;;  %v5634_v44 = vmul.f32 1.442695, %v7982_v34  ;;  %6668 = vmatprep.mubr.bf16.mxu1 %v6305_v6 }
 0xc31   : > { %v9855_v51 = vpop.eup %9854  ;;  %9880 = vrcp.f32 %v5820_v3  ;;  %v5821_v22 = vadd.f32 1.0, %v9853_v5  ;;  %v5183_v3 = vpop.f32.mrf.mxu0  ;;  %v6307_v5 = vpack.c.bf16 %v6195_v54, %v6191_v13  ;;  %v5636_v26 = vmul.f32 1.442695, %v7983_v50  ;;  %6669 = vmatmul.mubr.bf16.gmra.mxu1 %v6304_v19 }
 0xc32   : > { %v9857_v8 = vpop.eup %9856  ;;  %9882 = vrcp.f32 %v5822_v35  ;;  %v5823_v12 = vadd.f32 1.0, %v9855_v51  ;;  %v6199_v51 = vmul.f32 %v9843_v33, %v13366_v11  ;;  %v5640_v18 = vmul.f32 1.442695, %v7985_v63  ;;  %v4992_v11 = vpop.f32.mrf.mxu1 }
 0xc33   : > { %v9859_v10 = vpop.eup %9858  ;;  %9884 = vrcp.f32 %v5821_v22  ;;  %v5824_v4 = vadd.f32 1.0, %v9857_v8  ;;  %6829 = vmatprep.mubr.bf16.mxu0 %v6307_v5  ;;  %v13504_v33 = vadd.f32 %v5181_v16, %v13173_v15  ;;  %v6202_v34 = vmul.f32 %v13466_v57, %v13374_v61 }
 0xc34   : > { %v9861_v27 = vpop.eup %9860  ;;  %9886 = vrcp.f32 %v5823_v12  ;;  %v5826_v40 = vadd.f32 1.0, %v9859_v10  ;;  %v7984_v12 = vmul.f32 -1.702, %v13495_v58  ;;  %6830 = vmatmul.mubr.bf16.gmra.mxu0 %v6306_v47  ;;  %v13510_v19 = vadd.f32 %v4990_v31, %v13161_v49  ;;  %v5185_v10 = vpop.f32.mrf.mxu0 }
 0xc35   : > { %v9863_v20 = vpop.eup %9862  ;;  %9888 = vrcp.f32 %v5824_v4  ;;  %v5825_v36 = vadd.f32 1.0, %v9861_v27  ;;  %v13516_v63 = vadd.f32 %v4992_v11, %v13171_v7  ;;  %v7986_v27 = vmul.f32 -1.702, %v13504_v33 }
 0xc36   : > { %v9865_v35 = vpop.eup %9864  ;;  %9890 = vrcp.f32 %v5826_v40  ;;  %v5827_v22 = vadd.f32 1.0, %v9863_v20  ;;  %v13520_v40 = vadd.f32 %v5185_v10, %v13173_v15  ;;  %v6308_v31 = vpack.c.bf16 %v6200_v37, %v13486_v46 }
 0xc37   : > { %v9867_v8 = vpop.eup %9866  ;;  %9892 = vrcp.f32 %v5825_v36  ;;  %v5828_v43 = vadd.f32 1.0, %v9865_v35  ;;  %v7987_v6 = vmul.f32 -1.702, %v13510_v19  ;;  %v6310_v36 = vpack.c.bf16 %v6202_v34, %v13490_v23 }
 0xc38   : > { %v9869_v28 = vpop.eup %9868  ;;  %v6201_v13 = vmul.f32 %v9867_v8, %v13385_v2  ;;  %9894 = vrcp.f32 %v5827_v22  ;;  %v13513_v2 = vadd.f32 %v5183_v3, %v13165_v55  ;;  %v5638_v35 = vmul.f32 1.442695, %v7984_v12 }
 0xc39   : > { %v9871_v54 = vpop.eup %9870  ;;  %v6203_v50 = vmul.f32 %v9869_v28, %v13388_v38  ;;  %9896 = vrcp.f32 %v5828_v43  ;;  %v5642_v46 = vmul.f32 1.442695, %v7986_v27  ;;  %v7990_v8 = vmul.f32 -1.702, %v13520_v40 }
 0xc3a   : > { %v9873_v53 = vpop.eup %9872  ;;  %v5830_v1 = vadd.f32 1.0, %v9871_v54  ;;  %9898 = vpow2.f32 %v5630_v60  ;;  %v6309_v16 = vpack.c.bf16 %v6201_v13, %v6197_v17  ;;  %v7989_v3 = vmul.f32 -1.702, %v13513_v2 }
 0xc3b   : > { %v9875_v4 = vpop.eup %9874  ;;  %v5829_v47 = vadd.f32 1.0, %v9873_v53  ;;  %9900 = vpow2.f32 %v5634_v44  ;;  %v6311_v61 = vpack.c.bf16 %v6203_v50, %v6199_v51  ;;  %v7988_v51 = vmul.f32 -1.702, %v13516_v63 }
 0xc3c   : > { %v9877_v38 = vpop.eup %9876  ;;  %9902 = vrcp.f32 %v5830_v1  ;;  %v5831_v57 = vadd.f32 1.0, %v9875_v4  ;;  %6676 = vmatprep.mubr.bf16.mxu1 %v6309_v16  ;;  %v5644_v28 = vmul.f32 1.442695, %v7987_v6  ;;  %v5648_v37 = vmul.f32 1.442695, %v7989_v3 }
 0xc3d   : > { %v9879_v60 = vpop.eup %9878  ;;  %9904 = vrcp.f32 %v5829_v47  ;;  %v5832_v17 = vadd.f32 1.0, %v9877_v38  ;;  %6837 = vmatprep.mubr.bf16.mxu0 %v6311_v61  ;;  %6677 = vmatmul.mubr.bf16.gmra.mxu1 %v6308_v31  ;;  %v5646_v12 = vmul.f32 1.442695, %v7988_v51  ;;  %v5650_v50 = vmul.f32 1.442695, %v7990_v8 }
 0xc3e   : > { %v9881_v20 = vpop.eup %9880  ;;  %9906 = vrcp.f32 %v5831_v57  ;;  %v5834_v44 = vadd.f32 1.0, %v9879_v60  ;;  %6838 = vmatmul.mubr.bf16.gmra.mxu0 %v6310_v36 }
 0xc3f   : > { %v9883_v5 = vpop.eup %9882  ;;  %9908 = vrcp.f32 %v5832_v17  ;;  %v6204_v34 = vmul.f32 %v9881_v20, %v13392_v14 }
 0xc40   : > { %v9885_v22 = vpop.eup %9884  ;;  %9910 = vrcp.f32 %v5834_v44  ;;  %v6206_v47 = vmul.f32 %v9883_v5, %v13396_v9 }
 0xc41   : > { %v9887_v43 = vpop.eup %9886  ;;  %9912 = vpow2.f32 %v5636_v26  ;;  %v6205_v53 = vmul.f32 %v9885_v22, %v13400_v25 }
 0xc42   : > { %v9889_v23 = vpop.eup %9888  ;;  %9914 = vpow2.f32 %v5640_v18  ;;  %v6207_v16 = vmul.f32 %v9887_v43, %v13403_v39 }
 0xc43   : > { %v9891_v13 = vpop.eup %9890  ;;  %v6208_v11 = vmul.f32 %v9889_v23, %v13407_v59  ;;  %9916 = vpow2.f32 %v5638_v35 }
 0xc44   : > { %v9893_v54 = vpop.eup %9892  ;;  %9918 = vpow2.f32 %v5642_v46  ;;  %v6210_v1 = vmul.f32 %v9891_v13, %v13410_v30 }
 0xc45   : > { %v9895_v10 = vpop.eup %9894  ;;  %v6209_v26 = vmul.f32 %v9893_v54, %v13414_v29  ;;  %9920 = vpow2.f32 %v5644_v28  ;;  %v6312_v14 = vpack.c.bf16 %v6208_v11, %v6204_v34 }
 0xc46   : > { %v9897_v18 = vpop.eup %9896  ;;  %v6211_v59 = vmul.f32 %v9895_v10, %v13418_v32  ;;  %9922 = vpow2.f32 %v5648_v37  ;;  %v6314_v39 = vpack.c.bf16 %v6210_v1, %v6206_v47 }
 0xc47   : > { %v9899_v4 = vpop.eup %9898  ;;  %9924 = vpow2.f32 %v5646_v12  ;;  %v6313_v61 = vpack.c.bf16 %v6209_v26, %v6205_v53  ;;  %v4996_v38 = vpop.f32.mrf.mxu1  ;;  %v13555_v23 = vmul.f32 %v9897_v18, %v13422_v41 }
 0xc48   : > { %v5189_v57 = vpop.f32.mrf.mxu0  ;;  %v9901_v25 = vpop.eup %9900  ;;  %v5833_v27 = vadd.f32 1.0, %v9899_v4  ;;  %9926 = vpow2.f32 %v5650_v50  ;;  %v6315_v30 = vpack.c.bf16 %v6211_v59, %v6207_v16  ;;  %v13537_v29 = vadd.f32 %v4996_v38, %v13161_v49 }
 0xc49   : > { %v9903_v60 = vpop.eup %9902  ;;  %v5835_v31 = vadd.f32 1.0, %v9901_v25  ;;  %6684 = vmatprep.mubr.bf16.mxu1 %v6313_v61  ;;  %v13540_v32 = vadd.f32 %v5189_v57, %v13165_v55  ;;  %v4998_v9 = vpop.f32.mrf.mxu1 }
 0xc4a   : > { %v5191_v17 = vpop.f32.mrf.mxu0  ;;  %v9905_v6 = vpop.eup %9904  ;;  %9928 = vrcp.f32 %v5833_v27  ;;  %6845 = vmatprep.mubr.bf16.mxu0 %v6315_v30  ;;  %6685 = vmatmul.mubr.bf16.gmra.mxu1 %v6312_v14  ;;  %v7991_v20 = vmul.f32 -1.702, %v13537_v29  ;;  %v13544_v36 = vadd.f32 %v4998_v9, %v13171_v7  ;;  %v13558_v37 = vmul.f32 %v9903_v60, %v13428_v52 }
 0xc4b   : > { %v9907_v44 = vpop.eup %9906  ;;  %9930 = vrcp.f32 %v5835_v31  ;;  %6846 = vmatmul.mubr.bf16.gmra.mxu0 %v6314_v39  ;;  %v7993_v3 = vmul.f32 -1.702, %v13540_v32  ;;  %v13548_v5 = vadd.f32 %v5191_v17, %v13173_v15  ;;  %v5000_v35 = vpop.f32.mrf.mxu1  ;;  %v13564_v50 = vmul.f32 %v9905_v6, %v13432_v56 }
 0xc4c   : > { %v5193_v51 = vpop.f32.mrf.mxu0  ;;  %v9909_v22 = vpop.eup %9908  ;;  %v5652_v46 = vmul.f32 1.442695, %v7991_v20  ;;  %v7992_v8 = vmul.f32 -1.702, %v13544_v36  ;;  %v13552_v43 = vadd.f32 %v5000_v35, %v13161_v49  ;;  %v13567_v10 = vmul.f32 %v9907_v44, %v13435_v62 }
 0xc4d   : > { %v9911_v28 = vpop.eup %9910  ;;  %v5656_v13 = vmul.f32 1.442695, %v7993_v3  ;;  %v13561_v11 = vadd.f32 %v5193_v51, %v13165_v55  ;;  %v5002_v12 = vpop.f32.mrf.mxu1  ;;  %v13570_v1 = vmul.f32 %v9909_v22, %v13438_v42  ;;  %v7994_v26 = vmul.f32 -1.702, %v13548_v5 }
 0xc4e   : > { %v5195_v54 = vpop.f32.mrf.mxu0  ;;  %v9913_v34 = vpop.eup %9912  ;;  %9932 = vpow2.f32 %v5652_v46  ;;  %v5654_v53 = vmul.f32 1.442695, %v7992_v8  ;;  %v13574_v4 = vmul.f32 %v9911_v28, %v13442_v48  ;;  %v7995_v62 = vmul.f32 -1.702, %v13552_v43 }
 0xc4f   : > { %v9915_v41 = vpop.eup %9914  ;;  %v5836_v52 = vadd.f32 1.0, %v9913_v34  ;;  %9934 = vpow2.f32 %v5656_v13  ;;  %v5006_v18 = vpop.f32.mrf.mxu1  ;;  %v7997_v42 = vmul.f32 -1.702, %v13561_v11  ;;  %v13579_v61 = vadd.f32 %v5002_v12, %v13171_v7 }
 0xc50   : > { %v5199_v16 = vpop.f32.mrf.mxu0  ;;  %v9917_v59 = vpop.eup %9916  ;;  %v5838_v56 = vadd.f32 1.0, %v9915_v41  ;;  %9936 = vpow2.f32 %v5654_v53  ;;  %v13582_v48 = vadd.f32 %v5195_v54, %v13173_v15  ;;  %v13585_v30 = vadd.f32 %v5006_v18, %v13161_v49 }
 0xc51   : > { %v9919_v47 = vpop.eup %9918  ;;  %9938 = vrcp.f32 %v5836_v52  ;;  %v5837_v14 = vadd.f32 1.0, %v9917_v59  ;;  %v5008_v38 = vpop.f32.mrf.mxu1  ;;  %v6316_v39 = vpack.c.bf16 %v13570_v1, %v13555_v23  ;;  %v7996_v9 = vmul.f32 -1.702, %v13579_v61 }
 0xc52   : > { %v5201_v57 = vpop.f32.mrf.mxu0  ;;  %v9921_v25 = vpop.eup %9920  ;;  %9940 = vrcp.f32 %v5838_v56  ;;  %v5839_v27 = vadd.f32 1.0, %v9919_v47  ;;  %v5658_v44 = vmul.f32 1.442695, %v7994_v26  ;;  %v5660_v3 = vmul.f32 1.442695, %v7995_v62 }
 0xc53   : > { %v9923_v60 = vpop.eup %9922  ;;  %9942 = vrcp.f32 %v5837_v14  ;;  %v5840_v31 = vadd.f32 1.0, %v9921_v25  ;;  %v5010_v17 = vpop.f32.mrf.mxu1  ;;  %v7998_v46 = vmul.f32 -1.702, %v13582_v48  ;;  %v13592_v8 = vadd.f32 %v5199_v16, %v13165_v55 }
 0xc54   : > { %v9925_v6 = vpop.eup %9924  ;;  %9944 = vrcp.f32 %v5839_v27  ;;  %v5842_v20 = vadd.f32 1.0, %v9923_v60  ;;  %v5203_v35 = vpop.f32.mrf.mxu0  ;;  %v5664_v23 = vmul.f32 1.442695, %v7997_v42  ;;  %v7999_v13 = vmul.f32 -1.702, %v13585_v30 }
 0xc55   : > { %v9927_v51 = vpop.eup %9926  ;;  %9946 = vrcp.f32 %v5840_v31  ;;  %v5841_v22 = vadd.f32 1.0, %v9925_v6  ;;  %v5012_v12 = vpop.f32.mrf.mxu1  ;;  %v5662_v34 = vmul.f32 1.442695, %v7996_v9  ;;  %v8001_v53 = vmul.f32 -1.702, %v13592_v8 }
 0xc56   : > { %9948 = vrcp.f32 %v5842_v20  ;;  %v5843_v28 = vadd.f32 1.0, %v9927_v51  ;;  %v13597_v41 = vadd.f32 %v5008_v38, %v13171_v7  ;;  %v13601_v26 = vadd.f32 %v5201_v57, %v13173_v15  ;;  %v5205_v16 = vpop.f32.mrf.mxu0 }
 0xc57   : > { %v9929_v54 = vpop.eup %9928  ;;  %9950 = vrcp.f32 %v5841_v22  ;;  %v13604_v18 = vadd.f32 %v5010_v17, %v13161_v49  ;;  %v5666_v56 = vmul.f32 1.442695, %v7998_v46  ;;  %v13608_v62 = vadd.f32 %v5203_v35, %v13165_v55  ;;  %v5016_v42 = vpop.f32.mrf.mxu1 }
 0xc58   : > { %v9931_v1 = vpop.eup %9930  ;;  %v6217_v52 = vmul.f32 %v9929_v54, %v13449_v45  ;;  %9952 = vrcp.f32 %v5843_v28  ;;  %v6318_v47 = vpack.c.bf16 %v13574_v4, %v13558_v37  ;;  %v5668_v14 = vmul.f32 1.442695, %v7999_v13  ;;  %v5209_v4 = vpop.f32.mrf.mxu0 }
 0xc59   : > { %v6219_v59 = vmul.f32 %v9931_v1, %v13471_v0  ;;  %9954 = vpow2.f32 %v5658_v44  ;;  %v5672_v25 = vmul.f32 1.442695, %v8001_v53  ;;  %v8000_v0 = vmul.f32 -1.702, %v13597_v41  ;;  %v5018_v35 = vpop.f32.mrf.mxu1 }
 0xc5a   : > { %v6317_v45 = vpack.c.bf16 %v6217_v52, %v13564_v50  ;;  %9956 = vpow2.f32 %v5660_v3  ;;  %v8002_v31 = vmul.f32 -1.702, %v13601_v26  ;;  %v8003_v37 = vmul.f32 -1.702, %v13604_v18 }
 0xc5b   : > { %v9933_v38 = vpop.eup %9932  ;;  %v6319_v57 = vpack.c.bf16 %v6219_v59, %v13567_v10  ;;  %9958 = vpow2.f32 %v5664_v23  ;;  %v8005_v10 = vmul.f32 -1.702, %v13608_v62  ;;  %v13619_v17 = vadd.f32 %v5012_v12, %v13171_v7  ;;  %v5211_v12 = vpop.f32.mrf.mxu0 }
 0xc5c   : > { %v9935_v27 = vpop.eup %9934  ;;  %6692 = vmatprep.mubr.bf16.mxu1 %v6317_v45  ;;  %v5844_v60 = vadd.f32 1.0, %v9933_v38  ;;  %9960 = vpow2.f32 %v5662_v34  ;;  %v13622_v44 = vadd.f32 %v5205_v16, %v13173_v15  ;;  %v13625_v3 = vadd.f32 %v5016_v42, %v13161_v49 }
 0xc5d   : > { %v9937_v50 = vpop.eup %9936  ;;  %6853 = vmatprep.mubr.bf16.mxu0 %v6319_v57  ;;  %6693 = vmatmul.mubr.bf16.gmra.mxu1 %v6316_v39  ;;  %v5846_v9 = vadd.f32 1.0, %v9935_v27  ;;  %9962 = vpow2.f32 %v5666_v56  ;;  %v5670_v39 = vmul.f32 1.442695, %v8000_v0  ;;  %v8004_v22 = vmul.f32 -1.702, %v13619_v17  ;;  %v5020_v56 = vpop.f32.mrf.mxu1 }
 0xc5e   : > { %v9939_v6 = vpop.eup %9938  ;;  %6854 = vmatmul.mubr.bf16.gmra.mxu0 %v6318_v47  ;;  %9964 = vrcp.f32 %v5844_v60  ;;  %v5845_v20 = vadd.f32 1.0, %v9937_v50  ;;  %v5674_v28 = vmul.f32 1.442695, %v8002_v31  ;;  %v8006_v23 = vmul.f32 -1.702, %v13622_v44 }
 0xc5f   : > { %v9941_v51 = vpop.eup %9940  ;;  %9966 = vrcp.f32 %v5846_v9  ;;  %v13630_v13 = vadd.f32 %v5209_v4, %v13165_v55  ;;  %v5676_v34 = vmul.f32 1.442695, %v8003_v37  ;;  %v5680_v53 = vmul.f32 1.442695, %v8005_v10  ;;  %v5022_v50 = vpop.f32.mrf.mxu1 }
 0xc60   : > { %v9943_v46 = vpop.eup %9942  ;;  %9968 = vrcp.f32 %v5845_v20  ;;  %v6220_v52 = vmul.f32 %v9939_v6, %v13477_v24  ;;  %v6222_v16 = vmul.f32 %v9941_v51, %v13482_v21  ;;  %v8007_v59 = vmul.f32 -1.702, %v13625_v3  ;;  %v5213_v21 = vpop.f32.mrf.mxu0 }
 0xc61   : > { %v9945_v54 = vpop.eup %9944  ;;  %9970 = vpow2.f32 %v5668_v14  ;;  %v6221_v45 = vmul.f32 %v9943_v46, %v13495_v58  ;;  %v5678_v38 = vmul.f32 1.442695, %v8004_v22  ;;  %v5682_v14 = vmul.f32 1.442695, %v8006_v23 }
 0xc62   : > { %v9947_v1 = vpop.eup %9946  ;;  %9972 = vpow2.f32 %v5672_v25  ;;  %v8009_v0 = vmul.f32 -1.702, %v13630_v13  ;;  %v13639_v24 = vadd.f32 %v5018_v35, %v13171_v7  ;;  %v6223_v27 = vmul.f32 %v9945_v54, %v13504_v33 }
 0xc63   : > { %v9949_v47 = vpop.eup %9948  ;;  %v6224_v42 = vmul.f32 %v9947_v1, %v13510_v19  ;;  %9974 = vpow2.f32 %v5670_v39  ;;  %v13646_v37 = vadd.f32 %v5211_v12, %v13173_v15  ;;  %v13649_v4 = vadd.f32 %v5020_v56, %v13161_v49  ;;  %v5026_v12 = vpop.f32.mrf.mxu1 }
 0xc64   : > { %v9951_v57 = vpop.eup %9950  ;;  %9976 = vpow2.f32 %v5674_v28  ;;  %v6226_v60 = vmul.f32 %v9949_v47, %v13513_v2  ;;  %v8008_v35 = vmul.f32 -1.702, %v13639_v24  ;;  %v5684_v23 = vmul.f32 1.442695, %v8007_v59 }
 0xc65   : > { %v9953_v25 = vpop.eup %9952  ;;  %v6225_v58 = vmul.f32 %v9951_v57, %v13516_v63  ;;  %9978 = vpow2.f32 %v5676_v34  ;;  %v6320_v10 = vpack.c.bf16 %v6224_v42, %v6220_v52  ;;  %v8010_v1 = vmul.f32 -1.702, %v13646_v37 }
 0xc66   : > { %v9955_v19 = vpop.eup %9954  ;;  %v6227_v31 = vmul.f32 %v9953_v25, %v13520_v40  ;;  %9980 = vpow2.f32 %v5680_v53  ;;  %v5215_v40 = vpop.f32.mrf.mxu0  ;;  %v6322_v39 = vpack.c.bf16 %v6226_v60, %v6222_v16  ;;  %v5688_v53 = vmul.f32 1.442695, %v8009_v0 }
 0xc67   : > { %v9957_v9 = vpop.eup %9956  ;;  %v6321_v6 = vpack.c.bf16 %v6225_v58, %v6221_v45  ;;  %v5847_v33 = vadd.f32 1.0, %v9955_v19  ;;  %9982 = vpow2.f32 %v5678_v38  ;;  %v5686_v16 = vmul.f32 1.442695, %v8008_v35 }
 0xc68   : > { %v9959_v2 = vpop.eup %9958  ;;  %v6323_v20 = vpack.c.bf16 %v6227_v31, %v6223_v27  ;;  %v5848_v63 = vadd.f32 1.0, %v9957_v9  ;;  %9984 = vpow2.f32 %v5682_v14  ;;  %v8011_v56 = vmul.f32 -1.702, %v13649_v4  ;;  %v5219_v45 = vpop.f32.mrf.mxu0 }
 0xc69   : > { %v9961_v51 = vpop.eup %9960  ;;  %6700 = vmatprep.mubr.bf16.mxu1 %v6321_v6  ;;  %9986 = vrcp.f32 %v5847_v33  ;;  %v5850_v22 = vadd.f32 1.0, %v9959_v2  ;;  %v13655_v47 = vadd.f32 %v5213_v21, %v13165_v55  ;;  %v13658_v38 = vadd.f32 %v5022_v50, %v13171_v7  ;;  %v5028_v14 = vpop.f32.mrf.mxu1 }
 0xc6a   : > { %v9963_v46 = vpop.eup %9962  ;;  %6861 = vmatprep.mubr.bf16.mxu0 %v6323_v20  ;;  %6701 = vmatmul.mubr.bf16.gmra.mxu1 %v6320_v10  ;;  %9988 = vrcp.f32 %v5848_v63  ;;  %v5849_v28 = vadd.f32 1.0, %v9961_v51  ;;  %v13661_v57 = vadd.f32 %v5215_v40, %v13173_v15  ;;  %v5690_v27 = vmul.f32 1.442695, %v8010_v1  ;;  %v5221_v9 = vpop.f32.mrf.mxu0 }
 0xc6b   : > { %v9965_v54 = vpop.eup %9964  ;;  %6862 = vmatmul.mubr.bf16.gmra.mxu0 %v6322_v39  ;;  %9990 = vrcp.f32 %v5850_v22  ;;  %v5851_v34 = vadd.f32 1.0, %v9963_v46  ;;  %v13664_v60 = vadd.f32 %v5026_v12, %v13161_v49  ;;  %v5692_v19 = vmul.f32 1.442695, %v8011_v56  ;;  %v5030_v40 = vpop.f32.mrf.mxu1 }
 0xc6c   : > { %v9967_v52 = vpop.eup %9966  ;;  %9992 = vrcp.f32 %v5849_v28  ;;  %v8013_v31 = vmul.f32 -1.702, %v13655_v47  ;;  %v13668_v10 = vmul.f32 %v9965_v54, %v13537_v29  ;;  %v13671_v33 = vadd.f32 %v5219_v45, %v13165_v55  ;;  %v5223_v54 = vpop.f32.mrf.mxu0 }
 0xc6d   : > { %v9969_v42 = vpop.eup %9968  ;;  %9994 = vrcp.f32 %v5851_v34  ;;  %v8012_v63 = vmul.f32 -1.702, %v13658_v38  ;;  %v8014_v35 = vmul.f32 -1.702, %v13661_v57  ;;  %v13676_v39 = vmul.f32 %v9967_v52, %v13540_v32 }
 0xc6e   : > { %v9971_v59 = vpop.eup %9970  ;;  %9996 = vpow2.f32 %v5684_v23  ;;  %v8015_v22 = vmul.f32 -1.702, %v13664_v60  ;;  %v13680_v23 = vadd.f32 %v5028_v14, %v13171_v7  ;;  %v13683_v12 = vadd.f32 %v5221_v9, %v13173_v15 }
 0xc6f   : > { %v9973_v0 = vpop.eup %9972  ;;  %v5852_v25 = vadd.f32 1.0, %v9971_v59  ;;  %9998 = vpow2.f32 %v5688_v53  ;;  %v8017_v32 = vmul.f32 -1.702, %v13671_v33  ;;  %v13687_v1 = vadd.f32 %v5030_v40, %v13161_v49 }
 0xc70   : > { %v9975_v21 = vpop.eup %9974  ;;  %v5854_v58 = vadd.f32 1.0, %v9973_v0  ;;  %10000 = vpow2.f32 %v5686_v16  ;;  %v6229_v16 = vmul.f32 %v9969_v42, %v13544_v36  ;;  %v5696_v45 = vmul.f32 1.442695, %v8013_v31 }
 0xc71   : > { %v9977_v50 = vpop.eup %9976  ;;  %10002 = vrcp.f32 %v5852_v25  ;;  %v5853_v6 = vadd.f32 1.0, %v9975_v21  ;;  %v5694_v14 = vmul.f32 1.442695, %v8012_v63  ;;  %v5698_v0 = vmul.f32 1.442695, %v8014_v35  ;;  %v5032_v21 = vpop.f32.mrf.mxu1 }
 0xc72   : > { %v9979_v2 = vpop.eup %9978  ;;  %10004 = vrcp.f32 %v5854_v58  ;;  %v5855_v20 = vadd.f32 1.0, %v9977_v50  ;;  %v5700_v25 = vmul.f32 1.442695, %v8015_v22  ;;  %v8016_v9 = vmul.f32 -1.702, %v13680_v23 }
 0xc73   : > { %v9981_v51 = vpop.eup %9980  ;;  %10006 = vrcp.f32 %v5853_v6  ;;  %v5856_v29 = vadd.f32 1.0, %v9979_v2  ;;  %v8018_v50 = vmul.f32 -1.702, %v13683_v12  ;;  %v13693_v6 = vadd.f32 %v5223_v54, %v13165_v55  ;;  %v5225_v2 = vpop.f32.mrf.mxu0 }
 0xc74   : > { %v9983_v46 = vpop.eup %9982  ;;  %10008 = vrcp.f32 %v5855_v20  ;;  %v5858_v28 = vadd.f32 1.0, %v9981_v51  ;;  %v5704_v31 = vmul.f32 1.442695, %v8017_v32  ;;  %v8019_v20 = vmul.f32 -1.702, %v13687_v1 }
 0xc75   : > { %v9985_v34 = vpop.eup %9984  ;;  %10010 = vrcp.f32 %v5856_v29  ;;  %v5857_v53 = vadd.f32 1.0, %v9983_v46  ;;  %v13700_v51 = vadd.f32 %v5032_v21, %v13171_v7 }
 0xc76   : > { %v9987_v52 = vpop.eup %9986  ;;  %10012 = vrcp.f32 %v5858_v28  ;;  %v5859_v56 = vadd.f32 1.0, %v9985_v34 }
 0xc77   : > { %v9989_v59 = vpop.eup %9988  ;;  %10014 = vrcp.f32 %v5857_v53  ;;  %v6231_v22 = vmul.f32 %v9987_v52, %v13548_v5  ;;  %v8020_v52 = vmul.f32 -1.702, %v13700_v51 }
 0xc78   : > { %v9991_v58 = vpop.eup %9990  ;;  %10016 = vrcp.f32 %v5859_v56  ;;  %v6232_v42 = vmul.f32 %v9989_v59, %v13552_v43  ;;  %v13705_v43 = vadd.f32 %v5225_v2, %v13173_v15 }
 0xc79   : > { %v9993_v36 = vpop.eup %9992  ;;  %10018 = vpow2.f32 %v5690_v27  ;;  %v6234_v35 = vmul.f32 %v9991_v58, %v13561_v11  ;;  %v8021_v11 = vmul.f32 -1.702, %v13693_v6  ;;  %v5710_v58 = vmul.f32 1.442695, %v8020_v52 }
 0xc7a   : > { %v9995_v63 = vpop.eup %9994  ;;  %v6233_v40 = vmul.f32 %v9993_v36, %v13579_v61  ;;  %10020 = vpow2.f32 %v5692_v19  ;;  %v6324_v19 = vpack.c.bf16 %v6232_v42, %v13668_v10  ;;  %v8022_v59 = vmul.f32 -1.702, %v13705_v43 }
 0xc7b   : > { %v9997_v29 = vpop.eup %9996  ;;  %v6235_v46 = vmul.f32 %v9995_v63, %v13582_v48  ;;  %10022 = vpow2.f32 %v5696_v45  ;;  %v6326_v5 = vpack.c.bf16 %v6234_v35, %v13676_v39  ;;  %v5702_v45 = vmul.f32 1.442695, %v8016_v9 }
 0xc7c   : > { %v9999_v27 = vpop.eup %9998  ;;  %v5860_v28 = vadd.f32 1.0, %v9997_v29  ;;  %10024 = vpow2.f32 %v5694_v14  ;;  %v6325_v54 = vpack.c.bf16 %v6233_v40, %v6229_v16  ;;  %v5706_v10 = vmul.f32 1.442695, %v8018_v50 }
 0xc7d   : > { %v10001_v61 = vpop.eup %10000  ;;  %v5862_v34 = vadd.f32 1.0, %v9999_v27  ;;  %10026 = vpow2.f32 %v5698_v0  ;;  %v6327_v53 = vpack.c.bf16 %v6235_v46, %v6231_v22  ;;  %v5708_v0 = vmul.f32 1.442695, %v8019_v20 }
 0xc7e   : > { %v10003_v32 = vpop.eup %10002  ;;  %10028 = vrcp.f32 %v5860_v28  ;;  %v5861_v48 = vadd.f32 1.0, %v10001_v61  ;;  %6708 = vmatprep.mubr.bf16.mxu1 %v6325_v54  ;;  %v5712_v21 = vmul.f32 1.442695, %v8021_v11  ;;  %v5714_v42 = vmul.f32 1.442695, %v8022_v59 }
 0xc7f   : > { %v10005_v56 = vpop.eup %10004  ;;  %10030 = vrcp.f32 %v5862_v34  ;;  %6869 = vmatprep.mubr.bf16.mxu0 %v6327_v53  ;;  %6709 = vmatmul.mubr.bf16.gmra.mxu1 %v6324_v19  ;;  %v6236_v36 = vmul.f32 %v10003_v32, %v13585_v30 }
 0xc80   : > { %v10007_v16 = vpop.eup %10006  ;;  %10032 = vrcp.f32 %v5861_v48  ;;  %6870 = vmatmul.mubr.bf16.gmra.mxu0 %v6326_v5  ;;  %v6238_v35 = vmul.f32 %v10005_v56, %v13592_v8 }
 0xc81   : > { %v10009_v14 = vpop.eup %10008  ;;  %10034 = vpow2.f32 %v5700_v25  ;;  %v6237_v50 = vmul.f32 %v10007_v16, %v13597_v41 }
 0xc82   : > { %v10011_v39 = vpop.eup %10010  ;;  %10036 = vpow2.f32 %v5704_v31  ;;  %v6239_v31 = vmul.f32 %v10009_v14, %v13601_v26 }
 0xc83   : > { %v10013_v2 = vpop.eup %10012  ;;  %v6240_v9 = vmul.f32 %v10011_v39, %v13604_v18  ;;  %10038 = vpow2.f32 %v5702_v45 }
 0xc84   : > { %v10015_v63 = vpop.eup %10014  ;;  %v6242_v40 = vmul.f32 %v10013_v2, %v13608_v62  ;;  %10040 = vpow2.f32 %v5706_v10 }
 0xc85   : > { %v10017_v25 = vpop.eup %10016  ;;  %v6328_v20 = vpack.c.bf16 %v6240_v9, %v6236_v36  ;;  %v6241_v29 = vmul.f32 %v10015_v63, %v13619_v17  ;;  %10042 = vpow2.f32 %v5708_v0  ;;  %v5036_v30 = vpop.f32.mrf.mxu1 }
 0xc86   : > { %v5229_v22 = vpop.f32.mrf.mxu0  ;;  %v10019_v18 = vpop.eup %10018  ;;  %v6330_v46 = vpack.c.bf16 %v6242_v40, %v6238_v35  ;;  %v6243_v27 = vmul.f32 %v10017_v25, %v13622_v44  ;;  %10044 = vpow2.f32 %v5712_v21  ;;  %v13721_v8 = vadd.f32 %v5036_v30, %v13161_v49 }
 0xc87   : > { %v10021_v41 = vpop.eup %10020  ;;  %v5863_v62 = vadd.f32 1.0, %v10019_v18  ;;  %10046 = vpow2.f32 %v5710_v58  ;;  %v6329_v28 = vpack.c.bf16 %v6241_v29, %v6237_v50  ;;  %v13724_v26 = vadd.f32 %v5229_v22, %v13165_v55  ;;  %v5038_v11 = vpop.f32.mrf.mxu1 }
 0xc88   : > { %v5231_v17 = vpop.f32.mrf.mxu0  ;;  %v10023_v54 = vpop.eup %10022  ;;  %v5864_v61 = vadd.f32 1.0, %v10021_v41  ;;  %10048 = vpow2.f32 %v5714_v42  ;;  %v6331_v19 = vpack.c.bf16 %v6243_v27, %v6239_v31  ;;  %v8023_v34 = vmul.f32 -1.702, %v13721_v8 }
 0xc89   : > { %v10025_v44 = vpop.eup %10024  ;;  %10050 = vrcp.f32 %v5863_v62  ;;  %v5866_v53 = vadd.f32 1.0, %v10023_v54  ;;  %6716 = vmatprep.mubr.bf16.mxu1 %v6329_v28  ;;  %v8025_v32 = vmul.f32 -1.702, %v13724_v26  ;;  %v13729_v5 = vadd.f32 %v5038_v11, %v13171_v7  ;;  %v5040_v48 = vpop.f32.mrf.mxu1 }
 0xc8a   : > { %v5233_v52 = vpop.f32.mrf.mxu0  ;;  %v10027_v56 = vpop.eup %10026  ;;  %10052 = vrcp.f32 %v5864_v61  ;;  %v5865_v45 = vadd.f32 1.0, %v10025_v44  ;;  %6877 = vmatprep.mubr.bf16.mxu0 %v6331_v19  ;;  %6717 = vmatmul.mubr.bf16.gmra.mxu1 %v6328_v20  ;;  %v5716_v59 = vmul.f32 1.442695, %v8023_v34  ;;  %v13733_v36 = vadd.f32 %v5231_v17, %v13173_v15 }
 0xc8b   : > { %v10029_v16 = vpop.eup %10028  ;;  %10054 = vrcp.f32 %v5866_v53  ;;  %v5867_v10 = vadd.f32 1.0, %v10027_v56  ;;  %6878 = vmatmul.mubr.bf16.gmra.mxu0 %v6330_v46  ;;  %v5720_v14 = vmul.f32 1.442695, %v8025_v32  ;;  %v8024_v0 = vmul.f32 -1.702, %v13729_v5  ;;  %v5042_v21 = vpop.f32.mrf.mxu1 }
 0xc8c   : > { %v10031_v39 = vpop.eup %10030  ;;  %10056 = vrcp.f32 %v5865_v45  ;;  %v13736_v9 = vadd.f32 %v5040_v48, %v13161_v49  ;;  %v5235_v42 = vpop.f32.mrf.mxu0  ;;  %v13739_v35 = vadd.f32 %v5233_v52, %v13165_v55  ;;  %v13742_v25 = vadd.f32 %v5042_v21, %v13171_v7 }
 0xc8d   : > { %v10033_v58 = vpop.eup %10032  ;;  %10058 = vrcp.f32 %v5867_v10  ;;  %v5718_v2 = vmul.f32 1.442695, %v8024_v0  ;;  %v13745_v29 = vadd.f32 %v5235_v42, %v13173_v15  ;;  %v8026_v18 = vmul.f32 -1.702, %v13733_v36 }
 0xc8e   : > { %v10035_v63 = vpop.eup %10034  ;;  %10060 = vpow2.f32 %v5716_v59  ;;  %v8027_v46 = vmul.f32 -1.702, %v13736_v9  ;;  %v13750_v41 = vmul.f32 %v10029_v16, %v13625_v3  ;;  %v8029_v28 = vmul.f32 -1.702, %v13739_v35 }
 0xc8f   : > { %v10037_v50 = vpop.eup %10036  ;;  %v5868_v40 = vadd.f32 1.0, %v10035_v63  ;;  %10062 = vpow2.f32 %v5720_v14  ;;  %v8028_v54 = vmul.f32 -1.702, %v13742_v25  ;;  %v8030_v61 = vmul.f32 -1.702, %v13745_v29 }
 0xc90   : > { %v10039_v31 = vpop.eup %10038  ;;  %v5870_v20 = vadd.f32 1.0, %v10037_v50  ;;  %10064 = vpow2.f32 %v5718_v2  ;;  %v13756_v34 = vmul.f32 %v10031_v39, %v13630_v13  ;;  %v6245_v44 = vmul.f32 %v10033_v58, %v13639_v24 }
 0xc91   : > { %v10041_v30 = vpop.eup %10040  ;;  %10066 = vrcp.f32 %v5868_v40  ;;  %v5869_v22 = vadd.f32 1.0, %v10039_v31  ;;  %v5722_v48 = vmul.f32 1.442695, %v8026_v18  ;;  %v5724_v52 = vmul.f32 1.442695, %v8027_v46 }
 0xc92   : > { %v10043_v27 = vpop.eup %10042  ;;  %10068 = vrcp.f32 %v5870_v20  ;;  %v5871_v62 = vadd.f32 1.0, %v10041_v30  ;;  %v5728_v24 = vmul.f32 1.442695, %v8029_v28  ;;  %v5726_v0 = vmul.f32 1.442695, %v8028_v54 }
 0xc93   : > { %v10045_v11 = vpop.eup %10044  ;;  %10070 = vrcp.f32 %v5869_v22  ;;  %v5872_v17 = vadd.f32 1.0, %v10043_v27  ;;  %v5730_v39 = vmul.f32 1.442695, %v8030_v61 }
 0xc94   : > { %v10047_v19 = vpop.eup %10046  ;;  %10072 = vrcp.f32 %v5871_v62  ;;  %v5874_v3 = vadd.f32 1.0, %v10045_v11 }
 0xc95   : > { %v10049_v53 = vpop.eup %10048  ;;  %10074 = vrcp.f32 %v5872_v17  ;;  %v5873_v32 = vadd.f32 1.0, %v10047_v19  ;;  %v5046_v56 = vpop.f32.mrf.mxu1 }
 0xc96   : > { %v5239_v45 = vpop.f32.mrf.mxu0  ;;  %v10051_v59 = vpop.eup %10050  ;;  %10076 = vrcp.f32 %v5874_v3  ;;  %v5875_v16 = vadd.f32 1.0, %v10049_v53  ;;  %v13760_v10 = vadd.f32 %v5046_v56, %v13161_v49 }
 0xc97   : > { %v13763_v13 = vadd.f32 %v5239_v45, %v13165_v55  ;;  %v10053_v14 = vpop.eup %10052  ;;  %10078 = vrcp.f32 %v5873_v32  ;;  %v5048_v21 = vpop.f32.mrf.mxu1  ;;  %v6247_v42 = vmul.f32 %v10051_v59, %v13646_v37 }
 0xc98   : > { %v5241_v58 = vpop.f32.mrf.mxu0  ;;  %v10055_v2 = vpop.eup %10054  ;;  %v6248_v63 = vmul.f32 %v10053_v14, %v13649_v4  ;;  %10080 = vrcp.f32 %v5875_v16  ;;  %v8031_v50 = vmul.f32 -1.702, %v13760_v10  ;;  %v13770_v20 = vadd.f32 %v5048_v21, %v13171_v7 }
 0xc99   : > { %v10057_v40 = vpop.eup %10056  ;;  %v6250_v31 = vmul.f32 %v10055_v2, %v13655_v47  ;;  %10082 = vpow2.f32 %v5722_v48  ;;  %v13773_v30 = vadd.f32 %v5241_v58, %v13173_v15  ;;  %v5050_v22 = vpop.f32.mrf.mxu1  ;;  %v8033_v4 = vmul.f32 -1.702, %v13763_v13 }
 0xc9a   : > { %v10059_v18 = vpop.eup %10058  ;;  %v6332_v46 = vpack.c.bf16 %v6248_v63, %v13750_v41  ;;  %v6249_v37 = vmul.f32 %v10057_v40, %v13658_v38  ;;  %10084 = vpow2.f32 %v5724_v52  ;;  %v5243_v27 = vpop.f32.mrf.mxu0  ;;  %v5732_v11 = vmul.f32 1.442695, %v8031_v50 }
 0xc9b   : > { %v10061_v62 = vpop.eup %10060  ;;  %v6334_v47 = vpack.c.bf16 %v6250_v31, %v13756_v34  ;;  %v6251_v28 = vmul.f32 %v10059_v18, %v13661_v57  ;;  %10086 = vpow2.f32 %v5728_v24  ;;  %v8032_v19 = vmul.f32 -1.702, %v13770_v20  ;;  %v5052_v32 = vpop.f32.mrf.mxu1 }
 0xc9c   : > { %v10063_v17 = vpop.eup %10062  ;;  %v5876_v54 = vadd.f32 1.0, %v10061_v62  ;;  %v6333_v61 = vpack.c.bf16 %v6249_v37, %v6245_v44  ;;  %10088 = vpow2.f32 %v5726_v0  ;;  %v8034_v53 = vmul.f32 -1.702, %v13773_v30  ;;  %v5245_v56 = vpop.f32.mrf.mxu0 }
 0xc9d   : > { %v10065_v41 = vpop.eup %10064  ;;  %v5878_v3 = vadd.f32 1.0, %v10063_v17  ;;  %v6335_v38 = vpack.c.bf16 %v6251_v28, %v6247_v42  ;;  %10090 = vpow2.f32 %v5730_v39  ;;  %v5736_v57 = vmul.f32 1.442695, %v8033_v4 }
 0xc9e   : > { %v10067_v48 = vpop.eup %10066  ;;  %10092 = vrcp.f32 %v5876_v54  ;;  %6724 = vmatprep.mubr.bf16.mxu1 %v6333_v61  ;;  %v5877_v34 = vadd.f32 1.0, %v10065_v41  ;;  %v13783_v52 = vadd.f32 %v5050_v22, %v13161_v49  ;;  %v5734_v59 = vmul.f32 1.442695, %v8032_v19 }
 0xc9f   : > { %v10069_v44 = vpop.eup %10068  ;;  %v13786_v45 = vmul.f32 %v10067_v48, %v13664_v60  ;;  %10094 = vrcp.f32 %v5878_v3  ;;  %6885 = vmatprep.mubr.bf16.mxu0 %v6335_v38  ;;  %6725 = vmatmul.mubr.bf16.gmra.mxu1 %v6332_v46  ;;  %v13789_v16 = vadd.f32 %v5243_v27, %v13165_v55  ;;  %v5738_v24 = vmul.f32 1.442695, %v8034_v53 }
 0xca0   : > { %v10071_v14 = vpop.eup %10070  ;;  %10096 = vrcp.f32 %v5877_v34  ;;  %6886 = vmatmul.mubr.bf16.gmra.mxu0 %v6334_v47  ;;  %v8035_v0 = vmul.f32 -1.702, %v13783_v52  ;;  %v13793_v39 = vadd.f32 %v5052_v32, %v13171_v7  ;;  %v6254_v60 = vmul.f32 %v10069_v44, %v13671_v33 }
 0xca1   : > { %v10073_v21 = vpop.eup %10072  ;;  %10098 = vpow2.f32 %v5732_v11  ;;  %v8037_v58 = vmul.f32 -1.702, %v13789_v16  ;;  %v13798_v2 = vadd.f32 %v5245_v56, %v13173_v15  ;;  %v6253_v63 = vmul.f32 %v10071_v14, %v13680_v23 }
 0xca2   : > { %v10075_v42 = vpop.eup %10074  ;;  %10100 = vpow2.f32 %v5736_v57  ;;  %v5740_v50 = vmul.f32 1.442695, %v8035_v0  ;;  %v8036_v40 = vmul.f32 -1.702, %v13793_v39  ;;  %v6255_v37 = vmul.f32 %v10073_v21, %v13683_v12  ;;  %v5056_v11 = vpop.f32.mrf.mxu1 }
 0xca3   : > { %v10077_v31 = vpop.eup %10076  ;;  %v6256_v22 = vmul.f32 %v10075_v42, %v13687_v1  ;;  %10102 = vpow2.f32 %v5734_v59  ;;  %v5744_v18 = vmul.f32 1.442695, %v8037_v58  ;;  %v8038_v33 = vmul.f32 -1.702, %v13798_v2  ;;  %v5249_v1 = vpop.f32.mrf.mxu0 }
 0xca4   : > { %v10079_v46 = vpop.eup %10078  ;;  %v6258_v4 = vmul.f32 %v10077_v31, %v13693_v6  ;;  %10104 = vpow2.f32 %v5738_v24  ;;  %v5742_v27 = vmul.f32 1.442695, %v8036_v40  ;;  %v13810_v12 = vadd.f32 %v5056_v11, %v13161_v49 }
 0xca5   : > { %v10081_v62 = vpop.eup %10080  ;;  %v6336_v23 = vpack.c.bf16 %v6256_v22, %v13786_v45  ;;  %v6257_v47 = vmul.f32 %v10079_v46, %v13700_v51  ;;  %10106 = vpow2.f32 %v5740_v50  ;;  %v5746_v28 = vmul.f32 1.442695, %v8038_v33  ;;  %v5058_v51 = vpop.f32.mrf.mxu1 }
 0xca6   : > { %v10083_v17 = vpop.eup %10082  ;;  %v6338_v54 = vpack.c.bf16 %v6258_v4, %v6254_v60  ;;  %v6259_v61 = vmul.f32 %v10081_v62, %v13705_v43  ;;  %10108 = vpow2.f32 %v5744_v18  ;;  %v13813_v3 = vadd.f32 %v5249_v1, %v13165_v55  ;;  %v5251_v38 = vpop.f32.mrf.mxu0 }
 0xca7   : > { %v10085_v6 = vpop.eup %10084  ;;  %v5879_v19 = vadd.f32 1.0, %v10083_v17  ;;  %v6337_v41 = vpack.c.bf16 %v6257_v47, %v6253_v63  ;;  %10110 = vpow2.f32 %v5742_v27  ;;  %v8039_v34 = vmul.f32 -1.702, %v13810_v12  ;;  %v5060_v45 = vpop.f32.mrf.mxu1 }
 0xca8   : > { %v10087_v53 = vpop.eup %10086  ;;  %v5880_v32 = vadd.f32 1.0, %v10085_v6  ;;  %v6339_v48 = vpack.c.bf16 %v6259_v61, %v6255_v37  ;;  %10112 = vpow2.f32 %v5746_v28  ;;  %v8041_v56 = vmul.f32 -1.702, %v13813_v3  ;;  %v5253_v59 = vpop.f32.mrf.mxu0 }
 0xca9   : > { %v10089_v43 = vpop.eup %10088  ;;  %10114 = vrcp.f32 %v5879_v19  ;;  %v5882_v57 = vadd.f32 1.0, %v10087_v53  ;;  %6732 = vmatprep.mubr.bf16.mxu1 %v6337_v41  ;;  %v13818_v44 = vadd.f32 %v5058_v51, %v13171_v7  ;;  %v5748_v0 = vmul.f32 1.442695, %v8039_v34  ;;  %v5062_v50 = vpop.f32.mrf.mxu1 }
 0xcaa   : > { %v10091_v14 = vpop.eup %10090  ;;  %10116 = vrcp.f32 %v5880_v32  ;;  %v5881_v24 = vadd.f32 1.0, %v10089_v43  ;;  %6893 = vmatprep.mubr.bf16.mxu0 %v6339_v48  ;;  %6733 = vmatmul.mubr.bf16.gmra.mxu1 %v6336_v23  ;;  %v13821_v21 = vadd.f32 %v5251_v38, %v13173_v15  ;;  %v5752_v42 = vmul.f32 1.442695, %v8041_v56  ;;  %v5255_v40 = vpop.f32.mrf.mxu0 }
 0xcab   : > { %v10093_v60 = vpop.eup %10092  ;;  %10118 = vrcp.f32 %v5882_v57  ;;  %v5883_v58 = vadd.f32 1.0, %v10091_v14  ;;  %6894 = vmatmul.mubr.bf16.gmra.mxu0 %v6338_v54  ;;  %v8040_v63 = vmul.f32 -1.702, %v13818_v44  ;;  %v13826_v18 = vadd.f32 %v5060_v45, %v13161_v49  ;;  %v5066_v27 = vpop.f32.mrf.mxu1 }
 0xcac   : > { %v10095_v31 = vpop.eup %10094  ;;  %10120 = vrcp.f32 %v5881_v24  ;;  %v8042_v22 = vmul.f32 -1.702, %v13821_v21  ;;  %v13829_v46 = vmul.f32 %v10093_v60, %v13721_v8  ;;  %v13832_v4 = vadd.f32 %v5253_v59, %v13165_v55  ;;  %v5259_v62 = vpop.f32.mrf.mxu0 }
 0xcad   : > { %v10097_v33 = vpop.eup %10096  ;;  %10122 = vrcp.f32 %v5883_v58  ;;  %v5750_v37 = vmul.f32 1.442695, %v8040_v63  ;;  %v13835_v47 = vmul.f32 %v10095_v31, %v13724_v26  ;;  %v8043_v11 = vmul.f32 -1.702, %v13826_v18  ;;  %v5068_v61 = vpop.f32.mrf.mxu1 }
 0xcae   : > { %v10099_v23 = vpop.eup %10098  ;;  %v13838_v28 = vmul.f32 %v10097_v33, %v13729_v5  ;;  %10124 = vpow2.f32 %v5748_v0  ;;  %v8045_v17 = vmul.f32 -1.702, %v13832_v4  ;;  %v13843_v54 = vadd.f32 %v5062_v50, %v13171_v7  ;;  %v5261_v6 = vpop.f32.mrf.mxu0 }
 0xcaf   : > { %v10101_v1 = vpop.eup %10100  ;;  %v5884_v8 = vadd.f32 1.0, %v10099_v23  ;;  %10126 = vpow2.f32 %v5752_v42  ;;  %v5754_v26 = vmul.f32 1.442695, %v8042_v22  ;;  %v13846_v5 = vadd.f32 %v5255_v40, %v13173_v15  ;;  %v5070_v48 = vpop.f32.mrf.mxu1 }
 0xcb0   : > { %v10103_v19 = vpop.eup %10102  ;;  %v5886_v41 = vadd.f32 1.0, %v10101_v1  ;;  %10128 = vpow2.f32 %v5750_v37  ;;  %v5756_v53 = vmul.f32 1.442695, %v8043_v11  ;;  %v8044_v32 = vmul.f32 -1.702, %v13843_v54  ;;  %v5263_v34 = vpop.f32.mrf.mxu0 }
 0xcb1   : > { %v10105_v51 = vpop.eup %10104  ;;  %10130 = vrcp.f32 %v5884_v8  ;;  %v5885_v38 = vadd.f32 1.0, %v10103_v19  ;;  %v8046_v56 = vmul.f32 -1.702, %v13846_v5  ;;  %v13851_v45 = vadd.f32 %v5066_v27, %v13161_v49  ;;  %v5072_v60 = vpop.f32.mrf.mxu1 }
 0xcb2   : > { %v10107_v43 = vpop.eup %10106  ;;  %10132 = vrcp.f32 %v5886_v41  ;;  %v5887_v57 = vadd.f32 1.0, %v10105_v51  ;;  %v5760_v24 = vmul.f32 1.442695, %v8045_v17  ;;  %v13854_v0 = vadd.f32 %v5259_v62, %v13165_v55  ;;  %v5265_v58 = vpop.f32.mrf.mxu0 }
 0xcb3   : > { %v10109_v59 = vpop.eup %10108  ;;  %10134 = vrcp.f32 %v5885_v38  ;;  %v5888_v14 = vadd.f32 1.0, %v10107_v43  ;;  %v5758_v50 = vmul.f32 1.442695, %v8044_v32  ;;  %v8047_v40 = vmul.f32 -1.702, %v13851_v45  ;;  %v8526_v27 = vpop.f32.mrf.mxu1 }
 0xcb4   : > { %14755 = vst [vmem:[#allocation20_spill] sm:$0xff] %v13854_v0  ;;  %v10111_v42 = vpop.eup %10110  ;;  %10136 = vrcp.f32 %v5887_v57  ;;  %v5890_v63 = vadd.f32 1.0, %v10109_v59  ;;  %v8049_v33 = vmul.f32 -1.702, %v13854_v0  ;;  %v13859_v37 = vadd.f32 %v5068_v61, %v13171_v7  ;;  %v13861_v23 = vpop.f32.mrf.mxu0 }
 0xcb5   : > { %v10113_v31 = vpop.eup %10112  ;;  %10138 = vrcp.f32 %v5888_v14  ;;  %v5889_v22 = vadd.f32 1.0, %v10111_v42  ;;  %v5762_v1 = vmul.f32 1.442695, %v8046_v56  ;;  %v13864_v8 = vadd.f32 %v5261_v6, %v13173_v15  ;;  %v8527_v61 = vpop.f32.mrf.mxu1 }
 0xcb6   : > { %v10115_v62 = vpop.eup %10114  ;;  %10140 = vrcp.f32 %v5890_v63  ;;  %v5891_v11 = vadd.f32 1.0, %v10113_v31  ;;  %v5764_v41 = vmul.f32 1.442695, %v8047_v40  ;;  %v8048_v51 = vmul.f32 -1.702, %v13859_v37  ;;  %v8639_v38 = vpop.f32.mrf.mxu0 }
 0xcb7   : > { %v10117_v17 = vpop.eup %10116  ;;  %v13867_v19 = vmul.f32 %v10115_v62, %v13733_v36  ;;  %10142 = vrcp.f32 %v5889_v22  ;;  %v8050_v57 = vmul.f32 -1.702, %v13864_v8  ;;  %v13875_v6 = vadd.f32 %v5070_v48, %v13161_v49  ;;  %v8529_v42 = vpop.f32.mrf.mxu1 }
 0xcb8   : > { %v10119_v32 = vpop.eup %10118  ;;  %v13871_v43 = vmul.f32 %v10117_v17, %v13736_v9  ;;  %10144 = vrcp.f32 %v5891_v11  ;;  %v5768_v59 = vmul.f32 1.442695, %v8049_v33  ;;  %v13881_v14 = vadd.f32 %v5263_v34, %v13165_v55  ;;  %v8641_v63 = vpop.f32.mrf.mxu0 }
 0xcb9   : > { %v10121_v56 = vpop.eup %10120  ;;  %v13878_v36 = vmul.f32 %v10119_v32, %v13739_v35  ;;  %10146 = vpow2.f32 %v5754_v26  ;;  %v5766_v49 = vmul.f32 1.442695, %v8048_v51  ;;  %v5770_v26 = vmul.f32 1.442695, %v8050_v57  ;;  %v8530_v55 = vpop.f32.mrf.mxu1 }
 0xcba   : > { %v10123_v40 = vpop.eup %10122  ;;  %v6265_v31 = vmul.f32 %v10121_v56, %v13742_v25  ;;  %10148 = vpow2.f32 %v5756_v53  ;;  %v8051_v22 = vmul.f32 -1.702, %v13875_v6  ;;  %v8642_v34 = vpop.f32.mrf.mxu0  ;;  %v8053_v11 = vmul.f32 -1.702, %v13881_v14 }
 0xcbb   : > { %v10125_v48 = vpop.eup %10124  ;;  %10150 = vpow2.f32 %v5760_v24  ;;  %v13891_v17 = vadd.f32 %v5072_v60, %v13171_v7  ;;  %v6267_v53 = vmul.f32 %v10123_v40, %v13745_v29  ;;  %v13895_v24 = vadd.f32 %v5265_v58, %v13173_v15  ;;  %v8532_v32 = vpop.f32.mrf.mxu1 }
 0xcbc   : > { %v10127_v33 = vpop.eup %10126  ;;  %v5892_v62 = vadd.f32 1.0, %v10125_v48  ;;  %10152 = vpow2.f32 %v5758_v50  ;;  %v5772_v48 = vmul.f32 1.442695, %v8051_v22  ;;  %v5776_v7 = vmul.f32 1.442695, %v8053_v11 }
 0xcbd   : > { %v10129_v25 = vpop.eup %10128  ;;  %v5894_v51 = vadd.f32 1.0, %v10127_v33  ;;  %10154 = vpow2.f32 %v5762_v1  ;;  %v8644_v57 = vpop.f32.mrf.mxu0  ;;  %v8052_v50 = vmul.f32 -1.702, %v13891_v17  ;;  %v8054_v60 = vmul.f32 -1.702, %v13895_v24 }
 0xcbe   : > { %v10131_v56 = vpop.eup %10130  ;;  %10156 = vrcp.f32 %v5892_v62  ;;  %v5893_v35 = vadd.f32 1.0, %v10129_v25  ;;  %v8528_v0 = vadd.f32 %v8527_v61, %v8526_v27  ;;  %v8533_v29 = vpop.f32.mrf.mxu1  ;;  %v8640_v22 = vadd.f32 %v8639_v38, %v13861_v23  ;;  %v13915_v23 = vld [vmem:[%s724_s19] ss:$0 sm:$0xff]  ;;  %s14791_s19 = sld [smem:[#allocation53_spill]] (!%p8088_p1) }
 0xcbf   : > { %v10133_v9 = vpop.eup %10132  ;;  %10158 = vrcp.f32 %v5894_v51  ;;  %v8645_v40 = vpop.f32.mrf.mxu0  ;;  %v13900_v15 = vmul.f32 %v10131_v56, %v13760_v10  ;;  %v5774_v11 = vmul.f32 1.442695, %v8052_v50  ;;  %v6341_v27 = vpack.c.bf16 %v6265_v31, %v13838_v28 }
 0xcc0   : > { %v10135_v1 = vpop.eup %10134  ;;  %v13903_v58 = vmul.f32 %v10133_v9, %v13763_v13  ;;  %10160 = vrcp.f32 %v5893_v35  ;;  %v5778_v25 = vmul.f32 1.442695, %v8054_v60  ;;  %v6808_v51 = vadd.f32 %v8640_v22, %v8528_v0  ;;  %v8535_v28 = vpop.f32.mrf.mxu1  ;;  %v14756_v9 = vld [vmem:[#allocation25_spill] sm:$0xff] }
 0xcc1   : > { %v10137_v33 = vpop.eup %10136  ;;  %v6269_v62 = vmul.f32 %v10135_v1, %v13770_v20  ;;  %10162 = vpow2.f32 %v5764_v41  ;;  %v6343_v10 = vpack.c.bf16 %v6267_v53, %v13867_v19  ;;  %6740 = vmatprep.mubr.bf16.mxu1 %v6341_v27  ;;  %v8531_v20 = vadd.f32 %v8530_v55, %v8529_v42  ;;  %v8647_v38 = vpop.f32.mrf.mxu0 }
 0xcc2   : > { %v10139_v61 = vpop.eup %10138  ;;  %10164 = vpow2.f32 %v5768_v59  ;;  %v8643_v41 = vadd.f32 %v8642_v34, %v8641_v63  ;;  %v6271_v0 = vmul.f32 %v10137_v33, %v13773_v30  ;;  %v14757_v31 = vpack.c.bf16 %v13871_v43, %v13829_v46  ;;  %v8536_v50 = vpop.f32.mrf.mxu1 }
 0xcc3   : > { %v10141_v56 = vpop.eup %10140  ;;  %v6272_v13 = vmul.f32 %v10139_v61, %v13783_v52  ;;  %10166 = vpow2.f32 %v5766_v49  ;;  %v6934_v52 = vadd.f32 %v6808_v51, %v14756_v9  ;;  %6901 = vmatprep.mubr.bf16.mxu0 %v6343_v10  ;;  %v14758_v63 = vpack.c.bf16 %v13878_v36, %v13835_v47  ;;  %v8648_v60 = vpop.f32.mrf.mxu0  ;;  %v14760_v61 = vld [vmem:[#allocation18_spill] sm:$0xff] }
 0xcc4   : > { %v10143_v59 = vpop.eup %10142  ;;  %v6274_v19 = vmul.f32 %v10141_v56, %v13789_v16  ;;  %10168 = vpow2.f32 %v5770_v26  ;;  %6741 = vmatmul.mubr.bf16.gmra.mxu1 %v14757_v31  ;;  %v6811_v42 = vadd.f32 %v8643_v41, %v8531_v20  ;;  %v8534_v30 = vadd.f32 %v8533_v29, %v8532_v32  ;;  %v14761_v41 = vld [vmem:[#allocation46_spill] sm:$0xff] }
 0xcc5   : > { %v10145_v49 = vpop.eup %10144  ;;  %v6273_v35 = vmul.f32 %v10143_v59, %v13793_v39  ;;  %10170 = vpow2.f32 %v5772_v48  ;;  %6902 = vmatmul.mubr.bf16.gmra.mxu0 %v14758_v63  ;;  %v6344_v16 = vpack.c.bf16 %v6272_v13, %v13900_v15  ;;  %v13930_v34 = vadd.f32 %v13915_v23, %v6934_v52  ;;  %v14759_v39 = vld [vmem:[#allocation43_spill] sm:$0xff] }
 0xcc6   : > { %v10147_v55 = vpop.eup %10146  ;;  %v6275_v26 = vmul.f32 %v10145_v49, %v13798_v2  ;;  %10172 = vpow2.f32 %v5776_v7  ;;  %v6935_v53 = vadd.f32 %v6811_v42, %v14759_v39  ;;  %v8646_v48 = vadd.f32 %v8645_v40, %v8644_v57 }
 0xcc7   : > { %v10149_v46 = vpop.eup %10148  ;;  %v5895_v43 = vadd.f32 1.0, %v10147_v55  ;;  %10174 = vpow2.f32 %v5774_v11  ;;  %7005 = vst [vmem:[#allocation2 + $0xb0] sm:$0xff] %v13930_v34  ;;  %v6345_v32 = vpack.c.bf16 %v6273_v35, %v6269_v62  ;;  %v8537_v57 = vadd.f32 %v8536_v50, %v8535_v28 }
 0xcc8   : > { %v10151_v47 = vpop.eup %10150  ;;  %v5896_v36 = vadd.f32 1.0, %v10149_v46  ;;  %10176 = vpow2.f32 %v5778_v25  ;;  %v6347_v29 = vpack.c.bf16 %v6275_v26, %v6271_v0  ;;  %v13935_v1 = vadd.f32 %v13915_v23, %v6935_v53 }
 0xcc9   : > { %v10153_v2 = vpop.eup %10152  ;;  %10178 = vrcp.f32 %v5895_v43  ;;  %v5898_v7 = vadd.f32 1.0, %v10151_v47  ;;  %v6816_v15 = vadd.f32 %v8646_v48, %v8534_v30  ;;  %6748 = vmatprep.mubr.bf16.mxu1 %v6345_v32  ;;  %v8649_v40 = vadd.f32 %v8648_v60, %v8647_v38 }
 0xcca   : > { %v10155_v22 = vpop.eup %10154  ;;  %10180 = vrcp.f32 %v5896_v36  ;;  %v5897_v33 = vadd.f32 1.0, %v10153_v2  ;;  %6909 = vmatprep.mubr.bf16.mxu0 %v6347_v29  ;;  %v6346_v27 = vpack.c.bf16 %v6274_v19, %v13903_v58  ;;  %7006 = vst [vmem:[#allocation2] sm:$0xff] %v13935_v1 }
 0xccb   : > { %v13937_v11 = vpop.eup %10156  ;;  %10182 = vrcp.f32 %v5898_v7  ;;  %v5899_v62 = vadd.f32 1.0, %v10155_v22  ;;  %v6936_v25 = vadd.f32 %v6816_v15, %v14760_v61  ;;  %v6819_v10 = vadd.f32 %v8649_v40, %v8537_v57 }
 0xccc   : > { %v13942_v51 = vpop.eup %10158  ;;  %10184 = vrcp.f32 %v5897_v33  ;;  %6749 = vmatmul.mubr.bf16.gmra.mxu1 %v6344_v16  ;;  %v14762_v33 = vld [vmem:[#allocation44_spill] sm:$0xff] }
 0xccd   : > { %v10161_v56 = vpop.eup %10160  ;;  %10186 = vrcp.f32 %v5899_v62  ;;  %v13945_v13 = vadd.f32 %v13915_v23, %v6936_v25  ;;  %6910 = vmatmul.mubr.bf16.gmra.mxu0 %v6346_v27  ;;  %v6937_v58 = vadd.f32 %v6819_v10, %v14761_v41 }
 0xcce   : > { %v10163_v20 = vpop.eup %10162  ;;  %v6277_v62 = vmul.f32 %v10161_v56, %v13818_v44  ;;  %v6278_v44 = vmul.f32 %v13942_v51, %v13813_v3 }
 0xccf   : > { %v10165_v28 = vpop.eup %10164  ;;  %v5900_v38 = vadd.f32 1.0, %v10163_v20  ;;  %7007 = vst [vmem:[#allocation2 + $0xd8] sm:$0xff] %v13945_v13  ;;  %v13950_v19 = vadd.f32 %v13915_v23, %v6937_v58 }
 0xcd0   : > { %v10167_v59 = vpop.eup %10166  ;;  %v5902_v0 = vadd.f32 1.0, %v10165_v28  ;;  %v8538_v9 = vpop.f32.mrf.mxu1  ;;  %v6276_v28 = vmul.f32 %v13937_v11, %v13810_v12 }
 0xcd1   : > { %v10169_v52 = vpop.eup %10168  ;;  %10188 = vrcp.f32 %v5900_v38  ;;  %v5901_v31 = vadd.f32 1.0, %v10167_v59  ;;  %v8650_v49 = vpop.f32.mrf.mxu0  ;;  %7008 = vst [vmem:[#allocation2 + $0x18] sm:$0xff] %v13950_v19 }
 0xcd2   : > { %v10171_v35 = vpop.eup %10170  ;;  %10190 = vrcp.f32 %v5902_v0  ;;  %v5903_v42 = vadd.f32 1.0, %v10169_v52  ;;  %v8539_v63 = vpop.f32.mrf.mxu1 }
 0xcd3   : > { %v10173_v30 = vpop.eup %10172  ;;  %10192 = vrcp.f32 %v5901_v31  ;;  %v5904_v55 = vadd.f32 1.0, %v10171_v35  ;;  %v8540_v16 = vadd.f32 %v8539_v63, %v8538_v9  ;;  %v8651_v26 = vpop.f32.mrf.mxu0 }
 0xcd4   : > { %v10175_v46 = vpop.eup %10174  ;;  %10194 = vrcp.f32 %v5903_v42  ;;  %v5906_v43 = vadd.f32 1.0, %v10173_v30  ;;  %v8652_v39 = vadd.f32 %v8651_v26, %v8650_v49  ;;  %v8541_v53 = vpop.f32.mrf.mxu1 }
 0xcd5   : > { %v10177_v48 = vpop.eup %10176  ;;  %10196 = vrcp.f32 %v5904_v55  ;;  %v5905_v50 = vadd.f32 1.0, %v10175_v46  ;;  %v8653_v60 = vpop.f32.mrf.mxu0  ;;  %v14764_v46 = vld [vmem:[#allocation20_spill] sm:$0xff] }
 0xcd6   : > { %v10179_v47 = vpop.eup %10178  ;;  %10198 = vrcp.f32 %v5906_v43  ;;  %v5907_v36 = vadd.f32 1.0, %v10177_v48  ;;  %v6824_v32 = vadd.f32 %v8652_v39, %v8540_v16  ;;  %v8542_v29 = vpop.f32.mrf.mxu1 }
 0xcd7   : > { %v10181_v2 = vpop.eup %10180  ;;  %10200 = vrcp.f32 %v5905_v50  ;;  %v8543_v7 = vadd.f32 %v8542_v29, %v8541_v53  ;;  %v8654_v15 = vpop.f32.mrf.mxu0  ;;  %v6279_v38 = vmul.f32 %v10179_v47, %v13821_v21 }
 0xcd8   : > { %v10183_v22 = vpop.eup %10182  ;;  %10202 = vrcp.f32 %v5907_v36  ;;  %v6938_v57 = vadd.f32 %v6824_v32, %v14762_v33  ;;  %v8655_v40 = vadd.f32 %v8654_v15, %v8653_v60  ;;  %v6280_v61 = vmul.f32 %v10181_v2, %v13826_v18  ;;  %v14765_v2 = vld [vmem:[#allocation19_spill] sm:$0xff] }
 0xcd9   : > { %v10185_v27 = vpop.eup %10184  ;;  %v6282_v10 = vmul.f32 %v10183_v22, %v13832_v4  ;;  %v14763_v4 = vld [vmem:[#allocation29_spill] sm:$0xff] }
 0xcda   : > { %v10187_v25 = vpop.eup %10186  ;;  %v6281_v20 = vmul.f32 %v10185_v27, %v13843_v54  ;;  %v13959_v41 = vadd.f32 %v13915_v23, %v6938_v57  ;;  %v6827_v58 = vadd.f32 %v8655_v40, %v8543_v7  ;;  %v6348_v54 = vpack.c.bf16 %v6280_v61, %v6276_v28 }
 0xcdb   : > { %v6283_v59 = vmul.f32 %v10187_v25, %v13846_v5  ;;  %v6350_v52 = vpack.c.bf16 %v6282_v10, %v6278_v44  ;;  %v14766_v25 = vld [vmem:[#allocation30_spill] sm:$0xff] }
 0xcdc   : > { %7009 = vst [vmem:[#allocation2 + $0x50] sm:$0xff] %v13959_v41  ;;  %v6349_v18 = vpack.c.bf16 %v6281_v20, %v6277_v62  ;;  %v6939_v56 = vadd.f32 %v6827_v58, %v14763_v4 }
 0xcdd   : > { %v6351_v0 = vpack.c.bf16 %v6283_v59, %v6279_v38 }
 0xcde   : > { %v10189_v9 = vpop.eup %10188  ;;  %6756 = vmatprep.mubr.bf16.mxu1 %v6349_v18  ;;  %v13970_v31 = vadd.f32 %v13915_v23, %v6939_v56  ;;  %v14767_v56 = vld [vmem:[#allocation32_spill] sm:$0xff] }
 0xcdf   : > { %v10191_v12 = vpop.eup %10190  ;;  %6917 = vmatprep.mubr.bf16.mxu0 %v6351_v0  ;;  %6757 = vmatmul.mubr.bf16.gmra.mxu1 %v6348_v54  ;;  %v6284_v55 = vmul.f32 %v10189_v9, %v13851_v45 }
 0xce0   : > { %v10193_v21 = vpop.eup %10192  ;;  %7010 = vst [vmem:[#allocation2 + $0x68] sm:$0xff] %v13970_v31  ;;  %6918 = vmatmul.mubr.bf16.gmra.mxu0 %v6350_v52  ;;  %v6286_v43 = vmul.f32 %v10191_v12, %v14764_v46 }
 0xce1   : > { %v10195_v3 = vpop.eup %10194  ;;  %v6285_v42 = vmul.f32 %v10193_v21, %v13859_v37  ;;  %v14768_v21 = vld [vmem:[#allocation14_spill] sm:$0xff] }
 0xce2   : > { %v10197_v5 = vpop.eup %10196  ;;  %v6287_v16 = vmul.f32 %v10195_v3, %v13864_v8 }
 0xce3   : > { %v10199_v11 = vpop.eup %10198  ;;  %v6288_v49 = vmul.f32 %v10197_v5, %v13875_v6 }
 0xce4   : > { %v10201_v51 = vpop.eup %10200  ;;  %v6290_v63 = vmul.f32 %v10199_v11, %v13881_v14 }
 0xce5   : > { %v10203_v35 = vpop.eup %10202  ;;  %v6289_v30 = vmul.f32 %v10201_v51, %v13891_v17  ;;  %v6352_v53 = vpack.c.bf16 %v6288_v49, %v6284_v55 }
 0xce6   : > { %v6291_v26 = vmul.f32 %v10203_v35, %v13895_v24  ;;  %v6354_v50 = vpack.c.bf16 %v6290_v63, %v6286_v43  ;;  %v14769_v43 = vld [vmem:[#allocation31_spill] sm:$0xff] }
 0xce7   : > { %v6353_v39 = vpack.c.bf16 %v6289_v30, %v6285_v42 }
 0xce8   : > { %v6355_v48 = vpack.c.bf16 %v6291_v26, %v6287_v16 }
 0xce9   : > { %6764 = vmatprep.mubr.bf16.mxu1 %v6353_v39 }
 0xcea   : > { %6925 = vmatprep.mubr.bf16.mxu0 %v6355_v48  ;;  %6765 = vmatmul.mubr.bf16.gmra.mxu1 %v6352_v53 }
 0xceb   : > { %6926 = vmatmul.mubr.bf16.gmra.mxu0 %v6354_v50 }
 0xcf1   : > { %v8544_v37 = vpop.f32.mrf.mxu1 }
 0xcf3   : > { %v8545_v14 = vpop.f32.mrf.mxu1 }
 0xcf4   : > { %v8656_v6 = vpop.f32.mrf.mxu0  ;;  %v8546_v17 = vadd.f32 %v8545_v14, %v8544_v37  ;;  %v14770_v37 = vld [vmem:[#allocation27_spill] sm:$0xff] }
 0xcf5   : > { %v8547_v47 = vpop.f32.mrf.mxu1 }
 0xcf6   : > { %v8657_v60 = vpop.f32.mrf.mxu0 }
 0xcf7   : > { %v8658_v45 = vadd.f32 %v8657_v60, %v8656_v6  ;;  %v8548_v24 = vpop.f32.mrf.mxu1 }
 0xcf8   : > { %v8659_v8 = vpop.f32.mrf.mxu0  ;;  %v8549_v32 = vadd.f32 %v8548_v24, %v8547_v47 }
 0xcf9   : > { %v6832_v36 = vadd.f32 %v8658_v45, %v8546_v17 }
 0xcfa   : > { %v8660_v29 = vpop.f32.mrf.mxu0 }
 0xcfb   : > { %v6940_v7 = vadd.f32 %v6832_v36, %v14765_v2  ;;  %v8661_v15 = vadd.f32 %v8660_v29, %v8659_v8 }
 0xcfd   : > { %v8550_v22 = vpop.f32.mrf.mxu1  ;;  %v13983_v57 = vadd.f32 %v13915_v23, %v6940_v7  ;;  %v6835_v40 = vadd.f32 %v8661_v15, %v8549_v32 }
 0xcfe   : > { %v8662_v33 = vpop.f32.mrf.mxu0 }
 0xcff   : > { %v8551_v27 = vpop.f32.mrf.mxu1  ;;  %7011 = vst [vmem:[#allocation2 + $0x30] sm:$0xff] %v13983_v57  ;;  %v6941_v10 = vadd.f32 %v6835_v40, %v14766_v25 }
 0xd00   : > { %v8552_v62 = vadd.f32 %v8551_v27, %v8550_v22  ;;  %v8663_v61 = vpop.f32.mrf.mxu0  ;;  %v14771_v22 = vld [vmem:[#allocation16_spill] sm:$0xff] }
 0xd01   : > { %v8664_v20 = vadd.f32 %v8663_v61, %v8662_v33  ;;  %v8553_v58 = vpop.f32.mrf.mxu1  ;;  %v13988_v38 = vadd.f32 %v13915_v23, %v6941_v10  ;;  %v14772_v61 = vld [vmem:[#allocation17_spill] sm:$0xff] }
 0xd02   : > { %v8665_v28 = vpop.f32.mrf.mxu0 }
 0xd03   : > { %v6840_v59 = vadd.f32 %v8664_v20, %v8552_v62  ;;  %v8554_v44 = vpop.f32.mrf.mxu1  ;;  %7012 = vst [vmem:[#allocation2 + $0x48] sm:$0xff] %v13988_v38 }
 0xd04   : > { %v8555_v18 = vadd.f32 %v8554_v44, %v8553_v58  ;;  %v8666_v4 = vpop.f32.mrf.mxu0 }
 0xd05   : > { %v6942_v54 = vadd.f32 %v6840_v59, %v14767_v56  ;;  %v8667_v0 = vadd.f32 %v8666_v4, %v8665_v28 }
 0xd07   : > { %v13993_v9 = vadd.f32 %v13915_v23, %v6942_v54  ;;  %v6843_v52 = vadd.f32 %v8667_v0, %v8555_v18 }
 0xd09   : > { %7013 = vst [vmem:[#allocation2 + $0x80] sm:$0xff] %v13993_v9  ;;  %v6943_v3 = vadd.f32 %v6843_v52, %v14768_v21  ;;  %v14773_v21 = vld [vmem:[#allocation15_spill] sm:$0xff] }
 0xd0a   : > { %v8556_v12 = vpop.f32.mrf.mxu1 }
 0xd0b   : > { %v8668_v5 = vpop.f32.mrf.mxu0  ;;  %v13998_v51 = vadd.f32 %v13915_v23, %v6943_v3 }
 0xd0c   : > { %v8557_v11 = vpop.f32.mrf.mxu1 }
 0xd0d   : > { %v8558_v49 = vadd.f32 %v8557_v11, %v8556_v12  ;;  %v8669_v35 = vpop.f32.mrf.mxu0  ;;  %7014 = vst [vmem:[#allocation2 + $0x88] sm:$0xff] %v13998_v51 }
 0xd0e   : > { %v8670_v42 = vadd.f32 %v8669_v35, %v8668_v5  ;;  %v8559_v63 = vpop.f32.mrf.mxu1  ;;  %v14774_v35 = vld [vmem:[#allocation33_spill] sm:$0xff] }
 0xd0f   : > { %v8671_v30 = vpop.f32.mrf.mxu0 }
 0xd10   : > { %v6848_v55 = vadd.f32 %v8670_v42, %v8558_v49  ;;  %v8560_v16 = vpop.f32.mrf.mxu1 }
 0xd11   : > { %v8561_v26 = vadd.f32 %v8560_v16, %v8559_v63  ;;  %v8672_v46 = vpop.f32.mrf.mxu0 }
 0xd12   : > { %v6944_v39 = vadd.f32 %v6848_v55, %v14769_v43  ;;  %v8673_v53 = vadd.f32 %v8672_v46, %v8671_v30 }
 0xd14   : > { %v14003_v48 = vadd.f32 %v13915_v23, %v6944_v39  ;;  %v6851_v50 = vadd.f32 %v8673_v53, %v8561_v26 }
 0xd16   : > { %7015 = vst [vmem:[#allocation2 + $0xe8] sm:$0xff] %v14003_v48  ;;  %v6945_v6 = vadd.f32 %v6851_v50, %v14770_v37 }
 0xd18   : > { %v14008_v14 = vadd.f32 %v13915_v23, %v6945_v6 }
 0xd1a   : > { %7016 = vst [vmem:[#allocation2 + $0xb8] sm:$0xff] %v14008_v14 }
 0xd1d   : > { %v8562_v17 = vpop.f32.mrf.mxu1 }
 0xd1e   : > { %v8674_v60 = vpop.f32.mrf.mxu0 }
 0xd1f   : > { %v8563_v45 = vpop.f32.mrf.mxu1 }
 0xd20   : > { %v8564_v47 = vadd.f32 %v8563_v45, %v8562_v17  ;;  %v8675_v8 = vpop.f32.mrf.mxu0 }
 0xd21   : > { %v8676_v36 = vadd.f32 %v8675_v8, %v8674_v60  ;;  %v8565_v24 = vpop.f32.mrf.mxu1  ;;  %v14775_v60 = vld [vmem:[#allocation35_spill] sm:$0xff] }
 0xd22   : > { %v8677_v32 = vpop.f32.mrf.mxu0 }
 0xd23   : > { %v6856_v29 = vadd.f32 %v8676_v36, %v8564_v47  ;;  %v8566_v2 = vpop.f32.mrf.mxu1 }
 0xd24   : > { %v8567_v7 = vadd.f32 %v8566_v2, %v8565_v24  ;;  %v8678_v15 = vpop.f32.mrf.mxu0 }
 0xd25   : > { %v6946_v33 = vadd.f32 %v6856_v29, %v14771_v22  ;;  %v8679_v40 = vadd.f32 %v8678_v15, %v8677_v32  ;;  %v14776_v32 = vld [vmem:[#allocation38_spill] sm:$0xff] }
 0xd27   : > { %v14013_v27 = vadd.f32 %v13915_v23, %v6946_v33  ;;  %v6859_v62 = vadd.f32 %v8679_v40, %v8567_v7 }
 0xd29   : > { %7017 = vst [vmem:[#allocation2 + $0x60] sm:$0xff] %v14013_v27  ;;  %v6947_v25 = vadd.f32 %v6859_v62, %v14772_v61 }
 0xd2a   : > { %v8568_v10 = vpop.f32.mrf.mxu1 }
 0xd2b   : > { %v14018_v20 = vadd.f32 %v13915_v23, %v6947_v25  ;;  %v8680_v58 = vpop.f32.mrf.mxu0 }
 0xd2c   : > { %v8569_v28 = vpop.f32.mrf.mxu1 }
 0xd2d   : > { %7018 = vst [vmem:[#allocation2 + $0xf0] sm:$0xff] %v14018_v20  ;;  %v8570_v59 = vadd.f32 %v8569_v28, %v8568_v10  ;;  %v8681_v44 = vpop.f32.mrf.mxu0 }
 0xd2e   : > { %v8682_v18 = vadd.f32 %v8681_v44, %v8680_v58  ;;  %v8571_v4 = vpop.f32.mrf.mxu1 }
 0xd2f   : > { %v8683_v56 = vpop.f32.mrf.mxu0 }
 0xd30   : > { %v6864_v54 = vadd.f32 %v8682_v18, %v8570_v59  ;;  %v8572_v0 = vpop.f32.mrf.mxu1  ;;  %v14777_v59 = vld [vmem:[#allocation36_spill] sm:$0xff] }
 0xd31   : > { %v8573_v52 = vadd.f32 %v8572_v0, %v8571_v4  ;;  %v8684_v12 = vpop.f32.mrf.mxu0 }
 0xd32   : > { %v6948_v3 = vadd.f32 %v6864_v54, %v14773_v21  ;;  %v8685_v5 = vadd.f32 %v8684_v12, %v8683_v56  ;;  %v14778_v54 = vld [vmem:[#allocation37_spill] sm:$0xff] }
 0xd34   : > { %v14023_v11 = vadd.f32 %v13915_v23, %v6948_v3  ;;  %v6867_v49 = vadd.f32 %v8685_v5, %v8573_v52 }
 0xd36   : > { %7019 = vst [vmem:[#allocation2 + $0x8] sm:$0xff] %v14023_v11  ;;  %v6949_v42 = vadd.f32 %v6867_v49, %v14774_v35 }
 0xd38   : > { %v14028_v63 = vadd.f32 %v13915_v23, %v6949_v42 }
 0xd3a   : > { %7020 = vst [vmem:[#allocation2 + $0x78] sm:$0xff] %v14028_v63 }
 0xd3f   : > { %v8574_v30 = vpop.f32.mrf.mxu1 }
 0xd40   : > { %v8686_v55 = vpop.f32.mrf.mxu0 }
 0xd41   : > { %v8575_v16 = vpop.f32.mrf.mxu1 }
 0xd42   : > { %v8576_v26 = vadd.f32 %v8575_v16, %v8574_v30  ;;  %v8687_v46 = vpop.f32.mrf.mxu0 }
 0xd43   : > { %v8688_v43 = vadd.f32 %v8687_v46, %v8686_v55  ;;  %v8577_v39 = vpop.f32.mrf.mxu1 }
 0xd44   : > { %v8689_v53 = vpop.f32.mrf.mxu0 }
 0xd45   : > { %v6872_v50 = vadd.f32 %v8688_v43, %v8576_v26  ;;  %v8578_v37 = vpop.f32.mrf.mxu1  ;;  %v14779_v43 = vld [vmem:[#allocation34_spill] sm:$0xff] }
 0xd46   : > { %v8579_v6 = vadd.f32 %v8578_v37, %v8577_v39  ;;  %v8690_v17 = vpop.f32.mrf.mxu0 }
 0xd47   : > { %v6950_v45 = vadd.f32 %v6872_v50, %v14775_v60  ;;  %v8691_v47 = vadd.f32 %v8690_v17, %v8689_v53  ;;  %v14780_v17 = vld [vmem:[#allocation22_spill] sm:$0xff] }
 0xd49   : > { %v14033_v8 = vadd.f32 %v13915_v23, %v6950_v45  ;;  %v6875_v36 = vadd.f32 %v8691_v47, %v8579_v6 }
 0xd4a   : > { %v8580_v24 = vpop.f32.mrf.mxu1 }
 0xd4b   : > { %7021 = vst [vmem:[#allocation2 + $0x38] sm:$0xff] %v14033_v8  ;;  %v6951_v29 = vadd.f32 %v6875_v36, %v14776_v32  ;;  %v8692_v2 = vpop.f32.mrf.mxu0 }
 0xd4c   : > { %v8581_v7 = vpop.f32.mrf.mxu1 }
 0xd4d   : > { %v14038_v15 = vadd.f32 %v13915_v23, %v6951_v29  ;;  %v8582_v22 = vadd.f32 %v8581_v7, %v8580_v24  ;;  %v8693_v33 = vpop.f32.mrf.mxu0 }
 0xd4e   : > { %v8694_v40 = vadd.f32 %v8693_v33, %v8692_v2  ;;  %v8583_v62 = vpop.f32.mrf.mxu1 }
 0xd4f   : > { %7022 = vst [vmem:[#allocation2 + $0x58] sm:$0xff] %v14038_v15  ;;  %v8695_v61 = vpop.f32.mrf.mxu0 }
 0xd50   : > { %v6880_v25 = vadd.f32 %v8694_v40, %v8582_v22  ;;  %v8584_v10 = vpop.f32.mrf.mxu1 }
 0xd51   : > { %v8585_v58 = vadd.f32 %v8584_v10, %v8583_v62  ;;  %v8696_v28 = vpop.f32.mrf.mxu0 }
 0xd52   : > { %v6952_v44 = vadd.f32 %v6880_v25, %v14777_v59  ;;  %v8697_v18 = vadd.f32 %v8696_v28, %v8695_v61  ;;  %v14781_v61 = vld [vmem:[#allocation40_spill] sm:$0xff]  ;;  %v14782_v59 = vld [vmem:[#allocation26_spill] sm:$0xff] }
 0xd54   : > { %v14043_v4 = vadd.f32 %v13915_v23, %v6952_v44  ;;  %v6883_v56 = vadd.f32 %v8697_v18, %v8585_v58 }
 0xd56   : > { %7023 = vst [vmem:[#allocation2 + $0x40] sm:$0xff] %v14043_v4  ;;  %v6953_v0 = vadd.f32 %v6883_v56, %v14778_v54 }
 0xd58   : > { %v14048_v52 = vadd.f32 %v13915_v23, %v6953_v0 }
 0xd5a   : > { %7024 = vst [vmem:[#allocation2 + $0xc8] sm:$0xff] %v14048_v52 }
 0xd5f   : > { %v8586_v12 = vpop.f32.mrf.mxu1 }
 0xd60   : > { %v8698_v21 = vpop.f32.mrf.mxu0 }
 0xd61   : > { %v8587_v3 = vpop.f32.mrf.mxu1 }
 0xd62   : > { %v8588_v5 = vadd.f32 %v8587_v3, %v8586_v12  ;;  %v8699_v49 = vpop.f32.mrf.mxu0 }
 0xd63   : > { %v8700_v35 = vadd.f32 %v8699_v49, %v8698_v21  ;;  %v8589_v42 = vpop.f32.mrf.mxu1 }
 0xd64   : > { %v8701_v30 = vpop.f32.mrf.mxu0 }
 0xd65   : > { %v6888_v55 = vadd.f32 %v8700_v35, %v8588_v5  ;;  %v8590_v16 = vpop.f32.mrf.mxu1 }
 0xd66   : > { %v8591_v26 = vadd.f32 %v8590_v16, %v8589_v42  ;;  %v8702_v46 = vpop.f32.mrf.mxu0  ;;  %v14783_v16 = vld [vmem:[#allocation39_spill] sm:$0xff] }
 0xd67   : > { %v6954_v39 = vadd.f32 %v6888_v55, %v14779_v43  ;;  %v8703_v53 = vadd.f32 %v8702_v46, %v8701_v30 }
 0xd69   : > { %v14053_v50 = vadd.f32 %v13915_v23, %v6954_v39  ;;  %v6891_v37 = vadd.f32 %v8703_v53, %v8591_v26 }
 0xd6a   : > { %v8592_v6 = vpop.f32.mrf.mxu1 }
 0xd6b   : > { %7025 = vst [vmem:[#allocation2 + $0xe0] sm:$0xff] %v14053_v50  ;;  %v6955_v60 = vadd.f32 %v6891_v37, %v14780_v17  ;;  %v8704_v45 = vpop.f32.mrf.mxu0 }
 0xd6c   : > { %v8593_v47 = vpop.f32.mrf.mxu1 }
 0xd6d   : > { %v14058_v36 = vadd.f32 %v13915_v23, %v6955_v60  ;;  %v8594_v24 = vadd.f32 %v8593_v47, %v8592_v6  ;;  %v8705_v32 = vpop.f32.mrf.mxu0 }
 0xd6e   : > { %v8706_v29 = vadd.f32 %v8705_v32, %v8704_v45  ;;  %v8595_v2 = vpop.f32.mrf.mxu1  ;;  %v14784_v45 = vld [vmem:[#allocation24_spill] sm:$0xff] }
 0xd6f   : > { %7026 = vst [vmem:[#allocation2 + $0x90] sm:$0xff] %v14058_v36  ;;  %v8707_v7 = vpop.f32.mrf.mxu0 }
 0xd70   : > { %v6896_v22 = vadd.f32 %v8706_v29, %v8594_v24  ;;  %v8596_v33 = vpop.f32.mrf.mxu1 }
 0xd71   : > { %v8597_v40 = vadd.f32 %v8596_v33, %v8595_v2  ;;  %v8708_v62 = vpop.f32.mrf.mxu0 }
 0xd72   : > { %v6956_v25 = vadd.f32 %v6896_v22, %v14781_v61  ;;  %v8709_v10 = vadd.f32 %v8708_v62, %v8707_v7  ;;  %v14785_v62 = vld [vmem:[#allocation42_spill] sm:$0xff] }
 0xd74   : > { %v14063_v58 = vadd.f32 %v13915_v23, %v6956_v25  ;;  %v6899_v28 = vadd.f32 %v8709_v10, %v8597_v40 }
 0xd76   : > { %7027 = vst [vmem:[#allocation2 + $0x70] sm:$0xff] %v14063_v58  ;;  %v6957_v44 = vadd.f32 %v6899_v28, %v14782_v59  ;;  %v14786_v59 = vld [vmem:[#allocation41_spill] sm:$0xff] }
 0xd78   : > { %v14068_v18 = vadd.f32 %v13915_v23, %v6957_v44 }
 0xd7a   : > { %7028 = vst [vmem:[#allocation2 + $0xc0] sm:$0xff] %v14068_v18 }
 0xd84   : > { %v8598_v56 = vpop.f32.mrf.mxu1 }
 0xd85   : > { %v8710_v54 = vpop.f32.mrf.mxu0 }
 0xd86   : > { %v8599_v0 = vpop.f32.mrf.mxu1 }
 0xd87   : > { %v8600_v12 = vadd.f32 %v8599_v0, %v8598_v56  ;;  %v8711_v21 = vpop.f32.mrf.mxu0 }
 0xd88   : > { %v8712_v3 = vadd.f32 %v8711_v21, %v8710_v54  ;;  %v8601_v5 = vpop.f32.mrf.mxu1 }
 0xd89   : > { %v8713_v49 = vpop.f32.mrf.mxu0 }
 0xd8a   : > { %v6904_v35 = vadd.f32 %v8712_v3, %v8600_v12  ;;  %v8602_v42 = vpop.f32.mrf.mxu1 }
 0xd8b   : > { %v8603_v30 = vadd.f32 %v8602_v42, %v8601_v5  ;;  %v8714_v55 = vpop.f32.mrf.mxu0 }
 0xd8c   : > { %v6958_v26 = vadd.f32 %v6904_v35, %v14783_v16  ;;  %v8715_v46 = vadd.f32 %v8714_v55, %v8713_v49  ;;  %v8604_v43 = vpop.f32.mrf.mxu1 }
 0xd8d   : > { %v8716_v39 = vpop.f32.mrf.mxu0 }
 0xd8e   : > { %v14073_v53 = vadd.f32 %v13915_v23, %v6958_v26  ;;  %v6907_v37 = vadd.f32 %v8715_v46, %v8603_v30  ;;  %v8605_v6 = vpop.f32.mrf.mxu1  ;;  %v14787_v26 = vld [vmem:[#allocation23_spill] sm:$0xff] }
 0xd8f   : > { %v8606_v17 = vadd.f32 %v8605_v6, %v8604_v43  ;;  %v8717_v60 = vpop.f32.mrf.mxu0 }
 0xd90   : > { %7029 = vst [vmem:[#allocation2 + $0xa8] sm:$0xff] %v14073_v53  ;;  %v6959_v47 = vadd.f32 %v6907_v37, %v14784_v45  ;;  %v8718_v24 = vadd.f32 %v8717_v60, %v8716_v39  ;;  %v8607_v32 = vpop.f32.mrf.mxu1 }
 0xd91   : > { %v8719_v29 = vpop.f32.mrf.mxu0 }
 0xd92   : > { %v14078_v2 = vadd.f32 %v13915_v23, %v6959_v47  ;;  %v6912_v7 = vadd.f32 %v8718_v24, %v8606_v17  ;;  %v8608_v22 = vpop.f32.mrf.mxu1  ;;  %v14788_v17 = vld [vmem:[#allocation21_spill] sm:$0xff] }
 0xd93   : > { %v8609_v33 = vadd.f32 %v8608_v22, %v8607_v32  ;;  %v8720_v40 = vpop.f32.mrf.mxu0 }
 0xd94   : > { %7030 = vst [vmem:[#allocation2 + $0xd0] sm:$0xff] %v14078_v2  ;;  %v6960_v61 = vadd.f32 %v6912_v7, %v14785_v62  ;;  %v8721_v25 = vadd.f32 %v8720_v40, %v8719_v29 }
 0xd96   : > { %v14083_v10 = vadd.f32 %v13915_v23, %v6960_v61  ;;  %v6915_v28 = vadd.f32 %v8721_v25, %v8609_v33 }
 0xd98   : > { %7031 = vst [vmem:[#allocation2 + $0x10] sm:$0xff] %v14083_v10  ;;  %v6961_v44 = vadd.f32 %v6915_v28, %v14786_v59  ;;  %v14789_v28 = vld [vmem:[#allocation45_spill] sm:$0xff] }
 0xd9a   : > { %v14088_v56 = vadd.f32 %v13915_v23, %v6961_v44 }
 0xd9c   : > { %7032 = vst [vmem:[#allocation2 + $0x28] sm:$0xff] %v14088_v56 }
 0xd9f   : > { %v8610_v54 = vpop.f32.mrf.mxu1 }
 0xda0   : > { %v8722_v0 = vpop.f32.mrf.mxu0 }
 0xda1   : > { %v8611_v12 = vpop.f32.mrf.mxu1 }
 0xda2   : > { %v8612_v21 = vadd.f32 %v8611_v12, %v8610_v54  ;;  %v8723_v3 = vpop.f32.mrf.mxu0  ;;  %v14790_v12 = vld [vmem:[#allocation28_spill] sm:$0xff] }
 0xda3   : > { %v8724_v5 = vadd.f32 %v8723_v3, %v8722_v0  ;;  %v8613_v49 = vpop.f32.mrf.mxu1 }
 0xda4   : > { %v8725_v35 = vpop.f32.mrf.mxu0 }
 0xda5   : > { %v6920_v42 = vadd.f32 %v8724_v5, %v8612_v21  ;;  %v8614_v30 = vpop.f32.mrf.mxu1 }
 0xda6   : > { %v8615_v55 = vadd.f32 %v8614_v30, %v8613_v49  ;;  %v8726_v16 = vpop.f32.mrf.mxu0 }
 0xda7   : > { %v6962_v46 = vadd.f32 %v6920_v42, %v14787_v26  ;;  %v8727_v43 = vadd.f32 %v8726_v16, %v8725_v35 }
 0xda9   : > { %v14093_v39 = vadd.f32 %v13915_v23, %v6962_v46  ;;  %v6923_v37 = vadd.f32 %v8727_v43, %v8615_v55 }
 0xdaa   : > { %v8616_v6 = vpop.f32.mrf.mxu1 }
 0xdab   : > { %7033 = vst [vmem:[#allocation2 + $0xa0] sm:$0xff] %v14093_v39  ;;  %v6963_v60 = vadd.f32 %v6923_v37, %v14788_v17  ;;  %v8728_v45 = vpop.f32.mrf.mxu0 }
 0xdac   : > { %v8617_v47 = vpop.f32.mrf.mxu1 }
 0xdad   : > { %v14098_v24 = vadd.f32 %v13915_v23, %v6963_v60  ;;  %v8618_v32 = vadd.f32 %v8617_v47, %v8616_v6  ;;  %v8729_v29 = vpop.f32.mrf.mxu0 }
 0xdae   : > { %v8730_v7 = vadd.f32 %v8729_v29, %v8728_v45  ;;  %v8619_v22 = vpop.f32.mrf.mxu1 }
 0xdaf   : > { %7034 = vst [vmem:[#allocation2 + $0xf8] sm:$0xff] %v14098_v24  ;;  %v8731_v33 = vpop.f32.mrf.mxu0 }
 0xdb0   : > { %v6928_v40 = vadd.f32 %v8730_v7, %v8618_v32  ;;  %v8620_v62 = vpop.f32.mrf.mxu1 }
 0xdb1   : > { %v8621_v61 = vadd.f32 %v8620_v62, %v8619_v22  ;;  %v8732_v25 = vpop.f32.mrf.mxu0 }
 0xdb2   : > { %v6964_v59 = vadd.f32 %v6928_v40, %v14789_v28  ;;  %v8733_v44 = vadd.f32 %v8732_v25, %v8731_v33 }
 0xdb4   : > { %v14103_v54 = vadd.f32 %v13915_v23, %v6964_v59  ;;  %v6931_v0 = vadd.f32 %v8733_v44, %v8621_v61 }
 0xdb6   : > { %7035 = vst [vmem:[#allocation2 + $0x20] sm:$0xff] %v14103_v54  ;;  %v6965_v21 = vadd.f32 %v6931_v0, %v14790_v12  ;;  %7040 = sbr.rel (%p8088_p1) target bundleno = 3888 (0xf30), region = 100 }
 0xdb8   : > { %v14108_v3 = vadd.f32 %v13915_v23, %v6965_v21 }
 0xdba   : > { %7036 = vst [vmem:[#allocation2 + $0x98] sm:$0xff] %v14108_v3 }
 0xdbb   : > { %7043 = vadd.xlane.f32.xlu0 %v13930_v34  ;;  %7047 = vadd.xlane.f32.xlu1 %v13945_v13 }
 0xdbf   : > { %7045 = vadd.xlane.f32.xlu0 %v13935_v1  ;;  %7049 = vadd.xlane.f32.xlu1 %v13950_v19 }
 0xdc3   : > { %7051 = vadd.xlane.f32.xlu0 %v13959_v41  ;;  %7053 = vadd.xlane.f32.xlu1 %v13970_v31 }
 0xdc7   : > { %7055 = vadd.xlane.f32.xlu0 %v13983_v57  ;;  %7057 = vadd.xlane.f32.xlu1 %v13988_v38 }
 0xdcb   : > { %7059 = vadd.xlane.f32.xlu0 %v13993_v9  ;;  %7061 = vadd.xlane.f32.xlu1 %v13998_v51 }
 0xdcf   : > { %7063 = vadd.xlane.f32.xlu0 %v14003_v48  ;;  %7065 = vadd.xlane.f32.xlu1 %v14008_v14 }
 0xdd3   : > { %7067 = vadd.xlane.f32.xlu0 %v14013_v27  ;;  %7069 = vadd.xlane.f32.xlu1 %v14018_v20 }
 0xdd7   : > { %7071 = vadd.xlane.f32.xlu0 %v14023_v11  ;;  %7073 = vadd.xlane.f32.xlu1 %v14028_v63 }
 0xddb   : > { %7075 = vadd.xlane.f32.xlu0 %v14033_v8  ;;  %7077 = vadd.xlane.f32.xlu1 %v14038_v15 }
 0xddf   : > { %7079 = vadd.xlane.f32.xlu0 %v14043_v4  ;;  %7081 = vadd.xlane.f32.xlu1 %v14048_v52 }
 0xde3   : > { %7083 = vadd.xlane.f32.xlu0 %v14053_v50  ;;  %7085 = vadd.xlane.f32.xlu1 %v14058_v36 }
 0xde7   : > { %7087 = vadd.xlane.f32.xlu0 %v14063_v58  ;;  %7089 = vadd.xlane.f32.xlu1 %v14068_v18 }
 0xdeb   : > { %7091 = vadd.xlane.f32.xlu0 %v14073_v53  ;;  %7093 = vadd.xlane.f32.xlu1 %v14078_v2 }
 0xdef   : > { %7095 = vadd.xlane.f32.xlu0 %v14083_v10  ;;  %7097 = vadd.xlane.f32.xlu1 %v14088_v56 }
 0xdf3   : > { %7099 = vadd.xlane.f32.xlu0 %v14093_v39  ;;  %7101 = vadd.xlane.f32.xlu1 %v14098_v24 }
 0xdf7   : > { %7103 = vadd.xlane.f32.xlu0 %v14103_v54  ;;  %7105 = vadd.xlane.f32.xlu1 %v14108_v3 }
 0xe44   : > { %v7044_v23 = vpop.xlane.xlu0 %7043  ;;  %v7048_v5 = vpop.xlane.xlu1 %7047 }
 0xe45   : > { %v7107_v49 = vmul.f32 0.0078125, %v7044_v23  ;;  %v7109_v35 = vmul.f32 0.0078125, %v7048_v5 }
 0xe47   : > { %v14145_v42 = vsub.f32 %v13930_v34, %v7107_v49  ;;  %v14148_v30 = vsub.f32 %v13945_v13, %v7109_v35 }
 0xe48   : > { %v7046_v55 = vpop.xlane.xlu0 %7045  ;;  %v7050_v16 = vpop.xlane.xlu1 %7049 }
 0xe49   : > { %v7108_v26 = vmul.f32 0.0078125, %v7046_v55  ;;  %v7171_v46 = vmul.f32 %v14145_v42, %v14145_v42  ;;  %v7110_v43 = vmul.f32 0.0078125, %v7050_v16  ;;  %v7173_v34 = vmul.f32 %v14148_v30, %v14148_v30 }
 0xe4b   : > { %v14153_v37 = vsub.f32 %v13935_v1, %v7108_v26  ;;  %7203 = vadd.xlane.f32.xlu0 %v7171_v46  ;;  %v14156_v6 = vsub.f32 %v13950_v19, %v7110_v43 }
 0xe4c   : > { %v7052_v17 = vpop.xlane.xlu0 %7051  ;;  %v7054_v13 = vpop.xlane.xlu1 %7053 }
 0xe4d   : > { %v7111_v60 = vmul.f32 0.0078125, %v7052_v17  ;;  %v7172_v45 = vmul.f32 %v14153_v37, %v14153_v37  ;;  %v7112_v47 = vmul.f32 0.0078125, %v7054_v13  ;;  %v7174_v19 = vmul.f32 %v14156_v6, %v14156_v6 }
 0xe4f   : > { %v14163_v32 = vsub.f32 %v13959_v41, %v7111_v60  ;;  %7207 = vadd.xlane.f32.xlu0 %v7173_v34  ;;  %7205 = vadd.xlane.f32.xlu1 %v7172_v45  ;;  %v14166_v1 = vsub.f32 %v13970_v31, %v7112_v47 }
 0xe50   : > { %v7056_v29 = vpop.xlane.xlu0 %7055  ;;  %v7058_v7 = vpop.xlane.xlu1 %7057 }
 0xe51   : > { %v7113_v22 = vmul.f32 0.0078125, %v7056_v29  ;;  %v7175_v33 = vmul.f32 %v14163_v32, %v14163_v32  ;;  %v7114_v40 = vmul.f32 0.0078125, %v7058_v7  ;;  %v7176_v31 = vmul.f32 %v14166_v1, %v14166_v1 }
 0xe53   : > { %v14173_v62 = vsub.f32 %v13983_v57, %v7113_v22  ;;  %7209 = vadd.xlane.f32.xlu1 %v7174_v19  ;;  %7211 = vadd.xlane.f32.xlu0 %v7175_v33  ;;  %v14176_v41 = vsub.f32 %v13988_v38, %v7114_v40 }
 0xe54   : > { %v7060_v61 = vpop.xlane.xlu0 %7059  ;;  %v7062_v25 = vpop.xlane.xlu1 %7061 }
 0xe55   : > { %v7115_v28 = vmul.f32 0.0078125, %v7060_v61  ;;  %v7177_v59 = vmul.f32 %v14173_v62, %v14173_v62  ;;  %v7116_v44 = vmul.f32 0.0078125, %v7062_v25  ;;  %v7178_v38 = vmul.f32 %v14176_v41, %v14176_v41 }
 0xe57   : > { %v14183_v0 = vsub.f32 %v13993_v9, %v7115_v28  ;;  %7213 = vadd.xlane.f32.xlu1 %v7176_v31  ;;  %7215 = vadd.xlane.f32.xlu0 %v7177_v59  ;;  %v14186_v57 = vsub.f32 %v13998_v51, %v7116_v44 }
 0xe58   : > { %v7064_v12 = vpop.xlane.xlu0 %7063  ;;  %v7066_v21 = vpop.xlane.xlu1 %7065 }
 0xe59   : > { %v7117_v23 = vmul.f32 0.0078125, %v7064_v12  ;;  %v7179_v5 = vmul.f32 %v14183_v0, %v14183_v0  ;;  %v7118_v49 = vmul.f32 0.0078125, %v7066_v21  ;;  %v7180_v51 = vmul.f32 %v14186_v57, %v14186_v57 }
 0xe5b   : > { %v14193_v35 = vsub.f32 %v14003_v48, %v7117_v23  ;;  %7217 = vadd.xlane.f32.xlu1 %v7178_v38  ;;  %7219 = vadd.xlane.f32.xlu0 %v7179_v5  ;;  %v14196_v9 = vsub.f32 %v14008_v14, %v7118_v49 }
 0xe5c   : > { %v7068_v55 = vpop.xlane.xlu0 %7067  ;;  %v7070_v16 = vpop.xlane.xlu1 %7069 }
 0xe5d   : > { %v7119_v26 = vmul.f32 0.0078125, %v7068_v55  ;;  %v7181_v46 = vmul.f32 %v14193_v35, %v14193_v35  ;;  %v7120_v43 = vmul.f32 0.0078125, %v7070_v16  ;;  %v7182_v14 = vmul.f32 %v14196_v9, %v14196_v9 }
 0xe5f   : > { %v14203_v34 = vsub.f32 %v14013_v27, %v7119_v26  ;;  %7221 = vadd.xlane.f32.xlu1 %v7180_v51  ;;  %7223 = vadd.xlane.f32.xlu0 %v7181_v46  ;;  %v14206_v48 = vsub.f32 %v14018_v20, %v7120_v43 }
 0xe60   : > { %v7072_v17 = vpop.xlane.xlu0 %7071  ;;  %v7074_v13 = vpop.xlane.xlu1 %7073 }
 0xe61   : > { %v7121_v60 = vmul.f32 0.0078125, %v7072_v17  ;;  %v7183_v45 = vmul.f32 %v14203_v34, %v14203_v34  ;;  %v7122_v47 = vmul.f32 0.0078125, %v7074_v13  ;;  %v7184_v20 = vmul.f32 %v14206_v48, %v14206_v48 }
 0xe63   : > { %v14213_v19 = vsub.f32 %v14023_v11, %v7121_v60  ;;  %7225 = vadd.xlane.f32.xlu1 %v7182_v14  ;;  %7227 = vadd.xlane.f32.xlu0 %v7183_v45  ;;  %v14216_v27 = vsub.f32 %v14028_v63, %v7122_v47 }
 0xe64   : > { %v7076_v29 = vpop.xlane.xlu0 %7075  ;;  %v7078_v7 = vpop.xlane.xlu1 %7077 }
 0xe65   : > { %v7123_v22 = vmul.f32 0.0078125, %v7076_v29  ;;  %v7185_v33 = vmul.f32 %v14213_v19, %v14213_v19  ;;  %v7124_v40 = vmul.f32 0.0078125, %v7078_v7  ;;  %v7186_v63 = vmul.f32 %v14216_v27, %v14216_v27 }
 0xe67   : > { %v14223_v31 = vsub.f32 %v14033_v8, %v7123_v22  ;;  %7229 = vadd.xlane.f32.xlu1 %v7184_v20  ;;  %7231 = vadd.xlane.f32.xlu0 %v7185_v33  ;;  %v14226_v11 = vsub.f32 %v14038_v15, %v7124_v40 }
 0xe68   : > { %v7080_v61 = vpop.xlane.xlu0 %7079  ;;  %v7082_v25 = vpop.xlane.xlu1 %7081 }
 0xe69   : > { %v7125_v28 = vmul.f32 0.0078125, %v7080_v61  ;;  %v7187_v59 = vmul.f32 %v14223_v31, %v14223_v31  ;;  %v7126_v44 = vmul.f32 0.0078125, %v7082_v25  ;;  %v7188_v15 = vmul.f32 %v14226_v11, %v14226_v11 }
 0xe6b   : > { %v14233_v38 = vsub.f32 %v14043_v4, %v7125_v28  ;;  %7233 = vadd.xlane.f32.xlu1 %v7186_v63  ;;  %7235 = vadd.xlane.f32.xlu0 %v7187_v59  ;;  %v14236_v8 = vsub.f32 %v14048_v52, %v7126_v44 }
 0xe6c   : > { %v7084_v12 = vpop.xlane.xlu0 %7083  ;;  %v7086_v21 = vpop.xlane.xlu1 %7085 }
 0xe6d   : > { %v7127_v23 = vmul.f32 0.0078125, %v7084_v12  ;;  %v7189_v5 = vmul.f32 %v14233_v38, %v14233_v38  ;;  %v7128_v49 = vmul.f32 0.0078125, %v7086_v21  ;;  %v7190_v52 = vmul.f32 %v14236_v8, %v14236_v8 }
 0xe6f   : > { %v14243_v51 = vsub.f32 %v14053_v50, %v7127_v23  ;;  %7237 = vadd.xlane.f32.xlu1 %v7188_v15  ;;  %7239 = vadd.xlane.f32.xlu0 %v7189_v5  ;;  %v14246_v4 = vsub.f32 %v14058_v36, %v7128_v49 }
 0xe70   : > { %v7088_v55 = vpop.xlane.xlu0 %7087  ;;  %v7090_v16 = vpop.xlane.xlu1 %7089 }
 0xe71   : > { %v7129_v26 = vmul.f32 0.0078125, %v7088_v55  ;;  %v7191_v46 = vmul.f32 %v14243_v51, %v14243_v51  ;;  %v7130_v43 = vmul.f32 0.0078125, %v7090_v16  ;;  %v7192_v36 = vmul.f32 %v14246_v4, %v14246_v4 }
 0xe73   : > { %v14253_v14 = vsub.f32 %v14063_v58, %v7129_v26  ;;  %7241 = vadd.xlane.f32.xlu1 %v7190_v52  ;;  %7243 = vadd.xlane.f32.xlu0 %v7191_v46  ;;  %v14256_v50 = vsub.f32 %v14068_v18, %v7130_v43 }
 0xe74   : > { %v7092_v17 = vpop.xlane.xlu0 %7091  ;;  %v7094_v13 = vpop.xlane.xlu1 %7093 }
 0xe75   : > { %v7131_v60 = vmul.f32 0.0078125, %v7092_v17  ;;  %v7193_v45 = vmul.f32 %v14253_v14, %v14253_v14  ;;  %v7132_v47 = vmul.f32 0.0078125, %v7094_v13  ;;  %v7194_v18 = vmul.f32 %v14256_v50, %v14256_v50 }
 0xe77   : > { %v14263_v20 = vsub.f32 %v14073_v53, %v7131_v60  ;;  %7245 = vadd.xlane.f32.xlu1 %v7192_v36  ;;  %7247 = vadd.xlane.f32.xlu0 %v7193_v45  ;;  %v14266_v58 = vsub.f32 %v14078_v2, %v7132_v47 }
 0xe78   : > { %v7096_v29 = vpop.xlane.xlu0 %7095  ;;  %v7098_v7 = vpop.xlane.xlu1 %7097 }
 0xe79   : > { %v7133_v22 = vmul.f32 0.0078125, %v7096_v29  ;;  %v7195_v33 = vmul.f32 %v14263_v20, %v14263_v20  ;;  %v7134_v40 = vmul.f32 0.0078125, %v7098_v7  ;;  %v7196_v2 = vmul.f32 %v14266_v58, %v14266_v58 }
 0xe7b   : > { %v14273_v63 = vsub.f32 %v14083_v10, %v7133_v22  ;;  %7249 = vadd.xlane.f32.xlu1 %v7194_v18  ;;  %7251 = vadd.xlane.f32.xlu0 %v7195_v33  ;;  %v14276_v53 = vsub.f32 %v14088_v56, %v7134_v40 }
 0xe7c   : > { %v7100_v61 = vpop.xlane.xlu0 %7099  ;;  %v7102_v25 = vpop.xlane.xlu1 %7101 }
 0xe7d   : > { %v7135_v28 = vmul.f32 0.0078125, %v7100_v61  ;;  %v7197_v59 = vmul.f32 %v14273_v63, %v14273_v63  ;;  %v7136_v44 = vmul.f32 0.0078125, %v7102_v25  ;;  %v7198_v56 = vmul.f32 %v14276_v53, %v14276_v53 }
 0xe7f   : > { %v14283_v15 = vsub.f32 %v14093_v39, %v7135_v28  ;;  %7253 = vadd.xlane.f32.xlu1 %v7196_v2  ;;  %7255 = vadd.xlane.f32.xlu0 %v7197_v59  ;;  %v14286_v10 = vsub.f32 %v14098_v24, %v7136_v44 }
 0xe80   : > { %v7104_v12 = vpop.xlane.xlu0 %7103  ;;  %v7106_v21 = vpop.xlane.xlu1 %7105 }
 0xe81   : > { %v7137_v23 = vmul.f32 0.0078125, %v7104_v12  ;;  %v7199_v5 = vmul.f32 %v14283_v15, %v14283_v15  ;;  %v7138_v49 = vmul.f32 0.0078125, %v7106_v21  ;;  %v7200_v24 = vmul.f32 %v14286_v10, %v14286_v10 }
 0xe83   : > { %v14293_v52 = vsub.f32 %v14103_v54, %v7137_v23  ;;  %7257 = vadd.xlane.f32.xlu1 %v7198_v56  ;;  %7259 = vadd.xlane.f32.xlu0 %v7199_v5  ;;  %v14296_v39 = vsub.f32 %v14108_v3, %v7138_v49  ;;  %v14307_v23 = vld [vmem:[%s14791_s19] ss:$0 sm:$0xff] }
 0xe85   : > { %v7201_v55 = vmul.f32 %v14293_v52, %v14293_v52  ;;  %v7202_v16 = vmul.f32 %v14296_v39, %v14296_v39 }
 0xe87   : > { %7261 = vadd.xlane.f32.xlu1 %v7200_v24  ;;  %7263 = vadd.xlane.f32.xlu0 %v7201_v55 }
 0xe8b   : > { %7265 = vadd.xlane.f32.xlu1 %v7202_v16 }
 0xed4   : > { %v7204_v26 = vpop.xlane.xlu0 %7203 }
 0xed5   : > { %v7267_v54 = vmul.f32 0.0078125, %v7204_v26 }
 0xed7   : > { %v7299_v46 = vadd.f32 1e-05, %v7267_v54 }
 0xed8   : > { %v7206_v43 = vpop.xlane.xlu1 %7205  ;;  %v7208_v36 = vpop.xlane.xlu0 %7207 }
 0xed9   : > { %10254 = vrsqrt.f32 %v7299_v46  ;;  %v7268_v3 = vmul.f32 0.0078125, %v7206_v43  ;;  %v7269_v17 = vmul.f32 0.0078125, %v7208_v36 }
 0xedb   : > { %v7300_v13 = vadd.f32 1e-05, %v7268_v3  ;;  %v7301_v60 = vadd.f32 1e-05, %v7269_v17  ;;  %v14314_v3 = vld [vmem:[%s14792_s18] ss:$0 sm:$0xff] }
 0xedc   : > { %v7210_v45 = vpop.xlane.xlu1 %7209  ;;  %v7212_v47 = vpop.xlane.xlu0 %7211 }
 0xedd   : > { %10256 = vrsqrt.f32 %v7300_v13  ;;  %v7270_v18 = vmul.f32 0.0078125, %v7210_v45  ;;  %v7271_v29 = vmul.f32 0.0078125, %v7212_v47 }
 0xede   : > { %10258 = vrsqrt.f32 %v7301_v60 }
 0xedf   : > { %v7302_v7 = vadd.f32 1e-05, %v7270_v18  ;;  %v7303_v22 = vadd.f32 1e-05, %v7271_v29 }
 0xee0   : > { %v7214_v33 = vpop.xlane.xlu1 %7213  ;;  %v7216_v40 = vpop.xlane.xlu0 %7215 }
 0xee1   : > { %10260 = vrsqrt.f32 %v7302_v7  ;;  %v7272_v2 = vmul.f32 0.0078125, %v7214_v33  ;;  %v7273_v61 = vmul.f32 0.0078125, %v7216_v40 }
 0xee2   : > { %10262 = vrsqrt.f32 %v7303_v22 }
 0xee3   : > { %v7304_v25 = vadd.f32 1e-05, %v7272_v2  ;;  %v7305_v28 = vadd.f32 1e-05, %v7273_v61 }
 0xee4   : > { %v7218_v59 = vpop.xlane.xlu1 %7217  ;;  %v7220_v44 = vpop.xlane.xlu0 %7219 }
 0xee5   : > { %10264 = vrsqrt.f32 %v7304_v25  ;;  %v7274_v56 = vmul.f32 0.0078125, %v7218_v59  ;;  %v7275_v12 = vmul.f32 0.0078125, %v7220_v44 }
 0xee6   : > { %v10255_v21 = vpop.eup %10254  ;;  %10266 = vrsqrt.f32 %v7305_v28 }
 0xee7   : > { %v7363_v5 = vmul.f32 %v10255_v21, %v14145_v42  ;;  %v7306_v49 = vadd.f32 1e-05, %v7274_v56  ;;  %v7307_v24 = vadd.f32 1e-05, %v7275_v12 }
 0xee8   : > { %v7222_v55 = vpop.xlane.xlu1 %7221  ;;  %v7224_v16 = vpop.xlane.xlu0 %7223 }
 0xee9   : > { %10268 = vrsqrt.f32 %v7306_v49  ;;  %v7276_v26 = vmul.f32 0.0078125, %v7222_v55  ;;  %v7277_v54 = vmul.f32 0.0078125, %v7224_v16  ;;  %v7401_v43 = vmul.f32 %v14307_v23, %v7363_v5 }
 0xeea   : > { %v10257_v46 = vpop.eup %10256  ;;  %10270 = vrsqrt.f32 %v7307_v24 }
 0xeeb   : > { %v10259_v36 = vpop.eup %10258  ;;  %v7364_v17 = vmul.f32 %v10257_v46, %v14153_v37  ;;  %v7308_v42 = vadd.f32 1e-05, %v7276_v26  ;;  %v7309_v13 = vadd.f32 1e-05, %v7277_v54  ;;  %v7439_v33 = vadd.f32 %v14314_v3, %v7401_v43 }
 0xeec   : > { %v7365_v60 = vmul.f32 %v10259_v36, %v14148_v30  ;;  %v7226_v45 = vpop.xlane.xlu1 %7225  ;;  %v7228_v47 = vpop.xlane.xlu0 %7227 }
 0xeed   : > { %v7402_v18 = vmul.f32 %v14307_v23, %v7364_v17  ;;  %10272 = vrsqrt.f32 %v7308_v42  ;;  %v7278_v29 = vmul.f32 0.0078125, %v7226_v45  ;;  %v7279_v7 = vmul.f32 0.0078125, %v7228_v47 }
 0xeee   : > { %v10261_v22 = vpop.eup %10260  ;;  %v7403_v40 = vmul.f32 %v14307_v23, %v7365_v60  ;;  %10274 = vrsqrt.f32 %v7309_v13 }
 0xeef   : > { %v10263_v2 = vpop.eup %10262  ;;  %v7440_v37 = vadd.f32 %v14314_v3, %v7402_v18  ;;  %v7366_v61 = vmul.f32 %v10261_v22, %v14156_v6  ;;  %v7310_v25 = vadd.f32 1e-05, %v7278_v29  ;;  %v7311_v30 = vadd.f32 1e-05, %v7279_v7 }
 0xef0   : > { %v7367_v28 = vmul.f32 %v10263_v2, %v14163_v32  ;;  %v7230_v59 = vpop.xlane.xlu1 %7229  ;;  %v7232_v44 = vpop.xlane.xlu0 %7231  ;;  %v7441_v6 = vadd.f32 %v14314_v3, %v7403_v40 }
 0xef1   : > { %v8227_v56 = vpack.c.bf16 %v7440_v37, %v7439_v33  ;;  %v7404_v12 = vmul.f32 %v14307_v23, %v7366_v61  ;;  %10276 = vrsqrt.f32 %v7310_v25  ;;  %v7280_v21 = vmul.f32 0.0078125, %v7230_v59 }
 0xef2   : > { %v10265_v5 = vpop.eup %10264  ;;  %v7405_v49 = vmul.f32 %v14307_v23, %v7367_v28  ;;  %10278 = vrsqrt.f32 %v7311_v30  ;;  %v7281_v24 = vmul.f32 0.0078125, %v7232_v44 }
 0xef3   : > { %v10267_v55 = vpop.eup %10266  ;;  %8228 = vst [vmem:[%s14793_s17] sm:$0xff] %v8227_v56   ;;  %v7442_v32 = vadd.f32 %v14314_v3, %v7404_v12  ;;  %v7368_v16 = vmul.f32 %v10265_v5, %v14166_v1  ;;  %v7312_v26 = vadd.f32 1e-05, %v7280_v21 }
 0xef4   : > { %v7369_v54 = vmul.f32 %v10267_v55, %v14173_v62  ;;  %v7313_v46 = vadd.f32 1e-05, %v7281_v24  ;;  %v7234_v43 = vpop.xlane.xlu1 %7233  ;;  %v7236_v36 = vpop.xlane.xlu0 %7235  ;;  %v7443_v45 = vadd.f32 %v14314_v3, %v7405_v49 }
 0xef5   : > { %v8232_v17 = vpack.c.bf16 %v7442_v32, %v7441_v6  ;;  %v7406_v42 = vmul.f32 %v14307_v23, %v7368_v16  ;;  %10280 = vrsqrt.f32 %v7312_v26  ;;  %v7282_v13 = vmul.f32 0.0078125, %v7234_v43 }
 0xef6   : > { %v10269_v60 = vpop.eup %10268  ;;  %10282 = vrsqrt.f32 %v7313_v46  ;;  %v7283_v47 = vmul.f32 0.0078125, %v7236_v36  ;;  %v7407_v62 = vmul.f32 %v14307_v23, %v7369_v54 }
 0xef7   : > { %v10271_v18 = vpop.eup %10270  ;;  %8319 = vst [vmem:[%s14793_s17 + $0x8] sm:$0xff] %v8232_v17   ;;  %v7444_v1 = vadd.f32 %v14314_v3, %v7406_v42  ;;  %v7370_v29 = vmul.f32 %v10269_v60, %v14176_v41  ;;  %v7314_v7 = vadd.f32 1e-05, %v7282_v13 }
 0xef8   : > { %v7371_v22 = vmul.f32 %v10271_v18, %v14183_v0  ;;  %v7315_v33 = vadd.f32 1e-05, %v7283_v47  ;;  %v7238_v40 = vpop.xlane.xlu1 %7237  ;;  %v7240_v2 = vpop.xlane.xlu0 %7239  ;;  %v7445_v41 = vadd.f32 %v14314_v3, %v7407_v62 }
 0xef9   : > { %v8237_v37 = vpack.c.bf16 %v7444_v1, %v7443_v45  ;;  %v7408_v61 = vmul.f32 %v14307_v23, %v7370_v29  ;;  %10284 = vrsqrt.f32 %v7314_v7  ;;  %v7284_v25 = vmul.f32 0.0078125, %v7238_v40 }
 0xefa   : > { %v10273_v30 = vpop.eup %10272  ;;  %v7409_v28 = vmul.f32 %v14307_v23, %v7371_v22  ;;  %10286 = vrsqrt.f32 %v7315_v33  ;;  %v7285_v59 = vmul.f32 0.0078125, %v7240_v2 }
 0xefb   : > { %v10275_v44 = vpop.eup %10274  ;;  %8320 = vst [vmem:[%s14793_s17 + $0x10] sm:$0xff] %v8237_v37   ;;  %v7446_v0 = vadd.f32 %v14314_v3, %v7408_v61  ;;  %v7372_v56 = vmul.f32 %v10273_v30, %v14186_v57  ;;  %v7316_v12 = vadd.f32 1e-05, %v7284_v25 }
 0xefc   : > { %v7373_v21 = vmul.f32 %v10275_v44, %v14193_v35  ;;  %v7317_v5 = vadd.f32 1e-05, %v7285_v59  ;;  %v7242_v49 = vpop.xlane.xlu1 %7241  ;;  %v7244_v24 = vpop.xlane.xlu0 %7243  ;;  %v7447_v26 = vadd.f32 %v14314_v3, %v7409_v28 }
 0xefd   : > { %v8242_v55 = vpack.c.bf16 %v7446_v0, %v7445_v41  ;;  %v7410_v6 = vmul.f32 %v14307_v23, %v7372_v56  ;;  %10288 = vrsqrt.f32 %v7316_v12  ;;  %v7286_v32 = vmul.f32 0.0078125, %v7242_v49 }
 0xefe   : > { %v10277_v16 = vpop.eup %10276  ;;  %10290 = vrsqrt.f32 %v7317_v5  ;;  %v7287_v54 = vmul.f32 0.0078125, %v7244_v24  ;;  %v7411_v35 = vmul.f32 %v14307_v23, %v7373_v21 }
 0xeff   : > { %v10279_v46 = vpop.eup %10278  ;;  %8321 = vst [vmem:[%s14793_s17 + $0x18] sm:$0xff] %v8242_v55   ;;  %v7448_v57 = vadd.f32 %v14314_v3, %v7410_v6  ;;  %v7374_v43 = vmul.f32 %v10277_v16, %v14196_v9  ;;  %v7318_v36 = vadd.f32 1e-05, %v7286_v32 }
 0xf00   : > { %v7375_v17 = vmul.f32 %v10279_v46, %v14203_v34  ;;  %v7319_v42 = vadd.f32 1e-05, %v7287_v54  ;;  %v7246_v13 = vpop.xlane.xlu1 %7245  ;;  %v7248_v60 = vpop.xlane.xlu0 %7247  ;;  %v7449_v9 = vadd.f32 %v14314_v3, %v7411_v35 }
 0xf01   : > { %v8247_v45 = vpack.c.bf16 %v7448_v57, %v7447_v26  ;;  %v7412_v47 = vmul.f32 %v14307_v23, %v7374_v43  ;;  %10292 = vrsqrt.f32 %v7318_v36  ;;  %v7288_v18 = vmul.f32 0.0078125, %v7246_v13 }
 0xf02   : > { %v10281_v1 = vpop.eup %10280  ;;  %v7413_v62 = vmul.f32 %v14307_v23, %v7375_v17  ;;  %10294 = vrsqrt.f32 %v7319_v42  ;;  %v7289_v29 = vmul.f32 0.0078125, %v7248_v60 }
 0xf03   : > { %v10283_v7 = vpop.eup %10282  ;;  %8322 = vst [vmem:[%s14793_s17 + $0x20] sm:$0xff] %v8247_v45   ;;  %v7450_v34 = vadd.f32 %v14314_v3, %v7412_v47  ;;  %v7376_v22 = vmul.f32 %v10281_v1, %v14206_v48  ;;  %v7320_v33 = vadd.f32 1e-05, %v7288_v18 }
 0xf04   : > { %v7377_v40 = vmul.f32 %v10283_v7, %v14213_v19  ;;  %v7321_v2 = vadd.f32 1e-05, %v7289_v29  ;;  %v7250_v37 = vpop.xlane.xlu1 %7249  ;;  %v7252_v61 = vpop.xlane.xlu0 %7251  ;;  %v7451_v44 = vadd.f32 %v14314_v3, %v7413_v62 }
 0xf05   : > { %v8252_v25 = vpack.c.bf16 %v7450_v34, %v7449_v9  ;;  %v7414_v30 = vmul.f32 %v14307_v23, %v7376_v22  ;;  %10296 = vrsqrt.f32 %v7320_v33  ;;  %v7290_v28 = vmul.f32 0.0078125, %v7250_v37 }
 0xf06   : > { %v10285_v59 = vpop.eup %10284  ;;  %10298 = vrsqrt.f32 %v7321_v2  ;;  %v7291_v41 = vmul.f32 0.0078125, %v7252_v61  ;;  %v7415_v19 = vmul.f32 %v14307_v23, %v7377_v40 }
 0xf07   : > { %v10287_v0 = vpop.eup %10286  ;;  %8323 = vst [vmem:[%s14793_s17 + $0x28] sm:$0xff] %v8252_v25   ;;  %v7452_v48 = vadd.f32 %v14314_v3, %v7414_v30  ;;  %v7378_v56 = vmul.f32 %v10285_v59, %v14216_v27  ;;  %v7322_v12 = vadd.f32 1e-05, %v7290_v28 }
 0xf08   : > { %v7379_v21 = vmul.f32 %v10287_v0, %v14223_v31  ;;  %v7323_v5 = vadd.f32 1e-05, %v7291_v41  ;;  %v7254_v49 = vpop.xlane.xlu1 %7253  ;;  %v7256_v24 = vpop.xlane.xlu0 %7255  ;;  %v7453_v27 = vadd.f32 %v14314_v3, %v7415_v19 }
 0xf09   : > { %v8257_v55 = vpack.c.bf16 %v7452_v48, %v7451_v44  ;;  %v7416_v6 = vmul.f32 %v14307_v23, %v7378_v56  ;;  %10300 = vrsqrt.f32 %v7322_v12  ;;  %v7292_v32 = vmul.f32 0.0078125, %v7254_v49 }
 0xf0a   : > { %v10289_v16 = vpop.eup %10288  ;;  %v7417_v26 = vmul.f32 %v14307_v23, %v7379_v21  ;;  %10302 = vrsqrt.f32 %v7323_v5  ;;  %v7293_v54 = vmul.f32 0.0078125, %v7256_v24 }
 0xf0b   : > { %v10291_v46 = vpop.eup %10290  ;;  %8324 = vst [vmem:[%s14793_s17 + $0x30] sm:$0xff] %v8257_v55   ;;  %v7454_v31 = vadd.f32 %v14314_v3, %v7416_v6  ;;  %v7380_v57 = vmul.f32 %v10289_v16, %v14226_v11  ;;  %v7324_v35 = vadd.f32 1e-05, %v7292_v32 }
 0xf0c   : > { %v7381_v43 = vmul.f32 %v10291_v46, %v14233_v38  ;;  %v7325_v36 = vadd.f32 1e-05, %v7293_v54  ;;  %v7258_v17 = vpop.xlane.xlu1 %7257  ;;  %v7260_v42 = vpop.xlane.xlu0 %7259  ;;  %v7455_v18 = vadd.f32 %v14314_v3, %v7417_v26 }
 0xf0d   : > { %v8262_v13 = vpack.c.bf16 %v7454_v31, %v7453_v27  ;;  %v7418_v60 = vmul.f32 %v14307_v23, %v7380_v57  ;;  %10304 = vrsqrt.f32 %v7324_v35  ;;  %v7294_v45 = vmul.f32 0.0078125, %v7258_v17 }
 0xf0e   : > { %v10293_v47 = vpop.eup %10292  ;;  %10306 = vrsqrt.f32 %v7325_v36  ;;  %v7295_v1 = vmul.f32 0.0078125, %v7260_v42  ;;  %v7419_v38 = vmul.f32 %v14307_v23, %v7381_v43 }
 0xf0f   : > { %v10295_v62 = vpop.eup %10294  ;;  %8325 = vst [vmem:[%s14793_s17 + $0x38] sm:$0xff] %v8262_v13   ;;  %v7456_v11 = vadd.f32 %v14314_v3, %v7418_v60  ;;  %v7382_v29 = vmul.f32 %v10293_v47, %v14236_v8  ;;  %v7326_v7 = vadd.f32 1e-05, %v7294_v45 }
 0xf10   : > { %v7383_v9 = vmul.f32 %v10295_v62, %v14243_v51  ;;  %v7327_v34 = vadd.f32 1e-05, %v7295_v1  ;;  %v7262_v22 = vpop.xlane.xlu1 %7261  ;;  %v7264_v33 = vpop.xlane.xlu0 %7263  ;;  %v7457_v8 = vadd.f32 %v14314_v3, %v7419_v38 }
 0xf11   : > { %v8267_v40 = vpack.c.bf16 %v7456_v11, %v7455_v18  ;;  %v7420_v2 = vmul.f32 %v14307_v23, %v7382_v29  ;;  %10308 = vrsqrt.f32 %v7326_v7  ;;  %v7296_v37 = vmul.f32 0.0078125, %v7262_v22 }
 0xf12   : > { %v10297_v61 = vpop.eup %10296  ;;  %v7421_v25 = vmul.f32 %v14307_v23, %v7383_v9  ;;  %10310 = vrsqrt.f32 %v7327_v34  ;;  %v7297_v30 = vmul.f32 0.0078125, %v7264_v33 }
 0xf13   : > { %v10299_v28 = vpop.eup %10298  ;;  %8326 = vst [vmem:[%s14793_s17 + $0x40] sm:$0xff] %v8267_v40   ;;  %v7458_v51 = vadd.f32 %v14314_v3, %v7420_v2  ;;  %v7384_v59 = vmul.f32 %v10297_v61, %v14246_v4  ;;  %v7328_v44 = vadd.f32 1e-05, %v7296_v37 }
 0xf14   : > { %v7385_v41 = vmul.f32 %v10299_v28, %v14253_v14  ;;  %v7329_v0 = vadd.f32 1e-05, %v7297_v30  ;;  %v7266_v48 = vpop.xlane.xlu1 %7265  ;;  %v7459_v5 = vadd.f32 %v14314_v3, %v7421_v25 }
 0xf15   : > { %v8272_v19 = vpack.c.bf16 %v7458_v51, %v7457_v8  ;;  %v7422_v56 = vmul.f32 %v14307_v23, %v7384_v59  ;;  %10312 = vrsqrt.f32 %v7328_v44  ;;  %v7298_v12 = vmul.f32 0.0078125, %v7266_v48 }
 0xf16   : > { %v10301_v21 = vpop.eup %10300  ;;  %10314 = vrsqrt.f32 %v7329_v0  ;;  %v7423_v14 = vmul.f32 %v14307_v23, %v7385_v41 }
 0xf17   : > { %v10303_v49 = vpop.eup %10302  ;;  %8327 = vst [vmem:[%s14793_s17 + $0x48] sm:$0xff] %v8272_v19   ;;  %v7460_v4 = vadd.f32 %v14314_v3, %v7422_v56  ;;  %v7386_v24 = vmul.f32 %v10301_v21, %v14256_v50  ;;  %v7330_v55 = vadd.f32 1e-05, %v7298_v12 }
 0xf18   : > { %v7387_v6 = vmul.f32 %v10303_v49, %v14263_v20  ;;  %v7461_v46 = vadd.f32 %v14314_v3, %v7423_v14 }
 0xf19   : > { %v8277_v32 = vpack.c.bf16 %v7460_v4, %v7459_v5  ;;  %v7424_v16 = vmul.f32 %v14307_v23, %v7386_v24  ;;  %10316 = vrsqrt.f32 %v7330_v55 }
 0xf1a   : > { %v10305_v26 = vpop.eup %10304  ;;  %v7425_v31 = vmul.f32 %v14307_v23, %v7387_v6 }
 0xf1b   : > { %v10307_v54 = vpop.eup %10306  ;;  %8328 = vst [vmem:[%s14793_s17 + $0x50] sm:$0xff] %v8277_v32   ;;  %v7462_v27 = vadd.f32 %v14314_v3, %v7424_v16  ;;  %v7388_v50 = vmul.f32 %v10305_v26, %v14266_v58 }
 0xf1c   : > { %v7389_v20 = vmul.f32 %v10307_v54, %v14273_v63  ;;  %v7463_v17 = vadd.f32 %v14314_v3, %v7425_v31 }
 0xf1d   : > { %v8282_v57 = vpack.c.bf16 %v7462_v27, %v7461_v46  ;;  %v7426_v35 = vmul.f32 %v14307_v23, %v7388_v50 }
 0xf1e   : > { %v10309_v43 = vpop.eup %10308  ;;  %v7427_v13 = vmul.f32 %v14307_v23, %v7389_v20 }
 0xf1f   : > { %v10311_v36 = vpop.eup %10310  ;;  %8329 = vst [vmem:[%s14793_s17 + $0x58] sm:$0xff] %v8282_v57   ;;  %v7464_v42 = vadd.f32 %v14314_v3, %v7426_v35  ;;  %v7390_v60 = vmul.f32 %v10309_v43, %v14276_v53 }
 0xf20   : > { %v7391_v58 = vmul.f32 %v10311_v36, %v14283_v15  ;;  %v7465_v1 = vadd.f32 %v14314_v3, %v7427_v13 }
 0xf21   : > { %v8287_v63 = vpack.c.bf16 %v7464_v42, %v7463_v17  ;;  %v7428_v45 = vmul.f32 %v14307_v23, %v7390_v60 }
 0xf22   : > { %v10313_v47 = vpop.eup %10312  ;;  %v7429_v11 = vmul.f32 %v14307_v23, %v7391_v58 }
 0xf23   : > { %v10315_v18 = vpop.eup %10314  ;;  %8330 = vst [vmem:[%s14793_s17 + $0x60] sm:$0xff] %v8287_v63   ;;  %v7466_v62 = vadd.f32 %v14314_v3, %v7428_v45  ;;  %v7392_v38 = vmul.f32 %v10313_v47, %v14286_v10 }
 0xf24   : > { %v7393_v53 = vmul.f32 %v10315_v18, %v14293_v52  ;;  %v7467_v9 = vadd.f32 %v14314_v3, %v7429_v11 }
 0xf25   : > { %v8292_v15 = vpack.c.bf16 %v7466_v62, %v7465_v1  ;;  %v7430_v29 = vmul.f32 %v14307_v23, %v7392_v38 }
 0xf26   : > { %v10317_v7 = vpop.eup %10316  ;;  %v7431_v22 = vmul.f32 %v14307_v23, %v7393_v53 }
 0xf27   : > { %8331 = vst [vmem:[%s14793_s17 + $0x68] sm:$0xff] %v8292_v15   ;;  %v7468_v34 = vadd.f32 %v14314_v3, %v7430_v29  ;;  %v7394_v33 = vmul.f32 %v10317_v7, %v14296_v39 }
 0xf28   : > { %v7469_v52 = vadd.f32 %v14314_v3, %v7431_v22 }
 0xf29   : > { %v8297_v40 = vpack.c.bf16 %v7468_v34, %v7467_v9  ;;  %v7432_v10 = vmul.f32 %v14307_v23, %v7394_v33 }
 0xf2b   : > { %8332 = vst [vmem:[%s14793_s17 + $0x70] sm:$0xff] %v8297_v40   ;;  %v7470_v2 = vadd.f32 %v14314_v3, %v7432_v10 }
 0xf2d   : > { %v8302_v37 = vpack.c.bf16 %v7470_v2, %v7469_v52 }
 0xf2f   : > { %8333 = vst [vmem:[%s14793_s17 + $0x78] sm:$0xff] %v8302_v37  }
 0xf30 PF: > { %s14794_s24 = sld [smem:[#allocation11_spill]] }
 0xf31   : > { %s14795_s21 = sld [smem:[#allocation9_spill]] }
 0xf32   : > { %s14796_s22 = sld [smem:[#allocation10_spill]] }
 0xf33   : > { %s14797_s23 = sld [smem:[#allocation12_spill]] }
 0xf36   : > { %p29_p4 = scmp.ge.s32.totalorder %s14794_s24, 4  }
 0xf38   :  { %31 = sbr.rel (!%p29_p4) target bundleno = 15 (0xf), region = 172 }
 0xf3d   :  { %7642 = vsyncpa [#allocation4], 1 }
 0xf3e   :  { %7644 = vsyncpa [#allocation4 + $0x1], 1 }
 0xf3f   :  { %7645 = vsyncpa [#allocation6], 1 }
 0xf40   :  { %7647 = vsyncpa [#allocation6 + $0x1], 1 }

</bundles_post_ra>
